<compile_context>
chip_gen: v7x
topology: tpu7x:2x2x1
jax: 0.10.0
libtpu: 0.0.40
codegen_flags: <defaults>
</compile_context>

<pallas_src>
import functools
import math

import jax
import jax.numpy as jnp
from jax.experimental import pallas as pl
from jax.experimental.pallas import tpu as pltpu


# ----------------------------------------------------------------------------
# Pallas kernel 1: GEMM + bias + ReLU (conv1 / conv2), tiled per TensorCore
# ----------------------------------------------------------------------------

def _mm_bias_relu_kernel(a_ref, w_ref, b_ref, o_ref):
    acc = jnp.dot(a_ref[...], w_ref[...], preferred_element_type=jnp.float32)
    o_ref[...] = jnp.maximum(acc + b_ref[...], 0.0)


def matmul_bias_relu(a, w, b2d, *, num_blocks=1):
    """(M, K) @ (K, OC) + b[1, OC], ReLU.

    num_blocks = number of M-blocks: 1 on single-TC chips (v5e/v6e), 2 on dual-TC chips
    (v7x/v4/v5p) so each TensorCore gets exactly one block and there are no extra grid steps.
    """
    M, K = a.shape
    K2, OC = w.shape
    assert K == K2
    if num_blocks <= 1 or M <= 8:
        tm, grid = M, 1
    else:
        tm = ((-(-M // num_blocks)) + 7) // 8 * 8        # 8-aligned per-core block
        grid = pl.cdiv(M, tm)
    return pl.pallas_call(
        _mm_bias_relu_kernel,
        out_shape=jax.ShapeDtypeStruct((M, OC), jnp.float32),
        grid=(grid,),
        in_specs=[
            pl.BlockSpec((tm, K), lambda i: (i, 0)),
            pl.BlockSpec((K, OC), lambda i: (0, 0)),     # weight stays resident
            pl.BlockSpec((1, OC), lambda i: (0, 0)),     # bias stays resident
        ],
        out_specs=pl.BlockSpec((tm, OC), lambda i: (i, 0)),
        compiler_params=pltpu.CompilerParams(dimension_semantics=("parallel",)),
    )(a, w, b2d)


# ----------------------------------------------------------------------------
# Pallas kernel 2: fused conv3 + conv4 + conv5 + FC stack + 4-layer tanh RNN + head
#   conv3: GEMM on wrapper-built im2col patches (stride-2).
#   conv4/conv5: in-kernel stride-1 "im2col" via unit-stride row slices + 3x3 shifted matmuls.
#   Geometry is the 64x64 instantiation: conv3 out 5x5, conv4 out 3x3, conv5 out 1x1.
# ----------------------------------------------------------------------------

def _tail_kernel(p3_ref, wp_ref, h0_ref, y_ref, hN_ref, *, offs, batch, nlayers):
    hidden = h0_ref.shape[1]

    def W(name):                                   # static row/col slice of the packed slab
        r0, nr, nc = offs[name]
        return wp_ref[r0:r0 + nr, 0:nc]

    dot = functools.partial(jnp.dot, preferred_element_type=jnp.float32)

    # ---- conv3 (5x5, stride 2) as one GEMM on the (batch*25, 900) patch matrix ----------
    a3 = jnp.maximum(dot(p3_ref[...], W("w3")) + W("b3"), 0.0)        # (batch*25, 48)

    # ---- conv4 (3x3, s1, 48->64) + conv5 (3x3, s1, 64->64), all in vregs ----------------
    w4 = W("w4")                                                       # (9*48, 64)
    w5 = W("w5")                                                       # (9*64, 64)
    w4b = [w4[b * 48:(b + 1) * 48, :] for b in range(9)]               # W4[:, :, i, j].T
    w5b = [w5[b * 64:(b + 1) * 64, :] for b in range(9)]               # W5[:, :, i, j].T
    b4, b5 = W("b4"), W("b5")

    feats = []
    for n in range(batch):                       # unrolled over the (tiny) batch
        a3n = a3[n * 25:(n + 1) * 25, :]         # rows ordered (h, w), w fastest; 5x5 image
        rows4 = []                               # conv4 output: one (3, 64) block per oh
        for oh in range(3):
            acc = None
            for i in range(3):
                base = (oh + i) * 5
                for j in range(3):
                    t = dot(a3n[base + j:base + j + 3, :], w4b[i * 3 + j])   # (3, 64)
                    acc = t if acc is None else acc + t
            rows4.append(jnp.maximum(acc + b4, 0.0))
        acc5 = None
        for i in range(3):
            for j in range(3):
                t = dot(rows4[i][j:j + 1, :], w5b[i * 3 + j])                # (1, 64)
                acc5 = t if acc5 is None else acc5 + t
        feats.append(jnp.maximum(acc5 + b5, 0.0))                            # (1, 64)
    xf = jnp.concatenate(feats, axis=0)          # (batch, 64) == PyTorch flatten(1) order

    # ---- dropout(identity) -> lin1 -> relu -> lin2 -> relu -> lin3 ----------------------
    a = jnp.maximum(dot(xf, W("l1w")) + W("l1b"), 0.0)                 # (batch, 100)
    a = jnp.maximum(dot(a, W("l2w")) + W("l2b"), 0.0)                  # (batch, 50)
    a = dot(a, W("l3w")) + W("l3b")                                    # (batch, 10)

    # ---- 4-layer tanh RNN over the `batch` rows (unbatched sequence); state in vregs ----
    rih, rhh, rb = W("rih"), W("rhh"), W("rb")
    w_ih = [W("rih0")] + [rih[(l - 1) * hidden:l * hidden, :] for l in range(1, nlayers)]
    w_hh = [rhh[l * hidden:(l + 1) * hidden, :] for l in range(nlayers)]
    h = [h0_ref[l:l + 1, :] for l in range(nlayers)]
    outs = []
    for t in range(batch):
        inp = a[t:t + 1, :]
        for l in range(nlayers):
            z = dot(inp, w_ih[l]) + dot(h[l], w_hh[l]) + rb[l:l + 1, :]
            h[l] = jnp.tanh(z)
            inp = h[l]
        outs.append(inp)
    hN_ref[...] = jnp.concatenate(h, axis=0)                           # (nlayers, hidden)

    # ---- relu -> lin4 -> tanh ------------------------------------------------------------
    r = jnp.maximum(jnp.concatenate(outs, axis=0), 0.0)                # (batch, hidden)
    y_ref[...] = jnp.tanh(dot(r, W("l4w")) + W("l4b"))                 # (batch, 1)


def conv_tail_fused(p3, wpack, h0, offs, *, batch):
    nlayers, hidden = h0.shape
    assert p3.shape == (batch * 25, 900), "fused tail assumes the 64x64 instantiation"
    assert wpack.shape[1] == 128
    kern = functools.partial(_tail_kernel, offs=offs, batch=batch, nlayers=nlayers)
    return pl.pallas_call(
        kern,
        out_shape=(jax.ShapeDtypeStruct((batch, 1), jnp.float32),
                   jax.ShapeDtypeStruct((nlayers, hidden), jnp.float32)),
        grid=(1,),
        in_specs=[pl.BlockSpec(p3.shape, lambda i: (0, 0)),
                  pl.BlockSpec(wpack.shape, lambda i: (0, 0)),
                  pl.BlockSpec(h0.shape, lambda i: (0, 0))],
        out_specs=(pl.BlockSpec((batch, 1), lambda i: (0, 0)),
                   pl.BlockSpec((nlayers, hidden), lambda i: (0, 0))),
    )(p3, wpack, h0)


# ----------------------------------------------------------------------------
# JAX glue: NHWC im2col (stride-2 convs) + one-pass BatchNorm folding
# ----------------------------------------------------------------------------

def _im2col_nhwc(x, k, stride):
    """x: (N, H, W, C) -> patches (N*OH*OW, k*k*C), feature order (kh, kw, c)."""
    N, H, W, C = x.shape
    OH = (H - k) // stride + 1
    OW = (W - k) // stride + 1
    cols = []
    for i in range(k):
        for j in range(k):
            cols.append(x[:, i:i + stride * (OH - 1) + 1:stride,
                             j:j + stride * (OW - 1) + 1:stride, :])
    patches = jnp.concatenate(cols, axis=-1)                   # (N, OH, OW, k*k*C)
    return patches.reshape(N * OH * OW, k * k * C), OH, OW


def fold_bn_into_conv1(x_nchw, gamma, beta, w_flat, b2d, k, eps=1e-3):
    """Fold BatchNorm (batch stats, biased var) into conv1's flattened weight/bias.

    One fused pass over x (mean and E[x^2] together), no centered temporary.
    """
    mean = jnp.mean(x_nchw, axis=(0, 2, 3))                                    # (C,)
    ex2 = jnp.mean(jnp.square(x_nchw), axis=(0, 2, 3))                         # (C,)
    var = jnp.maximum(ex2 - jnp.square(mean), 0.0)
    scale = gamma * jax.lax.rsqrt(var + eps)                                   # (C,)
    shift = beta - mean * scale                                                # (C,)
    row_scale = jnp.tile(scale, k * k)          # patch rows are ordered (kh, kw, c)
    row_shift = jnp.tile(shift, k * k)
    w_eff = w_flat * row_scale[:, None]
    b_eff = b2d + row_shift[None, :] @ w_flat                                  # (1, OC)
    return w_eff, b_eff


def _num_tensorcores():
    """2 on dual-TensorCore chips (v7x / v4 / v5p), else 1 (v5e / v6e / unknown)."""
    try:
        kind = jax.devices()[0].device_kind.lower()
    except Exception:
        return 1
    if "v7" in kind or "7x" in kind or "v4" in kind or "v5p" in kind:
        return 2
    return 1


# ----------------------------------------------------------------------------
# Model
# ----------------------------------------------------------------------------

_CONV_CFG = [("conv1", 3, 24, 5, 2), ("conv2", 24, 36, 5, 2),
             ("conv3", 36, 48, 5, 2), ("conv4", 48, 64, 3, 1),
             ("conv5", 64, 64, 3, 1)]


def mini_rnn_forward(params, tail_packed, x, h, *, tail_offs, num_cores=1):
    # x: (N, 3, H, W) NCHW; h: (nlayers=4, hidden=4)
    N = x.shape[0]
    # ---- BN folded into conv1; conv1 GEMM + ReLU (Pallas launch #1) ----
    w1_eff, b1_eff = fold_bn_into_conv1(x, params["bn_gamma"], params["bn_beta"],
                                        params["conv1_w"], params["conv1_b"], k=5, eps=1e-3)
    x = jnp.transpose(x, (0, 2, 3, 1))                            # single NCHW -> NHWC
    p1, oh1, ow1 = _im2col_nhwc(x, 5, 2)
    a1 = matmul_bias_relu(p1, w1_eff, b1_eff, num_blocks=num_cores)
    a1 = a1.reshape(N, oh1, ow1, -1)
    # ---- conv2 GEMM + ReLU (Pallas launch #2) ----
    p2, oh2, ow2 = _im2col_nhwc(a1, 5, 2)
    a2 = matmul_bias_relu(p2, params["conv2_w"], params["conv2_b"], num_blocks=num_cores)
    a2 = a2.reshape(N, oh2, ow2, -1)
    # ---- conv3 + conv4 + conv5 + FC stack + RNN + head (Pallas launch #3, fused) ----
    p3, _, _ = _im2col_nhwc(a2, 5, 2)
    return conv_tail_fused(p3, tail_packed, h, tail_offs, batch=N)


# ----------------------------------------------------------------------------
# Parameter init (xavier_uniform conv/linear, zero biases, PyTorch-default RNN init)
# and one-time packing of the fused-tail weights into a single (rows, 128) slab.
# ----------------------------------------------------------------------------

def _xavier_uniform(key, shape, fan_in, fan_out):
    bound = math.sqrt(6.0 / (fan_in + fan_out))
    return jax.random.uniform(key, shape, jnp.float32, -bound, bound)


def init_params(key, flat_size, rnn_in=10, rnn_hidden=4, nlayers=4):
    ki = iter(jax.random.split(key, 32))
    params = {"bn_gamma": jnp.ones((3,), jnp.float32),
              "bn_beta": jnp.zeros((3,), jnp.float32)}
    for name, ic, oc, k, _s in _CONV_CFG:
        w = _xavier_uniform(next(ki), (oc, ic, k, k), ic * k * k, oc * k * k)
        # Flatten to (k*k*ic, oc) with row order (kh, kw, ic): matches im2col patch order
        # and gives per-offset blocks W[:, :, i, j].T at rows [(i*k+j)*ic : (i*k+j+1)*ic].
        params[name + "_w"] = jnp.transpose(w, (2, 3, 1, 0)).reshape(k * k * ic, oc)
        params[name + "_b"] = jnp.zeros((1, oc), jnp.float32)
    for name, fin, fout in [("lin1", flat_size, 100), ("lin2", 100, 50),
                            ("lin3", 50, 10), ("lin4", 4, 1)]:
        w = _xavier_uniform(next(ki), (fout, fin), fin, fout)
        params[name + "_w"] = w.T                                   # (in, out)
        params[name + "_b"] = jnp.zeros((1, fout), jnp.float32)
    kb = 1.0 / math.sqrt(rnn_hidden)
    u = lambda kk, shape: jax.random.uniform(kk, shape, jnp.float32, -kb, kb)
    params["rnn_w_ih0"] = u(next(ki), (rnn_hidden, rnn_in)).T                 # (10, H)
    params["rnn_w_ih_rest"] = jnp.stack(
        [u(next(ki), (rnn_hidden, rnn_hidden)).T for _ in range(nlayers - 1)])
    params["rnn_w_hh"] = jnp.stack(
        [u(next(ki), (rnn_hidden, rnn_hidden)).T for _ in range(nlayers)])
    b_ih = jnp.stack([u(next(ki), (rnn_hidden,)) for _ in range(nlayers)])
    b_hh = jnp.stack([u(next(ki), (rnn_hidden,)) for _ in range(nlayers)])
    params["rnn_b"] = b_ih + b_hh                                   # tanh RNN: fold biases
    return params


_PACK_ORDER = [("w3", "conv3_w"), ("b3", "conv3_b"),
               ("w4", "conv4_w"), ("b4", "conv4_b"),
               ("w5", "conv5_w"), ("b5", "conv5_b"),
               ("l1w", "lin1_w"), ("l1b", "lin1_b"),
               ("l2w", "lin2_w"), ("l2b", "lin2_b"),
               ("l3w", "lin3_w"), ("l3b", "lin3_b"),
               ("l4w", "lin4_w"), ("l4b", "lin4_b")]


def pack_tail_params(params, rnn_hidden=4):
    """Pack all fused-tail weights into one (rows, 128) f32 slab (done ONCE, outside jit)."""
    mats = [(name, jnp.asarray(params[pname], jnp.float32)) for name, pname in _PACK_ORDER]
    mats += [("rih0", params["rnn_w_ih0"]),
             ("rih", params["rnn_w_ih_rest"].reshape(-1, rnn_hidden)),
             ("rhh", params["rnn_w_hh"].reshape(-1, rnn_hidden)),
             ("rb", params["rnn_b"])]
    offs, blocks, r = {}, [], 0
    for name, m in mats:
        assert m.ndim == 2 and m.shape[1] <= 128
        offs[name] = (r, int(m.shape[0]), int(m.shape[1]))
        blocks.append(jnp.pad(m, ((0, 0), (0, 128 - m.shape[1]))))
        r += int(m.shape[0])
    packed = jnp.concatenate(blocks, axis=0)
    if r % 8:
        packed = jnp.pad(packed, ((0, 8 - r % 8), (0, 0)))
    return packed, offs


# ----------------------------------------------------------------------------
# Main
# ----------------------------------------------------------------------------

if __name__ == "__main__":
    N, H_IMG, W_IMG = 2, 64, 64        # small input_shape=(64, 64)
    NLAYERS, HIDDEN = 4, 4

    # Size of the flattened conv-stack output (mirrors the module's __init__ probe).
    s = H_IMG
    for _n, _ic, _oc, k, st in _CONV_CFG:
        s = (s - k) // st + 1
    flat_size = 64 * s * s             # 64 * 1 * 1 = 64 for a 64x64 input

    key = jax.random.PRNGKey(0)
    kx, kh, kp = jax.random.split(key, 3)
    params = init_params(kp, flat_size)
    tail_packed, tail_offs = pack_tail_params(params, rnn_hidden=HIDDEN)
    x = jax.random.normal(kx, (N, 3, H_IMG, W_IMG), jnp.float32)
    h0 = jax.random.normal(kh, (NLAYERS, HIDDEN), jnp.float32)

    ncores = _num_tensorcores()
    fwd = jax.jit(functools.partial(mini_rnn_forward,
                                    tail_offs=tail_offs, num_cores=ncores))
    y, hidden = fwd(params, tail_packed, x, h0)
    jax.block_until_ready((y, hidden))

    assert y.shape == (N, 1) and y.dtype == jnp.float32
    assert hidden.shape == (NLAYERS, HIDDEN)
    assert bool(jnp.all(jnp.isfinite(y))) and bool(jnp.all(jnp.abs(y) <= 1.0))
    assert bool(jnp.all(jnp.isfinite(hidden))) and bool(jnp.all(jnp.abs(hidden) <= 1.0))
    print("KERNEL_OK")
</pallas_src>

<mosaic_0001>
module attributes {stable_mosaic.version = 11 : i64} {
  func.func @_mm_bias_relu_kernel(%arg0: i32, %arg1: memref<1800x75xf32, #tpu.memory_space<vmem>>, %arg2: memref<75x24xf32, #tpu.memory_space<vmem>>, %arg3: memref<1x24xf32, #tpu.memory_space<vmem>>, %arg4: memref<1800x24xf32, #tpu.memory_space<vmem>>) attributes {dimension_semantics = [#tpu.dimension_semantics<parallel>], iteration_bounds = array<i64: 1>, scalar_prefetch = 0 : i64, scratch_operands = 0 : i64, tpu.core_type = #tpu.core_type<tc>, window_params = [{transform_indices = @transform_0, window_bounds = array<i64: 1800, 75>}, {pipeline_mode = #tpu.pipeline_mode<synchronous>, transform_indices = @transform_1, window_bounds = array<i64: 75, 24>}, {pipeline_mode = #tpu.pipeline_mode<synchronous>, transform_indices = @transform_2, window_bounds = array<i64: 1, 24>}, {transform_indices = @transform_3, window_bounds = array<i64: 1800, 24>}]} {
    %c0 = arith.constant 0 : index
    %c0_0 = arith.constant 0 : index
    %0 = vector.load %arg1[%c0, %c0_0] : memref<1800x75xf32, #tpu.memory_space<vmem>>, vector<1800x75xf32>
    %c0_1 = arith.constant 0 : index
    %c0_2 = arith.constant 0 : index
    %1 = vector.load %arg2[%c0_1, %c0_2] : memref<75x24xf32, #tpu.memory_space<vmem>>, vector<75x24xf32>
    %cst = arith.constant dense<0.000000e+00> : vector<1800x24xf32>
    %2 = tpu.matmul %0, %1, %cst {dimension_numbers = #tpu.dot_dimension_numbers<[1], [0], [0], [1], [0, 0, 1, 1], [], []>} : vector<1800x75xf32>, vector<75x24xf32>, vector<1800x24xf32> -> vector<1800x24xf32>
    %c0_3 = arith.constant 0 : index
    %c0_4 = arith.constant 0 : index
    %3 = vector.load %arg3[%c0_3, %c0_4] : memref<1x24xf32, #tpu.memory_space<vmem>>, vector<1x24xf32>
    %4 = vector.broadcast %3 : vector<1x24xf32> to vector<1800x24xf32>
    %5 = arith.addf %2, %4 : vector<1800x24xf32>
    %cst_5 = arith.constant 0.000000e+00 : f32
    %6 = vector.broadcast %cst_5 : f32 to vector<1800x24xf32>
    %7 = arith.maximumf %5, %6 : vector<1800x24xf32>
    %c0_6 = arith.constant 0 : index
    %c0_7 = arith.constant 0 : index
    %8 = vector.load %arg4[%c0_6, %c0_7] : memref<1800x24xf32, #tpu.memory_space<vmem>>, vector<1800x24xf32>
    tpu.vector_store %arg4[%c0_6, %c0_7], %7 {strides = array<i32>} : memref<1800x24xf32, #tpu.memory_space<vmem>>, vector<1800x24xf32>,
    return
  }
  func.func @transform_0(%arg0: i32) -> (i32, i32) {
    %c0_i32 = arith.constant 0 : i32
    %c0_i32_0 = arith.constant 0 : i32
    return %arg0, %c0_i32 : i32, i32
  }
  func.func @transform_1(%arg0: i32) -> (i32, i32) {
    %c0_i32 = arith.constant 0 : i32
    %c0_i32_0 = arith.constant 0 : i32
    %c0_i32_1 = arith.constant 0 : i32
    return %c0_i32, %c0_i32_0 : i32, i32
  }
  func.func @transform_2(%arg0: i32) -> (i32, i32) {
    %c0_i32 = arith.constant 0 : i32
    %c0_i32_0 = arith.constant 0 : i32
    %c0_i32_1 = arith.constant 0 : i32
    return %c0_i32, %c0_i32_0 : i32, i32
  }
  func.func @transform_3(%arg0: i32) -> (i32, i32) {
    %c0_i32 = arith.constant 0 : i32
    %c0_i32_0 = arith.constant 0 : i32
    return %arg0, %c0_i32 : i32, i32
  }
}

module attributes {stable_mosaic.version = 11 : i64} {
  func.func @_mm_bias_relu_kernel(%arg0: i32, %arg1: memref<338x600xf32, #tpu.memory_space<vmem>>, %arg2: memref<600x36xf32, #tpu.memory_space<vmem>>, %arg3: memref<1x36xf32, #tpu.memory_space<vmem>>, %arg4: memref<338x36xf32, #tpu.memory_space<vmem>>) attributes {dimension_semantics = [#tpu.dimension_semantics<parallel>], iteration_bounds = array<i64: 1>, scalar_prefetch = 0 : i64, scratch_operands = 0 : i64, tpu.core_type = #tpu.core_type<tc>, window_params = [{transform_indices = @transform_0, window_bounds = array<i64: 338, 600>}, {pipeline_mode = #tpu.pipeline_mode<synchronous>, transform_indices = @transform_1, window_bounds = array<i64: 600, 36>}, {pipeline_mode = #tpu.pipeline_mode<synchronous>, transform_indices = @transform_2, window_bounds = array<i64: 1, 36>}, {transform_indices = @transform_3, window_bounds = array<i64: 338, 36>}]} {
    %c0 = arith.constant 0 : index
    %c0_0 = arith.constant 0 : index
    %0 = vector.load %arg1[%c0, %c0_0] : memref<338x600xf32, #tpu.memory_space<vmem>>, vector<338x600xf32>
    %c0_1 = arith.constant 0 : index
    %c0_2 = arith.constant 0 : index
    %1 = vector.load %arg2[%c0_1, %c0_2] : memref<600x36xf32, #tpu.memory_space<vmem>>, vector<600x36xf32>
    %cst = arith.constant dense<0.000000e+00> : vector<338x36xf32>
    %2 = tpu.matmul %0, %1, %cst {dimension_numbers = #tpu.dot_dimension_numbers<[1], [0], [0], [1], [0, 0, 1, 1], [], []>} : vector<338x600xf32>, vector<600x36xf32>, vector<338x36xf32> -> vector<338x36xf32>
    %c0_3 = arith.constant 0 : index
    %c0_4 = arith.constant 0 : index
    %3 = vector.load %arg3[%c0_3, %c0_4] : memref<1x36xf32, #tpu.memory_space<vmem>>, vector<1x36xf32>
    %4 = vector.broadcast %3 : vector<1x36xf32> to vector<338x36xf32>
    %5 = arith.addf %2, %4 : vector<338x36xf32>
    %cst_5 = arith.constant 0.000000e+00 : f32
    %6 = vector.broadcast %cst_5 : f32 to vector<338x36xf32>
    %7 = arith.maximumf %5, %6 : vector<338x36xf32>
    %c0_6 = arith.constant 0 : index
    %c0_7 = arith.constant 0 : index
    %8 = vector.load %arg4[%c0_6, %c0_7] : memref<338x36xf32, #tpu.memory_space<vmem>>, vector<338x36xf32>
    tpu.vector_store %arg4[%c0_6, %c0_7], %7 {strides = array<i32>} : memref<338x36xf32, #tpu.memory_space<vmem>>, vector<338x36xf32>,
    return
  }
  func.func @transform_0(%arg0: i32) -> (i32, i32) {
    %c0_i32 = arith.constant 0 : i32
    %c0_i32_0 = arith.constant 0 : i32
    return %arg0, %c0_i32 : i32, i32
  }
  func.func @transform_1(%arg0: i32) -> (i32, i32) {
    %c0_i32 = arith.constant 0 : i32
    %c0_i32_0 = arith.constant 0 : i32
    %c0_i32_1 = arith.constant 0 : i32
    return %c0_i32, %c0_i32_0 : i32, i32
  }
  func.func @transform_2(%arg0: i32) -> (i32, i32) {
    %c0_i32 = arith.constant 0 : i32
    %c0_i32_0 = arith.constant 0 : i32
    %c0_i32_1 = arith.constant 0 : i32
    return %c0_i32, %c0_i32_0 : i32, i32
  }
  func.func @transform_3(%arg0: i32) -> (i32, i32) {
    %c0_i32 = arith.constant 0 : i32
    %c0_i32_0 = arith.constant 0 : i32
    return %arg0, %c0_i32 : i32, i32
  }
}

module attributes {stable_mosaic.version = 11 : i64} {
  func.func @_tail_kernel(%arg0: i32, %arg1: memref<50x900xf32, #tpu.memory_space<vmem>>, %arg2: memref<2176x128xf32, #tpu.memory_space<vmem>>, %arg3: memref<4x4xf32, #tpu.memory_space<vmem>>, %arg4: memref<2x1xf32, #tpu.memory_space<vmem>>, %arg5: memref<4x4xf32, #tpu.memory_space<vmem>>) attributes {dimension_semantics = [#tpu.dimension_semantics<arbitrary>], iteration_bounds = array<i64: 1>, scalar_prefetch = 0 : i64, scratch_operands = 0 : i64, tpu.core_type = #tpu.core_type<tc>, window_params = [{pipeline_mode = #tpu.pipeline_mode<synchronous>, transform_indices = @transform_0, window_bounds = array<i64: 50, 900>}, {pipeline_mode = #tpu.pipeline_mode<synchronous>, transform_indices = @transform_1, window_bounds = array<i64: 2176, 128>}, {pipeline_mode = #tpu.pipeline_mode<synchronous>, transform_indices = @transform_2, window_bounds = array<i64: 4, 4>}, {pipeline_mode = #tpu.pipeline_mode<synchronous>, transform_indices = @transform_3, window_bounds = array<i64: 2, 1>}, {pipeline_mode = #tpu.pipeline_mode<synchronous>, transform_indices = @transform_4, window_bounds = array<i64: 4, 4>}]} {
    %c0 = arith.constant 0 : index
    %c0_0 = arith.constant 0 : index
    %0 = vector.load %arg1[%c0, %c0_0] : memref<50x900xf32, #tpu.memory_space<vmem>>, vector<50x900xf32>
    %c0_1 = arith.constant 0 : index
    %c0_2 = arith.constant 0 : index
    %1 = vector.load %arg2[%c0_1, %c0_2] : memref<2176x128xf32, #tpu.memory_space<vmem>>, vector<900x48xf32>
    %cst = arith.constant dense<0.000000e+00> : vector<50x48xf32>
    %2 = tpu.matmul %0, %1, %cst {dimension_numbers = #tpu.dot_dimension_numbers<[1], [0], [0], [1], [0, 0, 1, 1], [], []>} : vector<50x900xf32>, vector<900x48xf32>, vector<50x48xf32> -> vector<50x48xf32>
    %c900 = arith.constant 900 : index
    %c0_3 = arith.constant 0 : index
    %3 = vector.load %arg2[%c900, %c0_3] : memref<2176x128xf32, #tpu.memory_space<vmem>>, vector<1x48xf32>
    %4 = vector.broadcast %3 : vector<1x48xf32> to vector<50x48xf32>
    %5 = arith.addf %2, %4 : vector<50x48xf32>
    %cst_4 = arith.constant 0.000000e+00 : f32
    %6 = vector.broadcast %cst_4 : f32 to vector<50x48xf32>
    %7 = arith.maximumf %5, %6 : vector<50x48xf32>
    %c901 = arith.constant 901 : index
    %c0_5 = arith.constant 0 : index
    %8 = vector.load %arg2[%c901, %c0_5] : memref<2176x128xf32, #tpu.memory_space<vmem>>, vector<432x64xf32>
    %c1334 = arith.constant 1334 : index
    %c0_6 = arith.constant 0 : index
    %9 = vector.load %arg2[%c1334, %c0_6] : memref<2176x128xf32, #tpu.memory_space<vmem>>, vector<576x64xf32>
    %10 = vector.extract_strided_slice %8 {offsets = [0, 0], sizes = [48, 64], strides = [1, 1]} : vector<432x64xf32> to vector<48x64xf32>
    %11 = vector.extract_strided_slice %8 {offsets = [48, 0], sizes = [48, 64], strides = [1, 1]} : vector<432x64xf32> to vector<48x64xf32>
    %12 = vector.extract_strided_slice %8 {offsets = [96, 0], sizes = [48, 64], strides = [1, 1]} : vector<432x64xf32> to vector<48x64xf32>
    %13 = vector.extract_strided_slice %8 {offsets = [144, 0], sizes = [48, 64], strides = [1, 1]} : vector<432x64xf32> to vector<48x64xf32>
    %14 = vector.extract_strided_slice %8 {offsets = [192, 0], sizes = [48, 64], strides = [1, 1]} : vector<432x64xf32> to vector<48x64xf32>
    %15 = vector.extract_strided_slice %8 {offsets = [240, 0], sizes = [48, 64], strides = [1, 1]} : vector<432x64xf32> to vector<48x64xf32>
    %16 = vector.extract_strided_slice %8 {offsets = [288, 0], sizes = [48, 64], strides = [1, 1]} : vector<432x64xf32> to vector<48x64xf32>
    %17 = vector.extract_strided_slice %8 {offsets = [336, 0], sizes = [48, 64], strides = [1, 1]} : vector<432x64xf32> to vector<48x64xf32>
    %18 = vector.extract_strided_slice %8 {offsets = [384, 0], sizes = [48, 64], strides = [1, 1]} : vector<432x64xf32> to vector<48x64xf32>
    %19 = vector.extract_strided_slice %9 {offsets = [0, 0], sizes = [64, 64], strides = [1, 1]} : vector<576x64xf32> to vector<64x64xf32>
    %20 = vector.extract_strided_slice %9 {offsets = [64, 0], sizes = [64, 64], strides = [1, 1]} : vector<576x64xf32> to vector<64x64xf32>
    %21 = vector.extract_strided_slice %9 {offsets = [128, 0], sizes = [64, 64], strides = [1, 1]} : vector<576x64xf32> to vector<64x64xf32>
    %22 = vector.extract_strided_slice %9 {offsets = [192, 0], sizes = [64, 64], strides = [1, 1]} : vector<576x64xf32> to vector<64x64xf32>
    %23 = vector.extract_strided_slice %9 {offsets = [256, 0], sizes = [64, 64], strides = [1, 1]} : vector<576x64xf32> to vector<64x64xf32>
    %24 = vector.extract_strided_slice %9 {offsets = [320, 0], sizes = [64, 64], strides = [1, 1]} : vector<576x64xf32> to vector<64x64xf32>
    %25 = vector.extract_strided_slice %9 {offsets = [384, 0], sizes = [64, 64], strides = [1, 1]} : vector<576x64xf32> to vector<64x64xf32>
    %26 = vector.extract_strided_slice %9 {offsets = [448, 0], sizes = [64, 64], strides = [1, 1]} : vector<576x64xf32> to vector<64x64xf32>
    %27 = vector.extract_strided_slice %9 {offsets = [512, 0], sizes = [64, 64], strides = [1, 1]} : vector<576x64xf32> to vector<64x64xf32>
    %c1333 = arith.constant 1333 : index
    %c0_7 = arith.constant 0 : index
    %28 = vector.load %arg2[%c1333, %c0_7] : memref<2176x128xf32, #tpu.memory_space<vmem>>, vector<1x64xf32>
    %c1910 = arith.constant 1910 : index
    %c0_8 = arith.constant 0 : index
    %29 = vector.load %arg2[%c1910, %c0_8] : memref<2176x128xf32, #tpu.memory_space<vmem>>, vector<1x64xf32>
    %30 = vector.extract_strided_slice %7 {offsets = [0, 0], sizes = [25, 48], strides = [1, 1]} : vector<50x48xf32> to vector<25x48xf32>
    %31 = vector.extract_strided_slice %30 {offsets = [0, 0], sizes = [3, 48], strides = [1, 1]} : vector<25x48xf32> to vector<3x48xf32>
    %cst_9 = arith.constant dense<0.000000e+00> : vector<3x64xf32>
    %32 = tpu.matmul %31, %10, %cst_9 {dimension_numbers = #tpu.dot_dimension_numbers<[1], [0], [0], [1], [0, 0, 1, 1], [], []>} : vector<3x48xf32>, vector<48x64xf32>, vector<3x64xf32> -> vector<3x64xf32>
    %33 = vector.extract_strided_slice %30 {offsets = [1, 0], sizes = [3, 48], strides = [1, 1]} : vector<25x48xf32> to vector<3x48xf32>
    %cst_10 = arith.constant dense<0.000000e+00> : vector<3x64xf32>
    %34 = tpu.matmul %33, %11, %cst_10 {dimension_numbers = #tpu.dot_dimension_numbers<[1], [0], [0], [1], [0, 0, 1, 1], [], []>} : vector<3x48xf32>, vector<48x64xf32>, vector<3x64xf32> -> vector<3x64xf32>
    %35 = arith.addf %32, %34 : vector<3x64xf32>
    %36 = vector.extract_strided_slice %30 {offsets = [2, 0], sizes = [3, 48], strides = [1, 1]} : vector<25x48xf32> to vector<3x48xf32>
    %cst_11 = arith.constant dense<0.000000e+00> : vector<3x64xf32>
    %37 = tpu.matmul %36, %12, %cst_11 {dimension_numbers = #tpu.dot_dimension_numbers<[1], [0], [0], [1], [0, 0, 1, 1], [], []>} : vector<3x48xf32>, vector<48x64xf32>, vector<3x64xf32> -> vector<3x64xf32>
    %38 = arith.addf %35, %37 : vector<3x64xf32>
    %39 = vector.extract_strided_slice %30 {offsets = [5, 0], sizes = [3, 48], strides = [1, 1]} : vector<25x48xf32> to vector<3x48xf32>
    %cst_12 = arith.constant dense<0.000000e+00> : vector<3x64xf32>
    %40 = tpu.matmul %39, %13, %cst_12 {dimension_numbers = #tpu.dot_dimension_numbers<[1], [0], [0], [1], [0, 0, 1, 1], [], []>} : vector<3x48xf32>, vector<48x64xf32>, vector<3x64xf32> -> vector<3x64xf32>
    %41 = arith.addf %38, %40 : vector<3x64xf32>
    %42 = vector.extract_strided_slice %30 {offsets = [6, 0], sizes = [3, 48], strides = [1, 1]} : vector<25x48xf32> to vector<3x48xf32>
    %cst_13 = arith.constant dense<0.000000e+00> : vector<3x64xf32>
    %43 = tpu.matmul %42, %14, %cst_13 {dimension_numbers = #tpu.dot_dimension_numbers<[1], [0], [0], [1], [0, 0, 1, 1], [], []>} : vector<3x48xf32>, vector<48x64xf32>, vector<3x64xf32> -> vector<3x64xf32>
    %44 = arith.addf %41, %43 : vector<3x64xf32>
    %45 = vector.extract_strided_slice %30 {offsets = [7, 0], sizes = [3, 48], strides = [1, 1]} : vector<25x48xf32> to vector<3x48xf32>
    %cst_14 = arith.constant dense<0.000000e+00> : vector<3x64xf32>
    %46 = tpu.matmul %45, %15, %cst_14 {dimension_numbers = #tpu.dot_dimension_numbers<[1], [0], [0], [1], [0, 0, 1, 1], [], []>} : vector<3x48xf32>, vector<48x64xf32>, vector<3x64xf32> -> vector<3x64xf32>
    %47 = arith.addf %44, %46 : vector<3x64xf32>
    %48 = vector.extract_strided_slice %30 {offsets = [10, 0], sizes = [3, 48], strides = [1, 1]} : vector<25x48xf32> to vector<3x48xf32>
    %cst_15 = arith.constant dense<0.000000e+00> : vector<3x64xf32>
    %49 = tpu.matmul %48, %16, %cst_15 {dimension_numbers = #tpu.dot_dimension_numbers<[1], [0], [0], [1], [0, 0, 1, 1], [], []>} : vector<3x48xf32>, vector<48x64xf32>, vector<3x64xf32> -> vector<3x64xf32>
    %50 = arith.addf %47, %49 : vector<3x64xf32>
    %51 = vector.extract_strided_slice %30 {offsets = [11, 0], sizes = [3, 48], strides = [1, 1]} : vector<25x48xf32> to vector<3x48xf32>
    %cst_16 = arith.constant dense<0.000000e+00> : vector<3x64xf32>
    %52 = tpu.matmul %51, %17, %cst_16 {dimension_numbers = #tpu.dot_dimension_numbers<[1], [0], [0], [1], [0, 0, 1, 1], [], []>} : vector<3x48xf32>, vector<48x64xf32>, vector<3x64xf32> -> vector<3x64xf32>
    %53 = arith.addf %50, %52 : vector<3x64xf32>
    %54 = vector.extract_strided_slice %30 {offsets = [12, 0], sizes = [3, 48], strides = [1, 1]} : vector<25x48xf32> to vector<3x48xf32>
    %cst_17 = arith.constant dense<0.000000e+00> : vector<3x64xf32>
    %55 = tpu.matmul %54, %18, %cst_17 {dimension_numbers = #tpu.dot_dimension_numbers<[1], [0], [0], [1], [0, 0, 1, 1], [], []>} : vector<3x48xf32>, vector<48x64xf32>, vector<3x64xf32> -> vector<3x64xf32>
    %56 = arith.addf %53, %55 : vector<3x64xf32>
    %57 = vector.broadcast %28 : vector<1x64xf32> to vector<3x64xf32>
    %58 = arith.addf %56, %57 : vector<3x64xf32>
    %cst_18 = arith.constant 0.000000e+00 : f32
    %59 = vector.broadcast %cst_18 : f32 to vector<3x64xf32>
    %60 = arith.maximumf %58, %59 : vector<3x64xf32>
    %61 = vector.extract_strided_slice %30 {offsets = [5, 0], sizes = [3, 48], strides = [1, 1]} : vector<25x48xf32> to vector<3x48xf32>
    %cst_19 = arith.constant dense<0.000000e+00> : vector<3x64xf32>
    %62 = tpu.matmul %61, %10, %cst_19 {dimension_numbers = #tpu.dot_dimension_numbers<[1], [0], [0], [1], [0, 0, 1, 1], [], []>} : vector<3x48xf32>, vector<48x64xf32>, vector<3x64xf32> -> vector<3x64xf32>
    %63 = vector.extract_strided_slice %30 {offsets = [6, 0], sizes = [3, 48], strides = [1, 1]} : vector<25x48xf32> to vector<3x48xf32>
    %cst_20 = arith.constant dense<0.000000e+00> : vector<3x64xf32>
    %64 = tpu.matmul %63, %11, %cst_20 {dimension_numbers = #tpu.dot_dimension_numbers<[1], [0], [0], [1], [0, 0, 1, 1], [], []>} : vector<3x48xf32>, vector<48x64xf32>, vector<3x64xf32> -> vector<3x64xf32>
    %65 = arith.addf %62, %64 : vector<3x64xf32>
    %66 = vector.extract_strided_slice %30 {offsets = [7, 0], sizes = [3, 48], strides = [1, 1]} : vector<25x48xf32> to vector<3x48xf32>
    %cst_21 = arith.constant dense<0.000000e+00> : vector<3x64xf32>
    %67 = tpu.matmul %66, %12, %cst_21 {dimension_numbers = #tpu.dot_dimension_numbers<[1], [0], [0], [1], [0, 0, 1, 1], [], []>} : vector<3x48xf32>, vector<48x64xf32>, vector<3x64xf32> -> vector<3x64xf32>
    %68 = arith.addf %65, %67 : vector<3x64xf32>
    %69 = vector.extract_strided_slice %30 {offsets = [10, 0], sizes = [3, 48], strides = [1, 1]} : vector<25x48xf32> to vector<3x48xf32>
    %cst_22 = arith.constant dense<0.000000e+00> : vector<3x64xf32>
    %70 = tpu.matmul %69, %13, %cst_22 {dimension_numbers = #tpu.dot_dimension_numbers<[1], [0], [0], [1], [0, 0, 1, 1], [], []>} : vector<3x48xf32>, vector<48x64xf32>, vector<3x64xf32> -> vector<3x64xf32>
    %71 = arith.addf %68, %70 : vector<3x64xf32>
    %72 = vector.extract_strided_slice %30 {offsets = [11, 0], sizes = [3, 48], strides = [1, 1]} : vector<25x48xf32> to vector<3x48xf32>
    %cst_23 = arith.constant dense<0.000000e+00> : vector<3x64xf32>
    %73 = tpu.matmul %72, %14, %cst_23 {dimension_numbers = #tpu.dot_dimension_numbers<[1], [0], [0], [1], [0, 0, 1, 1], [], []>} : vector<3x48xf32>, vector<48x64xf32>, vector<3x64xf32> -> vector<3x64xf32>
    %74 = arith.addf %71, %73 : vector<3x64xf32>
    %75 = vector.extract_strided_slice %30 {offsets = [12, 0], sizes = [3, 48], strides = [1, 1]} : vector<25x48xf32> to vector<3x48xf32>
    %cst_24 = arith.constant dense<0.000000e+00> : vector<3x64xf32>
    %76 = tpu.matmul %75, %15, %cst_24 {dimension_numbers = #tpu.dot_dimension_numbers<[1], [0], [0], [1], [0, 0, 1, 1], [], []>} : vector<3x48xf32>, vector<48x64xf32>, vector<3x64xf32> -> vector<3x64xf32>
    %77 = arith.addf %74, %76 : vector<3x64xf32>
    %78 = vector.extract_strided_slice %30 {offsets = [15, 0], sizes = [3, 48], strides = [1, 1]} : vector<25x48xf32> to vector<3x48xf32>
    %cst_25 = arith.constant dense<0.000000e+00> : vector<3x64xf32>
    %79 = tpu.matmul %78, %16, %cst_25 {dimension_numbers = #tpu.dot_dimension_numbers<[1], [0], [0], [1], [0, 0, 1, 1], [], []>} : vector<3x48xf32>, vector<48x64xf32>, vector<3x64xf32> -> vector<3x64xf32>
    %80 = arith.addf %77, %79 : vector<3x64xf32>
    %81 = vector.extract_strided_slice %30 {offsets = [16, 0], sizes = [3, 48], strides = [1, 1]} : vector<25x48xf32> to vector<3x48xf32>
    %cst_26 = arith.constant dense<0.000000e+00> : vector<3x64xf32>
    %82 = tpu.matmul %81, %17, %cst_26 {dimension_numbers = #tpu.dot_dimension_numbers<[1], [0], [0], [1], [0, 0, 1, 1], [], []>} : vector<3x48xf32>, vector<48x64xf32>, vector<3x64xf32> -> vector<3x64xf32>
    %83 = arith.addf %80, %82 : vector<3x64xf32>
    %84 = vector.extract_strided_slice %30 {offsets = [17, 0], sizes = [3, 48], strides = [1, 1]} : vector<25x48xf32> to vector<3x48xf32>
    %cst_27 = arith.constant dense<0.000000e+00> : vector<3x64xf32>
    %85 = tpu.matmul %84, %18, %cst_27 {dimension_numbers = #tpu.dot_dimension_numbers<[1], [0], [0], [1], [0, 0, 1, 1], [], []>} : vector<3x48xf32>, vector<48x64xf32>, vector<3x64xf32> -> vector<3x64xf32>
    %86 = arith.addf %83, %85 : vector<3x64xf32>
    %87 = vector.broadcast %28 : vector<1x64xf32> to vector<3x64xf32>
    %88 = arith.addf %86, %87 : vector<3x64xf32>
    %cst_28 = arith.constant 0.000000e+00 : f32
    %89 = vector.broadcast %cst_28 : f32 to vector<3x64xf32>
    %90 = arith.maximumf %88, %89 : vector<3x64xf32>
    %91 = vector.extract_strided_slice %30 {offsets = [10, 0], sizes = [3, 48], strides = [1, 1]} : vector<25x48xf32> to vector<3x48xf32>
    %cst_29 = arith.constant dense<0.000000e+00> : vector<3x64xf32>
    %92 = tpu.matmul %91, %10, %cst_29 {dimension_numbers = #tpu.dot_dimension_numbers<[1], [0], [0], [1], [0, 0, 1, 1], [], []>} : vector<3x48xf32>, vector<48x64xf32>, vector<3x64xf32> -> vector<3x64xf32>
    %93 = vector.extract_strided_slice %30 {offsets = [11, 0], sizes = [3, 48], strides = [1, 1]} : vector<25x48xf32> to vector<3x48xf32>
    %cst_30 = arith.constant dense<0.000000e+00> : vector<3x64xf32>
    %94 = tpu.matmul %93, %11, %cst_30 {dimension_numbers = #tpu.dot_dimension_numbers<[1], [0], [0], [1], [0, 0, 1, 1], [], []>} : vector<3x48xf32>, vector<48x64xf32>, vector<3x64xf32> -> vector<3x64xf32>
    %95 = arith.addf %92, %94 : vector<3x64xf32>
    %96 = vector.extract_strided_slice %30 {offsets = [12, 0], sizes = [3, 48], strides = [1, 1]} : vector<25x48xf32> to vector<3x48xf32>
    %cst_31 = arith.constant dense<0.000000e+00> : vector<3x64xf32>
    %97 = tpu.matmul %96, %12, %cst_31 {dimension_numbers = #tpu.dot_dimension_numbers<[1], [0], [0], [1], [0, 0, 1, 1], [], []>} : vector<3x48xf32>, vector<48x64xf32>, vector<3x64xf32> -> vector<3x64xf32>
    %98 = arith.addf %95, %97 : vector<3x64xf32>
    %99 = vector.extract_strided_slice %30 {offsets = [15, 0], sizes = [3, 48], strides = [1, 1]} : vector<25x48xf32> to vector<3x48xf32>
    %cst_32 = arith.constant dense<0.000000e+00> : vector<3x64xf32>
    %100 = tpu.matmul %99, %13, %cst_32 {dimension_numbers = #tpu.dot_dimension_numbers<[1], [0], [0], [1], [0, 0, 1, 1], [], []>} : vector<3x48xf32>, vector<48x64xf32>, vector<3x64xf32> -> vector<3x64xf32>
    %101 = arith.addf %98, %100 : vector<3x64xf32>
    %102 = vector.extract_strided_slice %30 {offsets = [16, 0], sizes = [3, 48], strides = [1, 1]} : vector<25x48xf32> to vector<3x48xf32>
    %cst_33 = arith.constant dense<0.000000e+00> : vector<3x64xf32>
    %103 = tpu.matmul %102, %14, %cst_33 {dimension_numbers = #tpu.dot_dimension_numbers<[1], [0], [0], [1], [0, 0, 1, 1], [], []>} : vector<3x48xf32>, vector<48x64xf32>, vector<3x64xf32> -> vector<3x64xf32>
    %104 = arith.addf %101, %103 : vector<3x64xf32>
    %105 = vector.extract_strided_slice %30 {offsets = [17, 0], sizes = [3, 48], strides = [1, 1]} : vector<25x48xf32> to vector<3x48xf32>
    %cst_34 = arith.constant dense<0.000000e+00> : vector<3x64xf32>
    %106 = tpu.matmul %105, %15, %cst_34 {dimension_numbers = #tpu.dot_dimension_numbers<[1], [0], [0], [1], [0, 0, 1, 1], [], []>} : vector<3x48xf32>, vector<48x64xf32>, vector<3x64xf32> -> vector<3x64xf32>
    %107 = arith.addf %104, %106 : vector<3x64xf32>
    %108 = vector.extract_strided_slice %30 {offsets = [20, 0], sizes = [3, 48], strides = [1, 1]} : vector<25x48xf32> to vector<3x48xf32>
    %cst_35 = arith.constant dense<0.000000e+00> : vector<3x64xf32>
    %109 = tpu.matmul %108, %16, %cst_35 {dimension_numbers = #tpu.dot_dimension_numbers<[1], [0], [0], [1], [0, 0, 1, 1], [], []>} : vector<3x48xf32>, vector<48x64xf32>, vector<3x64xf32> -> vector<3x64xf32>
    %110 = arith.addf %107, %109 : vector<3x64xf32>
    %111 = vector.extract_strided_slice %30 {offsets = [21, 0], sizes = [3, 48], strides = [1, 1]} : vector<25x48xf32> to vector<3x48xf32>
    %cst_36 = arith.constant dense<0.000000e+00> : vector<3x64xf32>
    %112 = tpu.matmul %111, %17, %cst_36 {dimension_numbers = #tpu.dot_dimension_numbers<[1], [0], [0], [1], [0, 0, 1, 1], [], []>} : vector<3x48xf32>, vector<48x64xf32>, vector<3x64xf32> -> vector<3x64xf32>
    %113 = arith.addf %110, %112 : vector<3x64xf32>
    %114 = vector.extract_strided_slice %30 {offsets = [22, 0], sizes = [3, 48], strides = [1, 1]} : vector<25x48xf32> to vector<3x48xf32>
    %cst_37 = arith.constant dense<0.000000e+00> : vector<3x64xf32>
    %115 = tpu.matmul %114, %18, %cst_37 {dimension_numbers = #tpu.dot_dimension_numbers<[1], [0], [0], [1], [0, 0, 1, 1], [], []>} : vector<3x48xf32>, vector<48x64xf32>, vector<3x64xf32> -> vector<3x64xf32>
    %116 = arith.addf %113, %115 : vector<3x64xf32>
    %117 = vector.broadcast %28 : vector<1x64xf32> to vector<3x64xf32>
    %118 = arith.addf %116, %117 : vector<3x64xf32>
    %cst_38 = arith.constant 0.000000e+00 : f32
    %119 = vector.broadcast %cst_38 : f32 to vector<3x64xf32>
    %120 = arith.maximumf %118, %119 : vector<3x64xf32>
    %121 = vector.extract_strided_slice %60 {offsets = [0, 0], sizes = [1, 64], strides = [1, 1]} : vector<3x64xf32> to vector<1x64xf32>
    %cst_39 = arith.constant dense<0.000000e+00> : vector<1x64xf32>
    %122 = tpu.matmul %121, %19, %cst_39 {dimension_numbers = #tpu.dot_dimension_numbers<[1], [0], [0], [1], [0, 0, 1, 1], [], []>} : vector<1x64xf32>, vector<64x64xf32>, vector<1x64xf32> -> vector<1x64xf32>
    %123 = vector.extract_strided_slice %60 {offsets = [1, 0], sizes = [1, 64], strides = [1, 1]} : vector<3x64xf32> to vector<1x64xf32>
    %cst_40 = arith.constant dense<0.000000e+00> : vector<1x64xf32>
    %124 = tpu.matmul %123, %20, %cst_40 {dimension_numbers = #tpu.dot_dimension_numbers<[1], [0], [0], [1], [0, 0, 1, 1], [], []>} : vector<1x64xf32>, vector<64x64xf32>, vector<1x64xf32> -> vector<1x64xf32>
    %125 = arith.addf %122, %124 : vector<1x64xf32>
    %126 = vector.extract_strided_slice %60 {offsets = [2, 0], sizes = [1, 64], strides = [1, 1]} : vector<3x64xf32> to vector<1x64xf32>
    %cst_41 = arith.constant dense<0.000000e+00> : vector<1x64xf32>
    %127 = tpu.matmul %126, %21, %cst_41 {dimension_numbers = #tpu.dot_dimension_numbers<[1], [0], [0], [1], [0, 0, 1, 1], [], []>} : vector<1x64xf32>, vector<64x64xf32>, vector<1x64xf32> -> vector<1x64xf32>
    %128 = arith.addf %125, %127 : vector<1x64xf32>
    %129 = vector.extract_strided_slice %90 {offsets = [0, 0], sizes = [1, 64], strides = [1, 1]} : vector<3x64xf32> to vector<1x64xf32>
    %cst_42 = arith.constant dense<0.000000e+00> : vector<1x64xf32>
    %130 = tpu.matmul %129, %22, %cst_42 {dimension_numbers = #tpu.dot_dimension_numbers<[1], [0], [0], [1], [0, 0, 1, 1], [], []>} : vector<1x64xf32>, vector<64x64xf32>, vector<1x64xf32> -> vector<1x64xf32>
    %131 = arith.addf %128, %130 : vector<1x64xf32>
    %132 = vector.extract_strided_slice %90 {offsets = [1, 0], sizes = [1, 64], strides = [1, 1]} : vector<3x64xf32> to vector<1x64xf32>
    %cst_43 = arith.constant dense<0.000000e+00> : vector<1x64xf32>
    %133 = tpu.matmul %132, %23, %cst_43 {dimension_numbers = #tpu.dot_dimension_numbers<[1], [0], [0], [1], [0, 0, 1, 1], [], []>} : vector<1x64xf32>, vector<64x64xf32>, vector<1x64xf32> -> vector<1x64xf32>
    %134 = arith.addf %131, %133 : vector<1x64xf32>
    %135 = vector.extract_strided_slice %90 {offsets = [2, 0], sizes = [1, 64], strides = [1, 1]} : vector<3x64xf32> to vector<1x64xf32>
    %cst_44 = arith.constant dense<0.000000e+00> : vector<1x64xf32>
    %136 = tpu.matmul %135, %24, %cst_44 {dimension_numbers = #tpu.dot_dimension_numbers<[1], [0], [0], [1], [0, 0, 1, 1], [], []>} : vector<1x64xf32>, vector<64x64xf32>, vector<1x64xf32> -> vector<1x64xf32>
    %137 = arith.addf %134, %136 : vector<1x64xf32>
    %138 = vector.extract_strided_slice %120 {offsets = [0, 0], sizes = [1, 64], strides = [1, 1]} : vector<3x64xf32> to vector<1x64xf32>
    %cst_45 = arith.constant dense<0.000000e+00> : vector<1x64xf32>
    %139 = tpu.matmul %138, %25, %cst_45 {dimension_numbers = #tpu.dot_dimension_numbers<[1], [0], [0], [1], [0, 0, 1, 1], [], []>} : vector<1x64xf32>, vector<64x64xf32>, vector<1x64xf32> -> vector<1x64xf32>
    %140 = arith.addf %137, %139 : vector<1x64xf32>
    %141 = vector.extract_strided_slice %120 {offsets = [1, 0], sizes = [1, 64], strides = [1, 1]} : vector<3x64xf32> to vector<1x64xf32>
    %cst_46 = arith.constant dense<0.000000e+00> : vector<1x64xf32>
    %142 = tpu.matmul %141, %26, %cst_46 {dimension_numbers = #tpu.dot_dimension_numbers<[1], [0], [0], [1], [0, 0, 1, 1], [], []>} : vector<1x64xf32>, vector<64x64xf32>, vector<1x64xf32> -> vector<1x64xf32>
    %143 = arith.addf %140, %142 : vector<1x64xf32>
    %144 = vector.extract_strided_slice %120 {offsets = [2, 0], sizes = [1, 64], strides = [1, 1]} : vector<3x64xf32> to vector<1x64xf32>
    %cst_47 = arith.constant dense<0.000000e+00> : vector<1x64xf32>
    %145 = tpu.matmul %144, %27, %cst_47 {dimension_numbers = #tpu.dot_dimension_numbers<[1], [0], [0], [1], [0, 0, 1, 1], [], []>} : vector<1x64xf32>, vector<64x64xf32>, vector<1x64xf32> -> vector<1x64xf32>
    %146 = arith.addf %143, %145 : vector<1x64xf32>
    %147 = arith.addf %146, %29 : vector<1x64xf32>
    %cst_48 = arith.constant 0.000000e+00 : f32
    %148 = vector.broadcast %cst_48 : f32 to vector<1x64xf32>
    %149 = arith.maximumf %147, %148 : vector<1x64xf32>
    %150 = vector.extract_strided_slice %7 {offsets = [25, 0], sizes = [25, 48], strides = [1, 1]} : vector<50x48xf32> to vector<25x48xf32>
    %151 = vector.extract_strided_slice %150 {offsets = [0, 0], sizes = [3, 48], strides = [1, 1]} : vector<25x48xf32> to vector<3x48xf32>
    %cst_49 = arith.constant dense<0.000000e+00> : vector<3x64xf32>
    %152 = tpu.matmul %151, %10, %cst_49 {dimension_numbers = #tpu.dot_dimension_numbers<[1], [0], [0], [1], [0, 0, 1, 1], [], []>} : vector<3x48xf32>, vector<48x64xf32>, vector<3x64xf32> -> vector<3x64xf32>
    %153 = vector.extract_strided_slice %150 {offsets = [1, 0], sizes = [3, 48], strides = [1, 1]} : vector<25x48xf32> to vector<3x48xf32>
    %cst_50 = arith.constant dense<0.000000e+00> : vector<3x64xf32>
    %154 = tpu.matmul %153, %11, %cst_50 {dimension_numbers = #tpu.dot_dimension_numbers<[1], [0], [0], [1], [0, 0, 1, 1], [], []>} : vector<3x48xf32>, vector<48x64xf32>, vector<3x64xf32> -> vector<3x64xf32>
    %155 = arith.addf %152, %154 : vector<3x64xf32>
    %156 = vector.extract_strided_slice %150 {offsets = [2, 0], sizes = [3, 48], strides = [1, 1]} : vector<25x48xf32> to vector<3x48xf32>
    %cst_51 = arith.constant dense<0.000000e+00> : vector<3x64xf32>
    %157 = tpu.matmul %156, %12, %cst_51 {dimension_numbers = #tpu.dot_dimension_numbers<[1], [0], [0], [1], [0, 0, 1, 1], [], []>} : vector<3x48xf32>, vector<48x64xf32>, vector<3x64xf32> -> vector<3x64xf32>
    %158 = arith.addf %155, %157 : vector<3x64xf32>
    %159 = vector.extract_strided_slice %150 {offsets = [5, 0], sizes = [3, 48], strides = [1, 1]} : vector<25x48xf32> to vector<3x48xf32>
    %cst_52 = arith.constant dense<0.000000e+00> : vector<3x64xf32>
    %160 = tpu.matmul %159, %13, %cst_52 {dimension_numbers = #tpu.dot_dimension_numbers<[1], [0], [0], [1], [0, 0, 1, 1], [], []>} : vector<3x48xf32>, vector<48x64xf32>, vector<3x64xf32> -> vector<3x64xf32>
    %161 = arith.addf %158, %160 : vector<3x64xf32>
    %162 = vector.extract_strided_slice %150 {offsets = [6, 0], sizes = [3, 48], strides = [1, 1]} : vector<25x48xf32> to vector<3x48xf32>
    %cst_53 = arith.constant dense<0.000000e+00> : vector<3x64xf32>
    %163 = tpu.matmul %162, %14, %cst_53 {dimension_numbers = #tpu.dot_dimension_numbers<[1], [0], [0], [1], [0, 0, 1, 1], [], []>} : vector<3x48xf32>, vector<48x64xf32>, vector<3x64xf32> -> vector<3x64xf32>
    %164 = arith.addf %161, %163 : vector<3x64xf32>
    %165 = vector.extract_strided_slice %150 {offsets = [7, 0], sizes = [3, 48], strides = [1, 1]} : vector<25x48xf32> to vector<3x48xf32>
    %cst_54 = arith.constant dense<0.000000e+00> : vector<3x64xf32>
    %166 = tpu.matmul %165, %15, %cst_54 {dimension_numbers = #tpu.dot_dimension_numbers<[1], [0], [0], [1], [0, 0, 1, 1], [], []>} : vector<3x48xf32>, vector<48x64xf32>, vector<3x64xf32> -> vector<3x64xf32>
    %167 = arith.addf %164, %166 : vector<3x64xf32>
    %168 = vector.extract_strided_slice %150 {offsets = [10, 0], sizes = [3, 48], strides = [1, 1]} : vector<25x48xf32> to vector<3x48xf32>
    %cst_55 = arith.constant dense<0.000000e+00> : vector<3x64xf32>
    %169 = tpu.matmul %168, %16, %cst_55 {dimension_numbers = #tpu.dot_dimension_numbers<[1], [0], [0], [1], [0, 0, 1, 1], [], []>} : vector<3x48xf32>, vector<48x64xf32>, vector<3x64xf32> -> vector<3x64xf32>
    %170 = arith.addf %167, %169 : vector<3x64xf32>
    %171 = vector.extract_strided_slice %150 {offsets = [11, 0], sizes = [3, 48], strides = [1, 1]} : vector<25x48xf32> to vector<3x48xf32>
    %cst_56 = arith.constant dense<0.000000e+00> : vector<3x64xf32>
    %172 = tpu.matmul %171, %17, %cst_56 {dimension_numbers = #tpu.dot_dimension_numbers<[1], [0], [0], [1], [0, 0, 1, 1], [], []>} : vector<3x48xf32>, vector<48x64xf32>, vector<3x64xf32> -> vector<3x64xf32>
    %173 = arith.addf %170, %172 : vector<3x64xf32>
    %174 = vector.extract_strided_slice %150 {offsets = [12, 0], sizes = [3, 48], strides = [1, 1]} : vector<25x48xf32> to vector<3x48xf32>
    %cst_57 = arith.constant dense<0.000000e+00> : vector<3x64xf32>
    %175 = tpu.matmul %174, %18, %cst_57 {dimension_numbers = #tpu.dot_dimension_numbers<[1], [0], [0], [1], [0, 0, 1, 1], [], []>} : vector<3x48xf32>, vector<48x64xf32>, vector<3x64xf32> -> vector<3x64xf32>
    %176 = arith.addf %173, %175 : vector<3x64xf32>
    %177 = vector.broadcast %28 : vector<1x64xf32> to vector<3x64xf32>
    %178 = arith.addf %176, %177 : vector<3x64xf32>
    %cst_58 = arith.constant 0.000000e+00 : f32
    %179 = vector.broadcast %cst_58 : f32 to vector<3x64xf32>
    %180 = arith.maximumf %178, %179 : vector<3x64xf32>
    %181 = vector.extract_strided_slice %150 {offsets = [5, 0], sizes = [3, 48], strides = [1, 1]} : vector<25x48xf32> to vector<3x48xf32>
    %cst_59 = arith.constant dense<0.000000e+00> : vector<3x64xf32>
    %182 = tpu.matmul %181, %10, %cst_59 {dimension_numbers = #tpu.dot_dimension_numbers<[1], [0], [0], [1], [0, 0, 1, 1], [], []>} : vector<3x48xf32>, vector<48x64xf32>, vector<3x64xf32> -> vector<3x64xf32>
    %183 = vector.extract_strided_slice %150 {offsets = [6, 0], sizes = [3, 48], strides = [1, 1]} : vector<25x48xf32> to vector<3x48xf32>
    %cst_60 = arith.constant dense<0.000000e+00> : vector<3x64xf32>
    %184 = tpu.matmul %183, %11, %cst_60 {dimension_numbers = #tpu.dot_dimension_numbers<[1], [0], [0], [1], [0, 0, 1, 1], [], []>} : vector<3x48xf32>, vector<48x64xf32>, vector<3x64xf32> -> vector<3x64xf32>
    %185 = arith.addf %182, %184 : vector<3x64xf32>
    %186 = vector.extract_strided_slice %150 {offsets = [7, 0], sizes = [3, 48], strides = [1, 1]} : vector<25x48xf32> to vector<3x48xf32>
    %cst_61 = arith.constant dense<0.000000e+00> : vector<3x64xf32>
    %187 = tpu.matmul %186, %12, %cst_61 {dimension_numbers = #tpu.dot_dimension_numbers<[1], [0], [0], [1], [0, 0, 1, 1], [], []>} : vector<3x48xf32>, vector<48x64xf32>, vector<3x64xf32> -> vector<3x64xf32>
    %188 = arith.addf %185, %187 : vector<3x64xf32>
    %189 = vector.extract_strided_slice %150 {offsets = [10, 0], sizes = [3, 48], strides = [1, 1]} : vector<25x48xf32> to vector<3x48xf32>
    %cst_62 = arith.constant dense<0.000000e+00> : vector<3x64xf32>
    %190 = tpu.matmul %189, %13, %cst_62 {dimension_numbers = #tpu.dot_dimension_numbers<[1], [0], [0], [1], [0, 0, 1, 1], [], []>} : vector<3x48xf32>, vector<48x64xf32>, vector<3x64xf32> -> vector<3x64xf32>
    %191 = arith.addf %188, %190 : vector<3x64xf32>
    %192 = vector.extract_strided_slice %150 {offsets = [11, 0], sizes = [3, 48], strides = [1, 1]} : vector<25x48xf32> to vector<3x48xf32>
    %cst_63 = arith.constant dense<0.000000e+00> : vector<3x64xf32>
    %193 = tpu.matmul %192, %14, %cst_63 {dimension_numbers = #tpu.dot_dimension_numbers<[1], [0], [0], [1], [0, 0, 1, 1], [], []>} : vector<3x48xf32>, vector<48x64xf32>, vector<3x64xf32> -> vector<3x64xf32>
    %194 = arith.addf %191, %193 : vector<3x64xf32>
    %195 = vector.extract_strided_slice %150 {offsets = [12, 0], sizes = [3, 48], strides = [1, 1]} : vector<25x48xf32> to vector<3x48xf32>
    %cst_64 = arith.constant dense<0.000000e+00> : vector<3x64xf32>
    %196 = tpu.matmul %195, %15, %cst_64 {dimension_numbers = #tpu.dot_dimension_numbers<[1], [0], [0], [1], [0, 0, 1, 1], [], []>} : vector<3x48xf32>, vector<48x64xf32>, vector<3x64xf32> -> vector<3x64xf32>
    %197 = arith.addf %194, %196 : vector<3x64xf32>
    %198 = vector.extract_strided_slice %150 {offsets = [15, 0], sizes = [3, 48], strides = [1, 1]} : vector<25x48xf32> to vector<3x48xf32>
    %cst_65 = arith.constant dense<0.000000e+00> : vector<3x64xf32>
    %199 = tpu.matmul %198, %16, %cst_65 {dimension_numbers = #tpu.dot_dimension_numbers<[1], [0], [0], [1], [0, 0, 1, 1], [], []>} : vector<3x48xf32>, vector<48x64xf32>, vector<3x64xf32> -> vector<3x64xf32>
    %200 = arith.addf %197, %199 : vector<3x64xf32>
    %201 = vector.extract_strided_slice %150 {offsets = [16, 0], sizes = [3, 48], strides = [1, 1]} : vector<25x48xf32> to vector<3x48xf32>
    %cst_66 = arith.constant dense<0.000000e+00> : vector<3x64xf32>
    %202 = tpu.matmul %201, %17, %cst_66 {dimension_numbers = #tpu.dot_dimension_numbers<[1], [0], [0], [1], [0, 0, 1, 1], [], []>} : vector<3x48xf32>, vector<48x64xf32>, vector<3x64xf32> -> vector<3x64xf32>
    %203 = arith.addf %200, %202 : vector<3x64xf32>
    %204 = vector.extract_strided_slice %150 {offsets = [17, 0], sizes = [3, 48], strides = [1, 1]} : vector<25x48xf32> to vector<3x48xf32>
    %cst_67 = arith.constant dense<0.000000e+00> : vector<3x64xf32>
    %205 = tpu.matmul %204, %18, %cst_67 {dimension_numbers = #tpu.dot_dimension_numbers<[1], [0], [0], [1], [0, 0, 1, 1], [], []>} : vector<3x48xf32>, vector<48x64xf32>, vector<3x64xf32> -> vector<3x64xf32>
    %206 = arith.addf %203, %205 : vector<3x64xf32>
    %207 = vector.broadcast %28 : vector<1x64xf32> to vector<3x64xf32>
    %208 = arith.addf %206, %207 : vector<3x64xf32>
    %cst_68 = arith.constant 0.000000e+00 : f32
    %209 = vector.broadcast %cst_68 : f32 to vector<3x64xf32>
    %210 = arith.maximumf %208, %209 : vector<3x64xf32>
    %211 = vector.extract_strided_slice %150 {offsets = [10, 0], sizes = [3, 48], strides = [1, 1]} : vector<25x48xf32> to vector<3x48xf32>
    %cst_69 = arith.constant dense<0.000000e+00> : vector<3x64xf32>
    %212 = tpu.matmul %211, %10, %cst_69 {dimension_numbers = #tpu.dot_dimension_numbers<[1], [0], [0], [1], [0, 0, 1, 1], [], []>} : vector<3x48xf32>, vector<48x64xf32>, vector<3x64xf32> -> vector<3x64xf32>
    %213 = vector.extract_strided_slice %150 {offsets = [11, 0], sizes = [3, 48], strides = [1, 1]} : vector<25x48xf32> to vector<3x48xf32>
    %cst_70 = arith.constant dense<0.000000e+00> : vector<3x64xf32>
    %214 = tpu.matmul %213, %11, %cst_70 {dimension_numbers = #tpu.dot_dimension_numbers<[1], [0], [0], [1], [0, 0, 1, 1], [], []>} : vector<3x48xf32>, vector<48x64xf32>, vector<3x64xf32> -> vector<3x64xf32>
    %215 = arith.addf %212, %214 : vector<3x64xf32>
    %216 = vector.extract_strided_slice %150 {offsets = [12, 0], sizes = [3, 48], strides = [1, 1]} : vector<25x48xf32> to vector<3x48xf32>
    %cst_71 = arith.constant dense<0.000000e+00> : vector<3x64xf32>
    %217 = tpu.matmul %216, %12, %cst_71 {dimension_numbers = #tpu.dot_dimension_numbers<[1], [0], [0], [1], [0, 0, 1, 1], [], []>} : vector<3x48xf32>, vector<48x64xf32>, vector<3x64xf32> -> vector<3x64xf32>
    %218 = arith.addf %215, %217 : vector<3x64xf32>
    %219 = vector.extract_strided_slice %150 {offsets = [15, 0], sizes = [3, 48], strides = [1, 1]} : vector<25x48xf32> to vector<3x48xf32>
    %cst_72 = arith.constant dense<0.000000e+00> : vector<3x64xf32>
    %220 = tpu.matmul %219, %13, %cst_72 {dimension_numbers = #tpu.dot_dimension_numbers<[1], [0], [0], [1], [0, 0, 1, 1], [], []>} : vector<3x48xf32>, vector<48x64xf32>, vector<3x64xf32> -> vector<3x64xf32>
    %221 = arith.addf %218, %220 : vector<3x64xf32>
    %222 = vector.extract_strided_slice %150 {offsets = [16, 0], sizes = [3, 48], strides = [1, 1]} : vector<25x48xf32> to vector<3x48xf32>
    %cst_73 = arith.constant dense<0.000000e+00> : vector<3x64xf32>
    %223 = tpu.matmul %222, %14, %cst_73 {dimension_numbers = #tpu.dot_dimension_numbers<[1], [0], [0], [1], [0, 0, 1, 1], [], []>} : vector<3x48xf32>, vector<48x64xf32>, vector<3x64xf32> -> vector<3x64xf32>
    %224 = arith.addf %221, %223 : vector<3x64xf32>
    %225 = vector.extract_strided_slice %150 {offsets = [17, 0], sizes = [3, 48], strides = [1, 1]} : vector<25x48xf32> to vector<3x48xf32>
    %cst_74 = arith.constant dense<0.000000e+00> : vector<3x64xf32>
    %226 = tpu.matmul %225, %15, %cst_74 {dimension_numbers = #tpu.dot_dimension_numbers<[1], [0], [0], [1], [0, 0, 1, 1], [], []>} : vector<3x48xf32>, vector<48x64xf32>, vector<3x64xf32> -> vector<3x64xf32>
    %227 = arith.addf %224, %226 : vector<3x64xf32>
    %228 = vector.extract_strided_slice %150 {offsets = [20, 0], sizes = [3, 48], strides = [1, 1]} : vector<25x48xf32> to vector<3x48xf32>
    %cst_75 = arith.constant dense<0.000000e+00> : vector<3x64xf32>
    %229 = tpu.matmul %228, %16, %cst_75 {dimension_numbers = #tpu.dot_dimension_numbers<[1], [0], [0], [1], [0, 0, 1, 1], [], []>} : vector<3x48xf32>, vector<48x64xf32>, vector<3x64xf32> -> vector<3x64xf32>
    %230 = arith.addf %227, %229 : vector<3x64xf32>
    %231 = vector.extract_strided_slice %150 {offsets = [21, 0], sizes = [3, 48], strides = [1, 1]} : vector<25x48xf32> to vector<3x48xf32>
    %cst_76 = arith.constant dense<0.000000e+00> : vector<3x64xf32>
    %232 = tpu.matmul %231, %17, %cst_76 {dimension_numbers = #tpu.dot_dimension_numbers<[1], [0], [0], [1], [0, 0, 1, 1], [], []>} : vector<3x48xf32>, vector<48x64xf32>, vector<3x64xf32> -> vector<3x64xf32>
    %233 = arith.addf %230, %232 : vector<3x64xf32>
    %234 = vector.extract_strided_slice %150 {offsets = [22, 0], sizes = [3, 48], strides = [1, 1]} : vector<25x48xf32> to vector<3x48xf32>
    %cst_77 = arith.constant dense<0.000000e+00> : vector<3x64xf32>
    %235 = tpu.matmul %234, %18, %cst_77 {dimension_numbers = #tpu.dot_dimension_numbers<[1], [0], [0], [1], [0, 0, 1, 1], [], []>} : vector<3x48xf32>, vector<48x64xf32>, vector<3x64xf32> -> vector<3x64xf32>
    %236 = arith.addf %233, %235 : vector<3x64xf32>
    %237 = vector.broadcast %28 : vector<1x64xf32> to vector<3x64xf32>
    %238 = arith.addf %236, %237 : vector<3x64xf32>
    %cst_78 = arith.constant 0.000000e+00 : f32
    %239 = vector.broadcast %cst_78 : f32 to vector<3x64xf32>
    %240 = arith.maximumf %238, %239 : vector<3x64xf32>
    %241 = vector.extract_strided_slice %180 {offsets = [0, 0], sizes = [1, 64], strides = [1, 1]} : vector<3x64xf32> to vector<1x64xf32>
    %cst_79 = arith.constant dense<0.000000e+00> : vector<1x64xf32>
    %242 = tpu.matmul %241, %19, %cst_79 {dimension_numbers = #tpu.dot_dimension_numbers<[1], [0], [0], [1], [0, 0, 1, 1], [], []>} : vector<1x64xf32>, vector<64x64xf32>, vector<1x64xf32> -> vector<1x64xf32>
    %243 = vector.extract_strided_slice %180 {offsets = [1, 0], sizes = [1, 64], strides = [1, 1]} : vector<3x64xf32> to vector<1x64xf32>
    %cst_80 = arith.constant dense<0.000000e+00> : vector<1x64xf32>
    %244 = tpu.matmul %243, %20, %cst_80 {dimension_numbers = #tpu.dot_dimension_numbers<[1], [0], [0], [1], [0, 0, 1, 1], [], []>} : vector<1x64xf32>, vector<64x64xf32>, vector<1x64xf32> -> vector<1x64xf32>
    %245 = arith.addf %242, %244 : vector<1x64xf32>
    %246 = vector.extract_strided_slice %180 {offsets = [2, 0], sizes = [1, 64], strides = [1, 1]} : vector<3x64xf32> to vector<1x64xf32>
    %cst_81 = arith.constant dense<0.000000e+00> : vector<1x64xf32>
    %247 = tpu.matmul %246, %21, %cst_81 {dimension_numbers = #tpu.dot_dimension_numbers<[1], [0], [0], [1], [0, 0, 1, 1], [], []>} : vector<1x64xf32>, vector<64x64xf32>, vector<1x64xf32> -> vector<1x64xf32>
    %248 = arith.addf %245, %247 : vector<1x64xf32>
    %249 = vector.extract_strided_slice %210 {offsets = [0, 0], sizes = [1, 64], strides = [1, 1]} : vector<3x64xf32> to vector<1x64xf32>
    %cst_82 = arith.constant dense<0.000000e+00> : vector<1x64xf32>
    %250 = tpu.matmul %249, %22, %cst_82 {dimension_numbers = #tpu.dot_dimension_numbers<[1], [0], [0], [1], [0, 0, 1, 1], [], []>} : vector<1x64xf32>, vector<64x64xf32>, vector<1x64xf32> -> vector<1x64xf32>
    %251 = arith.addf %248, %250 : vector<1x64xf32>
    %252 = vector.extract_strided_slice %210 {offsets = [1, 0], sizes = [1, 64], strides = [1, 1]} : vector<3x64xf32> to vector<1x64xf32>
    %cst_83 = arith.constant dense<0.000000e+00> : vector<1x64xf32>
    %253 = tpu.matmul %252, %23, %cst_83 {dimension_numbers = #tpu.dot_dimension_numbers<[1], [0], [0], [1], [0, 0, 1, 1], [], []>} : vector<1x64xf32>, vector<64x64xf32>, vector<1x64xf32> -> vector<1x64xf32>
    %254 = arith.addf %251, %253 : vector<1x64xf32>
    %255 = vector.extract_strided_slice %210 {offsets = [2, 0], sizes = [1, 64], strides = [1, 1]} : vector<3x64xf32> to vector<1x64xf32>
    %cst_84 = arith.constant dense<0.000000e+00> : vector<1x64xf32>
    %256 = tpu.matmul %255, %24, %cst_84 {dimension_numbers = #tpu.dot_dimension_numbers<[1], [0], [0], [1], [0, 0, 1, 1], [], []>} : vector<1x64xf32>, vector<64x64xf32>, vector<1x64xf32> -> vector<1x64xf32>
    %257 = arith.addf %254, %256 : vector<1x64xf32>
    %258 = vector.extract_strided_slice %240 {offsets = [0, 0], sizes = [1, 64], strides = [1, 1]} : vector<3x64xf32> to vector<1x64xf32>
    %cst_85 = arith.constant dense<0.000000e+00> : vector<1x64xf32>
    %259 = tpu.matmul %258, %25, %cst_85 {dimension_numbers = #tpu.dot_dimension_numbers<[1], [0], [0], [1], [0, 0, 1, 1], [], []>} : vector<1x64xf32>, vector<64x64xf32>, vector<1x64xf32> -> vector<1x64xf32>
    %260 = arith.addf %257, %259 : vector<1x64xf32>
    %261 = vector.extract_strided_slice %240 {offsets = [1, 0], sizes = [1, 64], strides = [1, 1]} : vector<3x64xf32> to vector<1x64xf32>
    %cst_86 = arith.constant dense<0.000000e+00> : vector<1x64xf32>
    %262 = tpu.matmul %261, %26, %cst_86 {dimension_numbers = #tpu.dot_dimension_numbers<[1], [0], [0], [1], [0, 0, 1, 1], [], []>} : vector<1x64xf32>, vector<64x64xf32>, vector<1x64xf32> -> vector<1x64xf32>
    %263 = arith.addf %260, %262 : vector<1x64xf32>
    %264 = vector.extract_strided_slice %240 {offsets = [2, 0], sizes = [1, 64], strides = [1, 1]} : vector<3x64xf32> to vector<1x64xf32>
    %cst_87 = arith.constant dense<0.000000e+00> : vector<1x64xf32>
    %265 = tpu.matmul %264, %27, %cst_87 {dimension_numbers = #tpu.dot_dimension_numbers<[1], [0], [0], [1], [0, 0, 1, 1], [], []>} : vector<1x64xf32>, vector<64x64xf32>, vector<1x64xf32> -> vector<1x64xf32>
    %266 = arith.addf %263, %265 : vector<1x64xf32>
    %267 = arith.addf %266, %29 : vector<1x64xf32>
    %cst_88 = arith.constant 0.000000e+00 : f32
    %268 = vector.broadcast %cst_88 : f32 to vector<1x64xf32>
    %269 = arith.maximumf %267, %268 : vector<1x64xf32>
    %270 = tpu.concatenate %149, %269 in 0 : vector<1x64xf32>, vector<1x64xf32> -> vector<2x64xf32>
    %c1911 = arith.constant 1911 : index
    %c0_89 = arith.constant 0 : index
    %271 = vector.load %arg2[%c1911, %c0_89] : memref<2176x128xf32, #tpu.memory_space<vmem>>, vector<64x100xf32>
    %cst_90 = arith.constant dense<0.000000e+00> : vector<2x100xf32>
    %272 = tpu.matmul %270, %271, %cst_90 {dimension_numbers = #tpu.dot_dimension_numbers<[1], [0], [0], [1], [0, 0, 1, 1], [], []>} : vector<2x64xf32>, vector<64x100xf32>, vector<2x100xf32> -> vector<2x100xf32>
    %c1975 = arith.constant 1975 : index
    %c0_91 = arith.constant 0 : index
    %273 = vector.load %arg2[%c1975, %c0_91] : memref<2176x128xf32, #tpu.memory_space<vmem>>, vector<1x100xf32>
    %274 = vector.broadcast %273 : vector<1x100xf32> to vector<2x100xf32>
    %275 = arith.addf %272, %274 : vector<2x100xf32>
    %cst_92 = arith.constant 0.000000e+00 : f32
    %276 = vector.broadcast %cst_92 : f32 to vector<2x100xf32>
    %277 = arith.maximumf %275, %276 : vector<2x100xf32>
    %c1976 = arith.constant 1976 : index
    %c0_93 = arith.constant 0 : index
    %278 = vector.load %arg2[%c1976, %c0_93] : memref<2176x128xf32, #tpu.memory_space<vmem>>, vector<100x50xf32>
    %cst_94 = arith.constant dense<0.000000e+00> : vector<2x50xf32>
    %279 = tpu.matmul %277, %278, %cst_94 {dimension_numbers = #tpu.dot_dimension_numbers<[1], [0], [0], [1], [0, 0, 1, 1], [], []>} : vector<2x100xf32>, vector<100x50xf32>, vector<2x50xf32> -> vector<2x50xf32>
    %c2076 = arith.constant 2076 : index
    %c0_95 = arith.constant 0 : index
    %280 = vector.load %arg2[%c2076, %c0_95] : memref<2176x128xf32, #tpu.memory_space<vmem>>, vector<1x50xf32>
    %281 = vector.broadcast %280 : vector<1x50xf32> to vector<2x50xf32>
    %282 = arith.addf %279, %281 : vector<2x50xf32>
    %cst_96 = arith.constant 0.000000e+00 : f32
    %283 = vector.broadcast %cst_96 : f32 to vector<2x50xf32>
    %284 = arith.maximumf %282, %283 : vector<2x50xf32>
    %c2077 = arith.constant 2077 : index
    %c0_97 = arith.constant 0 : index
    %285 = vector.load %arg2[%c2077, %c0_97] : memref<2176x128xf32, #tpu.memory_space<vmem>>, vector<50x10xf32>
    %cst_98 = arith.constant dense<0.000000e+00> : vector<2x10xf32>
    %286 = tpu.matmul %284, %285, %cst_98 {dimension_numbers = #tpu.dot_dimension_numbers<[1], [0], [0], [1], [0, 0, 1, 1], [], []>} : vector<2x50xf32>, vector<50x10xf32>, vector<2x10xf32> -> vector<2x10xf32>
    %c2127 = arith.constant 2127 : index
    %c0_99 = arith.constant 0 : index
    %287 = vector.load %arg2[%c2127, %c0_99] : memref<2176x128xf32, #tpu.memory_space<vmem>>, vector<1x10xf32>
    %288 = vector.broadcast %287 : vector<1x10xf32> to vector<2x10xf32>
    %289 = arith.addf %286, %288 : vector<2x10xf32>
    %c2143 = arith.constant 2143 : index
    %c0_100 = arith.constant 0 : index
    %290 = vector.load %arg2[%c2143, %c0_100] : memref<2176x128xf32, #tpu.memory_space<vmem>>, vector<12x4xf32>
    %c2155 = arith.constant 2155 : index
    %c0_101 = arith.constant 0 : index
    %291 = vector.load %arg2[%c2155, %c0_101] : memref<2176x128xf32, #tpu.memory_space<vmem>>, vector<16x4xf32>
    %c2171 = arith.constant 2171 : index
    %c0_102 = arith.constant 0 : index
    %292 = vector.load %arg2[%c2171, %c0_102] : memref<2176x128xf32, #tpu.memory_space<vmem>>, vector<4x4xf32>
    %c2133 = arith.constant 2133 : index
    %c0_103 = arith.constant 0 : index
    %293 = vector.load %arg2[%c2133, %c0_103] : memref<2176x128xf32, #tpu.memory_space<vmem>>, vector<10x4xf32>
    %294 = vector.extract_strided_slice %290 {offsets = [0, 0], sizes = [4, 4], strides = [1, 1]} : vector<12x4xf32> to vector<4x4xf32>
    %295 = vector.extract_strided_slice %290 {offsets = [4, 0], sizes = [4, 4], strides = [1, 1]} : vector<12x4xf32> to vector<4x4xf32>
    %296 = vector.extract_strided_slice %290 {offsets = [8, 0], sizes = [4, 4], strides = [1, 1]} : vector<12x4xf32> to vector<4x4xf32>
    %297 = vector.extract_strided_slice %291 {offsets = [0, 0], sizes = [4, 4], strides = [1, 1]} : vector<16x4xf32> to vector<4x4xf32>
    %298 = vector.extract_strided_slice %291 {offsets = [4, 0], sizes = [4, 4], strides = [1, 1]} : vector<16x4xf32> to vector<4x4xf32>
    %299 = vector.extract_strided_slice %291 {offsets = [8, 0], sizes = [4, 4], strides = [1, 1]} : vector<16x4xf32> to vector<4x4xf32>
    %300 = vector.extract_strided_slice %291 {offsets = [12, 0], sizes = [4, 4], strides = [1, 1]} : vector<16x4xf32> to vector<4x4xf32>
    %c0_104 = arith.constant 0 : index
    %c0_105 = arith.constant 0 : index
    %301 = vector.load %arg3[%c0_104, %c0_105] : memref<4x4xf32, #tpu.memory_space<vmem>>, vector<1x4xf32>
    %c1 = arith.constant 1 : index
    %c0_106 = arith.constant 0 : index
    %302 = vector.load %arg3[%c1, %c0_106] : memref<4x4xf32, #tpu.memory_space<vmem>>, vector<1x4xf32>
    %c2 = arith.constant 2 : index
    %c0_107 = arith.constant 0 : index
    %303 = vector.load %arg3[%c2, %c0_107] : memref<4x4xf32, #tpu.memory_space<vmem>>, vector<1x4xf32>
    %c3 = arith.constant 3 : index
    %c0_108 = arith.constant 0 : index
    %304 = vector.load %arg3[%c3, %c0_108] : memref<4x4xf32, #tpu.memory_space<vmem>>, vector<1x4xf32>
    %305 = vector.extract_strided_slice %289 {offsets = [0, 0], sizes = [1, 10], strides = [1, 1]} : vector<2x10xf32> to vector<1x10xf32>
    %cst_109 = arith.constant dense<0.000000e+00> : vector<1x4xf32>
    %306 = tpu.matmul %305, %293, %cst_109 {dimension_numbers = #tpu.dot_dimension_numbers<[1], [0], [0], [1], [0, 0, 1, 1], [], []>} : vector<1x10xf32>, vector<10x4xf32>, vector<1x4xf32> -> vector<1x4xf32>
    %cst_110 = arith.constant dense<0.000000e+00> : vector<1x4xf32>
    %307 = tpu.matmul %301, %297, %cst_110 {dimension_numbers = #tpu.dot_dimension_numbers<[1], [0], [0], [1], [0, 0, 1, 1], [], []>} : vector<1x4xf32>, vector<4x4xf32>, vector<1x4xf32> -> vector<1x4xf32>
    %308 = arith.addf %306, %307 : vector<1x4xf32>
    %309 = vector.extract_strided_slice %292 {offsets = [0, 0], sizes = [1, 4], strides = [1, 1]} : vector<4x4xf32> to vector<1x4xf32>
    %310 = arith.addf %308, %309 : vector<1x4xf32>
    %311 = math.tanh %310 : vector<1x4xf32>
    %cst_111 = arith.constant dense<0.000000e+00> : vector<1x4xf32>
    %312 = tpu.matmul %311, %294, %cst_111 {dimension_numbers = #tpu.dot_dimension_numbers<[1], [0], [0], [1], [0, 0, 1, 1], [], []>} : vector<1x4xf32>, vector<4x4xf32>, vector<1x4xf32> -> vector<1x4xf32>
    %cst_112 = arith.constant dense<0.000000e+00> : vector<1x4xf32>
    %313 = tpu.matmul %302, %298, %cst_112 {dimension_numbers = #tpu.dot_dimension_numbers<[1], [0], [0], [1], [0, 0, 1, 1], [], []>} : vector<1x4xf32>, vector<4x4xf32>, vector<1x4xf32> -> vector<1x4xf32>
    %314 = arith.addf %312, %313 : vector<1x4xf32>
    %315 = vector.extract_strided_slice %292 {offsets = [1, 0], sizes = [1, 4], strides = [1, 1]} : vector<4x4xf32> to vector<1x4xf32>
    %316 = arith.addf %314, %315 : vector<1x4xf32>
    %317 = math.tanh %316 : vector<1x4xf32>
    %cst_113 = arith.constant dense<0.000000e+00> : vector<1x4xf32>
    %318 = tpu.matmul %317, %295, %cst_113 {dimension_numbers = #tpu.dot_dimension_numbers<[1], [0], [0], [1], [0, 0, 1, 1], [], []>} : vector<1x4xf32>, vector<4x4xf32>, vector<1x4xf32> -> vector<1x4xf32>
    %cst_114 = arith.constant dense<0.000000e+00> : vector<1x4xf32>
    %319 = tpu.matmul %303, %299, %cst_114 {dimension_numbers = #tpu.dot_dimension_numbers<[1], [0], [0], [1], [0, 0, 1, 1], [], []>} : vector<1x4xf32>, vector<4x4xf32>, vector<1x4xf32> -> vector<1x4xf32>
    %320 = arith.addf %318, %319 : vector<1x4xf32>
    %321 = vector.extract_strided_slice %292 {offsets = [2, 0], sizes = [1, 4], strides = [1, 1]} : vector<4x4xf32> to vector<1x4xf32>
    %322 = arith.addf %320, %321 : vector<1x4xf32>
    %323 = math.tanh %322 : vector<1x4xf32>
    %cst_115 = arith.constant dense<0.000000e+00> : vector<1x4xf32>
    %324 = tpu.matmul %323, %296, %cst_115 {dimension_numbers = #tpu.dot_dimension_numbers<[1], [0], [0], [1], [0, 0, 1, 1], [], []>} : vector<1x4xf32>, vector<4x4xf32>, vector<1x4xf32> -> vector<1x4xf32>
    %cst_116 = arith.constant dense<0.000000e+00> : vector<1x4xf32>
    %325 = tpu.matmul %304, %300, %cst_116 {dimension_numbers = #tpu.dot_dimension_numbers<[1], [0], [0], [1], [0, 0, 1, 1], [], []>} : vector<1x4xf32>, vector<4x4xf32>, vector<1x4xf32> -> vector<1x4xf32>
    %326 = arith.addf %324, %325 : vector<1x4xf32>
    %327 = vector.extract_strided_slice %292 {offsets = [3, 0], sizes = [1, 4], strides = [1, 1]} : vector<4x4xf32> to vector<1x4xf32>
    %328 = arith.addf %326, %327 : vector<1x4xf32>
    %329 = math.tanh %328 : vector<1x4xf32>
    %330 = vector.extract_strided_slice %289 {offsets = [1, 0], sizes = [1, 10], strides = [1, 1]} : vector<2x10xf32> to vector<1x10xf32>
    %cst_117 = arith.constant dense<0.000000e+00> : vector<1x4xf32>
    %331 = tpu.matmul %330, %293, %cst_117 {dimension_numbers = #tpu.dot_dimension_numbers<[1], [0], [0], [1], [0, 0, 1, 1], [], []>} : vector<1x10xf32>, vector<10x4xf32>, vector<1x4xf32> -> vector<1x4xf32>
    %cst_118 = arith.constant dense<0.000000e+00> : vector<1x4xf32>
    %332 = tpu.matmul %311, %297, %cst_118 {dimension_numbers = #tpu.dot_dimension_numbers<[1], [0], [0], [1], [0, 0, 1, 1], [], []>} : vector<1x4xf32>, vector<4x4xf32>, vector<1x4xf32> -> vector<1x4xf32>
    %333 = arith.addf %331, %332 : vector<1x4xf32>
    %334 = vector.extract_strided_slice %292 {offsets = [0, 0], sizes = [1, 4], strides = [1, 1]} : vector<4x4xf32> to vector<1x4xf32>
    %335 = arith.addf %333, %334 : vector<1x4xf32>
    %336 = math.tanh %335 : vector<1x4xf32>
    %cst_119 = arith.constant dense<0.000000e+00> : vector<1x4xf32>
    %337 = tpu.matmul %336, %294, %cst_119 {dimension_numbers = #tpu.dot_dimension_numbers<[1], [0], [0], [1], [0, 0, 1, 1], [], []>} : vector<1x4xf32>, vector<4x4xf32>, vector<1x4xf32> -> vector<1x4xf32>
    %cst_120 = arith.constant dense<0.000000e+00> : vector<1x4xf32>
    %338 = tpu.matmul %317, %298, %cst_120 {dimension_numbers = #tpu.dot_dimension_numbers<[1], [0], [0], [1], [0, 0, 1, 1], [], []>} : vector<1x4xf32>, vector<4x4xf32>, vector<1x4xf32> -> vector<1x4xf32>
    %339 = arith.addf %337, %338 : vector<1x4xf32>
    %340 = vector.extract_strided_slice %292 {offsets = [1, 0], sizes = [1, 4], strides = [1, 1]} : vector<4x4xf32> to vector<1x4xf32>
    %341 = arith.addf %339, %340 : vector<1x4xf32>
    %342 = math.tanh %341 : vector<1x4xf32>
    %cst_121 = arith.constant dense<0.000000e+00> : vector<1x4xf32>
    %343 = tpu.matmul %342, %295, %cst_121 {dimension_numbers = #tpu.dot_dimension_numbers<[1], [0], [0], [1], [0, 0, 1, 1], [], []>} : vector<1x4xf32>, vector<4x4xf32>, vector<1x4xf32> -> vector<1x4xf32>
    %cst_122 = arith.constant dense<0.000000e+00> : vector<1x4xf32>
    %344 = tpu.matmul %323, %299, %cst_122 {dimension_numbers = #tpu.dot_dimension_numbers<[1], [0], [0], [1], [0, 0, 1, 1], [], []>} : vector<1x4xf32>, vector<4x4xf32>, vector<1x4xf32> -> vector<1x4xf32>
    %345 = arith.addf %343, %344 : vector<1x4xf32>
    %346 = vector.extract_strided_slice %292 {offsets = [2, 0], sizes = [1, 4], strides = [1, 1]} : vector<4x4xf32> to vector<1x4xf32>
    %347 = arith.addf %345, %346 : vector<1x4xf32>
    %348 = math.tanh %347 : vector<1x4xf32>
    %cst_123 = arith.constant dense<0.000000e+00> : vector<1x4xf32>
    %349 = tpu.matmul %348, %296, %cst_123 {dimension_numbers = #tpu.dot_dimension_numbers<[1], [0], [0], [1], [0, 0, 1, 1], [], []>} : vector<1x4xf32>, vector<4x4xf32>, vector<1x4xf32> -> vector<1x4xf32>
    %cst_124 = arith.constant dense<0.000000e+00> : vector<1x4xf32>
    %350 = tpu.matmul %329, %300, %cst_124 {dimension_numbers = #tpu.dot_dimension_numbers<[1], [0], [0], [1], [0, 0, 1, 1], [], []>} : vector<1x4xf32>, vector<4x4xf32>, vector<1x4xf32> -> vector<1x4xf32>
    %351 = arith.addf %349, %350 : vector<1x4xf32>
    %352 = vector.extract_strided_slice %292 {offsets = [3, 0], sizes = [1, 4], strides = [1, 1]} : vector<4x4xf32> to vector<1x4xf32>
    %353 = arith.addf %351, %352 : vector<1x4xf32>
    %354 = math.tanh %353 : vector<1x4xf32>
    %355 = tpu.concatenate %336, %342, %348, %354 in 0 : vector<1x4xf32>, vector<1x4xf32>, vector<1x4xf32>, vector<1x4xf32> -> vector<4x4xf32>
    %c0_125 = arith.constant 0 : index
    %c0_126 = arith.constant 0 : index
    %356 = vector.load %arg5[%c0_125, %c0_126] : memref<4x4xf32, #tpu.memory_space<vmem>>, vector<4x4xf32>
    tpu.vector_store %arg5[%c0_125, %c0_126], %355 {strides = array<i32>} : memref<4x4xf32, #tpu.memory_space<vmem>>, vector<4x4xf32>,
    %357 = tpu.concatenate %329, %354 in 0 : vector<1x4xf32>, vector<1x4xf32> -> vector<2x4xf32>
    %cst_127 = arith.constant 0.000000e+00 : f32
    %358 = vector.broadcast %cst_127 : f32 to vector<2x4xf32>
    %359 = arith.maximumf %357, %358 : vector<2x4xf32>
    %c2128 = arith.constant 2128 : index
    %c0_128 = arith.constant 0 : index
    %360 = vector.load %arg2[%c2128, %c0_128] : memref<2176x128xf32, #tpu.memory_space<vmem>>, vector<4x1xf32>
    %cst_129 = arith.constant dense<0.000000e+00> : vector<2x1xf32>
    %361 = tpu.matmul %359, %360, %cst_129 {dimension_numbers = #tpu.dot_dimension_numbers<[1], [0], [0], [1], [0, 0, 1, 1], [], []>} : vector<2x4xf32>, vector<4x1xf32>, vector<2x1xf32> -> vector<2x1xf32>
    %c2132 = arith.constant 2132 : index
    %c0_130 = arith.constant 0 : index
    %362 = vector.load %arg2[%c2132, %c0_130] : memref<2176x128xf32, #tpu.memory_space<vmem>>, vector<1x1xf32>
    %363 = vector.broadcast %362 : vector<1x1xf32> to vector<2x1xf32>
    %364 = arith.addf %361, %363 : vector<2x1xf32>
    %365 = math.tanh %364 : vector<2x1xf32>
    %c0_131 = arith.constant 0 : index
    %c0_132 = arith.constant 0 : index
    %366 = vector.load %arg4[%c0_131, %c0_132] : memref<2x1xf32, #tpu.memory_space<vmem>>, vector<2x1xf32>
    tpu.vector_store %arg4[%c0_131, %c0_132], %365 {strides = array<i32>} : memref<2x1xf32, #tpu.memory_space<vmem>>, vector<2x1xf32>,
    return
  }
  func.func @transform_0(%arg0: i32) -> (i32, i32) {
    %c0_i32 = arith.constant 0 : i32
    %c0_i32_0 = arith.constant 0 : i32
    %c0_i32_1 = arith.constant 0 : i32
    return %c0_i32, %c0_i32_0 : i32, i32
  }
  func.func @transform_1(%arg0: i32) -> (i32, i32) {
    %c0_i32 = arith.constant 0 : i32
    %c0_i32_0 = arith.constant 0 : i32
    %c0_i32_1 = arith.constant 0 : i32
    return %c0_i32, %c0_i32_0 : i32, i32
  }
  func.func @transform_2(%arg0: i32) -> (i32, i32) {
    %c0_i32 = arith.constant 0 : i32
    %c0_i32_0 = arith.constant 0 : i32
    %c0_i32_1 = arith.constant 0 : i32
    return %c0_i32, %c0_i32_0 : i32, i32
  }
  func.func @transform_3(%arg0: i32) -> (i32, i32) {
    %c0_i32 = arith.constant 0 : i32
    %c0_i32_0 = arith.constant 0 : i32
    %c0_i32_1 = arith.constant 0 : i32
    return %c0_i32, %c0_i32_0 : i32, i32
  }
  func.func @transform_4(%arg0: i32) -> (i32, i32) {
    %c0_i32 = arith.constant 0 : i32
    %c0_i32_0 = arith.constant 0 : i32
    %c0_i32_1 = arith.constant 0 : i32
    return %c0_i32, %c0_i32_0 : i32, i32
  }
}

</mosaic_0001>

<bundles_post_ra>
// kernel: tile.13
= control target key start
LH: loop header
LB: loop body
LE: loop exit
PB: predicated region body
PF: predicated region fallthrough
CT: control target
= control target key end

     0   :  { %s40_s0 = inlined_call_operand.vmem [shape: f32[3], index: 0, kind: input, shape index: {}]   ;;  %s41_s1 = inlined_call_operand.vmem [shape: f32[25,3], index: 1, kind: output, shape index: {}]  }
   0x1   :  { %v4_v0 = vld [vmem:[%s40_s0] ss:$0 sm:$0xff] }
   0x2   :  { %5 = vst [vmem:[%s41_s1] sm:$0xff] %v4_v0  ;;  %12 = vst [vmem:[%s41_s1 + $0x8] sm:$0xff] %v4_v0 }
   0x3   :  { %13 = vst [vmem:[%s41_s1 + $0x10] sm:$0xff] %v4_v0  ;;  %14 = vst [vmem:[%s41_s1 + $0x18] sm:$0xff] %v4_v0 }

// kernel: mul.9
= control target key start
LH: loop header
LB: loop body
LE: loop exit
PB: predicated region body
PF: predicated region fallthrough
CT: control target
= control target key end

     0   :  { %s203_s10 = smov 72   ;;  %s204_s11 = smov 66   ;;  %vm3_vm0 = vcmask 23552   ;;  %vm9_vm1 = vcmask 613952   ;;  %vm15_vm2 = vcmask 589352   ;;  %vm21_vm3 = vcmask 564752   ;;  %s315_s0 = inlined_call_operand.vmem [shape: f32[25,3], index: 0, kind: input, shape index: {}]   ;;  %s316_s1 = inlined_call_operand.vmem [shape: f32[75], index: 1, kind: output, shape index: {}]  }
   0x1   :  { %v155_v0 = vld [vmem:[%s315_s0 + $0x18] sm:$0x1]   ;;  %v157_v1 = vld [vmem:[%s315_s0 + $0x16] sm:$0x1]   ;;  %v156_v2 = vld [vmem:[%s315_s0 + $0x17] sm:$0x1]  }
   0x2   :  { %7 = vrot.lane.b32.xlu0 %v155_v0, %s203_s10  ;;  %19 = vrot.lane.b32.xlu1 %v157_v1, %s204_s11  ;;  %v158_v3 = vld [vmem:[%s315_s0 + $0x15] sm:$0x1]   ;;  %s205_s16 = smov 69   ;;  %s206_s17 = smov 63   ;;  %v159_v4 = vld [vmem:[%s315_s0 + $0x14] sm:$0x1]  }
   0x3   :  { %v160_v5 = vld [vmem:[%s315_s0 + $0x13] sm:$0x1]   ;;  %s207_s22 = smov 60   ;;  %s208_s23 = smov 57   ;;  %v161_v6 = vld [vmem:[%s315_s0 + $0x12] sm:$0x1]  }
   0x4   :  { %v162_v7 = vld [vmem:[%s315_s0 + $0x11] sm:$0x1]   ;;  %v2_v8 = vld [vmem:[%s315_s0] sm:$0x1]   ;;  %s209_s30 = smov 54   ;;  %s210_s2 = smov 51  }
   0x5   :  { %4 = vst.msk [vmem:[#allocation0] sm:$0x1] %vm3_vm0, %v2_v8   ;;  %v163_v9 = vld [vmem:[%s315_s0 + $0x10] sm:$0x1]   ;;  %v164_v10 = vld [vmem:[%s315_s0 + $0xf] sm:$0x1]  }
   0x6   :  { %13 = vrot.lane.b32.xlu0 %v156_v2, %s205_s16  ;;  %25 = vrot.lane.b32.xlu1 %v158_v3, %s206_s17  ;;  %s211_s7 = smov 48   ;;  %s212_s8 = smov 45   ;;  %v165_v11 = vld [vmem:[%s315_s0 + $0xe] sm:$0x1]   ;;  %v166_v12 = vld [vmem:[%s315_s0 + $0xd] sm:$0x1]  }
   0x7   :  { %s213_s13 = smov 42   ;;  %s214_s14 = smov 39   ;;  %v167_v13 = vld [vmem:[%s315_s0 + $0xc] sm:$0x1]   ;;  %v168_v14 = vld [vmem:[%s315_s0 + $0xb] sm:$0x1]  }
   0x8   :  { %s215_s19 = smov 36   ;;  %s216_s20 = smov 33   ;;  %v169_v15 = vld [vmem:[%s315_s0 + $0xa] sm:$0x1]   ;;  %v170_v16 = vld [vmem:[%s315_s0 + $0x9] sm:$0x1]  }
   0x9   :  { %s217_s25 = smov 30   ;;  %s218_s26 = smov 27   ;;  %v171_v17 = vld [vmem:[%s315_s0 + $0x8] sm:$0x1]   ;;  %v172_v18 = vld [vmem:[%s315_s0 + $0x7] sm:$0x1]  }
   0xa   :  { %31 = vrot.lane.b32.xlu0 %v159_v4, %s207_s22  ;;  %37 = vrot.lane.b32.xlu1 %v160_v5, %s208_s23  ;;  %s220_s3 = smov 21   ;;  %v173_v19 = vld [vmem:[%s315_s0 + $0x6] sm:$0x1]   ;;  %v174_v20 = vld [vmem:[%s315_s0 + $0x5] sm:$0x1]   ;;  %s222_s9 = smov 15  }
   0xb   :  { %v175_v21 = vld [vmem:[%s315_s0 + $0x4] sm:$0x1]   ;;  %v176_v22 = vld [vmem:[%s315_s0 + $0x3] sm:$0x1]   ;;  %s224_s15 = smov 9   ;;  %vm27_vm4 = vcmask 540152  }
   0xc   :  { %v177_v23 = vld [vmem:[%s315_s0 + $0x2] sm:$0x1]   ;;  %v178_v24 = vld [vmem:[%s315_s0 + $0x1] sm:$0x1]   ;;  %s225_s0 = smov 6   ;;  %vm33_vm5 = vcmask 515552  }
   0xd   :  { %vm39_vm6 = vcmask 490952   ;;  %vm45_vm7 = vcmask 466352   ;;  %vm51_vm8 = vcmask 441752   ;;  %vm57_vm9 = vcmask 417152  }
   0xe   :  { %43 = vrot.lane.b32.xlu0 %v161_v6, %s209_s30  ;;  %49 = vrot.lane.b32.xlu1 %v162_v7, %s210_s2  ;;  %s219_s2 = smov 24   ;;  %vm63_vm10 = vcmask 392552   ;;  %vm69_vm11 = vcmask 367952   ;;  %vm75_vm12 = vcmask 343352   ;;  %vm81_vm13 = vcmask 318752  }
   0xf   :  { %vm87_vm14 = vcmask 294152   ;;  %vm93_vm15 = vcmask 269552   ;;  %vm99_vm0 = vcmask 244952  }
  0x12   :  { %55 = vrot.lane.b32.xlu0 %v163_v9, %s211_s7  ;;  %61 = vrot.lane.b32.xlu1 %v164_v10, %s212_s8  ;;  %s221_s8 = smov 18  }
  0x16   :  { %67 = vrot.lane.b32.xlu0 %v165_v11, %s213_s13  ;;  %73 = vrot.lane.b32.xlu1 %v166_v12, %s214_s14  ;;  %s223_s14 = smov 12  }
  0x1a   :  { %79 = vrot.lane.b32.xlu0 %v167_v13, %s215_s19  ;;  %85 = vrot.lane.b32.xlu1 %v168_v14, %s216_s20  ;;  %s226_s20 = smov 3  }
  0x1e   :  { %91 = vrot.lane.b32.xlu0 %v169_v15, %s217_s25  ;;  %97 = vrot.lane.b32.xlu1 %v170_v16, %s218_s26 }
  0x22   :  { %103 = vrot.lane.b32.xlu0 %v171_v17, %s219_s2  ;;  %109 = vrot.lane.b32.xlu1 %v172_v18, %s220_s3 }
  0x26   :  { %115 = vrot.lane.b32.xlu0 %v173_v19, %s221_s8  ;;  %121 = vrot.lane.b32.xlu1 %v174_v20, %s222_s9 }
  0x2a   :  { %127 = vrot.lane.b32.xlu0 %v175_v21, %s223_s14  ;;  %133 = vrot.lane.b32.xlu1 %v176_v22, %s224_s15 }
  0x2e   :  { %139 = vrot.lane.b32.xlu0 %v177_v23, %s225_s0  ;;  %145 = vrot.lane.b32.xlu1 %v178_v24, %s226_s20 }
  0x74   :  { %v8_v25 = vpop.permute.xlu0 %7   ;;  %v20_v26 = vpop.permute.xlu1 %19  }
  0x75   :  { %10 = vst.msk [vmem:[#allocation0] sm:$0x1] %vm9_vm1, %v8_v25   ;;  %vm105_vm1 = vcmask 220352  }
  0x78   :  { %v14_v27 = vpop.permute.xlu0 %13   ;;  %v26_v28 = vpop.permute.xlu1 %25  }
  0x79   :  { %16 = vst.msk [vmem:[#allocation0] sm:$0x1] %vm15_vm2, %v14_v27   ;;  %vm111_vm2 = vcmask 195752  }
  0x7a   :  { %22 = vst.msk [vmem:[#allocation0] sm:$0x1] %vm21_vm3, %v20_v26   ;;  %vm117_vm3 = vcmask 171152  }
  0x7b   :  { %28 = vst.msk [vmem:[#allocation0] sm:$0x1] %vm27_vm4, %v26_v28   ;;  %vm123_vm4 = vcmask 146552  }
  0x7c   :  { %v32_v29 = vpop.permute.xlu0 %31   ;;  %v38_v30 = vpop.permute.xlu1 %37  }
  0x7d   :  { %34 = vst.msk [vmem:[#allocation0] sm:$0x1] %vm33_vm5, %v32_v29   ;;  %vm129_vm5 = vcmask 121952  }
  0x7e   :  { %40 = vst.msk [vmem:[#allocation0] sm:$0x1] %vm39_vm6, %v38_v30   ;;  %vm135_vm6 = vcmask 97352  }
  0x80   :  { %v44_v31 = vpop.permute.xlu0 %43   ;;  %v50_v32 = vpop.permute.xlu1 %49  }
  0x81   :  { %46 = vst.msk [vmem:[#allocation0] sm:$0x1] %vm45_vm7, %v44_v31   ;;  %vm141_vm7 = vcmask 72752  }
  0x82   :  { %52 = vst.msk [vmem:[#allocation0] sm:$0x1] %vm51_vm8, %v50_v32   ;;  %vm147_vm8 = vcmask 48152  }
  0x84   :  { %v56_v33 = vpop.permute.xlu0 %55   ;;  %v62_v34 = vpop.permute.xlu1 %61  }
  0x85   :  { %58 = vst.msk [vmem:[#allocation0] sm:$0x1] %vm57_vm9, %v56_v33  }
  0x86   :  { %64 = vst.msk [vmem:[#allocation0] sm:$0x1] %vm63_vm10, %v62_v34  }
  0x88   :  { %v68_v35 = vpop.permute.xlu0 %67   ;;  %v74_v36 = vpop.permute.xlu1 %73  }
  0x89   :  { %70 = vst.msk [vmem:[#allocation0] sm:$0x1] %vm69_vm11, %v68_v35  }
  0x8a   :  { %76 = vst.msk [vmem:[#allocation0] sm:$0x1] %vm75_vm12, %v74_v36  }
  0x8c   :  { %v80_v37 = vpop.permute.xlu0 %79   ;;  %v86_v38 = vpop.permute.xlu1 %85  }
  0x8d   :  { %82 = vst.msk [vmem:[#allocation0] sm:$0x1] %vm81_vm13, %v80_v37  }
  0x8e   :  { %88 = vst.msk [vmem:[#allocation0] sm:$0x1] %vm87_vm14, %v86_v38  }
  0x90   :  { %v92_v39 = vpop.permute.xlu0 %91   ;;  %v98_v40 = vpop.permute.xlu1 %97  }
  0x91   :  { %94 = vst.msk [vmem:[#allocation0] sm:$0x1] %vm93_vm15, %v92_v39  }
  0x92   :  { %100 = vst.msk [vmem:[#allocation0] sm:$0x1] %vm99_vm0, %v98_v40  }
  0x94   :  { %v104_v41 = vpop.permute.xlu0 %103   ;;  %v110_v42 = vpop.permute.xlu1 %109  }
  0x95   :  { %106 = vst.msk [vmem:[#allocation0] sm:$0x1] %vm105_vm1, %v104_v41  }
  0x96   :  { %112 = vst.msk [vmem:[#allocation0] sm:$0x1] %vm111_vm2, %v110_v42  }
  0x98   :  { %v116_v43 = vpop.permute.xlu0 %115   ;;  %v122_v44 = vpop.permute.xlu1 %121  }
  0x99   :  { %118 = vst.msk [vmem:[#allocation0] sm:$0x1] %vm117_vm3, %v116_v43  }
  0x9a   :  { %124 = vst.msk [vmem:[#allocation0] sm:$0x1] %vm123_vm4, %v122_v44  }
  0x9c   :  { %v128_v45 = vpop.permute.xlu0 %127   ;;  %v134_v46 = vpop.permute.xlu1 %133  }
  0x9d   :  { %130 = vst.msk [vmem:[#allocation0] sm:$0x1] %vm129_vm5, %v128_v45  }
  0x9e   :  { %136 = vst.msk [vmem:[#allocation0] sm:$0x1] %vm135_vm6, %v134_v46  }
  0xa0   :  { %v140_v47 = vpop.permute.xlu0 %139   ;;  %v146_v48 = vpop.permute.xlu1 %145  }
  0xa1   :  { %142 = vst.msk [vmem:[#allocation0] sm:$0x1] %vm141_vm7, %v140_v47  }
  0xa2   :  { %148 = vst.msk [vmem:[#allocation0] sm:$0x1] %vm147_vm8, %v146_v48  }
  0xa9   :  { %v152_v49 = vld [vmem:[#allocation0] sm:$0x1] }
  0xaa   :  { %154 = vst [vmem:[%s316_s1] sm:$0x1] %v152_v49 }

// kernel: mini_rnn_forward.3
= control target key start
LH: loop header
LB: loop body
LE: loop exit
PB: predicated region body
PF: predicated region fallthrough
CT: control target
= control target key end

     0   :  { %v3770_v0 = vmov 0.0|0.0   ;;  %vm3771_vm0 = vmmov 0   ;;  %v3772_v6 = vmov 0.0   ;;  %vm932_vm1 = vcmask 1042432   ;;  %s6314_s1 = inlined_call_operand.vmem [shape: f32[75,24], index: 1, kind: input, shape index: {}]   ;;  %s6315_s0 = inlined_call_operand.vmem [shape: f32[1800,75], index: 0, kind: input, shape index: {}]   ;;  %s6316_s2 = inlined_call_operand.vmem [shape: f32[1,24], index: 2, kind: input, shape index: {}]   ;;  %s6317_s3 = inlined_call_operand.vmem [shape: f32[1800,24], index: 3, kind: output, shape index: {}]  }
   0x1   :  { %3738 = vmatprep.subr.bf16.mxu0 %v3770_v0  ;;  %v239_v1 = vld [vmem:[%s6314_s1] sm:$0xff]  ;;  %v240_v2 = vld [vmem:[%s6314_s1 + $0x8] sm:$0xff]  ;;  %3754 = vmatprep.subr.bf16.mxu1 %v3770_v0  ;;  %v241_v3 = vld [vmem:[%s6314_s1 + $0x10] sm:$0xff]  ;;  %vm3773_vm2 = vmmov 1   ;;  %vm256_vm4 = vcmask 613376   ;;  %vm2351_vm5 = vcmask 195584  }
   0x2   :  { %v3739_v4 = vpack.c.bf16 %v240_v2, %v239_v1  ;;  %v242_v5 = vld [vmem:[%s6314_s1 + $0x18] sm:$0xff]  ;;  %3063 = vmatprep.mubr.msk.f32.mxu0 %vm3771_vm0, %v3772_v6  ;;  %3402 = vmatprep.mubr.msk.f32.mxu1 %vm3771_vm0, %v3772_v6  ;;  %v243_v8 = vld [vmem:[%s6314_s1 + $0x20] sm:$0xff]  ;;  %v244_v9 = vld [vmem:[%s6314_s1 + $0x28] sm:$0xff] }
   0x3   :  { %v3742_v7 = vpack.c.bf16 %v242_v5, %v241_v3  ;;  %v3745_v10 = vpack.c.bf16 %v244_v9, %v243_v8  ;;  %v245_v11 = vld [vmem:[%s6314_s1 + $0x30] sm:$0xff]  ;;  %v246_v12 = vld [vmem:[%s6314_s1 + $0x38] sm:$0xff]  ;;  %v247_v14 = vld [vmem:[%s6314_s1 + $0x40] sm:$0xff] }
   0x4   :  { %3740 = vmatpush3.bf16.msra.mxu0 %v3739_v4  ;;  %3759 = vmatpush3.bf16.msra.mxu1 %v3739_v4  ;;  %v3748_v13 = vpack.c.bf16 %v246_v12, %v245_v11  ;;  %v248_v15 = vld [vmem:[%s6314_s1 + $0x48] sm:$0x7]  ;;  %vm3752_vm3 = vmpackc.low %vm932_vm1, %vm3773_vm2  ;;  %v14_v17 = vld [vmem:[%s6315_s0] sm:$0xff] }
   0x5   :  { %3741 = vmatprep.subr.bf16.mxu0 %v3770_v0  ;;  %3755 = vmatprep.subr.bf16.mxu1 %v3770_v0  ;;  %v3751_v16 = vpack.c.bf16 %v248_v15, %v247_v14  ;;  %v127_v18 = vld [vmem:[%s6315_s0 + $0x388] sm:$0xff]  ;;  %v128_v20 = vld [vmem:[%s6315_s0 + $0x390] sm:$0xff]  ;;  %v129_v22 = vld [vmem:[%s6315_s0 + $0x398] sm:$0xff] }
   0x6   :  { %v15_v19 = vld [vmem:[%s6315_s0 + $0x8] sm:$0xff]  ;;  %v16_v21 = vld [vmem:[%s6315_s0 + $0x10] sm:$0xff]  ;;  %v17_v23 = vld [vmem:[%s6315_s0 + $0x18] sm:$0xff] }
   0x7   :  { %v130_v24 = vld [vmem:[%s6315_s0 + $0x3a0] sm:$0xff]  ;;  %v131_v26 = vld [vmem:[%s6315_s0 + $0x3a8] sm:$0xff]  ;;  %v132_v28 = vld [vmem:[%s6315_s0 + $0x3b0] sm:$0xff] }
   0x8   :  { %3743 = vmatpush3.bf16.msra.mxu0 %v3742_v7  ;;  %3760 = vmatpush3.bf16.msra.mxu1 %v3742_v7  ;;  %v18_v25 = vld [vmem:[%s6315_s0 + $0x20] sm:$0xff]  ;;  %v19_v27 = vld [vmem:[%s6315_s0 + $0x28] sm:$0xff]  ;;  %v20_v29 = vld [vmem:[%s6315_s0 + $0x30] sm:$0xff] }
   0x9   :  { %3744 = vmatprep.subr.bf16.mxu0 %v3770_v0  ;;  %3756 = vmatprep.subr.bf16.mxu1 %v3770_v0  ;;  %v133_v30 = vld [vmem:[%s6315_s0 + $0x3b8] sm:$0xff]  ;;  %v134_v32 = vld [vmem:[%s6315_s0 + $0x3c0] sm:$0xff]  ;;  %v135_v34 = vld [vmem:[%s6315_s0 + $0x3c8] sm:$0xff] }
   0xa   :  { %v21_v31 = vld [vmem:[%s6315_s0 + $0x38] sm:$0xff]  ;;  %v22_v33 = vld [vmem:[%s6315_s0 + $0x40] sm:$0xff]  ;;  %v23_v35 = vld [vmem:[%s6315_s0 + $0x48] sm:$0xff] }
   0xb   :  { %v136_v36 = vld [vmem:[%s6315_s0 + $0x3d0] sm:$0xff]  ;;  %v137_v38 = vld [vmem:[%s6315_s0 + $0x3d8] sm:$0xff]  ;;  %v138_v40 = vld [vmem:[%s6315_s0 + $0x3e0] sm:$0xff] }
   0xc   :  { %3746 = vmatpush3.bf16.msra.mxu0 %v3745_v10  ;;  %3761 = vmatpush3.bf16.msra.mxu1 %v3745_v10  ;;  %v24_v37 = vld [vmem:[%s6315_s0 + $0x50] sm:$0xff]  ;;  %v25_v39 = vld [vmem:[%s6315_s0 + $0x58] sm:$0xff]  ;;  %v26_v41 = vld [vmem:[%s6315_s0 + $0x60] sm:$0xff] }
   0xd   :  { %3747 = vmatprep.subr.bf16.mxu0 %v3770_v0  ;;  %3757 = vmatprep.subr.bf16.mxu1 %v3770_v0  ;;  %v139_v42 = vld [vmem:[%s6315_s0 + $0x3e8] sm:$0xff]  ;;  %v140_v44 = vld [vmem:[%s6315_s0 + $0x3f0] sm:$0xff]  ;;  %v141_v46 = vld [vmem:[%s6315_s0 + $0x3f8] sm:$0xff] }
   0xe   :  { %v27_v43 = vld [vmem:[%s6315_s0 + $0x68] sm:$0xff]  ;;  %v28_v45 = vld [vmem:[%s6315_s0 + $0x70] sm:$0xff]  ;;  %v29_v47 = vld [vmem:[%s6315_s0 + $0x78] sm:$0xff] }
   0xf   :  { %v142_v48 = vld [vmem:[%s6315_s0 + $0x400] sm:$0xff]  ;;  %v143_v50 = vld [vmem:[%s6315_s0 + $0x408] sm:$0xff]  ;;  %v144_v52 = vld [vmem:[%s6315_s0 + $0x410] sm:$0xff] }
  0x10   :  { %3749 = vmatpush3.bf16.msra.mxu0 %v3748_v13  ;;  %3762 = vmatpush3.bf16.msra.mxu1 %v3748_v13  ;;  %v30_v49 = vld [vmem:[%s6315_s0 + $0x80] sm:$0xff]  ;;  %v31_v51 = vld [vmem:[%s6315_s0 + $0x88] sm:$0xff]  ;;  %v32_v53 = vld [vmem:[%s6315_s0 + $0x90] sm:$0xff] }
  0x11   :  { %3750 = vmatprep.subr.bf16.mxu0 %v3770_v0  ;;  %3758 = vmatprep.subr.bf16.mxu1 %v3770_v0  ;;  %v145_v54 = vld [vmem:[%s6315_s0 + $0x418] sm:$0xff]  ;;  %v146_v56 = vld [vmem:[%s6315_s0 + $0x420] sm:$0xff]  ;;  %v147_v58 = vld [vmem:[%s6315_s0 + $0x428] sm:$0xff] }
  0x12   :  { %v33_v55 = vld [vmem:[%s6315_s0 + $0x98] sm:$0xff]  ;;  %v34_v57 = vld [vmem:[%s6315_s0 + $0xa0] sm:$0xff]  ;;  %v35_v59 = vld [vmem:[%s6315_s0 + $0xa8] sm:$0xff] }
  0x13   :  { %v148_v60 = vld [vmem:[%s6315_s0 + $0x430] sm:$0xff]  ;;  %v149_v62 = vld [vmem:[%s6315_s0 + $0x438] sm:$0xff]  ;;  %v150_v0 = vld [vmem:[%s6315_s0 + $0x440] sm:$0xff] }
  0x14   :  { %3753 = vmatpush3.bf16.msk.msra.mxu0 %vm3752_vm3, %v3751_v16  ;;  %3763 = vmatpush3.bf16.msk.msra.mxu1 %vm3752_vm3, %v3751_v16  ;;  %v36_v61 = vld [vmem:[%s6315_s0 + $0xb0] sm:$0xff]  ;;  %v37_v63 = vld [vmem:[%s6315_s0 + $0xb8] sm:$0xff]  ;;  %v38_v1 = vld [vmem:[%s6315_s0 + $0xc0] sm:$0xff] }
  0x15   :  { %v151_v2 = vld [vmem:[%s6315_s0 + $0x448] sm:$0xff]  ;;  %v152_v4 = vld [vmem:[%s6315_s0 + $0x450] sm:$0xff]  ;;  %v153_v7 = vld [vmem:[%s6315_s0 + $0x458] sm:$0xff] }
  0x16   :  { %v39_v3 = vld [vmem:[%s6315_s0 + $0xc8] sm:$0xff]  ;;  %v40_v5 = vld [vmem:[%s6315_s0 + $0xd0] sm:$0xff]  ;;  %v41_v8 = vld [vmem:[%s6315_s0 + $0xd8] sm:$0xff] }
  0x17   :  { %3064 = vmatmul.mubr.msk.f32.vlgmr.msra.gmra.mrb[0].mxu0 %vm256_vm4, %v14_v17  ;;  %3403 = vmatmul.mubr.msk.f32.vlgmr.msra.gmra.mrb[0].mxu1 %vm256_vm4, %v127_v18  ;;  %v154_v9 = vld [vmem:[%s6315_s0 + $0x460] sm:$0xff]  ;;  %v155_v11 = vld [vmem:[%s6315_s0 + $0x468] sm:$0xff]  ;;  %v156_v13 = vld [vmem:[%s6315_s0 + $0x470] sm:$0xff] }
  0x18   :  { %3066 = vmatprep.mubr.msk.f32.mxu0 %vm3771_vm0, %v3772_v6  ;;  %3405 = vmatprep.mubr.msk.f32.mxu1 %vm3771_vm0, %v3772_v6  ;;  %v42_v10 = vld [vmem:[%s6315_s0 + $0xe0] sm:$0xff]  ;;  %v43_v12 = vld [vmem:[%s6315_s0 + $0xe8] sm:$0xff]  ;;  %v44_v14 = vld [vmem:[%s6315_s0 + $0xf0] sm:$0xff] }
  0x19   :  { %v157_v15 = vld [vmem:[%s6315_s0 + $0x478] sm:$0xff]  ;;  %v158_v17 = vld [vmem:[%s6315_s0 + $0x480] sm:$0xff] }
  0x1a   :  { %v45_v16 = vld [vmem:[%s6315_s0 + $0xf8] sm:$0xff]  ;;  %v46_v18 = vld [vmem:[%s6315_s0 + $0x100] sm:$0xff] }
  0x1b   :  { %3067 = vmatmul.mubr.msk.f32.gmra.mrb[2].mxu0 %vm256_vm4, %v15_v19  ;;  %3406 = vmatmul.mubr.msk.f32.gmra.mrb[2].mxu1 %vm256_vm4, %v128_v20  ;;  %v159_v19 = vld [vmem:[%s6315_s0 + $0x488] sm:$0xff] }
  0x1c   :  { %3069 = vmatprep.mubr.msk.f32.mxu0 %vm3771_vm0, %v3772_v6  ;;  %3408 = vmatprep.mubr.msk.f32.mxu1 %vm3771_vm0, %v3772_v6  ;;  %v47_v20 = vld [vmem:[%s6315_s0 + $0x108] sm:$0xff] }
  0x1f   :  { %3070 = vmatmul.mubr.msk.f32.gmra.mrb[4].mxu0 %vm256_vm4, %v16_v21  ;;  %3409 = vmatmul.mubr.msk.f32.gmra.mrb[4].mxu1 %vm256_vm4, %v129_v22  ;;  %v160_v21 = vld [vmem:[%s6315_s0 + $0x490] sm:$0xff] }
  0x20   :  { %3072 = vmatprep.mubr.msk.f32.mxu0 %vm3771_vm0, %v3772_v6  ;;  %3411 = vmatprep.mubr.msk.f32.mxu1 %vm3771_vm0, %v3772_v6  ;;  %v48_v22 = vld [vmem:[%s6315_s0 + $0x110] sm:$0xff] }
  0x23   :  { %3073 = vmatmul.mubr.msk.f32.gmra.mrb[6].mxu0 %vm256_vm4, %v17_v23  ;;  %3412 = vmatmul.mubr.msk.f32.gmra.mrb[6].mxu1 %vm256_vm4, %v130_v24  ;;  %v161_v23 = vld [vmem:[%s6315_s0 + $0x498] sm:$0xff] }
  0x24   :  { %3075 = vmatprep.mubr.msk.f32.mxu0 %vm3771_vm0, %v3772_v6  ;;  %3414 = vmatprep.mubr.msk.f32.mxu1 %vm3771_vm0, %v3772_v6  ;;  %v49_v24 = vld [vmem:[%s6315_s0 + $0x118] sm:$0xff] }
  0x27   :  { %3076 = vmatmul.mubr.msk.f32.gmra.mrb[8].mxu0 %vm256_vm4, %v18_v25  ;;  %3415 = vmatmul.mubr.msk.f32.gmra.mrb[8].mxu1 %vm256_vm4, %v131_v26  ;;  %v162_v25 = vld [vmem:[%s6315_s0 + $0x4a0] sm:$0xff] }
  0x28   :  { %3078 = vmatprep.mubr.msk.f32.mxu0 %vm3771_vm0, %v3772_v6  ;;  %3417 = vmatprep.mubr.msk.f32.mxu1 %vm3771_vm0, %v3772_v6  ;;  %v50_v26 = vld [vmem:[%s6315_s0 + $0x120] sm:$0xff] }
  0x2b   :  { %3079 = vmatmul.mubr.msk.f32.gmra.mrb[10].mxu0 %vm256_vm4, %v19_v27  ;;  %3418 = vmatmul.mubr.msk.f32.gmra.mrb[10].mxu1 %vm256_vm4, %v132_v28  ;;  %v163_v27 = vld [vmem:[%s6315_s0 + $0x4a8] sm:$0xff] }
  0x2c   :  { %3081 = vmatprep.mubr.msk.f32.mxu0 %vm3771_vm0, %v3772_v6  ;;  %3420 = vmatprep.mubr.msk.f32.mxu1 %vm3771_vm0, %v3772_v6  ;;  %v51_v28 = vld [vmem:[%s6315_s0 + $0x128] sm:$0xff] }
  0x2f   :  { %3082 = vmatmul.mubr.msk.f32.gmra.mrb[12].mxu0 %vm256_vm4, %v20_v29  ;;  %3421 = vmatmul.mubr.msk.f32.gmra.mrb[12].mxu1 %vm256_vm4, %v133_v30  ;;  %v164_v29 = vld [vmem:[%s6315_s0 + $0x4b0] sm:$0xff] }
  0x30   :  { %3084 = vmatprep.mubr.msk.f32.mxu0 %vm3771_vm0, %v3772_v6  ;;  %3423 = vmatprep.mubr.msk.f32.mxu1 %vm3771_vm0, %v3772_v6  ;;  %v52_v30 = vld [vmem:[%s6315_s0 + $0x130] sm:$0xff] }
  0x33   :  { %3085 = vmatmul.mubr.msk.f32.gmra.mrb[14].mxu0 %vm256_vm4, %v21_v31  ;;  %3424 = vmatmul.mubr.msk.f32.gmra.mrb[14].mxu1 %vm256_vm4, %v134_v32  ;;  %v165_v31 = vld [vmem:[%s6315_s0 + $0x4b8] sm:$0xff] }
  0x34   :  { %3087 = vmatprep.mubr.msk.f32.mxu0 %vm3771_vm0, %v3772_v6  ;;  %3426 = vmatprep.mubr.msk.f32.mxu1 %vm3771_vm0, %v3772_v6  ;;  %v53_v32 = vld [vmem:[%s6315_s0 + $0x138] sm:$0xff] }
  0x37   :  { %3088 = vmatmul.mubr.msk.f32.gmra.mrb[16].mxu0 %vm256_vm4, %v22_v33  ;;  %3427 = vmatmul.mubr.msk.f32.gmra.mrb[16].mxu1 %vm256_vm4, %v135_v34  ;;  %v166_v33 = vld [vmem:[%s6315_s0 + $0x4c0] sm:$0xff] }
  0x38   :  { %3090 = vmatprep.mubr.msk.f32.mxu0 %vm3771_vm0, %v3772_v6  ;;  %3429 = vmatprep.mubr.msk.f32.mxu1 %vm3771_vm0, %v3772_v6  ;;  %v54_v34 = vld [vmem:[%s6315_s0 + $0x140] sm:$0xff] }
  0x3b   :  { %3091 = vmatmul.mubr.msk.f32.gmra.mrb[18].mxu0 %vm256_vm4, %v23_v35  ;;  %3430 = vmatmul.mubr.msk.f32.gmra.mrb[18].mxu1 %vm256_vm4, %v136_v36  ;;  %v167_v35 = vld [vmem:[%s6315_s0 + $0x4c8] sm:$0xff] }
  0x3c   :  { %3093 = vmatprep.mubr.msk.f32.mxu0 %vm3771_vm0, %v3772_v6  ;;  %3432 = vmatprep.mubr.msk.f32.mxu1 %vm3771_vm0, %v3772_v6  ;;  %v55_v36 = vld [vmem:[%s6315_s0 + $0x148] sm:$0xff] }
  0x3f   :  { %3094 = vmatmul.mubr.msk.f32.gmra.mrb[20].mxu0 %vm256_vm4, %v24_v37  ;;  %3433 = vmatmul.mubr.msk.f32.gmra.mrb[20].mxu1 %vm256_vm4, %v137_v38  ;;  %v168_v37 = vld [vmem:[%s6315_s0 + $0x4d0] sm:$0xff] }
  0x40   :  { %3096 = vmatprep.mubr.msk.f32.mxu0 %vm3771_vm0, %v3772_v6  ;;  %3435 = vmatprep.mubr.msk.f32.mxu1 %vm3771_vm0, %v3772_v6  ;;  %v56_v38 = vld [vmem:[%s6315_s0 + $0x150] sm:$0xff] }
  0x43   :  { %3097 = vmatmul.mubr.msk.f32.gmra.mrb[22].mxu0 %vm256_vm4, %v25_v39  ;;  %3436 = vmatmul.mubr.msk.f32.gmra.mrb[22].mxu1 %vm256_vm4, %v138_v40  ;;  %v169_v39 = vld [vmem:[%s6315_s0 + $0x4d8] sm:$0xff] }
  0x44   :  { %3099 = vmatprep.mubr.msk.f32.mxu0 %vm3771_vm0, %v3772_v6  ;;  %3438 = vmatprep.mubr.msk.f32.mxu1 %vm3771_vm0, %v3772_v6  ;;  %v57_v40 = vld [vmem:[%s6315_s0 + $0x158] sm:$0xff] }
  0x47   :  { %3100 = vmatmul.mubr.msk.f32.gmra.mrb[24].mxu0 %vm256_vm4, %v26_v41  ;;  %3439 = vmatmul.mubr.msk.f32.gmra.mrb[24].mxu1 %vm256_vm4, %v139_v42  ;;  %v170_v41 = vld [vmem:[%s6315_s0 + $0x4e0] sm:$0xff] }
  0x48   :  { %3102 = vmatprep.mubr.msk.f32.mxu0 %vm3771_vm0, %v3772_v6  ;;  %3441 = vmatprep.mubr.msk.f32.mxu1 %vm3771_vm0, %v3772_v6  ;;  %v58_v42 = vld [vmem:[%s6315_s0 + $0x160] sm:$0xff] }
  0x4b   :  { %3103 = vmatmul.mubr.msk.f32.gmra.mrb[26].mxu0 %vm256_vm4, %v27_v43  ;;  %3442 = vmatmul.mubr.msk.f32.gmra.mrb[26].mxu1 %vm256_vm4, %v140_v44  ;;  %v171_v43 = vld [vmem:[%s6315_s0 + $0x4e8] sm:$0xff] }
  0x4c   :  { %3105 = vmatprep.mubr.msk.f32.mxu0 %vm3771_vm0, %v3772_v6  ;;  %3444 = vmatprep.mubr.msk.f32.mxu1 %vm3771_vm0, %v3772_v6  ;;  %v59_v44 = vld [vmem:[%s6315_s0 + $0x168] sm:$0xff] }
  0x4f   :  { %3106 = vmatmul.mubr.msk.f32.gmra.mrb[28].mxu0 %vm256_vm4, %v28_v45  ;;  %3445 = vmatmul.mubr.msk.f32.gmra.mrb[28].mxu1 %vm256_vm4, %v141_v46  ;;  %v172_v45 = vld [vmem:[%s6315_s0 + $0x4f0] sm:$0xff] }
  0x50   :  { %3108 = vmatprep.mubr.msk.f32.mxu0 %vm3771_vm0, %v3772_v6  ;;  %3447 = vmatprep.mubr.msk.f32.mxu1 %vm3771_vm0, %v3772_v6  ;;  %v60_v46 = vld [vmem:[%s6315_s0 + $0x170] sm:$0xff] }
  0x53   :  { %3109 = vmatmul.mubr.msk.f32.gmra.mrb[30].mxu0 %vm256_vm4, %v29_v47  ;;  %3448 = vmatmul.mubr.msk.f32.gmra.mrb[30].mxu1 %vm256_vm4, %v142_v48  ;;  %v173_v47 = vld [vmem:[%s6315_s0 + $0x4f8] sm:$0xff] }
  0x54   :  { %3111 = vmatprep.mubr.msk.f32.mxu0 %vm3771_vm0, %v3772_v6  ;;  %3450 = vmatprep.mubr.msk.f32.mxu1 %vm3771_vm0, %v3772_v6  ;;  %v61_v48 = vld [vmem:[%s6315_s0 + $0x178] sm:$0xff] }
  0x57   :  { %3112 = vmatmul.mubr.msk.f32.gmra.mrb[32].mxu0 %vm256_vm4, %v30_v49  ;;  %3451 = vmatmul.mubr.msk.f32.gmra.mrb[32].mxu1 %vm256_vm4, %v143_v50  ;;  %v174_v49 = vld [vmem:[%s6315_s0 + $0x500] sm:$0xff] }
  0x58   :  { %3114 = vmatprep.mubr.msk.f32.mxu0 %vm3771_vm0, %v3772_v6  ;;  %3453 = vmatprep.mubr.msk.f32.mxu1 %vm3771_vm0, %v3772_v6  ;;  %v62_v50 = vld [vmem:[%s6315_s0 + $0x180] sm:$0xff] }
  0x5b   :  { %3115 = vmatmul.mubr.msk.f32.gmra.mrb[34].mxu0 %vm256_vm4, %v31_v51  ;;  %3454 = vmatmul.mubr.msk.f32.gmra.mrb[34].mxu1 %vm256_vm4, %v144_v52  ;;  %v175_v51 = vld [vmem:[%s6315_s0 + $0x508] sm:$0xff] }
  0x5c   :  { %3117 = vmatprep.mubr.msk.f32.mxu0 %vm3771_vm0, %v3772_v6  ;;  %3456 = vmatprep.mubr.msk.f32.mxu1 %vm3771_vm0, %v3772_v6  ;;  %v63_v52 = vld [vmem:[%s6315_s0 + $0x188] sm:$0xff] }
  0x5f   :  { %3118 = vmatmul.mubr.msk.f32.gmra.mrb[36].mxu0 %vm256_vm4, %v32_v53  ;;  %3457 = vmatmul.mubr.msk.f32.gmra.mrb[36].mxu1 %vm256_vm4, %v145_v54  ;;  %v176_v53 = vld [vmem:[%s6315_s0 + $0x510] sm:$0xff] }
  0x60   :  { %3120 = vmatprep.mubr.msk.f32.mxu0 %vm3771_vm0, %v3772_v6  ;;  %3459 = vmatprep.mubr.msk.f32.mxu1 %vm3771_vm0, %v3772_v6  ;;  %v64_v54 = vld [vmem:[%s6315_s0 + $0x190] sm:$0xff] }
  0x63   :  { %3121 = vmatmul.mubr.msk.f32.gmra.mrb[38].mxu0 %vm256_vm4, %v33_v55  ;;  %3460 = vmatmul.mubr.msk.f32.gmra.mrb[38].mxu1 %vm256_vm4, %v146_v56  ;;  %v177_v55 = vld [vmem:[%s6315_s0 + $0x518] sm:$0xff] }
  0x64   :  { %3123 = vmatprep.mubr.msk.f32.mxu0 %vm3771_vm0, %v3772_v6  ;;  %3462 = vmatprep.mubr.msk.f32.mxu1 %vm3771_vm0, %v3772_v6  ;;  %v65_v56 = vld [vmem:[%s6315_s0 + $0x198] sm:$0xff] }
  0x67   :  { %3124 = vmatmul.mubr.msk.f32.gmra.mrb[40].mxu0 %vm256_vm4, %v34_v57  ;;  %3463 = vmatmul.mubr.msk.f32.gmra.mrb[40].mxu1 %vm256_vm4, %v147_v58  ;;  %v178_v57 = vld [vmem:[%s6315_s0 + $0x520] sm:$0xff] }
  0x68   :  { %3126 = vmatprep.mubr.msk.f32.mxu0 %vm3771_vm0, %v3772_v6  ;;  %3465 = vmatprep.mubr.msk.f32.mxu1 %vm3771_vm0, %v3772_v6  ;;  %v66_v58 = vld [vmem:[%s6315_s0 + $0x1a0] sm:$0xff] }
  0x6b   :  { %3127 = vmatmul.mubr.msk.f32.gmra.mrb[42].mxu0 %vm256_vm4, %v35_v59  ;;  %3466 = vmatmul.mubr.msk.f32.gmra.mrb[42].mxu1 %vm256_vm4, %v148_v60  ;;  %v179_v59 = vld [vmem:[%s6315_s0 + $0x528] sm:$0xff]  ;;  %v4463_v60 = vld [vmem:[%s6316_s2] ss:$0 sm:$0xff] }
  0x6c   :  { %3129 = vmatprep.mubr.msk.f32.mxu0 %vm3771_vm0, %v3772_v6  ;;  %3468 = vmatprep.mubr.msk.f32.mxu1 %vm3771_vm0, %v3772_v6 }
  0x6f   :  { %3130 = vmatmul.mubr.msk.f32.gmra.mrb[44].mxu0 %vm256_vm4, %v36_v61  ;;  %3469 = vmatmul.mubr.msk.f32.gmra.mrb[44].mxu1 %vm256_vm4, %v149_v62  ;;  %v67_v61 = vld [vmem:[%s6315_s0 + $0x1a8] sm:$0xff]  ;;  %v180_v62 = vld [vmem:[%s6315_s0 + $0x530] sm:$0xff] }
  0x70   :  { %3132 = vmatprep.mubr.msk.f32.mxu0 %vm3771_vm0, %v3772_v6  ;;  %3471 = vmatprep.mubr.msk.f32.mxu1 %vm3771_vm0, %v3772_v6 }
  0x73   :  { %3133 = vmatmul.mubr.msk.f32.gmra.mrb[46].mxu0 %vm256_vm4, %v37_v63  ;;  %3472 = vmatmul.mubr.msk.f32.gmra.mrb[46].mxu1 %vm256_vm4, %v150_v0 }
  0x74   :  { %3135 = vmatprep.mubr.msk.f32.mxu0 %vm3771_vm0, %v3772_v6  ;;  %3474 = vmatprep.mubr.msk.f32.mxu1 %vm3771_vm0, %v3772_v6 }
  0x77   :  { %3136 = vmatmul.mubr.msk.f32.gmra.mrb[48].mxu0 %vm256_vm4, %v38_v1  ;;  %3475 = vmatmul.mubr.msk.f32.gmra.mrb[48].mxu1 %vm256_vm4, %v151_v2 }
  0x78   :  { %3138 = vmatprep.mubr.msk.f32.mxu0 %vm3771_vm0, %v3772_v6  ;;  %3477 = vmatprep.mubr.msk.f32.mxu1 %vm3771_vm0, %v3772_v6 }
  0x7b   :  { %3139 = vmatmul.mubr.msk.f32.gmra.mrb[50].mxu0 %vm256_vm4, %v39_v3  ;;  %3478 = vmatmul.mubr.msk.f32.gmra.mrb[50].mxu1 %vm256_vm4, %v152_v4 }
  0x7c   :  { %3141 = vmatprep.mubr.msk.f32.mxu0 %vm3771_vm0, %v3772_v6  ;;  %3480 = vmatprep.mubr.msk.f32.mxu1 %vm3771_vm0, %v3772_v6 }
  0x7f   :  { %3142 = vmatmul.mubr.msk.f32.gmra.mrb[52].mxu0 %vm256_vm4, %v40_v5  ;;  %3481 = vmatmul.mubr.msk.f32.gmra.mrb[52].mxu1 %vm256_vm4, %v153_v7  ;;  %v68_v5 = vld [vmem:[%s6315_s0 + $0x1b0] sm:$0xff]  ;;  %v181_v7 = vld [vmem:[%s6315_s0 + $0x538] sm:$0xff] }
  0x80   :  { %3144 = vmatprep.mubr.msk.f32.mxu0 %vm3771_vm0, %v3772_v6  ;;  %3483 = vmatprep.mubr.msk.f32.mxu1 %vm3771_vm0, %v3772_v6 }
  0x83   :  { %3145 = vmatmul.mubr.msk.f32.gmra.mrb[54].mxu0 %vm256_vm4, %v41_v8  ;;  %3484 = vmatmul.mubr.msk.f32.gmra.mrb[54].mxu1 %vm256_vm4, %v154_v9 }
  0x84   :  { %3147 = vmatprep.mubr.msk.f32.mxu0 %vm3771_vm0, %v3772_v6  ;;  %3486 = vmatprep.mubr.msk.f32.mxu1 %vm3771_vm0, %v3772_v6 }
  0x87   :  { %3148 = vmatmul.mubr.msk.f32.gmra.mrb[56].mxu0 %vm256_vm4, %v42_v10  ;;  %3487 = vmatmul.mubr.msk.f32.gmra.mrb[56].mxu1 %vm256_vm4, %v155_v11 }
  0x88   :  { %3150 = vmatprep.mubr.msk.f32.mxu0 %vm3771_vm0, %v3772_v6  ;;  %3489 = vmatprep.mubr.msk.f32.mxu1 %vm3771_vm0, %v3772_v6 }
  0x8b   :  { %3151 = vmatmul.mubr.msk.f32.gmra.mrb[58].mxu0 %vm256_vm4, %v43_v12  ;;  %3490 = vmatmul.mubr.msk.f32.gmra.mrb[58].mxu1 %vm256_vm4, %v156_v13 }
  0x8c   :  { %3153 = vmatprep.mubr.msk.f32.mxu0 %vm3771_vm0, %v3772_v6  ;;  %3492 = vmatprep.mubr.msk.f32.mxu1 %vm3771_vm0, %v3772_v6 }
  0x8f   :  { %3154 = vmatmul.mubr.msk.f32.gmra.mrb[60].mxu0 %vm256_vm4, %v44_v14  ;;  %3493 = vmatmul.mubr.msk.f32.gmra.mrb[60].mxu1 %vm256_vm4, %v157_v15 }
  0x90   :  { %3156 = vmatprep.mubr.msk.f32.mxu0 %vm3771_vm0, %v3772_v6  ;;  %3495 = vmatprep.mubr.msk.f32.mxu1 %vm3771_vm0, %v3772_v6 }
  0x93   :  { %3157 = vmatmul.mubr.msk.f32.gmra.mrb[62].mxu0 %vm256_vm4, %v45_v16  ;;  %3496 = vmatmul.mubr.msk.f32.gmra.mrb[62].mxu1 %vm256_vm4, %v158_v17  ;;  %v69_v16 = vld [vmem:[%s6315_s0 + $0x1b8] sm:$0xff]  ;;  %v182_v17 = vld [vmem:[%s6315_s0 + $0x540] sm:$0xff] }
  0x94   :  { %3159 = vmatprep.mubr.msk.f32.mxu0 %vm3771_vm0, %v3772_v6  ;;  %3498 = vmatprep.mubr.msk.f32.mxu1 %vm3771_vm0, %v3772_v6 }
  0x97   :  { %3160 = vmatmul.mubr.msk.f32.gmra.mrb[64].mxu0 %vm256_vm4, %v46_v18  ;;  %3499 = vmatmul.mubr.msk.f32.gmra.mrb[64].mxu1 %vm256_vm4, %v159_v19 }
  0x98   :  { %3162 = vmatprep.mubr.msk.f32.mxu0 %vm3771_vm0, %v3772_v6  ;;  %3501 = vmatprep.mubr.msk.f32.mxu1 %vm3771_vm0, %v3772_v6 }
  0x9b   :  { %3163 = vmatmul.mubr.msk.f32.gmra.mrb[66].mxu0 %vm256_vm4, %v47_v20  ;;  %3502 = vmatmul.mubr.msk.f32.gmra.mrb[66].mxu1 %vm256_vm4, %v160_v21 }
  0x9c   :  { %3165 = vmatprep.mubr.msk.f32.mxu0 %vm3771_vm0, %v3772_v6  ;;  %3504 = vmatprep.mubr.msk.f32.mxu1 %vm3771_vm0, %v3772_v6 }
  0x9f   :  { %3166 = vmatmul.mubr.msk.f32.gmra.mrb[68].mxu0 %vm256_vm4, %v48_v22  ;;  %3505 = vmatmul.mubr.msk.f32.gmra.mrb[68].mxu1 %vm256_vm4, %v161_v23 }
  0xa0   :  { %3168 = vmatprep.mubr.msk.f32.mxu0 %vm3771_vm0, %v3772_v6  ;;  %3507 = vmatprep.mubr.msk.f32.mxu1 %vm3771_vm0, %v3772_v6 }
  0xa3   :  { %3169 = vmatmul.mubr.msk.f32.gmra.mrb[70].mxu0 %vm256_vm4, %v49_v24  ;;  %3508 = vmatmul.mubr.msk.f32.gmra.mrb[70].mxu1 %vm256_vm4, %v162_v25 }
  0xa4   :  { %3171 = vmatprep.mubr.msk.f32.mxu0 %vm3771_vm0, %v3772_v6  ;;  %3510 = vmatprep.mubr.msk.f32.mxu1 %vm3771_vm0, %v3772_v6 }
  0xa7   :  { %3172 = vmatmul.mubr.msk.f32.gmra.mrb[72].mxu0 %vm256_vm4, %v50_v26  ;;  %3511 = vmatmul.mubr.msk.f32.gmra.mrb[72].mxu1 %vm256_vm4, %v163_v27  ;;  %v70_v26 = vld [vmem:[%s6315_s0 + $0x1c0] sm:$0xff]  ;;  %v183_v27 = vld [vmem:[%s6315_s0 + $0x548] sm:$0xff] }
  0xa8   :  { %3174 = vmatprep.mubr.msk.f32.mxu0 %vm3771_vm0, %v3772_v6  ;;  %3513 = vmatprep.mubr.msk.f32.mxu1 %vm3771_vm0, %v3772_v6 }
  0xab   :  { %3175 = vmatmul.mubr.msk.f32.gmra.mrb[74].mxu0 %vm256_vm4, %v51_v28  ;;  %3514 = vmatmul.mubr.msk.f32.gmra.mrb[74].mxu1 %vm256_vm4, %v164_v29 }
  0xac   :  { %3177 = vmatprep.mubr.msk.f32.mxu0 %vm3771_vm0, %v3772_v6  ;;  %3516 = vmatprep.mubr.msk.f32.mxu1 %vm3771_vm0, %v3772_v6 }
  0xaf   :  { %3178 = vmatmul.mubr.msk.f32.gmra.mrb[76].mxu0 %vm256_vm4, %v52_v30  ;;  %3517 = vmatmul.mubr.msk.f32.gmra.mrb[76].mxu1 %vm256_vm4, %v165_v31 }
  0xb0   :  { %3180 = vmatprep.mubr.msk.f32.mxu0 %vm3771_vm0, %v3772_v6  ;;  %3519 = vmatprep.mubr.msk.f32.mxu1 %vm3771_vm0, %v3772_v6 }
  0xb3   :  { %3181 = vmatmul.mubr.msk.f32.gmra.mrb[78].mxu0 %vm256_vm4, %v53_v32  ;;  %3520 = vmatmul.mubr.msk.f32.gmra.mrb[78].mxu1 %vm256_vm4, %v166_v33 }
  0xb4   :  { %3183 = vmatprep.mubr.msk.f32.mxu0 %vm3771_vm0, %v3772_v6  ;;  %3522 = vmatprep.mubr.msk.f32.mxu1 %vm3771_vm0, %v3772_v6 }
  0xb7   :  { %3184 = vmatmul.mubr.msk.f32.gmra.mrb[80].mxu0 %vm256_vm4, %v54_v34  ;;  %3523 = vmatmul.mubr.msk.f32.gmra.mrb[80].mxu1 %vm256_vm4, %v167_v35 }
  0xb8   :  { %3186 = vmatprep.mubr.msk.f32.mxu0 %vm3771_vm0, %v3772_v6  ;;  %3525 = vmatprep.mubr.msk.f32.mxu1 %vm3771_vm0, %v3772_v6 }
  0xbb   :  { %3187 = vmatmul.mubr.msk.f32.gmra.mrb[82].mxu0 %vm256_vm4, %v55_v36  ;;  %3526 = vmatmul.mubr.msk.f32.gmra.mrb[82].mxu1 %vm256_vm4, %v168_v37  ;;  %v71_v36 = vld [vmem:[%s6315_s0 + $0x1c8] sm:$0xff]  ;;  %v184_v37 = vld [vmem:[%s6315_s0 + $0x550] sm:$0xff] }
  0xbc   :  { %3189 = vmatprep.mubr.msk.f32.mxu0 %vm3771_vm0, %v3772_v6  ;;  %3528 = vmatprep.mubr.msk.f32.mxu1 %vm3771_vm0, %v3772_v6 }
  0xbf   :  { %3190 = vmatmul.mubr.msk.f32.gmra.mrb[84].mxu0 %vm256_vm4, %v56_v38  ;;  %3529 = vmatmul.mubr.msk.f32.gmra.mrb[84].mxu1 %vm256_vm4, %v169_v39 }
  0xc0   :  { %3192 = vmatprep.mubr.msk.f32.mxu0 %vm3771_vm0, %v3772_v6  ;;  %3531 = vmatprep.mubr.msk.f32.mxu1 %vm3771_vm0, %v3772_v6 }
  0xc3   :  { %3193 = vmatmul.mubr.msk.f32.gmra.mrb[86].mxu0 %vm256_vm4, %v57_v40  ;;  %3532 = vmatmul.mubr.msk.f32.gmra.mrb[86].mxu1 %vm256_vm4, %v170_v41 }
  0xc4   :  { %3195 = vmatprep.mubr.msk.f32.mxu0 %vm3771_vm0, %v3772_v6  ;;  %3534 = vmatprep.mubr.msk.f32.mxu1 %vm3771_vm0, %v3772_v6 }
  0xc7   :  { %3196 = vmatmul.mubr.msk.f32.gmra.mrb[88].mxu0 %vm256_vm4, %v58_v42  ;;  %3535 = vmatmul.mubr.msk.f32.gmra.mrb[88].mxu1 %vm256_vm4, %v171_v43 }
  0xc8   :  { %3198 = vmatprep.mubr.msk.f32.mxu0 %vm3771_vm0, %v3772_v6  ;;  %3537 = vmatprep.mubr.msk.f32.mxu1 %vm3771_vm0, %v3772_v6 }
  0xcb   :  { %3199 = vmatmul.mubr.msk.f32.gmra.mrb[90].mxu0 %vm256_vm4, %v59_v44  ;;  %3538 = vmatmul.mubr.msk.f32.gmra.mrb[90].mxu1 %vm256_vm4, %v172_v45 }
  0xcc   :  { %3201 = vmatprep.mubr.msk.f32.mxu0 %vm3771_vm0, %v3772_v6  ;;  %3540 = vmatprep.mubr.msk.f32.mxu1 %vm3771_vm0, %v3772_v6 }
  0xcf   :  { %3202 = vmatmul.mubr.msk.f32.gmra.mrb[92].mxu0 %vm256_vm4, %v60_v46  ;;  %3541 = vmatmul.mubr.msk.f32.gmra.mrb[92].mxu1 %vm256_vm4, %v173_v47  ;;  %v72_v46 = vld [vmem:[%s6315_s0 + $0x1d0] sm:$0xff]  ;;  %v185_v47 = vld [vmem:[%s6315_s0 + $0x558] sm:$0xff] }
  0xd0   :  { %3204 = vmatprep.mubr.msk.f32.mxu0 %vm3771_vm0, %v3772_v6  ;;  %3543 = vmatprep.mubr.msk.f32.mxu1 %vm3771_vm0, %v3772_v6 }
  0xd3   :  { %3205 = vmatmul.mubr.msk.f32.gmra.mrb[94].mxu0 %vm256_vm4, %v61_v48  ;;  %3544 = vmatmul.mubr.msk.f32.gmra.mrb[94].mxu1 %vm256_vm4, %v174_v49 }
  0xd4   :  { %3207 = vmatprep.mubr.msk.f32.mxu0 %vm3771_vm0, %v3772_v6  ;;  %3546 = vmatprep.mubr.msk.f32.mxu1 %vm3771_vm0, %v3772_v6 }
  0xd7   :  { %3208 = vmatmul.mubr.msk.f32.gmra.mrb[96].mxu0 %vm256_vm4, %v62_v50  ;;  %3547 = vmatmul.mubr.msk.f32.gmra.mrb[96].mxu1 %vm256_vm4, %v175_v51 }
  0xd8   :  { %3210 = vmatprep.mubr.msk.f32.mxu0 %vm3771_vm0, %v3772_v6  ;;  %3549 = vmatprep.mubr.msk.f32.mxu1 %vm3771_vm0, %v3772_v6 }
  0xdb   :  { %3211 = vmatmul.mubr.msk.f32.gmra.mrb[98].mxu0 %vm256_vm4, %v63_v52  ;;  %3550 = vmatmul.mubr.msk.f32.gmra.mrb[98].mxu1 %vm256_vm4, %v176_v53 }
  0xdc   :  { %3213 = vmatprep.mubr.msk.f32.mxu0 %vm3771_vm0, %v3772_v6  ;;  %3552 = vmatprep.mubr.msk.f32.mxu1 %vm3771_vm0, %v3772_v6 }
  0xdf   :  { %3214 = vmatmul.mubr.msk.f32.gmra.mrb[100].mxu0 %vm256_vm4, %v64_v54  ;;  %3553 = vmatmul.mubr.msk.f32.gmra.mrb[100].mxu1 %vm256_vm4, %v177_v55 }
  0xe0   :  { %3216 = vmatprep.mubr.msk.f32.mxu0 %vm3771_vm0, %v3772_v6  ;;  %3555 = vmatprep.mubr.msk.f32.mxu1 %vm3771_vm0, %v3772_v6 }
  0xe3   :  { %3217 = vmatmul.mubr.msk.f32.gmra.mrb[102].mxu0 %vm256_vm4, %v65_v56  ;;  %3556 = vmatmul.mubr.msk.f32.gmra.mrb[102].mxu1 %vm256_vm4, %v178_v57  ;;  %v73_v56 = vld [vmem:[%s6315_s0 + $0x1d8] sm:$0xff]  ;;  %v186_v57 = vld [vmem:[%s6315_s0 + $0x560] sm:$0xff] }
  0xe4   :  { %3219 = vmatprep.mubr.msk.f32.mxu0 %vm3771_vm0, %v3772_v6  ;;  %3558 = vmatprep.mubr.msk.f32.mxu1 %vm3771_vm0, %v3772_v6 }
  0xe7   :  { %3220 = vmatmul.mubr.msk.f32.gmra.mrb[104].mxu0 %vm256_vm4, %v66_v58  ;;  %3559 = vmatmul.mubr.msk.f32.gmra.mrb[104].mxu1 %vm256_vm4, %v179_v59 }
  0xe8   :  { %3222 = vmatprep.mubr.msk.f32.mxu0 %vm3771_vm0, %v3772_v6  ;;  %3561 = vmatprep.mubr.msk.f32.mxu1 %vm3771_vm0, %v3772_v6 }
  0xea   :  { %v1002_v63 = vpop.f32.mrb[0].mxu0  ;;  %v1567_v0 = vpop.f32.mrb[0].mxu1 }
  0xeb   :  { %v1003_v1 = vadd.f32 %v4463_v60, %v1002_v63  ;;  %v3065_v2 = vpop.f32.mrb[1].mxu0  ;;  %3223 = vmatmul.mubr.msk.f32.gmra.mrb[106].mxu0 %vm256_vm4, %v67_v61  ;;  %v1568_v3 = vadd.f32 %v4463_v60, %v1567_v0  ;;  %v3404_v4 = vpop.f32.mrb[1].mxu1  ;;  %3562 = vmatmul.mubr.msk.f32.gmra.mrb[106].mxu1 %vm256_vm4, %v180_v62 }
  0xec   :  { %3225 = vmatprep.mubr.msk.f32.mxu0 %vm3771_vm0, %v3772_v6  ;;  %3564 = vmatprep.mubr.msk.f32.mxu1 %vm3771_vm0, %v3772_v6  ;;  %v187_v4 = vld [vmem:[%s6315_s0 + $0x568] sm:$0xff] }
  0xed   :  { %v2126_v8 = vmax.f32 %v1003_v1, 0.0  ;;  %v2239_v9 = vmax.f32 %v1568_v3, 0.0  ;;  %v74_v3 = vld [vmem:[%s6315_s0 + $0x1e0] sm:$0xff] }
  0xee   :  { %v1007_v10 = vpop.f32.mrb[2].mxu0  ;;  %v1572_v11 = vpop.f32.mrb[2].mxu1 }
  0xef   :  { %2352 = vst.msk [vmem:[%s6317_s3] sm:$0xff] %vm2351_vm5, %v2126_v8  ;;  %2465 = vst.msk [vmem:[%s6317_s3 + $0x388] sm:$0xff] %vm2351_vm5, %v2239_v9  ;;  %v1008_v12 = vadd.f32 %v4463_v60, %v1007_v10  ;;  %v3068_v13 = vpop.f32.mrb[3].mxu0  ;;  %3226 = vmatmul.mubr.msk.f32.gmra.mrb[108].mxu0 %vm256_vm4, %v68_v5  ;;  %v1573_v14 = vadd.f32 %v4463_v60, %v1572_v11  ;;  %v3407_v15 = vpop.f32.mrb[3].mxu1  ;;  %3565 = vmatmul.mubr.msk.f32.gmra.mrb[108].mxu1 %vm256_vm4, %v181_v7 }
  0xf0   :  { %3228 = vmatprep.mubr.msk.f32.mxu0 %vm3771_vm0, %v3772_v6  ;;  %3567 = vmatprep.mubr.msk.f32.mxu1 %vm3771_vm0, %v3772_v6  ;;  %v188_v15 = vld [vmem:[%s6315_s0 + $0x570] sm:$0xff] }
  0xf1   :  { %v2127_v18 = vmax.f32 %v1008_v12, 0.0  ;;  %v2240_v19 = vmax.f32 %v1573_v14, 0.0  ;;  %v75_v14 = vld [vmem:[%s6315_s0 + $0x1e8] sm:$0xff] }
  0xf2   :  { %v1012_v20 = vpop.f32.mrb[4].mxu0  ;;  %v1577_v21 = vpop.f32.mrb[4].mxu1 }
  0xf3   :  { %2353 = vst.msk [vmem:[%s6317_s3 + $0x8] sm:$0xff] %vm2351_vm5, %v2127_v18  ;;  %2466 = vst.msk [vmem:[%s6317_s3 + $0x390] sm:$0xff] %vm2351_vm5, %v2240_v19  ;;  %v1013_v22 = vadd.f32 %v4463_v60, %v1012_v20  ;;  %v3071_v23 = vpop.f32.mrb[5].mxu0  ;;  %3229 = vmatmul.mubr.msk.f32.gmra.mrb[110].mxu0 %vm256_vm4, %v69_v16  ;;  %v1578_v24 = vadd.f32 %v4463_v60, %v1577_v21  ;;  %v3410_v25 = vpop.f32.mrb[5].mxu1  ;;  %3568 = vmatmul.mubr.msk.f32.gmra.mrb[110].mxu1 %vm256_vm4, %v182_v17 }
  0xf4   :  { %3231 = vmatprep.mubr.msk.f32.mxu0 %vm3771_vm0, %v3772_v6  ;;  %3570 = vmatprep.mubr.msk.f32.mxu1 %vm3771_vm0, %v3772_v6  ;;  %v189_v25 = vld [vmem:[%s6315_s0 + $0x578] sm:$0xff] }
  0xf5   :  { %v2128_v28 = vmax.f32 %v1013_v22, 0.0  ;;  %v2241_v29 = vmax.f32 %v1578_v24, 0.0  ;;  %v76_v24 = vld [vmem:[%s6315_s0 + $0x1f0] sm:$0xff] }
  0xf6   :  { %v1017_v30 = vpop.f32.mrb[6].mxu0  ;;  %v1582_v31 = vpop.f32.mrb[6].mxu1 }
  0xf7   :  { %2354 = vst.msk [vmem:[%s6317_s3 + $0x10] sm:$0xff] %vm2351_vm5, %v2128_v28  ;;  %2467 = vst.msk [vmem:[%s6317_s3 + $0x398] sm:$0xff] %vm2351_vm5, %v2241_v29  ;;  %v1018_v32 = vadd.f32 %v4463_v60, %v1017_v30  ;;  %v3074_v33 = vpop.f32.mrb[7].mxu0  ;;  %3232 = vmatmul.mubr.msk.f32.gmra.mrb[112].mxu0 %vm256_vm4, %v70_v26  ;;  %v1583_v34 = vadd.f32 %v4463_v60, %v1582_v31  ;;  %v3413_v35 = vpop.f32.mrb[7].mxu1  ;;  %3571 = vmatmul.mubr.msk.f32.gmra.mrb[112].mxu1 %vm256_vm4, %v183_v27 }
  0xf8   :  { %3234 = vmatprep.mubr.msk.f32.mxu0 %vm3771_vm0, %v3772_v6  ;;  %3573 = vmatprep.mubr.msk.f32.mxu1 %vm3771_vm0, %v3772_v6  ;;  %v190_v35 = vld [vmem:[%s6315_s0 + $0x580] sm:$0xff] }
  0xf9   :  { %v2129_v38 = vmax.f32 %v1018_v32, 0.0  ;;  %v2242_v39 = vmax.f32 %v1583_v34, 0.0  ;;  %v77_v34 = vld [vmem:[%s6315_s0 + $0x1f8] sm:$0xff] }
  0xfa   :  { %v1022_v40 = vpop.f32.mrb[8].mxu0  ;;  %v1587_v41 = vpop.f32.mrb[8].mxu1 }
  0xfb   :  { %2355 = vst.msk [vmem:[%s6317_s3 + $0x18] sm:$0xff] %vm2351_vm5, %v2129_v38  ;;  %2468 = vst.msk [vmem:[%s6317_s3 + $0x3a0] sm:$0xff] %vm2351_vm5, %v2242_v39  ;;  %v1023_v42 = vadd.f32 %v4463_v60, %v1022_v40  ;;  %v3077_v43 = vpop.f32.mrb[9].mxu0  ;;  %3235 = vmatmul.mubr.msk.f32.gmra.mrb[114].mxu0 %vm256_vm4, %v71_v36  ;;  %v1588_v44 = vadd.f32 %v4463_v60, %v1587_v41  ;;  %v3416_v45 = vpop.f32.mrb[9].mxu1  ;;  %3574 = vmatmul.mubr.msk.f32.gmra.mrb[114].mxu1 %vm256_vm4, %v184_v37 }
  0xfc   :  { %3237 = vmatprep.mubr.msk.f32.mxu0 %vm3771_vm0, %v3772_v6  ;;  %3576 = vmatprep.mubr.msk.f32.mxu1 %vm3771_vm0, %v3772_v6  ;;  %v191_v45 = vld [vmem:[%s6315_s0 + $0x588] sm:$0xff] }
  0xfd   :  { %v2130_v48 = vmax.f32 %v1023_v42, 0.0  ;;  %v2243_v49 = vmax.f32 %v1588_v44, 0.0  ;;  %v78_v44 = vld [vmem:[%s6315_s0 + $0x200] sm:$0xff] }
  0xfe   :  { %v1027_v50 = vpop.f32.mrb[10].mxu0  ;;  %v1592_v51 = vpop.f32.mrb[10].mxu1 }
  0xff   :  { %2356 = vst.msk [vmem:[%s6317_s3 + $0x20] sm:$0xff] %vm2351_vm5, %v2130_v48  ;;  %2469 = vst.msk [vmem:[%s6317_s3 + $0x3a8] sm:$0xff] %vm2351_vm5, %v2243_v49  ;;  %v1028_v52 = vadd.f32 %v4463_v60, %v1027_v50  ;;  %v3080_v53 = vpop.f32.mrb[11].mxu0  ;;  %3238 = vmatmul.mubr.msk.f32.gmra.mrb[116].mxu0 %vm256_vm4, %v72_v46  ;;  %v1593_v54 = vadd.f32 %v4463_v60, %v1592_v51  ;;  %v3419_v55 = vpop.f32.mrb[11].mxu1  ;;  %3577 = vmatmul.mubr.msk.f32.gmra.mrb[116].mxu1 %vm256_vm4, %v185_v47 }
 0x100   :  { %3240 = vmatprep.mubr.msk.f32.mxu0 %vm3771_vm0, %v3772_v6  ;;  %3579 = vmatprep.mubr.msk.f32.mxu1 %vm3771_vm0, %v3772_v6  ;;  %v192_v55 = vld [vmem:[%s6315_s0 + $0x590] sm:$0xff] }
 0x101   :  { %v2131_v58 = vmax.f32 %v1028_v52, 0.0  ;;  %v2244_v59 = vmax.f32 %v1593_v54, 0.0  ;;  %v79_v54 = vld [vmem:[%s6315_s0 + $0x208] sm:$0xff] }
 0x102   :  { %v1032_v61 = vpop.f32.mrb[12].mxu0  ;;  %v1597_v62 = vpop.f32.mrb[12].mxu1 }
 0x103   :  { %2357 = vst.msk [vmem:[%s6317_s3 + $0x28] sm:$0xff] %vm2351_vm5, %v2131_v58  ;;  %2470 = vst.msk [vmem:[%s6317_s3 + $0x3b0] sm:$0xff] %vm2351_vm5, %v2244_v59  ;;  %v1033_v63 = vadd.f32 %v4463_v60, %v1032_v61  ;;  %v3083_v0 = vpop.f32.mrb[13].mxu0  ;;  %3241 = vmatmul.mubr.msk.f32.gmra.mrb[118].mxu0 %vm256_vm4, %v73_v56  ;;  %v1598_v1 = vadd.f32 %v4463_v60, %v1597_v62  ;;  %v3422_v2 = vpop.f32.mrb[13].mxu1  ;;  %3580 = vmatmul.mubr.msk.f32.gmra.mrb[118].mxu1 %vm256_vm4, %v186_v57 }
 0x104   :  { %3243 = vmatprep.mubr.msk.f32.mxu0 %vm3771_vm0, %v3772_v6  ;;  %3582 = vmatprep.mubr.msk.f32.mxu1 %vm3771_vm0, %v3772_v6  ;;  %v193_v2 = vld [vmem:[%s6315_s0 + $0x598] sm:$0xff] }
 0x105   :  { %v2132_v5 = vmax.f32 %v1033_v63, 0.0  ;;  %v2245_v7 = vmax.f32 %v1598_v1, 0.0  ;;  %v80_v1 = vld [vmem:[%s6315_s0 + $0x210] sm:$0xff] }
 0x106   :  { %v1037_v8 = vpop.f32.mrb[14].mxu0  ;;  %v1602_v9 = vpop.f32.mrb[14].mxu1 }
 0x107   :  { %2358 = vst.msk [vmem:[%s6317_s3 + $0x30] sm:$0xff] %vm2351_vm5, %v2132_v5  ;;  %2471 = vst.msk [vmem:[%s6317_s3 + $0x3b8] sm:$0xff] %vm2351_vm5, %v2245_v7  ;;  %v1038_v10 = vadd.f32 %v4463_v60, %v1037_v8  ;;  %v3086_v11 = vpop.f32.mrb[15].mxu0  ;;  %3244 = vmatmul.mubr.msk.f32.gmra.mrb[120].mxu0 %vm256_vm4, %v74_v3  ;;  %v1603_v12 = vadd.f32 %v4463_v60, %v1602_v9  ;;  %v3425_v13 = vpop.f32.mrb[15].mxu1  ;;  %3583 = vmatmul.mubr.msk.f32.gmra.mrb[120].mxu1 %vm256_vm4, %v187_v4 }
 0x108   :  { %3246 = vmatprep.mubr.msk.f32.mxu0 %vm3771_vm0, %v3772_v6  ;;  %3585 = vmatprep.mubr.msk.f32.mxu1 %vm3771_vm0, %v3772_v6  ;;  %v194_v13 = vld [vmem:[%s6315_s0 + $0x5a0] sm:$0xff] }
 0x109   :  { %v2133_v16 = vmax.f32 %v1038_v10, 0.0  ;;  %v2246_v17 = vmax.f32 %v1603_v12, 0.0  ;;  %v81_v12 = vld [vmem:[%s6315_s0 + $0x218] sm:$0xff] }
 0x10a   :  { %v1042_v18 = vpop.f32.mrb[16].mxu0  ;;  %v1607_v19 = vpop.f32.mrb[16].mxu1 }
 0x10b   :  { %2359 = vst.msk [vmem:[%s6317_s3 + $0x38] sm:$0xff] %vm2351_vm5, %v2133_v16  ;;  %2472 = vst.msk [vmem:[%s6317_s3 + $0x3c0] sm:$0xff] %vm2351_vm5, %v2246_v17  ;;  %v1043_v20 = vadd.f32 %v4463_v60, %v1042_v18  ;;  %v3089_v21 = vpop.f32.mrb[17].mxu0  ;;  %3247 = vmatmul.mubr.msk.f32.gmra.mrb[122].mxu0 %vm256_vm4, %v75_v14  ;;  %v1608_v22 = vadd.f32 %v4463_v60, %v1607_v19  ;;  %v3428_v23 = vpop.f32.mrb[17].mxu1  ;;  %3586 = vmatmul.mubr.msk.f32.gmra.mrb[122].mxu1 %vm256_vm4, %v188_v15 }
 0x10c   :  { %3249 = vmatprep.mubr.msk.f32.mxu0 %vm3771_vm0, %v3772_v6  ;;  %3588 = vmatprep.mubr.msk.f32.mxu1 %vm3771_vm0, %v3772_v6  ;;  %v195_v23 = vld [vmem:[%s6315_s0 + $0x5a8] sm:$0xff] }
 0x10d   :  { %v2134_v26 = vmax.f32 %v1043_v20, 0.0  ;;  %v2247_v27 = vmax.f32 %v1608_v22, 0.0  ;;  %v82_v22 = vld [vmem:[%s6315_s0 + $0x220] sm:$0xff] }
 0x10e   :  { %v1047_v28 = vpop.f32.mrb[18].mxu0  ;;  %v1612_v29 = vpop.f32.mrb[18].mxu1 }
 0x10f   :  { %2360 = vst.msk [vmem:[%s6317_s3 + $0x40] sm:$0xff] %vm2351_vm5, %v2134_v26  ;;  %2473 = vst.msk [vmem:[%s6317_s3 + $0x3c8] sm:$0xff] %vm2351_vm5, %v2247_v27  ;;  %v1048_v30 = vadd.f32 %v4463_v60, %v1047_v28  ;;  %v3092_v31 = vpop.f32.mrb[19].mxu0  ;;  %3250 = vmatmul.mubr.msk.f32.gmra.mrb[124].mxu0 %vm256_vm4, %v76_v24  ;;  %v1613_v32 = vadd.f32 %v4463_v60, %v1612_v29  ;;  %v3431_v33 = vpop.f32.mrb[19].mxu1  ;;  %3589 = vmatmul.mubr.msk.f32.gmra.mrb[124].mxu1 %vm256_vm4, %v189_v25 }
 0x110   :  { %3252 = vmatprep.mubr.msk.f32.mxu0 %vm3771_vm0, %v3772_v6  ;;  %3591 = vmatprep.mubr.msk.f32.mxu1 %vm3771_vm0, %v3772_v6  ;;  %v196_v33 = vld [vmem:[%s6315_s0 + $0x5b0] sm:$0xff] }
 0x111   :  { %v2135_v36 = vmax.f32 %v1048_v30, 0.0  ;;  %v2248_v37 = vmax.f32 %v1613_v32, 0.0  ;;  %v83_v32 = vld [vmem:[%s6315_s0 + $0x228] sm:$0xff] }
 0x112   :  { %v1052_v38 = vpop.f32.mrb[20].mxu0  ;;  %v1617_v39 = vpop.f32.mrb[20].mxu1 }
 0x113   :  { %2361 = vst.msk [vmem:[%s6317_s3 + $0x48] sm:$0xff] %vm2351_vm5, %v2135_v36  ;;  %2474 = vst.msk [vmem:[%s6317_s3 + $0x3d0] sm:$0xff] %vm2351_vm5, %v2248_v37  ;;  %v1053_v40 = vadd.f32 %v4463_v60, %v1052_v38  ;;  %v3095_v41 = vpop.f32.mrb[21].mxu0  ;;  %3253 = vmatmul.mubr.msk.f32.gmra.mrb[126].mxu0 %vm256_vm4, %v77_v34  ;;  %v1618_v42 = vadd.f32 %v4463_v60, %v1617_v39  ;;  %v3434_v43 = vpop.f32.mrb[21].mxu1  ;;  %3592 = vmatmul.mubr.msk.f32.gmra.mrb[126].mxu1 %vm256_vm4, %v190_v35 }
 0x114   :  { %3255 = vmatprep.mubr.msk.f32.mxu0 %vm3771_vm0, %v3772_v6  ;;  %3594 = vmatprep.mubr.msk.f32.mxu1 %vm3771_vm0, %v3772_v6  ;;  %v197_v43 = vld [vmem:[%s6315_s0 + $0x5b8] sm:$0xff] }
 0x115   :  { %v2136_v46 = vmax.f32 %v1053_v40, 0.0  ;;  %v2249_v47 = vmax.f32 %v1618_v42, 0.0  ;;  %v84_v42 = vld [vmem:[%s6315_s0 + $0x230] sm:$0xff] }
 0x116   :  { %v1057_v48 = vpop.f32.mrb[22].mxu0  ;;  %v1622_v49 = vpop.f32.mrb[22].mxu1 }
 0x117   :  { %2362 = vst.msk [vmem:[%s6317_s3 + $0x50] sm:$0xff] %vm2351_vm5, %v2136_v46  ;;  %2475 = vst.msk [vmem:[%s6317_s3 + $0x3d8] sm:$0xff] %vm2351_vm5, %v2249_v47  ;;  %v1058_v50 = vadd.f32 %v4463_v60, %v1057_v48  ;;  %v3098_v51 = vpop.f32.mrb[23].mxu0  ;;  %3256 = vmatmul.mubr.msk.f32.gmra.mrb[128].mxu0 %vm256_vm4, %v78_v44  ;;  %v1623_v52 = vadd.f32 %v4463_v60, %v1622_v49  ;;  %v3437_v53 = vpop.f32.mrb[23].mxu1  ;;  %3595 = vmatmul.mubr.msk.f32.gmra.mrb[128].mxu1 %vm256_vm4, %v191_v45 }
 0x118   :  { %3258 = vmatprep.mubr.msk.f32.mxu0 %vm3771_vm0, %v3772_v6  ;;  %3597 = vmatprep.mubr.msk.f32.mxu1 %vm3771_vm0, %v3772_v6  ;;  %v198_v53 = vld [vmem:[%s6315_s0 + $0x5c0] sm:$0xff] }
 0x119   :  { %v2137_v56 = vmax.f32 %v1058_v50, 0.0  ;;  %v2250_v57 = vmax.f32 %v1623_v52, 0.0  ;;  %v85_v52 = vld [vmem:[%s6315_s0 + $0x238] sm:$0xff] }
 0x11a   :  { %v1062_v58 = vpop.f32.mrb[24].mxu0  ;;  %v1627_v59 = vpop.f32.mrb[24].mxu1 }
 0x11b   :  { %2363 = vst.msk [vmem:[%s6317_s3 + $0x58] sm:$0xff] %vm2351_vm5, %v2137_v56  ;;  %2476 = vst.msk [vmem:[%s6317_s3 + $0x3e0] sm:$0xff] %vm2351_vm5, %v2250_v57  ;;  %v1063_v61 = vadd.f32 %v4463_v60, %v1062_v58  ;;  %v3101_v62 = vpop.f32.mrb[25].mxu0  ;;  %3259 = vmatmul.mubr.msk.f32.gmra.mrb[130].mxu0 %vm256_vm4, %v79_v54  ;;  %v1628_v63 = vadd.f32 %v4463_v60, %v1627_v59  ;;  %v3440_v0 = vpop.f32.mrb[25].mxu1  ;;  %3598 = vmatmul.mubr.msk.f32.gmra.mrb[130].mxu1 %vm256_vm4, %v192_v55 }
 0x11c   :  { %3261 = vmatprep.mubr.msk.f32.mxu0 %vm3771_vm0, %v3772_v6  ;;  %3600 = vmatprep.mubr.msk.f32.mxu1 %vm3771_vm0, %v3772_v6  ;;  %v199_v0 = vld [vmem:[%s6315_s0 + $0x5c8] sm:$0xff] }
 0x11d   :  { %v2138_v3 = vmax.f32 %v1063_v61, 0.0  ;;  %v2251_v4 = vmax.f32 %v1628_v63, 0.0  ;;  %v86_v63 = vld [vmem:[%s6315_s0 + $0x240] sm:$0xff] }
 0x11e   :  { %v1067_v5 = vpop.f32.mrb[26].mxu0  ;;  %v1632_v7 = vpop.f32.mrb[26].mxu1 }
 0x11f   :  { %2364 = vst.msk [vmem:[%s6317_s3 + $0x60] sm:$0xff] %vm2351_vm5, %v2138_v3  ;;  %2477 = vst.msk [vmem:[%s6317_s3 + $0x3e8] sm:$0xff] %vm2351_vm5, %v2251_v4  ;;  %v1068_v8 = vadd.f32 %v4463_v60, %v1067_v5  ;;  %v3104_v9 = vpop.f32.mrb[27].mxu0  ;;  %3262 = vmatmul.mubr.msk.f32.gmra.mrb[132].mxu0 %vm256_vm4, %v80_v1  ;;  %v1633_v10 = vadd.f32 %v4463_v60, %v1632_v7  ;;  %v3443_v11 = vpop.f32.mrb[27].mxu1  ;;  %3601 = vmatmul.mubr.msk.f32.gmra.mrb[132].mxu1 %vm256_vm4, %v193_v2 }
 0x120   :  { %3264 = vmatprep.mubr.msk.f32.mxu0 %vm3771_vm0, %v3772_v6  ;;  %3603 = vmatprep.mubr.msk.f32.mxu1 %vm3771_vm0, %v3772_v6  ;;  %v200_v11 = vld [vmem:[%s6315_s0 + $0x5d0] sm:$0xff] }
 0x121   :  { %v2139_v14 = vmax.f32 %v1068_v8, 0.0  ;;  %v2252_v15 = vmax.f32 %v1633_v10, 0.0  ;;  %v87_v10 = vld [vmem:[%s6315_s0 + $0x248] sm:$0xff] }
 0x122   :  { %v1072_v16 = vpop.f32.mrb[28].mxu0  ;;  %v1637_v17 = vpop.f32.mrb[28].mxu1 }
 0x123   :  { %2365 = vst.msk [vmem:[%s6317_s3 + $0x68] sm:$0xff] %vm2351_vm5, %v2139_v14  ;;  %2478 = vst.msk [vmem:[%s6317_s3 + $0x3f0] sm:$0xff] %vm2351_vm5, %v2252_v15  ;;  %v1073_v18 = vadd.f32 %v4463_v60, %v1072_v16  ;;  %v3107_v19 = vpop.f32.mrb[29].mxu0  ;;  %3265 = vmatmul.mubr.msk.f32.gmra.mrb[134].mxu0 %vm256_vm4, %v81_v12  ;;  %v1638_v20 = vadd.f32 %v4463_v60, %v1637_v17  ;;  %v3446_v21 = vpop.f32.mrb[29].mxu1  ;;  %3604 = vmatmul.mubr.msk.f32.gmra.mrb[134].mxu1 %vm256_vm4, %v194_v13 }
 0x124   :  { %3267 = vmatprep.mubr.msk.f32.mxu0 %vm3771_vm0, %v3772_v6  ;;  %3606 = vmatprep.mubr.msk.f32.mxu1 %vm3771_vm0, %v3772_v6  ;;  %v201_v21 = vld [vmem:[%s6315_s0 + $0x5d8] sm:$0xff] }
 0x125   :  { %v2140_v24 = vmax.f32 %v1073_v18, 0.0  ;;  %v2253_v25 = vmax.f32 %v1638_v20, 0.0  ;;  %v88_v20 = vld [vmem:[%s6315_s0 + $0x250] sm:$0xff] }
 0x126   :  { %v1077_v26 = vpop.f32.mrb[30].mxu0  ;;  %v1642_v27 = vpop.f32.mrb[30].mxu1 }
 0x127   :  { %2366 = vst.msk [vmem:[%s6317_s3 + $0x70] sm:$0xff] %vm2351_vm5, %v2140_v24  ;;  %2479 = vst.msk [vmem:[%s6317_s3 + $0x3f8] sm:$0xff] %vm2351_vm5, %v2253_v25  ;;  %v1078_v28 = vadd.f32 %v4463_v60, %v1077_v26  ;;  %v3110_v29 = vpop.f32.mrb[31].mxu0  ;;  %3268 = vmatmul.mubr.msk.f32.gmra.mrb[136].mxu0 %vm256_vm4, %v82_v22  ;;  %v1643_v30 = vadd.f32 %v4463_v60, %v1642_v27  ;;  %v3449_v31 = vpop.f32.mrb[31].mxu1  ;;  %3607 = vmatmul.mubr.msk.f32.gmra.mrb[136].mxu1 %vm256_vm4, %v195_v23 }
 0x128   :  { %3270 = vmatprep.mubr.msk.f32.mxu0 %vm3771_vm0, %v3772_v6  ;;  %3609 = vmatprep.mubr.msk.f32.mxu1 %vm3771_vm0, %v3772_v6  ;;  %v202_v31 = vld [vmem:[%s6315_s0 + $0x5e0] sm:$0xff] }
 0x129   :  { %v2141_v34 = vmax.f32 %v1078_v28, 0.0  ;;  %v2254_v35 = vmax.f32 %v1643_v30, 0.0  ;;  %v89_v30 = vld [vmem:[%s6315_s0 + $0x258] sm:$0xff] }
 0x12a   :  { %v1082_v36 = vpop.f32.mrb[32].mxu0  ;;  %v1647_v37 = vpop.f32.mrb[32].mxu1 }
 0x12b   :  { %2367 = vst.msk [vmem:[%s6317_s3 + $0x78] sm:$0xff] %vm2351_vm5, %v2141_v34  ;;  %2480 = vst.msk [vmem:[%s6317_s3 + $0x400] sm:$0xff] %vm2351_vm5, %v2254_v35  ;;  %v1083_v38 = vadd.f32 %v4463_v60, %v1082_v36  ;;  %v3113_v39 = vpop.f32.mrb[33].mxu0  ;;  %3271 = vmatmul.mubr.msk.f32.gmra.mrb[138].mxu0 %vm256_vm4, %v83_v32  ;;  %v1648_v40 = vadd.f32 %v4463_v60, %v1647_v37  ;;  %v3452_v41 = vpop.f32.mrb[33].mxu1  ;;  %3610 = vmatmul.mubr.msk.f32.gmra.mrb[138].mxu1 %vm256_vm4, %v196_v33 }
 0x12c   :  { %3273 = vmatprep.mubr.msk.f32.mxu0 %vm3771_vm0, %v3772_v6  ;;  %3612 = vmatprep.mubr.msk.f32.mxu1 %vm3771_vm0, %v3772_v6  ;;  %v203_v41 = vld [vmem:[%s6315_s0 + $0x5e8] sm:$0xff] }
 0x12d   :  { %v2142_v44 = vmax.f32 %v1083_v38, 0.0  ;;  %v2255_v45 = vmax.f32 %v1648_v40, 0.0  ;;  %v90_v40 = vld [vmem:[%s6315_s0 + $0x260] sm:$0xff] }
 0x12e   :  { %v1087_v46 = vpop.f32.mrb[34].mxu0  ;;  %v1652_v47 = vpop.f32.mrb[34].mxu1 }
 0x12f   :  { %2368 = vst.msk [vmem:[%s6317_s3 + $0x80] sm:$0xff] %vm2351_vm5, %v2142_v44  ;;  %2481 = vst.msk [vmem:[%s6317_s3 + $0x408] sm:$0xff] %vm2351_vm5, %v2255_v45  ;;  %v1088_v48 = vadd.f32 %v4463_v60, %v1087_v46  ;;  %v3116_v49 = vpop.f32.mrb[35].mxu0  ;;  %3274 = vmatmul.mubr.msk.f32.gmra.mrb[140].mxu0 %vm256_vm4, %v84_v42  ;;  %v1653_v50 = vadd.f32 %v4463_v60, %v1652_v47  ;;  %v3455_v51 = vpop.f32.mrb[35].mxu1  ;;  %3613 = vmatmul.mubr.msk.f32.gmra.mrb[140].mxu1 %vm256_vm4, %v197_v43 }
 0x130   :  { %3276 = vmatprep.mubr.msk.f32.mxu0 %vm3771_vm0, %v3772_v6  ;;  %3615 = vmatprep.mubr.msk.f32.mxu1 %vm3771_vm0, %v3772_v6  ;;  %v204_v51 = vld [vmem:[%s6315_s0 + $0x5f0] sm:$0xff] }
 0x131   :  { %v2143_v54 = vmax.f32 %v1088_v48, 0.0  ;;  %v2256_v55 = vmax.f32 %v1653_v50, 0.0  ;;  %v91_v50 = vld [vmem:[%s6315_s0 + $0x268] sm:$0xff] }
 0x132   :  { %v1092_v56 = vpop.f32.mrb[36].mxu0  ;;  %v1657_v57 = vpop.f32.mrb[36].mxu1 }
 0x133   :  { %2369 = vst.msk [vmem:[%s6317_s3 + $0x88] sm:$0xff] %vm2351_vm5, %v2143_v54  ;;  %2482 = vst.msk [vmem:[%s6317_s3 + $0x410] sm:$0xff] %vm2351_vm5, %v2256_v55  ;;  %v1093_v58 = vadd.f32 %v4463_v60, %v1092_v56  ;;  %v3119_v59 = vpop.f32.mrb[37].mxu0  ;;  %3277 = vmatmul.mubr.msk.f32.gmra.mrb[142].mxu0 %vm256_vm4, %v85_v52  ;;  %v1658_v61 = vadd.f32 %v4463_v60, %v1657_v57  ;;  %v3458_v62 = vpop.f32.mrb[37].mxu1  ;;  %3616 = vmatmul.mubr.msk.f32.gmra.mrb[142].mxu1 %vm256_vm4, %v198_v53 }
 0x134   :  { %3279 = vmatprep.mubr.msk.f32.mxu0 %vm3771_vm0, %v3772_v6  ;;  %3618 = vmatprep.mubr.msk.f32.mxu1 %vm3771_vm0, %v3772_v6  ;;  %v205_v62 = vld [vmem:[%s6315_s0 + $0x5f8] sm:$0xff] }
 0x135   :  { %v2144_v1 = vmax.f32 %v1093_v58, 0.0  ;;  %v2257_v2 = vmax.f32 %v1658_v61, 0.0  ;;  %v92_v61 = vld [vmem:[%s6315_s0 + $0x270] sm:$0xff] }
 0x136   :  { %v1097_v3 = vpop.f32.mrb[38].mxu0  ;;  %v1662_v4 = vpop.f32.mrb[38].mxu1 }
 0x137   :  { %2370 = vst.msk [vmem:[%s6317_s3 + $0x90] sm:$0xff] %vm2351_vm5, %v2144_v1  ;;  %2483 = vst.msk [vmem:[%s6317_s3 + $0x418] sm:$0xff] %vm2351_vm5, %v2257_v2  ;;  %v1098_v5 = vadd.f32 %v4463_v60, %v1097_v3  ;;  %v3122_v7 = vpop.f32.mrb[39].mxu0  ;;  %3280 = vmatmul.mubr.msk.f32.gmra.mrb[144].mxu0 %vm256_vm4, %v86_v63  ;;  %v1663_v8 = vadd.f32 %v4463_v60, %v1662_v4  ;;  %v3461_v9 = vpop.f32.mrb[39].mxu1  ;;  %3619 = vmatmul.mubr.msk.f32.gmra.mrb[144].mxu1 %vm256_vm4, %v199_v0 }
 0x138   :  { %3282 = vmatprep.mubr.msk.f32.mxu0 %vm3771_vm0, %v3772_v6  ;;  %3621 = vmatprep.mubr.msk.f32.mxu1 %vm3771_vm0, %v3772_v6  ;;  %v206_v9 = vld [vmem:[%s6315_s0 + $0x600] sm:$0xff] }
 0x139   :  { %v2145_v12 = vmax.f32 %v1098_v5, 0.0  ;;  %v2258_v13 = vmax.f32 %v1663_v8, 0.0  ;;  %v93_v8 = vld [vmem:[%s6315_s0 + $0x278] sm:$0xff] }
 0x13a   :  { %v1102_v14 = vpop.f32.mrb[40].mxu0  ;;  %v1667_v15 = vpop.f32.mrb[40].mxu1 }
 0x13b   :  { %2371 = vst.msk [vmem:[%s6317_s3 + $0x98] sm:$0xff] %vm2351_vm5, %v2145_v12  ;;  %2484 = vst.msk [vmem:[%s6317_s3 + $0x420] sm:$0xff] %vm2351_vm5, %v2258_v13  ;;  %v1103_v16 = vadd.f32 %v4463_v60, %v1102_v14  ;;  %v3125_v17 = vpop.f32.mrb[41].mxu0  ;;  %3283 = vmatmul.mubr.msk.f32.gmra.mrb[146].mxu0 %vm256_vm4, %v87_v10  ;;  %v1668_v18 = vadd.f32 %v4463_v60, %v1667_v15  ;;  %v3464_v19 = vpop.f32.mrb[41].mxu1  ;;  %3622 = vmatmul.mubr.msk.f32.gmra.mrb[146].mxu1 %vm256_vm4, %v200_v11 }
 0x13c   :  { %3285 = vmatprep.mubr.msk.f32.mxu0 %vm3771_vm0, %v3772_v6  ;;  %3624 = vmatprep.mubr.msk.f32.mxu1 %vm3771_vm0, %v3772_v6  ;;  %v207_v19 = vld [vmem:[%s6315_s0 + $0x608] sm:$0xff] }
 0x13d   :  { %v2146_v22 = vmax.f32 %v1103_v16, 0.0  ;;  %v2259_v23 = vmax.f32 %v1668_v18, 0.0  ;;  %v94_v18 = vld [vmem:[%s6315_s0 + $0x280] sm:$0xff] }
 0x13e   :  { %v1107_v24 = vpop.f32.mrb[42].mxu0  ;;  %v1672_v25 = vpop.f32.mrb[42].mxu1 }
 0x13f   :  { %2372 = vst.msk [vmem:[%s6317_s3 + $0xa0] sm:$0xff] %vm2351_vm5, %v2146_v22  ;;  %2485 = vst.msk [vmem:[%s6317_s3 + $0x428] sm:$0xff] %vm2351_vm5, %v2259_v23  ;;  %v1108_v26 = vadd.f32 %v4463_v60, %v1107_v24  ;;  %v3128_v27 = vpop.f32.mrb[43].mxu0  ;;  %3286 = vmatmul.mubr.msk.f32.gmra.mrb[148].mxu0 %vm256_vm4, %v88_v20  ;;  %v1673_v28 = vadd.f32 %v4463_v60, %v1672_v25  ;;  %v3467_v29 = vpop.f32.mrb[43].mxu1  ;;  %3625 = vmatmul.mubr.msk.f32.gmra.mrb[148].mxu1 %vm256_vm4, %v201_v21 }
 0x140   :  { %3288 = vmatprep.mubr.msk.f32.mxu0 %vm3771_vm0, %v3772_v6  ;;  %3627 = vmatprep.mubr.msk.f32.mxu1 %vm3771_vm0, %v3772_v6  ;;  %v208_v29 = vld [vmem:[%s6315_s0 + $0x610] sm:$0xff] }
 0x141   :  { %v2147_v32 = vmax.f32 %v1108_v26, 0.0  ;;  %v2260_v33 = vmax.f32 %v1673_v28, 0.0  ;;  %v95_v28 = vld [vmem:[%s6315_s0 + $0x288] sm:$0xff] }
 0x142   :  { %v1112_v34 = vpop.f32.mrb[44].mxu0  ;;  %v1677_v35 = vpop.f32.mrb[44].mxu1 }
 0x143   :  { %2373 = vst.msk [vmem:[%s6317_s3 + $0xa8] sm:$0xff] %vm2351_vm5, %v2147_v32  ;;  %2486 = vst.msk [vmem:[%s6317_s3 + $0x430] sm:$0xff] %vm2351_vm5, %v2260_v33  ;;  %v1113_v36 = vadd.f32 %v4463_v60, %v1112_v34  ;;  %v3131_v37 = vpop.f32.mrb[45].mxu0  ;;  %3289 = vmatmul.mubr.msk.f32.gmra.mrb[150].mxu0 %vm256_vm4, %v89_v30  ;;  %v1678_v38 = vadd.f32 %v4463_v60, %v1677_v35  ;;  %v3470_v39 = vpop.f32.mrb[45].mxu1  ;;  %3628 = vmatmul.mubr.msk.f32.gmra.mrb[150].mxu1 %vm256_vm4, %v202_v31 }
 0x144   :  { %3291 = vmatprep.mubr.msk.f32.mxu0 %vm3771_vm0, %v3772_v6  ;;  %3630 = vmatprep.mubr.msk.f32.mxu1 %vm3771_vm0, %v3772_v6  ;;  %v209_v39 = vld [vmem:[%s6315_s0 + $0x618] sm:$0xff] }
 0x145   :  { %v2148_v42 = vmax.f32 %v1113_v36, 0.0  ;;  %v2261_v43 = vmax.f32 %v1678_v38, 0.0  ;;  %v96_v38 = vld [vmem:[%s6315_s0 + $0x290] sm:$0xff] }
 0x146   :  { %v1117_v44 = vpop.f32.mrb[46].mxu0  ;;  %v1682_v45 = vpop.f32.mrb[46].mxu1 }
 0x147   :  { %2374 = vst.msk [vmem:[%s6317_s3 + $0xb0] sm:$0xff] %vm2351_vm5, %v2148_v42  ;;  %2487 = vst.msk [vmem:[%s6317_s3 + $0x438] sm:$0xff] %vm2351_vm5, %v2261_v43  ;;  %v1118_v46 = vadd.f32 %v4463_v60, %v1117_v44  ;;  %v3134_v47 = vpop.f32.mrb[47].mxu0  ;;  %3292 = vmatmul.mubr.msk.f32.gmra.mrb[152].mxu0 %vm256_vm4, %v90_v40  ;;  %v1683_v48 = vadd.f32 %v4463_v60, %v1682_v45  ;;  %v3473_v49 = vpop.f32.mrb[47].mxu1  ;;  %3631 = vmatmul.mubr.msk.f32.gmra.mrb[152].mxu1 %vm256_vm4, %v203_v41 }
 0x148   :  { %3294 = vmatprep.mubr.msk.f32.mxu0 %vm3771_vm0, %v3772_v6  ;;  %3633 = vmatprep.mubr.msk.f32.mxu1 %vm3771_vm0, %v3772_v6  ;;  %v210_v49 = vld [vmem:[%s6315_s0 + $0x620] sm:$0xff] }
 0x149   :  { %v2149_v52 = vmax.f32 %v1118_v46, 0.0  ;;  %v2262_v53 = vmax.f32 %v1683_v48, 0.0  ;;  %v97_v48 = vld [vmem:[%s6315_s0 + $0x298] sm:$0xff] }
 0x14a   :  { %v1122_v54 = vpop.f32.mrb[48].mxu0  ;;  %v1687_v55 = vpop.f32.mrb[48].mxu1 }
 0x14b   :  { %2375 = vst.msk [vmem:[%s6317_s3 + $0xb8] sm:$0xff] %vm2351_vm5, %v2149_v52  ;;  %2488 = vst.msk [vmem:[%s6317_s3 + $0x440] sm:$0xff] %vm2351_vm5, %v2262_v53  ;;  %v1123_v56 = vadd.f32 %v4463_v60, %v1122_v54  ;;  %v3137_v57 = vpop.f32.mrb[49].mxu0  ;;  %3295 = vmatmul.mubr.msk.f32.gmra.mrb[154].mxu0 %vm256_vm4, %v91_v50  ;;  %v1688_v58 = vadd.f32 %v4463_v60, %v1687_v55  ;;  %v3476_v59 = vpop.f32.mrb[49].mxu1  ;;  %3634 = vmatmul.mubr.msk.f32.gmra.mrb[154].mxu1 %vm256_vm4, %v204_v51 }
 0x14c   :  { %3297 = vmatprep.mubr.msk.f32.mxu0 %vm3771_vm0, %v3772_v6  ;;  %3636 = vmatprep.mubr.msk.f32.mxu1 %vm3771_vm0, %v3772_v6  ;;  %v211_v59 = vld [vmem:[%s6315_s0 + $0x628] sm:$0xff] }
 0x14d   :  { %v2150_v63 = vmax.f32 %v1123_v56, 0.0  ;;  %v2263_v0 = vmax.f32 %v1688_v58, 0.0  ;;  %v98_v58 = vld [vmem:[%s6315_s0 + $0x2a0] sm:$0xff] }
 0x14e   :  { %v1127_v1 = vpop.f32.mrb[50].mxu0  ;;  %v1692_v2 = vpop.f32.mrb[50].mxu1 }
 0x14f   :  { %2376 = vst.msk [vmem:[%s6317_s3 + $0xc0] sm:$0xff] %vm2351_vm5, %v2150_v63  ;;  %2489 = vst.msk [vmem:[%s6317_s3 + $0x448] sm:$0xff] %vm2351_vm5, %v2263_v0  ;;  %v1128_v3 = vadd.f32 %v4463_v60, %v1127_v1  ;;  %v3140_v4 = vpop.f32.mrb[51].mxu0  ;;  %3298 = vmatmul.mubr.msk.f32.gmra.mrb[156].mxu0 %vm256_vm4, %v92_v61  ;;  %v1693_v5 = vadd.f32 %v4463_v60, %v1692_v2  ;;  %v3479_v7 = vpop.f32.mrb[51].mxu1  ;;  %3637 = vmatmul.mubr.msk.f32.gmra.mrb[156].mxu1 %vm256_vm4, %v205_v62 }
 0x150   :  { %3300 = vmatprep.mubr.msk.f32.mxu0 %vm3771_vm0, %v3772_v6  ;;  %3639 = vmatprep.mubr.msk.f32.mxu1 %vm3771_vm0, %v3772_v6  ;;  %v212_v7 = vld [vmem:[%s6315_s0 + $0x630] sm:$0xff] }
 0x151   :  { %v2151_v10 = vmax.f32 %v1128_v3, 0.0  ;;  %v2264_v11 = vmax.f32 %v1693_v5, 0.0  ;;  %v99_v5 = vld [vmem:[%s6315_s0 + $0x2a8] sm:$0xff] }
 0x152   :  { %v1132_v12 = vpop.f32.mrb[52].mxu0  ;;  %v1697_v13 = vpop.f32.mrb[52].mxu1 }
 0x153   :  { %2377 = vst.msk [vmem:[%s6317_s3 + $0xc8] sm:$0xff] %vm2351_vm5, %v2151_v10  ;;  %2490 = vst.msk [vmem:[%s6317_s3 + $0x450] sm:$0xff] %vm2351_vm5, %v2264_v11  ;;  %v1133_v14 = vadd.f32 %v4463_v60, %v1132_v12  ;;  %v3143_v15 = vpop.f32.mrb[53].mxu0  ;;  %3301 = vmatmul.mubr.msk.f32.gmra.mrb[158].mxu0 %vm256_vm4, %v93_v8  ;;  %v1698_v16 = vadd.f32 %v4463_v60, %v1697_v13  ;;  %v3482_v17 = vpop.f32.mrb[53].mxu1  ;;  %3640 = vmatmul.mubr.msk.f32.gmra.mrb[158].mxu1 %vm256_vm4, %v206_v9  ;;  %v5182_v11 = vld [vmem:[%s6316_s2] ss:$0 sm:$0xff] }
 0x154   :  { %3303 = vmatprep.mubr.msk.f32.mxu0 %vm3771_vm0, %v3772_v6  ;;  %3642 = vmatprep.mubr.msk.f32.mxu1 %vm3771_vm0, %v3772_v6  ;;  %v213_v17 = vld [vmem:[%s6315_s0 + $0x638] sm:$0xff] }
 0x155   :  { %v2152_v20 = vmax.f32 %v1133_v14, 0.0  ;;  %v2265_v21 = vmax.f32 %v1698_v16, 0.0  ;;  %v100_v16 = vld [vmem:[%s6315_s0 + $0x2b0] sm:$0xff] }
 0x156   :  { %v1137_v22 = vpop.f32.mrb[54].mxu0  ;;  %v1702_v23 = vpop.f32.mrb[54].mxu1 }
 0x157   :  { %2378 = vst.msk [vmem:[%s6317_s3 + $0xd0] sm:$0xff] %vm2351_vm5, %v2152_v20  ;;  %2491 = vst.msk [vmem:[%s6317_s3 + $0x458] sm:$0xff] %vm2351_vm5, %v2265_v21  ;;  %v1138_v24 = vadd.f32 %v4463_v60, %v1137_v22  ;;  %v3146_v25 = vpop.f32.mrb[55].mxu0  ;;  %3304 = vmatmul.mubr.msk.f32.gmra.mrb[160].mxu0 %vm256_vm4, %v94_v18  ;;  %v1703_v26 = vadd.f32 %v4463_v60, %v1702_v23  ;;  %v3485_v27 = vpop.f32.mrb[55].mxu1  ;;  %3643 = vmatmul.mubr.msk.f32.gmra.mrb[160].mxu1 %vm256_vm4, %v207_v19 }
 0x158   :  { %3306 = vmatprep.mubr.msk.f32.mxu0 %vm3771_vm0, %v3772_v6  ;;  %3645 = vmatprep.mubr.msk.f32.mxu1 %vm3771_vm0, %v3772_v6  ;;  %v214_v27 = vld [vmem:[%s6315_s0 + $0x640] sm:$0xff] }
 0x159   :  { %v2153_v30 = vmax.f32 %v1138_v24, 0.0  ;;  %v2266_v31 = vmax.f32 %v1703_v26, 0.0  ;;  %v101_v26 = vld [vmem:[%s6315_s0 + $0x2b8] sm:$0xff] }
 0x15a   :  { %v1142_v32 = vpop.f32.mrb[56].mxu0  ;;  %v1707_v33 = vpop.f32.mrb[56].mxu1 }
 0x15b   :  { %2379 = vst.msk [vmem:[%s6317_s3 + $0xd8] sm:$0xff] %vm2351_vm5, %v2153_v30  ;;  %2492 = vst.msk [vmem:[%s6317_s3 + $0x460] sm:$0xff] %vm2351_vm5, %v2266_v31  ;;  %v1143_v34 = vadd.f32 %v4463_v60, %v1142_v32  ;;  %v3149_v35 = vpop.f32.mrb[57].mxu0  ;;  %3307 = vmatmul.mubr.msk.f32.gmra.mrb[162].mxu0 %vm256_vm4, %v95_v28  ;;  %v1708_v36 = vadd.f32 %v4463_v60, %v1707_v33  ;;  %v3488_v37 = vpop.f32.mrb[57].mxu1  ;;  %3646 = vmatmul.mubr.msk.f32.gmra.mrb[162].mxu1 %vm256_vm4, %v208_v29 }
 0x15c   :  { %3309 = vmatprep.mubr.msk.f32.mxu0 %vm3771_vm0, %v3772_v6  ;;  %3648 = vmatprep.mubr.msk.f32.mxu1 %vm3771_vm0, %v3772_v6  ;;  %v215_v37 = vld [vmem:[%s6315_s0 + $0x648] sm:$0xff] }
 0x15d   :  { %v2154_v40 = vmax.f32 %v1143_v34, 0.0  ;;  %v2267_v41 = vmax.f32 %v1708_v36, 0.0  ;;  %v102_v36 = vld [vmem:[%s6315_s0 + $0x2c0] sm:$0xff] }
 0x15e   :  { %v1147_v42 = vpop.f32.mrb[58].mxu0  ;;  %v1712_v43 = vpop.f32.mrb[58].mxu1 }
 0x15f   :  { %2380 = vst.msk [vmem:[%s6317_s3 + $0xe0] sm:$0xff] %vm2351_vm5, %v2154_v40  ;;  %2493 = vst.msk [vmem:[%s6317_s3 + $0x468] sm:$0xff] %vm2351_vm5, %v2267_v41  ;;  %v1148_v44 = vadd.f32 %v4463_v60, %v1147_v42  ;;  %v3152_v45 = vpop.f32.mrb[59].mxu0  ;;  %3310 = vmatmul.mubr.msk.f32.gmra.mrb[164].mxu0 %vm256_vm4, %v96_v38  ;;  %v1713_v46 = vadd.f32 %v4463_v60, %v1712_v43  ;;  %v3491_v47 = vpop.f32.mrb[59].mxu1  ;;  %3649 = vmatmul.mubr.msk.f32.gmra.mrb[164].mxu1 %vm256_vm4, %v209_v39 }
 0x160   :  { %3312 = vmatprep.mubr.msk.f32.mxu0 %vm3771_vm0, %v3772_v6  ;;  %3651 = vmatprep.mubr.msk.f32.mxu1 %vm3771_vm0, %v3772_v6  ;;  %v216_v47 = vld [vmem:[%s6315_s0 + $0x650] sm:$0xff] }
 0x161   :  { %v2155_v50 = vmax.f32 %v1148_v44, 0.0  ;;  %v2268_v51 = vmax.f32 %v1713_v46, 0.0  ;;  %v103_v46 = vld [vmem:[%s6315_s0 + $0x2c8] sm:$0xff] }
 0x162   :  { %v1152_v52 = vpop.f32.mrb[60].mxu0  ;;  %v1717_v53 = vpop.f32.mrb[60].mxu1 }
 0x163   :  { %2381 = vst.msk [vmem:[%s6317_s3 + $0xe8] sm:$0xff] %vm2351_vm5, %v2155_v50  ;;  %2494 = vst.msk [vmem:[%s6317_s3 + $0x470] sm:$0xff] %vm2351_vm5, %v2268_v51  ;;  %v1153_v54 = vadd.f32 %v4463_v60, %v1152_v52  ;;  %v3155_v55 = vpop.f32.mrb[61].mxu0  ;;  %3313 = vmatmul.mubr.msk.f32.gmra.mrb[166].mxu0 %vm256_vm4, %v97_v48  ;;  %v1718_v56 = vadd.f32 %v4463_v60, %v1717_v53  ;;  %v3494_v57 = vpop.f32.mrb[61].mxu1  ;;  %3652 = vmatmul.mubr.msk.f32.gmra.mrb[166].mxu1 %vm256_vm4, %v210_v49 }
 0x164   :  { %3315 = vmatprep.mubr.msk.f32.mxu0 %vm3771_vm0, %v3772_v6  ;;  %3654 = vmatprep.mubr.msk.f32.mxu1 %vm3771_vm0, %v3772_v6  ;;  %v217_v57 = vld [vmem:[%s6315_s0 + $0x658] sm:$0xff] }
 0x165   :  { %v2156_v61 = vmax.f32 %v1153_v54, 0.0  ;;  %v2269_v62 = vmax.f32 %v1718_v56, 0.0  ;;  %v104_v56 = vld [vmem:[%s6315_s0 + $0x2d0] sm:$0xff] }
 0x166   :  { %v1157_v63 = vpop.f32.mrb[62].mxu0  ;;  %v1722_v0 = vpop.f32.mrb[62].mxu1 }
 0x167   :  { %2382 = vst.msk [vmem:[%s6317_s3 + $0xf0] sm:$0xff] %vm2351_vm5, %v2156_v61  ;;  %2495 = vst.msk [vmem:[%s6317_s3 + $0x478] sm:$0xff] %vm2351_vm5, %v2269_v62  ;;  %v1158_v1 = vadd.f32 %v4463_v60, %v1157_v63  ;;  %v3158_v2 = vpop.f32.mrb[63].mxu0  ;;  %3316 = vmatmul.mubr.msk.f32.gmra.mrb[168].mxu0 %vm256_vm4, %v98_v58  ;;  %v1723_v3 = vadd.f32 %v4463_v60, %v1722_v0  ;;  %v3497_v4 = vpop.f32.mrb[63].mxu1  ;;  %3655 = vmatmul.mubr.msk.f32.gmra.mrb[168].mxu1 %vm256_vm4, %v211_v59 }
 0x168   :  { %3318 = vmatprep.mubr.msk.f32.mxu0 %vm3771_vm0, %v3772_v6  ;;  %3657 = vmatprep.mubr.msk.f32.mxu1 %vm3771_vm0, %v3772_v6  ;;  %v218_v4 = vld [vmem:[%s6315_s0 + $0x660] sm:$0xff] }
 0x169   :  { %v2157_v8 = vmax.f32 %v1158_v1, 0.0  ;;  %v2270_v9 = vmax.f32 %v1723_v3, 0.0  ;;  %v105_v3 = vld [vmem:[%s6315_s0 + $0x2d8] sm:$0xff] }
 0x16a   :  { %v1162_v60 = vpop.f32.mrb[64].mxu0  ;;  %v1727_v10 = vpop.f32.mrb[64].mxu1 }
 0x16b   :  { %2383 = vst.msk [vmem:[%s6317_s3 + $0xf8] sm:$0xff] %vm2351_vm5, %v2157_v8  ;;  %2496 = vst.msk [vmem:[%s6317_s3 + $0x480] sm:$0xff] %vm2351_vm5, %v2270_v9  ;;  %v1163_v12 = vadd.f32 %v5182_v11, %v1162_v60  ;;  %v3161_v13 = vpop.f32.mrb[65].mxu0  ;;  %3319 = vmatmul.mubr.msk.f32.gmra.mrb[170].mxu0 %vm256_vm4, %v99_v5  ;;  %v1728_v14 = vadd.f32 %v5182_v11, %v1727_v10  ;;  %v3500_v15 = vpop.f32.mrb[65].mxu1  ;;  %3658 = vmatmul.mubr.msk.f32.gmra.mrb[170].mxu1 %vm256_vm4, %v212_v7 }
 0x16c   :  { %3321 = vmatprep.mubr.msk.f32.mxu0 %vm3771_vm0, %v3772_v6  ;;  %3660 = vmatprep.mubr.msk.f32.mxu1 %vm3771_vm0, %v3772_v6  ;;  %v219_v15 = vld [vmem:[%s6315_s0 + $0x668] sm:$0xff] }
 0x16d   :  { %v2158_v18 = vmax.f32 %v1163_v12, 0.0  ;;  %v2271_v19 = vmax.f32 %v1728_v14, 0.0  ;;  %v106_v14 = vld [vmem:[%s6315_s0 + $0x2e0] sm:$0xff] }
 0x16e   :  { %v1167_v20 = vpop.f32.mrb[66].mxu0  ;;  %v1732_v21 = vpop.f32.mrb[66].mxu1 }
 0x16f   :  { %2384 = vst.msk [vmem:[%s6317_s3 + $0x100] sm:$0xff] %vm2351_vm5, %v2158_v18  ;;  %2497 = vst.msk [vmem:[%s6317_s3 + $0x488] sm:$0xff] %vm2351_vm5, %v2271_v19  ;;  %v1168_v22 = vadd.f32 %v5182_v11, %v1167_v20  ;;  %v3164_v23 = vpop.f32.mrb[67].mxu0  ;;  %3322 = vmatmul.mubr.msk.f32.gmra.mrb[172].mxu0 %vm256_vm4, %v100_v16  ;;  %v1733_v24 = vadd.f32 %v5182_v11, %v1732_v21  ;;  %v3503_v25 = vpop.f32.mrb[67].mxu1  ;;  %3661 = vmatmul.mubr.msk.f32.gmra.mrb[172].mxu1 %vm256_vm4, %v213_v17 }
 0x170   :  { %3324 = vmatprep.mubr.msk.f32.mxu0 %vm3771_vm0, %v3772_v6  ;;  %3663 = vmatprep.mubr.msk.f32.mxu1 %vm3771_vm0, %v3772_v6  ;;  %v220_v25 = vld [vmem:[%s6315_s0 + $0x670] sm:$0xff] }
 0x171   :  { %v2159_v28 = vmax.f32 %v1168_v22, 0.0  ;;  %v2272_v29 = vmax.f32 %v1733_v24, 0.0  ;;  %v107_v24 = vld [vmem:[%s6315_s0 + $0x2e8] sm:$0xff] }
 0x172   :  { %v1172_v30 = vpop.f32.mrb[68].mxu0  ;;  %v1737_v31 = vpop.f32.mrb[68].mxu1 }
 0x173   :  { %2385 = vst.msk [vmem:[%s6317_s3 + $0x108] sm:$0xff] %vm2351_vm5, %v2159_v28  ;;  %2498 = vst.msk [vmem:[%s6317_s3 + $0x490] sm:$0xff] %vm2351_vm5, %v2272_v29  ;;  %v1173_v32 = vadd.f32 %v5182_v11, %v1172_v30  ;;  %v3167_v33 = vpop.f32.mrb[69].mxu0  ;;  %3325 = vmatmul.mubr.msk.f32.gmra.mrb[174].mxu0 %vm256_vm4, %v101_v26  ;;  %v1738_v34 = vadd.f32 %v5182_v11, %v1737_v31  ;;  %v3506_v35 = vpop.f32.mrb[69].mxu1  ;;  %3664 = vmatmul.mubr.msk.f32.gmra.mrb[174].mxu1 %vm256_vm4, %v214_v27 }
 0x174   :  { %3327 = vmatprep.mubr.msk.f32.mxu0 %vm3771_vm0, %v3772_v6  ;;  %3666 = vmatprep.mubr.msk.f32.mxu1 %vm3771_vm0, %v3772_v6  ;;  %v221_v35 = vld [vmem:[%s6315_s0 + $0x678] sm:$0xff] }
 0x175   :  { %v2160_v38 = vmax.f32 %v1173_v32, 0.0  ;;  %v2273_v39 = vmax.f32 %v1738_v34, 0.0  ;;  %v108_v34 = vld [vmem:[%s6315_s0 + $0x2f0] sm:$0xff] }
 0x176   :  { %v1177_v40 = vpop.f32.mrb[70].mxu0  ;;  %v1742_v41 = vpop.f32.mrb[70].mxu1 }
 0x177   :  { %2386 = vst.msk [vmem:[%s6317_s3 + $0x110] sm:$0xff] %vm2351_vm5, %v2160_v38  ;;  %2499 = vst.msk [vmem:[%s6317_s3 + $0x498] sm:$0xff] %vm2351_vm5, %v2273_v39  ;;  %v1178_v42 = vadd.f32 %v5182_v11, %v1177_v40  ;;  %v3170_v43 = vpop.f32.mrb[71].mxu0  ;;  %3328 = vmatmul.mubr.msk.f32.gmra.mrb[176].mxu0 %vm256_vm4, %v102_v36  ;;  %v1743_v44 = vadd.f32 %v5182_v11, %v1742_v41  ;;  %v3509_v45 = vpop.f32.mrb[71].mxu1  ;;  %3667 = vmatmul.mubr.msk.f32.gmra.mrb[176].mxu1 %vm256_vm4, %v215_v37 }
 0x178   :  { %3330 = vmatprep.mubr.msk.f32.mxu0 %vm3771_vm0, %v3772_v6  ;;  %3669 = vmatprep.mubr.msk.f32.mxu1 %vm3771_vm0, %v3772_v6  ;;  %v222_v45 = vld [vmem:[%s6315_s0 + $0x680] sm:$0xff] }
 0x179   :  { %v2161_v48 = vmax.f32 %v1178_v42, 0.0  ;;  %v2274_v49 = vmax.f32 %v1743_v44, 0.0  ;;  %v109_v44 = vld [vmem:[%s6315_s0 + $0x2f8] sm:$0xff] }
 0x17a   :  { %v1182_v50 = vpop.f32.mrb[72].mxu0  ;;  %v1747_v51 = vpop.f32.mrb[72].mxu1 }
 0x17b   :  { %2387 = vst.msk [vmem:[%s6317_s3 + $0x118] sm:$0xff] %vm2351_vm5, %v2161_v48  ;;  %2500 = vst.msk [vmem:[%s6317_s3 + $0x4a0] sm:$0xff] %vm2351_vm5, %v2274_v49  ;;  %v1183_v52 = vadd.f32 %v5182_v11, %v1182_v50  ;;  %v3173_v53 = vpop.f32.mrb[73].mxu0  ;;  %3331 = vmatmul.mubr.msk.f32.gmra.mrb[178].mxu0 %vm256_vm4, %v103_v46  ;;  %v1748_v54 = vadd.f32 %v5182_v11, %v1747_v51  ;;  %v3512_v55 = vpop.f32.mrb[73].mxu1  ;;  %3670 = vmatmul.mubr.msk.f32.gmra.mrb[178].mxu1 %vm256_vm4, %v216_v47 }
 0x17c   :  { %3333 = vmatprep.mubr.msk.f32.mxu0 %vm3771_vm0, %v3772_v6  ;;  %3672 = vmatprep.mubr.msk.f32.mxu1 %vm3771_vm0, %v3772_v6  ;;  %v223_v55 = vld [vmem:[%s6315_s0 + $0x688] sm:$0xff] }
 0x17d   :  { %v2162_v58 = vmax.f32 %v1183_v52, 0.0  ;;  %v2275_v59 = vmax.f32 %v1748_v54, 0.0  ;;  %v110_v54 = vld [vmem:[%s6315_s0 + $0x300] sm:$0xff] }
 0x17e   :  { %v1187_v61 = vpop.f32.mrb[74].mxu0  ;;  %v1752_v62 = vpop.f32.mrb[74].mxu1 }
 0x17f   :  { %2388 = vst.msk [vmem:[%s6317_s3 + $0x120] sm:$0xff] %vm2351_vm5, %v2162_v58  ;;  %2501 = vst.msk [vmem:[%s6317_s3 + $0x4a8] sm:$0xff] %vm2351_vm5, %v2275_v59  ;;  %v1188_v63 = vadd.f32 %v5182_v11, %v1187_v61  ;;  %v3176_v0 = vpop.f32.mrb[75].mxu0  ;;  %3334 = vmatmul.mubr.msk.f32.gmra.mrb[180].mxu0 %vm256_vm4, %v104_v56  ;;  %v1753_v1 = vadd.f32 %v5182_v11, %v1752_v62  ;;  %v3515_v2 = vpop.f32.mrb[75].mxu1  ;;  %3673 = vmatmul.mubr.msk.f32.gmra.mrb[180].mxu1 %vm256_vm4, %v217_v57 }
 0x180   :  { %3336 = vmatprep.mubr.msk.f32.mxu0 %vm3771_vm0, %v3772_v6  ;;  %3675 = vmatprep.mubr.msk.f32.mxu1 %vm3771_vm0, %v3772_v6  ;;  %v224_v2 = vld [vmem:[%s6315_s0 + $0x690] sm:$0xff] }
 0x181   :  { %v2163_v5 = vmax.f32 %v1188_v63, 0.0  ;;  %v2276_v7 = vmax.f32 %v1753_v1, 0.0  ;;  %v111_v1 = vld [vmem:[%s6315_s0 + $0x308] sm:$0xff] }
 0x182   :  { %v1192_v8 = vpop.f32.mrb[76].mxu0  ;;  %v1757_v9 = vpop.f32.mrb[76].mxu1 }
 0x183   :  { %2389 = vst.msk [vmem:[%s6317_s3 + $0x128] sm:$0xff] %vm2351_vm5, %v2163_v5  ;;  %2502 = vst.msk [vmem:[%s6317_s3 + $0x4b0] sm:$0xff] %vm2351_vm5, %v2276_v7  ;;  %v1193_v60 = vadd.f32 %v5182_v11, %v1192_v8  ;;  %v3179_v10 = vpop.f32.mrb[77].mxu0  ;;  %3337 = vmatmul.mubr.msk.f32.gmra.mrb[182].mxu0 %vm256_vm4, %v105_v3  ;;  %v1758_v12 = vadd.f32 %v5182_v11, %v1757_v9  ;;  %v3518_v13 = vpop.f32.mrb[77].mxu1  ;;  %3676 = vmatmul.mubr.msk.f32.gmra.mrb[182].mxu1 %vm256_vm4, %v218_v4 }
 0x184   :  { %3339 = vmatprep.mubr.msk.f32.mxu0 %vm3771_vm0, %v3772_v6  ;;  %3678 = vmatprep.mubr.msk.f32.mxu1 %vm3771_vm0, %v3772_v6  ;;  %v225_v13 = vld [vmem:[%s6315_s0 + $0x698] sm:$0xff] }
 0x185   :  { %v2164_v16 = vmax.f32 %v1193_v60, 0.0  ;;  %v2277_v17 = vmax.f32 %v1758_v12, 0.0  ;;  %v112_v12 = vld [vmem:[%s6315_s0 + $0x310] sm:$0xff] }
 0x186   :  { %v1197_v18 = vpop.f32.mrb[78].mxu0  ;;  %v1762_v19 = vpop.f32.mrb[78].mxu1 }
 0x187   :  { %2390 = vst.msk [vmem:[%s6317_s3 + $0x130] sm:$0xff] %vm2351_vm5, %v2164_v16  ;;  %2503 = vst.msk [vmem:[%s6317_s3 + $0x4b8] sm:$0xff] %vm2351_vm5, %v2277_v17  ;;  %v1198_v20 = vadd.f32 %v5182_v11, %v1197_v18  ;;  %v3182_v21 = vpop.f32.mrb[79].mxu0  ;;  %3340 = vmatmul.mubr.msk.f32.gmra.mrb[184].mxu0 %vm256_vm4, %v106_v14  ;;  %v1763_v22 = vadd.f32 %v5182_v11, %v1762_v19  ;;  %v3521_v23 = vpop.f32.mrb[79].mxu1  ;;  %3679 = vmatmul.mubr.msk.f32.gmra.mrb[184].mxu1 %vm256_vm4, %v219_v15 }
 0x188   :  { %3342 = vmatprep.mubr.msk.f32.mxu0 %vm3771_vm0, %v3772_v6  ;;  %3681 = vmatprep.mubr.msk.f32.mxu1 %vm3771_vm0, %v3772_v6  ;;  %v226_v23 = vld [vmem:[%s6315_s0 + $0x6a0] sm:$0xff] }
 0x189   :  { %v2165_v26 = vmax.f32 %v1198_v20, 0.0  ;;  %v2278_v27 = vmax.f32 %v1763_v22, 0.0  ;;  %v113_v22 = vld [vmem:[%s6315_s0 + $0x318] sm:$0xff] }
 0x18a   :  { %v1202_v28 = vpop.f32.mrb[80].mxu0  ;;  %v1767_v29 = vpop.f32.mrb[80].mxu1 }
 0x18b   :  { %2391 = vst.msk [vmem:[%s6317_s3 + $0x138] sm:$0xff] %vm2351_vm5, %v2165_v26  ;;  %2504 = vst.msk [vmem:[%s6317_s3 + $0x4c0] sm:$0xff] %vm2351_vm5, %v2278_v27  ;;  %v1203_v30 = vadd.f32 %v5182_v11, %v1202_v28  ;;  %v3185_v31 = vpop.f32.mrb[81].mxu0  ;;  %3343 = vmatmul.mubr.msk.f32.gmra.mrb[186].mxu0 %vm256_vm4, %v107_v24  ;;  %v1768_v32 = vadd.f32 %v5182_v11, %v1767_v29  ;;  %v3524_v33 = vpop.f32.mrb[81].mxu1  ;;  %3682 = vmatmul.mubr.msk.f32.gmra.mrb[186].mxu1 %vm256_vm4, %v220_v25 }
 0x18c   :  { %3345 = vmatprep.mubr.msk.f32.mxu0 %vm3771_vm0, %v3772_v6  ;;  %3684 = vmatprep.mubr.msk.f32.mxu1 %vm3771_vm0, %v3772_v6  ;;  %v227_v33 = vld [vmem:[%s6315_s0 + $0x6a8] sm:$0xff] }
 0x18d   :  { %v2166_v36 = vmax.f32 %v1203_v30, 0.0  ;;  %v2279_v37 = vmax.f32 %v1768_v32, 0.0  ;;  %v114_v32 = vld [vmem:[%s6315_s0 + $0x320] sm:$0xff] }
 0x18e   :  { %v1207_v38 = vpop.f32.mrb[82].mxu0  ;;  %v1772_v39 = vpop.f32.mrb[82].mxu1 }
 0x18f   :  { %2392 = vst.msk [vmem:[%s6317_s3 + $0x140] sm:$0xff] %vm2351_vm5, %v2166_v36  ;;  %2505 = vst.msk [vmem:[%s6317_s3 + $0x4c8] sm:$0xff] %vm2351_vm5, %v2279_v37  ;;  %v1208_v40 = vadd.f32 %v5182_v11, %v1207_v38  ;;  %v3188_v41 = vpop.f32.mrb[83].mxu0  ;;  %3346 = vmatmul.mubr.msk.f32.gmra.mrb[188].mxu0 %vm256_vm4, %v108_v34  ;;  %v1773_v42 = vadd.f32 %v5182_v11, %v1772_v39  ;;  %v3527_v43 = vpop.f32.mrb[83].mxu1  ;;  %3685 = vmatmul.mubr.msk.f32.gmra.mrb[188].mxu1 %vm256_vm4, %v221_v35 }
 0x190   :  { %3348 = vmatprep.mubr.msk.f32.mxu0 %vm3771_vm0, %v3772_v6  ;;  %3687 = vmatprep.mubr.msk.f32.mxu1 %vm3771_vm0, %v3772_v6  ;;  %v228_v43 = vld [vmem:[%s6315_s0 + $0x6b0] sm:$0xff] }
 0x191   :  { %v2167_v46 = vmax.f32 %v1208_v40, 0.0  ;;  %v2280_v47 = vmax.f32 %v1773_v42, 0.0  ;;  %v115_v42 = vld [vmem:[%s6315_s0 + $0x328] sm:$0xff] }
 0x192   :  { %v1212_v48 = vpop.f32.mrb[84].mxu0  ;;  %v1777_v49 = vpop.f32.mrb[84].mxu1 }
 0x193   :  { %2393 = vst.msk [vmem:[%s6317_s3 + $0x148] sm:$0xff] %vm2351_vm5, %v2167_v46  ;;  %2506 = vst.msk [vmem:[%s6317_s3 + $0x4d0] sm:$0xff] %vm2351_vm5, %v2280_v47  ;;  %v1213_v50 = vadd.f32 %v5182_v11, %v1212_v48  ;;  %v3191_v51 = vpop.f32.mrb[85].mxu0  ;;  %3349 = vmatmul.mubr.msk.f32.gmra.mrb[190].mxu0 %vm256_vm4, %v109_v44  ;;  %v1778_v52 = vadd.f32 %v5182_v11, %v1777_v49  ;;  %v3530_v53 = vpop.f32.mrb[85].mxu1  ;;  %3688 = vmatmul.mubr.msk.f32.gmra.mrb[190].mxu1 %vm256_vm4, %v222_v45 }
 0x194   :  { %3351 = vmatprep.mubr.msk.f32.mxu0 %vm3771_vm0, %v3772_v6  ;;  %3690 = vmatprep.mubr.msk.f32.mxu1 %vm3771_vm0, %v3772_v6  ;;  %v229_v53 = vld [vmem:[%s6315_s0 + $0x6b8] sm:$0xff] }
 0x195   :  { %v2168_v56 = vmax.f32 %v1213_v50, 0.0  ;;  %v2281_v57 = vmax.f32 %v1778_v52, 0.0  ;;  %v116_v52 = vld [vmem:[%s6315_s0 + $0x330] sm:$0xff] }
 0x196   :  { %v1217_v58 = vpop.f32.mrb[86].mxu0  ;;  %v1782_v59 = vpop.f32.mrb[86].mxu1 }
 0x197   :  { %2394 = vst.msk [vmem:[%s6317_s3 + $0x150] sm:$0xff] %vm2351_vm5, %v2168_v56  ;;  %2507 = vst.msk [vmem:[%s6317_s3 + $0x4d8] sm:$0xff] %vm2351_vm5, %v2281_v57  ;;  %v1218_v61 = vadd.f32 %v5182_v11, %v1217_v58  ;;  %v3194_v62 = vpop.f32.mrb[87].mxu0  ;;  %3352 = vmatmul.mubr.msk.f32.gmra.mrb[192].mxu0 %vm256_vm4, %v110_v54  ;;  %v1783_v63 = vadd.f32 %v5182_v11, %v1782_v59  ;;  %v3533_v0 = vpop.f32.mrb[87].mxu1  ;;  %3691 = vmatmul.mubr.msk.f32.gmra.mrb[192].mxu1 %vm256_vm4, %v223_v55 }
 0x198   :  { %3354 = vmatprep.mubr.msk.f32.mxu0 %vm3771_vm0, %v3772_v6  ;;  %3693 = vmatprep.mubr.msk.f32.mxu1 %vm3771_vm0, %v3772_v6  ;;  %v230_v0 = vld [vmem:[%s6315_s0 + $0x6c0] sm:$0xff] }
 0x199   :  { %v2169_v3 = vmax.f32 %v1218_v61, 0.0  ;;  %v2282_v4 = vmax.f32 %v1783_v63, 0.0  ;;  %v117_v63 = vld [vmem:[%s6315_s0 + $0x338] sm:$0xff] }
 0x19a   :  { %v1222_v5 = vpop.f32.mrb[88].mxu0  ;;  %v1787_v7 = vpop.f32.mrb[88].mxu1 }
 0x19b   :  { %2395 = vst.msk [vmem:[%s6317_s3 + $0x158] sm:$0xff] %vm2351_vm5, %v2169_v3  ;;  %2508 = vst.msk [vmem:[%s6317_s3 + $0x4e0] sm:$0xff] %vm2351_vm5, %v2282_v4  ;;  %v1223_v8 = vadd.f32 %v5182_v11, %v1222_v5  ;;  %v3197_v9 = vpop.f32.mrb[89].mxu0  ;;  %3355 = vmatmul.mubr.msk.f32.gmra.mrb[194].mxu0 %vm256_vm4, %v111_v1  ;;  %v1788_v60 = vadd.f32 %v5182_v11, %v1787_v7  ;;  %v3536_v10 = vpop.f32.mrb[89].mxu1  ;;  %3694 = vmatmul.mubr.msk.f32.gmra.mrb[194].mxu1 %vm256_vm4, %v224_v2 }
 0x19c   :  { %3357 = vmatprep.mubr.msk.f32.mxu0 %vm3771_vm0, %v3772_v6  ;;  %3696 = vmatprep.mubr.msk.f32.mxu1 %vm3771_vm0, %v3772_v6  ;;  %v231_v10 = vld [vmem:[%s6315_s0 + $0x6c8] sm:$0xff] }
 0x19d   :  { %v2170_v14 = vmax.f32 %v1223_v8, 0.0  ;;  %v2283_v15 = vmax.f32 %v1788_v60, 0.0  ;;  %v118_v60 = vld [vmem:[%s6315_s0 + $0x340] sm:$0xff] }
 0x19e   :  { %v1227_v16 = vpop.f32.mrb[90].mxu0  ;;  %v1792_v17 = vpop.f32.mrb[90].mxu1 }
 0x19f   :  { %2396 = vst.msk [vmem:[%s6317_s3 + $0x160] sm:$0xff] %vm2351_vm5, %v2170_v14  ;;  %2509 = vst.msk [vmem:[%s6317_s3 + $0x4e8] sm:$0xff] %vm2351_vm5, %v2283_v15  ;;  %v1228_v18 = vadd.f32 %v5182_v11, %v1227_v16  ;;  %v3200_v19 = vpop.f32.mrb[91].mxu0  ;;  %3358 = vmatmul.mubr.msk.f32.gmra.mrb[196].mxu0 %vm256_vm4, %v112_v12  ;;  %v1793_v20 = vadd.f32 %v5182_v11, %v1792_v17  ;;  %v3539_v21 = vpop.f32.mrb[91].mxu1  ;;  %3697 = vmatmul.mubr.msk.f32.gmra.mrb[196].mxu1 %vm256_vm4, %v225_v13 }
 0x1a0   :  { %3360 = vmatprep.mubr.msk.f32.mxu0 %vm3771_vm0, %v3772_v6  ;;  %3699 = vmatprep.mubr.msk.f32.mxu1 %vm3771_vm0, %v3772_v6  ;;  %v232_v21 = vld [vmem:[%s6315_s0 + $0x6d0] sm:$0xff] }
 0x1a1   :  { %v2171_v24 = vmax.f32 %v1228_v18, 0.0  ;;  %v2284_v25 = vmax.f32 %v1793_v20, 0.0  ;;  %v119_v20 = vld [vmem:[%s6315_s0 + $0x348] sm:$0xff] }
 0x1a2   :  { %v1232_v26 = vpop.f32.mrb[92].mxu0  ;;  %v1797_v27 = vpop.f32.mrb[92].mxu1 }
 0x1a3   :  { %2397 = vst.msk [vmem:[%s6317_s3 + $0x168] sm:$0xff] %vm2351_vm5, %v2171_v24  ;;  %2510 = vst.msk [vmem:[%s6317_s3 + $0x4f0] sm:$0xff] %vm2351_vm5, %v2284_v25  ;;  %v1233_v28 = vadd.f32 %v5182_v11, %v1232_v26  ;;  %v3203_v29 = vpop.f32.mrb[93].mxu0  ;;  %3361 = vmatmul.mubr.msk.f32.gmra.mrb[198].mxu0 %vm256_vm4, %v113_v22  ;;  %v1798_v30 = vadd.f32 %v5182_v11, %v1797_v27  ;;  %v3542_v31 = vpop.f32.mrb[93].mxu1  ;;  %3700 = vmatmul.mubr.msk.f32.gmra.mrb[198].mxu1 %vm256_vm4, %v226_v23 }
 0x1a4   :  { %3363 = vmatprep.mubr.msk.f32.mxu0 %vm3771_vm0, %v3772_v6  ;;  %3702 = vmatprep.mubr.msk.f32.mxu1 %vm3771_vm0, %v3772_v6  ;;  %v233_v31 = vld [vmem:[%s6315_s0 + $0x6d8] sm:$0xff] }
 0x1a5   :  { %v2172_v34 = vmax.f32 %v1233_v28, 0.0  ;;  %v2285_v35 = vmax.f32 %v1798_v30, 0.0  ;;  %v120_v30 = vld [vmem:[%s6315_s0 + $0x350] sm:$0xff] }
 0x1a6   :  { %v1237_v36 = vpop.f32.mrb[94].mxu0  ;;  %v1802_v37 = vpop.f32.mrb[94].mxu1 }
 0x1a7   :  { %2398 = vst.msk [vmem:[%s6317_s3 + $0x170] sm:$0xff] %vm2351_vm5, %v2172_v34  ;;  %2511 = vst.msk [vmem:[%s6317_s3 + $0x4f8] sm:$0xff] %vm2351_vm5, %v2285_v35  ;;  %v1238_v38 = vadd.f32 %v5182_v11, %v1237_v36  ;;  %v3206_v39 = vpop.f32.mrb[95].mxu0  ;;  %3364 = vmatmul.mubr.msk.f32.gmra.mrb[200].mxu0 %vm256_vm4, %v114_v32  ;;  %v1803_v40 = vadd.f32 %v5182_v11, %v1802_v37  ;;  %v3545_v41 = vpop.f32.mrb[95].mxu1  ;;  %3703 = vmatmul.mubr.msk.f32.gmra.mrb[200].mxu1 %vm256_vm4, %v227_v33 }
 0x1a8   :  { %3366 = vmatprep.mubr.msk.f32.mxu0 %vm3771_vm0, %v3772_v6  ;;  %3705 = vmatprep.mubr.msk.f32.mxu1 %vm3771_vm0, %v3772_v6  ;;  %v234_v41 = vld [vmem:[%s6315_s0 + $0x6e0] sm:$0xff] }
 0x1a9   :  { %v2173_v44 = vmax.f32 %v1238_v38, 0.0  ;;  %v2286_v45 = vmax.f32 %v1803_v40, 0.0  ;;  %v121_v40 = vld [vmem:[%s6315_s0 + $0x358] sm:$0xff] }
 0x1aa   :  { %v1242_v46 = vpop.f32.mrb[96].mxu0  ;;  %v1807_v47 = vpop.f32.mrb[96].mxu1 }
 0x1ab   :  { %2399 = vst.msk [vmem:[%s6317_s3 + $0x178] sm:$0xff] %vm2351_vm5, %v2173_v44  ;;  %2512 = vst.msk [vmem:[%s6317_s3 + $0x500] sm:$0xff] %vm2351_vm5, %v2286_v45  ;;  %v1243_v48 = vadd.f32 %v5182_v11, %v1242_v46  ;;  %v3209_v49 = vpop.f32.mrb[97].mxu0  ;;  %3367 = vmatmul.mubr.msk.f32.gmra.mrb[202].mxu0 %vm256_vm4, %v115_v42  ;;  %v1808_v50 = vadd.f32 %v5182_v11, %v1807_v47  ;;  %v3548_v51 = vpop.f32.mrb[97].mxu1  ;;  %3706 = vmatmul.mubr.msk.f32.gmra.mrb[202].mxu1 %vm256_vm4, %v228_v43 }
 0x1ac   :  { %3369 = vmatprep.mubr.msk.f32.mxu0 %vm3771_vm0, %v3772_v6  ;;  %3708 = vmatprep.mubr.msk.f32.mxu1 %vm3771_vm0, %v3772_v6  ;;  %v235_v51 = vld [vmem:[%s6315_s0 + $0x6e8] sm:$0xff] }
 0x1ad   :  { %v2174_v54 = vmax.f32 %v1243_v48, 0.0  ;;  %v2287_v55 = vmax.f32 %v1808_v50, 0.0  ;;  %v122_v50 = vld [vmem:[%s6315_s0 + $0x360] sm:$0xff] }
 0x1ae   :  { %v1247_v56 = vpop.f32.mrb[98].mxu0  ;;  %v1812_v57 = vpop.f32.mrb[98].mxu1 }
 0x1af   :  { %2400 = vst.msk [vmem:[%s6317_s3 + $0x180] sm:$0xff] %vm2351_vm5, %v2174_v54  ;;  %2513 = vst.msk [vmem:[%s6317_s3 + $0x508] sm:$0xff] %vm2351_vm5, %v2287_v55  ;;  %v1248_v58 = vadd.f32 %v5182_v11, %v1247_v56  ;;  %v3212_v59 = vpop.f32.mrb[99].mxu0  ;;  %3370 = vmatmul.mubr.msk.f32.gmra.mrb[204].mxu0 %vm256_vm4, %v116_v52  ;;  %v1813_v61 = vadd.f32 %v5182_v11, %v1812_v57  ;;  %v3551_v62 = vpop.f32.mrb[99].mxu1  ;;  %3709 = vmatmul.mubr.msk.f32.gmra.mrb[204].mxu1 %vm256_vm4, %v229_v53 }
 0x1b0   :  { %3372 = vmatprep.mubr.msk.f32.mxu0 %vm3771_vm0, %v3772_v6  ;;  %3711 = vmatprep.mubr.msk.f32.mxu1 %vm3771_vm0, %v3772_v6  ;;  %v236_v62 = vld [vmem:[%s6315_s0 + $0x6f0] sm:$0xff] }
 0x1b1   :  { %v2175_v1 = vmax.f32 %v1248_v58, 0.0  ;;  %v2288_v2 = vmax.f32 %v1813_v61, 0.0  ;;  %v123_v61 = vld [vmem:[%s6315_s0 + $0x368] sm:$0xff] }
 0x1b2   :  { %v1252_v3 = vpop.f32.mrb[100].mxu0  ;;  %v1817_v4 = vpop.f32.mrb[100].mxu1 }
 0x1b3   :  { %2401 = vst.msk [vmem:[%s6317_s3 + $0x188] sm:$0xff] %vm2351_vm5, %v2175_v1  ;;  %2514 = vst.msk [vmem:[%s6317_s3 + $0x510] sm:$0xff] %vm2351_vm5, %v2288_v2  ;;  %v1253_v5 = vadd.f32 %v5182_v11, %v1252_v3  ;;  %v3215_v7 = vpop.f32.mrb[101].mxu0  ;;  %3373 = vmatmul.mubr.msk.f32.gmra.mrb[206].mxu0 %vm256_vm4, %v117_v63  ;;  %v1818_v8 = vadd.f32 %v5182_v11, %v1817_v4  ;;  %v3554_v9 = vpop.f32.mrb[101].mxu1  ;;  %3712 = vmatmul.mubr.msk.f32.gmra.mrb[206].mxu1 %vm256_vm4, %v230_v0 }
 0x1b4   :  { %3375 = vmatprep.mubr.msk.f32.mxu0 %vm3771_vm0, %v3772_v6  ;;  %3714 = vmatprep.mubr.msk.f32.mxu1 %vm3771_vm0, %v3772_v6  ;;  %v237_v9 = vld [vmem:[%s6315_s0 + $0x6f8] sm:$0xff] }
 0x1b5   :  { %v2176_v12 = vmax.f32 %v1253_v5, 0.0  ;;  %v2289_v13 = vmax.f32 %v1818_v8, 0.0  ;;  %v124_v8 = vld [vmem:[%s6315_s0 + $0x370] sm:$0xff] }
 0x1b6   :  { %v1257_v14 = vpop.f32.mrb[102].mxu0  ;;  %v1822_v15 = vpop.f32.mrb[102].mxu1 }
 0x1b7   :  { %2402 = vst.msk [vmem:[%s6317_s3 + $0x190] sm:$0xff] %vm2351_vm5, %v2176_v12  ;;  %2515 = vst.msk [vmem:[%s6317_s3 + $0x518] sm:$0xff] %vm2351_vm5, %v2289_v13  ;;  %v1258_v16 = vadd.f32 %v5182_v11, %v1257_v14  ;;  %v3218_v17 = vpop.f32.mrb[103].mxu0  ;;  %3376 = vmatmul.mubr.msk.f32.gmra.mrb[208].mxu0 %vm256_vm4, %v118_v60  ;;  %v1823_v18 = vadd.f32 %v5182_v11, %v1822_v15  ;;  %v3557_v19 = vpop.f32.mrb[103].mxu1  ;;  %3715 = vmatmul.mubr.msk.f32.gmra.mrb[208].mxu1 %vm256_vm4, %v231_v10 }
 0x1b8   :  { %3378 = vmatprep.mubr.msk.f32.mxu0 %vm3771_vm0, %v3772_v6  ;;  %3717 = vmatprep.mubr.msk.f32.mxu1 %vm3771_vm0, %v3772_v6  ;;  %v238_v19 = vld [vmem:[%s6315_s0 + $0x700] sm:$0xff] }
 0x1b9   :  { %v2177_v22 = vmax.f32 %v1258_v16, 0.0  ;;  %v2290_v23 = vmax.f32 %v1823_v18, 0.0  ;;  %v125_v18 = vld [vmem:[%s6315_s0 + $0x378] sm:$0xff] }
 0x1ba   :  { %v1262_v24 = vpop.f32.mrb[104].mxu0  ;;  %v1827_v25 = vpop.f32.mrb[104].mxu1 }
 0x1bb   :  { %2403 = vst.msk [vmem:[%s6317_s3 + $0x198] sm:$0xff] %vm2351_vm5, %v2177_v22  ;;  %2516 = vst.msk [vmem:[%s6317_s3 + $0x520] sm:$0xff] %vm2351_vm5, %v2290_v23  ;;  %v1263_v26 = vadd.f32 %v5182_v11, %v1262_v24  ;;  %v3221_v27 = vpop.f32.mrb[105].mxu0  ;;  %3379 = vmatmul.mubr.msk.f32.gmra.mrb[210].mxu0 %vm256_vm4, %v119_v20  ;;  %v1828_v28 = vadd.f32 %v5182_v11, %v1827_v25  ;;  %v3560_v29 = vpop.f32.mrb[105].mxu1  ;;  %3718 = vmatmul.mubr.msk.f32.gmra.mrb[210].mxu1 %vm256_vm4, %v232_v21 }
 0x1bc   :  { %3381 = vmatprep.mubr.msk.f32.mxu0 %vm3771_vm0, %v3772_v6  ;;  %3720 = vmatprep.mubr.msk.f32.mxu1 %vm3771_vm0, %v3772_v6 }
 0x1bd   :  { %v2178_v32 = vmax.f32 %v1263_v26, 0.0  ;;  %v2291_v33 = vmax.f32 %v1828_v28, 0.0  ;;  %v126_v28 = vld [vmem:[%s6315_s0 + $0x380] sm:$0xff] }
 0x1be   :  { %v1267_v34 = vpop.f32.mrb[106].mxu0  ;;  %v1832_v35 = vpop.f32.mrb[106].mxu1 }
 0x1bf   :  { %2404 = vst.msk [vmem:[%s6317_s3 + $0x1a0] sm:$0xff] %vm2351_vm5, %v2178_v32  ;;  %2517 = vst.msk [vmem:[%s6317_s3 + $0x528] sm:$0xff] %vm2351_vm5, %v2291_v33  ;;  %v1268_v36 = vadd.f32 %v5182_v11, %v1267_v34  ;;  %v3224_v37 = vpop.f32.mrb[107].mxu0  ;;  %3382 = vmatmul.mubr.msk.f32.gmra.mrb[212].mxu0 %vm256_vm4, %v120_v30  ;;  %v1833_v38 = vadd.f32 %v5182_v11, %v1832_v35  ;;  %v3563_v39 = vpop.f32.mrb[107].mxu1  ;;  %3721 = vmatmul.mubr.msk.f32.gmra.mrb[212].mxu1 %vm256_vm4, %v233_v31 }
 0x1c0   :  { %3384 = vmatprep.mubr.msk.f32.mxu0 %vm3771_vm0, %v3772_v6  ;;  %3723 = vmatprep.mubr.msk.f32.mxu1 %vm3771_vm0, %v3772_v6 }
 0x1c1   :  { %v2179_v42 = vmax.f32 %v1268_v36, 0.0  ;;  %v2292_v43 = vmax.f32 %v1833_v38, 0.0 }
 0x1c2   :  { %v1272_v44 = vpop.f32.mrb[108].mxu0  ;;  %v1837_v45 = vpop.f32.mrb[108].mxu1 }
 0x1c3   :  { %2405 = vst.msk [vmem:[%s6317_s3 + $0x1a8] sm:$0xff] %vm2351_vm5, %v2179_v42  ;;  %2518 = vst.msk [vmem:[%s6317_s3 + $0x530] sm:$0xff] %vm2351_vm5, %v2292_v43  ;;  %v1273_v46 = vadd.f32 %v5182_v11, %v1272_v44  ;;  %v3227_v47 = vpop.f32.mrb[109].mxu0  ;;  %3385 = vmatmul.mubr.msk.f32.gmra.mrb[214].mxu0 %vm256_vm4, %v121_v40  ;;  %v1838_v48 = vadd.f32 %v5182_v11, %v1837_v45  ;;  %v3566_v49 = vpop.f32.mrb[109].mxu1  ;;  %3724 = vmatmul.mubr.msk.f32.gmra.mrb[214].mxu1 %vm256_vm4, %v234_v41 }
 0x1c4   :  { %3387 = vmatprep.mubr.msk.f32.mxu0 %vm3771_vm0, %v3772_v6  ;;  %3726 = vmatprep.mubr.msk.f32.mxu1 %vm3771_vm0, %v3772_v6 }
 0x1c5   :  { %v2180_v52 = vmax.f32 %v1273_v46, 0.0  ;;  %v2293_v53 = vmax.f32 %v1838_v48, 0.0 }
 0x1c6   :  { %v1277_v54 = vpop.f32.mrb[110].mxu0  ;;  %v1842_v55 = vpop.f32.mrb[110].mxu1 }
 0x1c7   :  { %2406 = vst.msk [vmem:[%s6317_s3 + $0x1b0] sm:$0xff] %vm2351_vm5, %v2180_v52  ;;  %2519 = vst.msk [vmem:[%s6317_s3 + $0x538] sm:$0xff] %vm2351_vm5, %v2293_v53  ;;  %v1278_v56 = vadd.f32 %v5182_v11, %v1277_v54  ;;  %v3230_v57 = vpop.f32.mrb[111].mxu0  ;;  %3388 = vmatmul.mubr.msk.f32.gmra.mrb[216].mxu0 %vm256_vm4, %v122_v50  ;;  %v1843_v58 = vadd.f32 %v5182_v11, %v1842_v55  ;;  %v3569_v59 = vpop.f32.mrb[111].mxu1  ;;  %3727 = vmatmul.mubr.msk.f32.gmra.mrb[216].mxu1 %vm256_vm4, %v235_v51 }
 0x1c8   :  { %3390 = vmatprep.mubr.msk.f32.mxu0 %vm3771_vm0, %v3772_v6  ;;  %3729 = vmatprep.mubr.msk.f32.mxu1 %vm3771_vm0, %v3772_v6 }
 0x1c9   :  { %v2181_v63 = vmax.f32 %v1278_v56, 0.0  ;;  %v2294_v0 = vmax.f32 %v1843_v58, 0.0 }
 0x1ca   :  { %v1282_v1 = vpop.f32.mrb[112].mxu0  ;;  %v1847_v2 = vpop.f32.mrb[112].mxu1 }
 0x1cb   :  { %2407 = vst.msk [vmem:[%s6317_s3 + $0x1b8] sm:$0xff] %vm2351_vm5, %v2181_v63  ;;  %2520 = vst.msk [vmem:[%s6317_s3 + $0x540] sm:$0xff] %vm2351_vm5, %v2294_v0  ;;  %v1283_v3 = vadd.f32 %v5182_v11, %v1282_v1  ;;  %v3233_v4 = vpop.f32.mrb[113].mxu0  ;;  %3391 = vmatmul.mubr.msk.f32.gmra.mrb[218].mxu0 %vm256_vm4, %v123_v61  ;;  %v1848_v5 = vadd.f32 %v5182_v11, %v1847_v2  ;;  %v3572_v7 = vpop.f32.mrb[113].mxu1  ;;  %3730 = vmatmul.mubr.msk.f32.gmra.mrb[218].mxu1 %vm256_vm4, %v236_v62 }
 0x1cc   :  { %3393 = vmatprep.mubr.msk.f32.mxu0 %vm3771_vm0, %v3772_v6  ;;  %3732 = vmatprep.mubr.msk.f32.mxu1 %vm3771_vm0, %v3772_v6 }
 0x1cd   :  { %v2182_v60 = vmax.f32 %v1283_v3, 0.0  ;;  %v2295_v10 = vmax.f32 %v1848_v5, 0.0 }
 0x1ce   :  { %v1287_v12 = vpop.f32.mrb[114].mxu0  ;;  %v1852_v13 = vpop.f32.mrb[114].mxu1 }
 0x1cf   :  { %2408 = vst.msk [vmem:[%s6317_s3 + $0x1c0] sm:$0xff] %vm2351_vm5, %v2182_v60  ;;  %2521 = vst.msk [vmem:[%s6317_s3 + $0x548] sm:$0xff] %vm2351_vm5, %v2295_v10  ;;  %v1288_v14 = vadd.f32 %v5182_v11, %v1287_v12  ;;  %v3236_v15 = vpop.f32.mrb[115].mxu0  ;;  %3394 = vmatmul.mubr.msk.f32.gmra.mrb[220].mxu0 %vm256_vm4, %v124_v8  ;;  %v1853_v16 = vadd.f32 %v5182_v11, %v1852_v13  ;;  %v3575_v17 = vpop.f32.mrb[115].mxu1  ;;  %3733 = vmatmul.mubr.msk.f32.gmra.mrb[220].mxu1 %vm256_vm4, %v237_v9 }
 0x1d0   :  { %3396 = vmatprep.mubr.msk.f32.mxu0 %vm3771_vm0, %v3772_v6  ;;  %3735 = vmatprep.mubr.msk.f32.mxu1 %vm3771_vm0, %v3772_v6 }
 0x1d1   :  { %v2183_v20 = vmax.f32 %v1288_v14, 0.0  ;;  %v2296_v21 = vmax.f32 %v1853_v16, 0.0 }
 0x1d2   :  { %v1292_v22 = vpop.f32.mrb[116].mxu0  ;;  %v1857_v23 = vpop.f32.mrb[116].mxu1 }
 0x1d3   :  { %2409 = vst.msk [vmem:[%s6317_s3 + $0x1c8] sm:$0xff] %vm2351_vm5, %v2183_v20  ;;  %2522 = vst.msk [vmem:[%s6317_s3 + $0x550] sm:$0xff] %vm2351_vm5, %v2296_v21  ;;  %v1293_v24 = vadd.f32 %v5182_v11, %v1292_v22  ;;  %v3239_v25 = vpop.f32.mrb[117].mxu0  ;;  %3397 = vmatmul.mubr.msk.f32.gmra.mrb[222].mxu0 %vm256_vm4, %v125_v18  ;;  %v1858_v26 = vadd.f32 %v5182_v11, %v1857_v23  ;;  %v3578_v27 = vpop.f32.mrb[117].mxu1  ;;  %3736 = vmatmul.mubr.msk.f32.gmra.mrb[222].mxu1 %vm256_vm4, %v238_v19 }
 0x1d4   :  { %3399 = vmatprep.mubr.msk.f32.mxu0 %vm3771_vm0, %v3772_v6 }
 0x1d5   :  { %v2184_v29 = vmax.f32 %v1293_v24, 0.0  ;;  %v2297_v30 = vmax.f32 %v1858_v26, 0.0 }
 0x1d6   :  { %v1297_v31 = vpop.f32.mrb[118].mxu0  ;;  %v1862_v32 = vpop.f32.mrb[118].mxu1 }
 0x1d7   :  { %2410 = vst.msk [vmem:[%s6317_s3 + $0x1d0] sm:$0xff] %vm2351_vm5, %v2184_v29  ;;  %2523 = vst.msk [vmem:[%s6317_s3 + $0x558] sm:$0xff] %vm2351_vm5, %v2297_v30  ;;  %v1298_v6 = vadd.f32 %v5182_v11, %v1297_v31  ;;  %v3242_v33 = vpop.f32.mrb[119].mxu0  ;;  %3400 = vmatmul.mubr.msk.f32.gmra.mrb[224].mxu0 %vm256_vm4, %v126_v28  ;;  %v1863_v34 = vadd.f32 %v5182_v11, %v1862_v32  ;;  %v3581_v35 = vpop.f32.mrb[119].mxu1 }
 0x1d8   :  { %v5858_v35 = vld [vmem:[%s6316_s2] ss:$0 sm:$0xff] }
 0x1d9   :  { %v2185_v36 = vmax.f32 %v1298_v6, 0.0  ;;  %v2298_v37 = vmax.f32 %v1863_v34, 0.0 }
 0x1da   :  { %v1302_v38 = vpop.f32.mrb[120].mxu0  ;;  %v1867_v39 = vpop.f32.mrb[120].mxu1 }
 0x1db   :  { %2411 = vst.msk [vmem:[%s6317_s3 + $0x1d8] sm:$0xff] %vm2351_vm5, %v2185_v36  ;;  %2524 = vst.msk [vmem:[%s6317_s3 + $0x560] sm:$0xff] %vm2351_vm5, %v2298_v37  ;;  %v1303_v40 = vadd.f32 %v5182_v11, %v1302_v38  ;;  %v3245_v41 = vpop.f32.mrb[121].mxu0  ;;  %v1868_v42 = vadd.f32 %v5182_v11, %v1867_v39  ;;  %v3584_v43 = vpop.f32.mrb[121].mxu1 }
 0x1dd   :  { %v2186_v44 = vmax.f32 %v1303_v40, 0.0  ;;  %v2299_v45 = vmax.f32 %v1868_v42, 0.0 }
 0x1de   :  { %v1307_v46 = vpop.f32.mrb[122].mxu0  ;;  %v1872_v47 = vpop.f32.mrb[122].mxu1 }
 0x1df   :  { %2412 = vst.msk [vmem:[%s6317_s3 + $0x1e0] sm:$0xff] %vm2351_vm5, %v2186_v44  ;;  %2525 = vst.msk [vmem:[%s6317_s3 + $0x568] sm:$0xff] %vm2351_vm5, %v2299_v45  ;;  %v1308_v48 = vadd.f32 %v5182_v11, %v1307_v46  ;;  %v3248_v49 = vpop.f32.mrb[123].mxu0  ;;  %v1873_v50 = vadd.f32 %v5182_v11, %v1872_v47  ;;  %v3587_v51 = vpop.f32.mrb[123].mxu1 }
 0x1e1   :  { %v2187_v52 = vmax.f32 %v1308_v48, 0.0  ;;  %v2300_v53 = vmax.f32 %v1873_v50, 0.0 }
 0x1e2   :  { %v1312_v54 = vpop.f32.mrb[124].mxu0  ;;  %v1877_v55 = vpop.f32.mrb[124].mxu1 }
 0x1e3   :  { %2413 = vst.msk [vmem:[%s6317_s3 + $0x1e8] sm:$0xff] %vm2351_vm5, %v2187_v52  ;;  %2526 = vst.msk [vmem:[%s6317_s3 + $0x570] sm:$0xff] %vm2351_vm5, %v2300_v53  ;;  %v1313_v56 = vadd.f32 %v5182_v11, %v1312_v54  ;;  %v3251_v57 = vpop.f32.mrb[125].mxu0  ;;  %v1878_v58 = vadd.f32 %v5182_v11, %v1877_v55  ;;  %v3590_v59 = vpop.f32.mrb[125].mxu1 }
 0x1e5   :  { %v2188_v61 = vmax.f32 %v1313_v56, 0.0  ;;  %v2301_v62 = vmax.f32 %v1878_v58, 0.0 }
 0x1e6   :  { %v1317_v63 = vpop.f32.mrb[126].mxu0  ;;  %v1882_v0 = vpop.f32.mrb[126].mxu1 }
 0x1e7   :  { %2414 = vst.msk [vmem:[%s6317_s3 + $0x1f0] sm:$0xff] %vm2351_vm5, %v2188_v61  ;;  %2527 = vst.msk [vmem:[%s6317_s3 + $0x578] sm:$0xff] %vm2351_vm5, %v2301_v62  ;;  %v1318_v1 = vadd.f32 %v5182_v11, %v1317_v63  ;;  %v3254_v2 = vpop.f32.mrb[127].mxu0  ;;  %v1883_v3 = vadd.f32 %v5182_v11, %v1882_v0  ;;  %v3593_v4 = vpop.f32.mrb[127].mxu1 }
 0x1e9   :  { %v2189_v5 = vmax.f32 %v1318_v1, 0.0  ;;  %v2302_v7 = vmax.f32 %v1883_v3, 0.0 }
 0x1ea   :  { %v1322_v8 = vpop.f32.mrb[128].mxu0  ;;  %v1887_v9 = vpop.f32.mrb[128].mxu1 }
 0x1eb   :  { %2415 = vst.msk [vmem:[%s6317_s3 + $0x1f8] sm:$0xff] %vm2351_vm5, %v2189_v5  ;;  %2528 = vst.msk [vmem:[%s6317_s3 + $0x580] sm:$0xff] %vm2351_vm5, %v2302_v7  ;;  %v1323_v60 = vadd.f32 %v5182_v11, %v1322_v8  ;;  %v3257_v10 = vpop.f32.mrb[129].mxu0  ;;  %v1888_v12 = vadd.f32 %v5182_v11, %v1887_v9  ;;  %v3596_v13 = vpop.f32.mrb[129].mxu1 }
 0x1ed   :  { %v2190_v14 = vmax.f32 %v1323_v60, 0.0  ;;  %v2303_v15 = vmax.f32 %v1888_v12, 0.0 }
 0x1ee   :  { %v1327_v16 = vpop.f32.mrb[130].mxu0  ;;  %v1892_v17 = vpop.f32.mrb[130].mxu1 }
 0x1ef   :  { %2416 = vst.msk [vmem:[%s6317_s3 + $0x200] sm:$0xff] %vm2351_vm5, %v2190_v14  ;;  %2529 = vst.msk [vmem:[%s6317_s3 + $0x588] sm:$0xff] %vm2351_vm5, %v2303_v15  ;;  %v1328_v18 = vadd.f32 %v5182_v11, %v1327_v16  ;;  %v3260_v19 = vpop.f32.mrb[131].mxu0  ;;  %v1893_v20 = vadd.f32 %v5182_v11, %v1892_v17  ;;  %v3599_v21 = vpop.f32.mrb[131].mxu1 }
 0x1f1   :  { %v2191_v22 = vmax.f32 %v1328_v18, 0.0  ;;  %v2304_v23 = vmax.f32 %v1893_v20, 0.0 }
 0x1f2   :  { %v1332_v24 = vpop.f32.mrb[132].mxu0  ;;  %v1897_v25 = vpop.f32.mrb[132].mxu1 }
 0x1f3   :  { %2417 = vst.msk [vmem:[%s6317_s3 + $0x208] sm:$0xff] %vm2351_vm5, %v2191_v22  ;;  %2530 = vst.msk [vmem:[%s6317_s3 + $0x590] sm:$0xff] %vm2351_vm5, %v2304_v23  ;;  %v1333_v26 = vadd.f32 %v5182_v11, %v1332_v24  ;;  %v3263_v27 = vpop.f32.mrb[133].mxu0  ;;  %v1898_v28 = vadd.f32 %v5182_v11, %v1897_v25  ;;  %v3602_v29 = vpop.f32.mrb[133].mxu1 }
 0x1f5   :  { %v2192_v30 = vmax.f32 %v1333_v26, 0.0  ;;  %v2305_v31 = vmax.f32 %v1898_v28, 0.0 }
 0x1f6   :  { %v1337_v32 = vpop.f32.mrb[134].mxu0  ;;  %v1902_v6 = vpop.f32.mrb[134].mxu1 }
 0x1f7   :  { %2418 = vst.msk [vmem:[%s6317_s3 + $0x210] sm:$0xff] %vm2351_vm5, %v2192_v30  ;;  %2531 = vst.msk [vmem:[%s6317_s3 + $0x598] sm:$0xff] %vm2351_vm5, %v2305_v31  ;;  %v1338_v33 = vadd.f32 %v5182_v11, %v1337_v32  ;;  %v3266_v34 = vpop.f32.mrb[135].mxu0  ;;  %v1903_v36 = vadd.f32 %v5858_v35, %v1902_v6  ;;  %v3605_v37 = vpop.f32.mrb[135].mxu1 }
 0x1f9   :  { %v2193_v38 = vmax.f32 %v1338_v33, 0.0  ;;  %v2306_v39 = vmax.f32 %v1903_v36, 0.0 }
 0x1fa   :  { %v1342_v40 = vpop.f32.mrb[136].mxu0  ;;  %v1907_v41 = vpop.f32.mrb[136].mxu1 }
 0x1fb   :  { %2419 = vst.msk [vmem:[%s6317_s3 + $0x218] sm:$0xff] %vm2351_vm5, %v2193_v38  ;;  %2532 = vst.msk [vmem:[%s6317_s3 + $0x5a0] sm:$0xff] %vm2351_vm5, %v2306_v39  ;;  %v1343_v11 = vadd.f32 %v5858_v35, %v1342_v40  ;;  %v3269_v42 = vpop.f32.mrb[137].mxu0  ;;  %v1908_v43 = vadd.f32 %v5858_v35, %v1907_v41  ;;  %v3608_v44 = vpop.f32.mrb[137].mxu1 }
 0x1fd   :  { %v2194_v45 = vmax.f32 %v1343_v11, 0.0  ;;  %v2307_v46 = vmax.f32 %v1908_v43, 0.0 }
 0x1fe   :  { %v1347_v47 = vpop.f32.mrb[138].mxu0  ;;  %v1912_v48 = vpop.f32.mrb[138].mxu1 }
 0x1ff   :  { %2420 = vst.msk [vmem:[%s6317_s3 + $0x220] sm:$0xff] %vm2351_vm5, %v2194_v45  ;;  %2533 = vst.msk [vmem:[%s6317_s3 + $0x5a8] sm:$0xff] %vm2351_vm5, %v2307_v46  ;;  %v1348_v49 = vadd.f32 %v5858_v35, %v1347_v47  ;;  %v3272_v50 = vpop.f32.mrb[139].mxu0  ;;  %v1913_v51 = vadd.f32 %v5858_v35, %v1912_v48  ;;  %v3611_v52 = vpop.f32.mrb[139].mxu1 }
 0x201   :  { %v2195_v53 = vmax.f32 %v1348_v49, 0.0  ;;  %v2308_v54 = vmax.f32 %v1913_v51, 0.0 }
 0x202   :  { %v1352_v55 = vpop.f32.mrb[140].mxu0  ;;  %v1917_v56 = vpop.f32.mrb[140].mxu1 }
 0x203   :  { %2421 = vst.msk [vmem:[%s6317_s3 + $0x228] sm:$0xff] %vm2351_vm5, %v2195_v53  ;;  %2534 = vst.msk [vmem:[%s6317_s3 + $0x5b0] sm:$0xff] %vm2351_vm5, %v2308_v54  ;;  %v1353_v57 = vadd.f32 %v5858_v35, %v1352_v55  ;;  %v3275_v58 = vpop.f32.mrb[141].mxu0  ;;  %v1918_v59 = vadd.f32 %v5858_v35, %v1917_v56  ;;  %v3614_v61 = vpop.f32.mrb[141].mxu1 }
 0x205   :  { %v2196_v62 = vmax.f32 %v1353_v57, 0.0  ;;  %v2309_v63 = vmax.f32 %v1918_v59, 0.0 }
 0x206   :  { %v1357_v0 = vpop.f32.mrb[142].mxu0  ;;  %v1922_v1 = vpop.f32.mrb[142].mxu1 }
 0x207   :  { %2422 = vst.msk [vmem:[%s6317_s3 + $0x230] sm:$0xff] %vm2351_vm5, %v2196_v62  ;;  %2535 = vst.msk [vmem:[%s6317_s3 + $0x5b8] sm:$0xff] %vm2351_vm5, %v2309_v63  ;;  %v1358_v2 = vadd.f32 %v5858_v35, %v1357_v0  ;;  %v3278_v3 = vpop.f32.mrb[143].mxu0  ;;  %v1923_v4 = vadd.f32 %v5858_v35, %v1922_v1  ;;  %v3617_v5 = vpop.f32.mrb[143].mxu1 }
 0x209   :  { %v2197_v7 = vmax.f32 %v1358_v2, 0.0  ;;  %v2310_v8 = vmax.f32 %v1923_v4, 0.0 }
 0x20a   :  { %v1362_v9 = vpop.f32.mrb[144].mxu0  ;;  %v1927_v60 = vpop.f32.mrb[144].mxu1 }
 0x20b   :  { %2423 = vst.msk [vmem:[%s6317_s3 + $0x238] sm:$0xff] %vm2351_vm5, %v2197_v7  ;;  %2536 = vst.msk [vmem:[%s6317_s3 + $0x5c0] sm:$0xff] %vm2351_vm5, %v2310_v8  ;;  %v1363_v10 = vadd.f32 %v5858_v35, %v1362_v9  ;;  %v3281_v12 = vpop.f32.mrb[145].mxu0  ;;  %v1928_v13 = vadd.f32 %v5858_v35, %v1927_v60  ;;  %v3620_v14 = vpop.f32.mrb[145].mxu1 }
 0x20d   :  { %v2198_v15 = vmax.f32 %v1363_v10, 0.0  ;;  %v2311_v16 = vmax.f32 %v1928_v13, 0.0 }
 0x20e   :  { %v1367_v17 = vpop.f32.mrb[146].mxu0  ;;  %v1932_v18 = vpop.f32.mrb[146].mxu1 }
 0x20f   :  { %2424 = vst.msk [vmem:[%s6317_s3 + $0x240] sm:$0xff] %vm2351_vm5, %v2198_v15  ;;  %2537 = vst.msk [vmem:[%s6317_s3 + $0x5c8] sm:$0xff] %vm2351_vm5, %v2311_v16  ;;  %v1368_v19 = vadd.f32 %v5858_v35, %v1367_v17  ;;  %v3284_v20 = vpop.f32.mrb[147].mxu0  ;;  %v1933_v21 = vadd.f32 %v5858_v35, %v1932_v18  ;;  %v3623_v22 = vpop.f32.mrb[147].mxu1 }
 0x211   :  { %v2199_v23 = vmax.f32 %v1368_v19, 0.0  ;;  %v2312_v24 = vmax.f32 %v1933_v21, 0.0 }
 0x212   :  { %v1372_v25 = vpop.f32.mrb[148].mxu0  ;;  %v1937_v26 = vpop.f32.mrb[148].mxu1 }
 0x213   :  { %2425 = vst.msk [vmem:[%s6317_s3 + $0x248] sm:$0xff] %vm2351_vm5, %v2199_v23  ;;  %2538 = vst.msk [vmem:[%s6317_s3 + $0x5d0] sm:$0xff] %vm2351_vm5, %v2312_v24  ;;  %v1373_v27 = vadd.f32 %v5858_v35, %v1372_v25  ;;  %v3287_v28 = vpop.f32.mrb[149].mxu0  ;;  %v1938_v29 = vadd.f32 %v5858_v35, %v1937_v26  ;;  %v3626_v30 = vpop.f32.mrb[149].mxu1 }
 0x215   :  { %v2200_v31 = vmax.f32 %v1373_v27, 0.0  ;;  %v2313_v32 = vmax.f32 %v1938_v29, 0.0 }
 0x216   :  { %v1377_v6 = vpop.f32.mrb[150].mxu0  ;;  %v1942_v33 = vpop.f32.mrb[150].mxu1 }
 0x217   :  { %2426 = vst.msk [vmem:[%s6317_s3 + $0x250] sm:$0xff] %vm2351_vm5, %v2200_v31  ;;  %2539 = vst.msk [vmem:[%s6317_s3 + $0x5d8] sm:$0xff] %vm2351_vm5, %v2313_v32  ;;  %v1378_v34 = vadd.f32 %v5858_v35, %v1377_v6  ;;  %v3290_v36 = vpop.f32.mrb[151].mxu0  ;;  %v1943_v37 = vadd.f32 %v5858_v35, %v1942_v33  ;;  %v3629_v38 = vpop.f32.mrb[151].mxu1 }
 0x219   :  { %v2201_v39 = vmax.f32 %v1378_v34, 0.0  ;;  %v2314_v40 = vmax.f32 %v1943_v37, 0.0 }
 0x21a   :  { %v1382_v41 = vpop.f32.mrb[152].mxu0  ;;  %v1947_v11 = vpop.f32.mrb[152].mxu1 }
 0x21b   :  { %2427 = vst.msk [vmem:[%s6317_s3 + $0x258] sm:$0xff] %vm2351_vm5, %v2201_v39  ;;  %2540 = vst.msk [vmem:[%s6317_s3 + $0x5e0] sm:$0xff] %vm2351_vm5, %v2314_v40  ;;  %v1383_v42 = vadd.f32 %v5858_v35, %v1382_v41  ;;  %v3293_v43 = vpop.f32.mrb[153].mxu0  ;;  %v1948_v44 = vadd.f32 %v5858_v35, %v1947_v11  ;;  %v3632_v45 = vpop.f32.mrb[153].mxu1 }
 0x21d   :  { %v2202_v46 = vmax.f32 %v1383_v42, 0.0  ;;  %v2315_v47 = vmax.f32 %v1948_v44, 0.0 }
 0x21e   :  { %v1387_v48 = vpop.f32.mrb[154].mxu0  ;;  %v1952_v49 = vpop.f32.mrb[154].mxu1 }
 0x21f   :  { %2428 = vst.msk [vmem:[%s6317_s3 + $0x260] sm:$0xff] %vm2351_vm5, %v2202_v46  ;;  %2541 = vst.msk [vmem:[%s6317_s3 + $0x5e8] sm:$0xff] %vm2351_vm5, %v2315_v47  ;;  %v1388_v50 = vadd.f32 %v5858_v35, %v1387_v48  ;;  %v3296_v51 = vpop.f32.mrb[155].mxu0  ;;  %v1953_v52 = vadd.f32 %v5858_v35, %v1952_v49  ;;  %v3635_v53 = vpop.f32.mrb[155].mxu1 }
 0x221   :  { %v2203_v54 = vmax.f32 %v1388_v50, 0.0  ;;  %v2316_v55 = vmax.f32 %v1953_v52, 0.0 }
 0x222   :  { %v1392_v56 = vpop.f32.mrb[156].mxu0  ;;  %v1957_v57 = vpop.f32.mrb[156].mxu1 }
 0x223   :  { %2429 = vst.msk [vmem:[%s6317_s3 + $0x268] sm:$0xff] %vm2351_vm5, %v2203_v54  ;;  %2542 = vst.msk [vmem:[%s6317_s3 + $0x5f0] sm:$0xff] %vm2351_vm5, %v2316_v55  ;;  %v1393_v58 = vadd.f32 %v5858_v35, %v1392_v56  ;;  %v3299_v59 = vpop.f32.mrb[157].mxu0  ;;  %v1958_v61 = vadd.f32 %v5858_v35, %v1957_v57  ;;  %v3638_v62 = vpop.f32.mrb[157].mxu1 }
 0x225   :  { %v2204_v63 = vmax.f32 %v1393_v58, 0.0  ;;  %v2317_v0 = vmax.f32 %v1958_v61, 0.0 }
 0x226   :  { %v1397_v1 = vpop.f32.mrb[158].mxu0  ;;  %v1962_v2 = vpop.f32.mrb[158].mxu1 }
 0x227   :  { %2430 = vst.msk [vmem:[%s6317_s3 + $0x270] sm:$0xff] %vm2351_vm5, %v2204_v63  ;;  %2543 = vst.msk [vmem:[%s6317_s3 + $0x5f8] sm:$0xff] %vm2351_vm5, %v2317_v0  ;;  %v1398_v3 = vadd.f32 %v5858_v35, %v1397_v1  ;;  %v3302_v4 = vpop.f32.mrb[159].mxu0  ;;  %v1963_v5 = vadd.f32 %v5858_v35, %v1962_v2  ;;  %v3641_v7 = vpop.f32.mrb[159].mxu1 }
 0x229   :  { %v2205_v8 = vmax.f32 %v1398_v3, 0.0  ;;  %v2318_v9 = vmax.f32 %v1963_v5, 0.0 }
 0x22a   :  { %v1402_v60 = vpop.f32.mrb[160].mxu0  ;;  %v1967_v10 = vpop.f32.mrb[160].mxu1 }
 0x22b   :  { %2431 = vst.msk [vmem:[%s6317_s3 + $0x278] sm:$0xff] %vm2351_vm5, %v2205_v8  ;;  %2544 = vst.msk [vmem:[%s6317_s3 + $0x600] sm:$0xff] %vm2351_vm5, %v2318_v9  ;;  %v1403_v12 = vadd.f32 %v5858_v35, %v1402_v60  ;;  %v3305_v13 = vpop.f32.mrb[161].mxu0  ;;  %v1968_v14 = vadd.f32 %v5858_v35, %v1967_v10  ;;  %v3644_v15 = vpop.f32.mrb[161].mxu1 }
 0x22d   :  { %v2206_v16 = vmax.f32 %v1403_v12, 0.0  ;;  %v2319_v17 = vmax.f32 %v1968_v14, 0.0 }
 0x22e   :  { %v1407_v18 = vpop.f32.mrb[162].mxu0  ;;  %v1972_v19 = vpop.f32.mrb[162].mxu1 }
 0x22f   :  { %2432 = vst.msk [vmem:[%s6317_s3 + $0x280] sm:$0xff] %vm2351_vm5, %v2206_v16  ;;  %2545 = vst.msk [vmem:[%s6317_s3 + $0x608] sm:$0xff] %vm2351_vm5, %v2319_v17  ;;  %v1408_v20 = vadd.f32 %v5858_v35, %v1407_v18  ;;  %v3308_v21 = vpop.f32.mrb[163].mxu0  ;;  %v1973_v22 = vadd.f32 %v5858_v35, %v1972_v19  ;;  %v3647_v23 = vpop.f32.mrb[163].mxu1 }
 0x231   :  { %v2207_v24 = vmax.f32 %v1408_v20, 0.0  ;;  %v2320_v25 = vmax.f32 %v1973_v22, 0.0 }
 0x232   :  { %v1412_v26 = vpop.f32.mrb[164].mxu0  ;;  %v1977_v27 = vpop.f32.mrb[164].mxu1 }
 0x233   :  { %2433 = vst.msk [vmem:[%s6317_s3 + $0x288] sm:$0xff] %vm2351_vm5, %v2207_v24  ;;  %2546 = vst.msk [vmem:[%s6317_s3 + $0x610] sm:$0xff] %vm2351_vm5, %v2320_v25  ;;  %v1413_v28 = vadd.f32 %v5858_v35, %v1412_v26  ;;  %v3311_v29 = vpop.f32.mrb[165].mxu0  ;;  %v1978_v30 = vadd.f32 %v5858_v35, %v1977_v27  ;;  %v3650_v31 = vpop.f32.mrb[165].mxu1 }
 0x235   :  { %v2208_v32 = vmax.f32 %v1413_v28, 0.0  ;;  %v2321_v6 = vmax.f32 %v1978_v30, 0.0 }
 0x236   :  { %v1417_v33 = vpop.f32.mrb[166].mxu0  ;;  %v1982_v34 = vpop.f32.mrb[166].mxu1 }
 0x237   :  { %2434 = vst.msk [vmem:[%s6317_s3 + $0x290] sm:$0xff] %vm2351_vm5, %v2208_v32  ;;  %2547 = vst.msk [vmem:[%s6317_s3 + $0x618] sm:$0xff] %vm2351_vm5, %v2321_v6  ;;  %v1418_v36 = vadd.f32 %v5858_v35, %v1417_v33  ;;  %v3314_v37 = vpop.f32.mrb[167].mxu0  ;;  %v1983_v38 = vadd.f32 %v5858_v35, %v1982_v34  ;;  %v3653_v39 = vpop.f32.mrb[167].mxu1 }
 0x239   :  { %v2209_v40 = vmax.f32 %v1418_v36, 0.0  ;;  %v2322_v41 = vmax.f32 %v1983_v38, 0.0 }
 0x23a   :  { %v1422_v11 = vpop.f32.mrb[168].mxu0  ;;  %v1987_v42 = vpop.f32.mrb[168].mxu1 }
 0x23b   :  { %2435 = vst.msk [vmem:[%s6317_s3 + $0x298] sm:$0xff] %vm2351_vm5, %v2209_v40  ;;  %2548 = vst.msk [vmem:[%s6317_s3 + $0x620] sm:$0xff] %vm2351_vm5, %v2322_v41  ;;  %v1423_v43 = vadd.f32 %v5858_v35, %v1422_v11  ;;  %v3317_v44 = vpop.f32.mrb[169].mxu0  ;;  %v1988_v45 = vadd.f32 %v5858_v35, %v1987_v42  ;;  %v3656_v46 = vpop.f32.mrb[169].mxu1 }
 0x23d   :  { %v2210_v47 = vmax.f32 %v1423_v43, 0.0  ;;  %v2323_v48 = vmax.f32 %v1988_v45, 0.0 }
 0x23e   :  { %v1427_v49 = vpop.f32.mrb[170].mxu0  ;;  %v1992_v50 = vpop.f32.mrb[170].mxu1 }
 0x23f   :  { %2436 = vst.msk [vmem:[%s6317_s3 + $0x2a0] sm:$0xff] %vm2351_vm5, %v2210_v47  ;;  %2549 = vst.msk [vmem:[%s6317_s3 + $0x628] sm:$0xff] %vm2351_vm5, %v2323_v48  ;;  %v1428_v51 = vadd.f32 %v5858_v35, %v1427_v49  ;;  %v3320_v52 = vpop.f32.mrb[171].mxu0  ;;  %v1993_v53 = vadd.f32 %v5858_v35, %v1992_v50  ;;  %v3659_v54 = vpop.f32.mrb[171].mxu1 }
 0x241   :  { %v2211_v55 = vmax.f32 %v1428_v51, 0.0  ;;  %v2324_v56 = vmax.f32 %v1993_v53, 0.0 }
 0x242   :  { %v1432_v57 = vpop.f32.mrb[172].mxu0  ;;  %v1997_v58 = vpop.f32.mrb[172].mxu1 }
 0x243   :  { %2437 = vst.msk [vmem:[%s6317_s3 + $0x2a8] sm:$0xff] %vm2351_vm5, %v2211_v55  ;;  %2550 = vst.msk [vmem:[%s6317_s3 + $0x630] sm:$0xff] %vm2351_vm5, %v2324_v56  ;;  %v1433_v59 = vadd.f32 %v5858_v35, %v1432_v57  ;;  %v3323_v61 = vpop.f32.mrb[173].mxu0  ;;  %v1998_v62 = vadd.f32 %v5858_v35, %v1997_v58  ;;  %v3662_v63 = vpop.f32.mrb[173].mxu1 }
 0x245   :  { %v2212_v0 = vmax.f32 %v1433_v59, 0.0  ;;  %v2325_v1 = vmax.f32 %v1998_v62, 0.0 }
 0x246   :  { %v1437_v2 = vpop.f32.mrb[174].mxu0  ;;  %v2002_v3 = vpop.f32.mrb[174].mxu1 }
 0x247   :  { %2438 = vst.msk [vmem:[%s6317_s3 + $0x2b0] sm:$0xff] %vm2351_vm5, %v2212_v0  ;;  %2551 = vst.msk [vmem:[%s6317_s3 + $0x638] sm:$0xff] %vm2351_vm5, %v2325_v1  ;;  %v1438_v4 = vadd.f32 %v5858_v35, %v1437_v2  ;;  %v3326_v5 = vpop.f32.mrb[175].mxu0  ;;  %v2003_v7 = vadd.f32 %v5858_v35, %v2002_v3  ;;  %v3665_v8 = vpop.f32.mrb[175].mxu1 }
 0x249   :  { %v2213_v9 = vmax.f32 %v1438_v4, 0.0  ;;  %v2326_v60 = vmax.f32 %v2003_v7, 0.0 }
 0x24a   :  { %v1442_v10 = vpop.f32.mrb[176].mxu0  ;;  %v2007_v12 = vpop.f32.mrb[176].mxu1 }
 0x24b   :  { %2439 = vst.msk [vmem:[%s6317_s3 + $0x2b8] sm:$0xff] %vm2351_vm5, %v2213_v9  ;;  %2552 = vst.msk [vmem:[%s6317_s3 + $0x640] sm:$0xff] %vm2351_vm5, %v2326_v60  ;;  %v1443_v13 = vadd.f32 %v5858_v35, %v1442_v10  ;;  %v3329_v14 = vpop.f32.mrb[177].mxu0  ;;  %v2008_v15 = vadd.f32 %v5858_v35, %v2007_v12  ;;  %v3668_v16 = vpop.f32.mrb[177].mxu1 }
 0x24d   :  { %v2214_v17 = vmax.f32 %v1443_v13, 0.0  ;;  %v2327_v18 = vmax.f32 %v2008_v15, 0.0 }
 0x24e   :  { %v1447_v19 = vpop.f32.mrb[178].mxu0  ;;  %v2012_v20 = vpop.f32.mrb[178].mxu1 }
 0x24f   :  { %2440 = vst.msk [vmem:[%s6317_s3 + $0x2c0] sm:$0xff] %vm2351_vm5, %v2214_v17  ;;  %2553 = vst.msk [vmem:[%s6317_s3 + $0x648] sm:$0xff] %vm2351_vm5, %v2327_v18  ;;  %v1448_v21 = vadd.f32 %v5858_v35, %v1447_v19  ;;  %v3332_v22 = vpop.f32.mrb[179].mxu0  ;;  %v2013_v23 = vadd.f32 %v5858_v35, %v2012_v20  ;;  %v3671_v24 = vpop.f32.mrb[179].mxu1 }
 0x251   :  { %v2215_v25 = vmax.f32 %v1448_v21, 0.0  ;;  %v2328_v26 = vmax.f32 %v2013_v23, 0.0 }
 0x252   :  { %v1452_v27 = vpop.f32.mrb[180].mxu0  ;;  %v2017_v28 = vpop.f32.mrb[180].mxu1 }
 0x253   :  { %2441 = vst.msk [vmem:[%s6317_s3 + $0x2c8] sm:$0xff] %vm2351_vm5, %v2215_v25  ;;  %2554 = vst.msk [vmem:[%s6317_s3 + $0x650] sm:$0xff] %vm2351_vm5, %v2328_v26  ;;  %v1453_v29 = vadd.f32 %v5858_v35, %v1452_v27  ;;  %v3335_v30 = vpop.f32.mrb[181].mxu0  ;;  %v2018_v31 = vadd.f32 %v5858_v35, %v2017_v28  ;;  %v3674_v32 = vpop.f32.mrb[181].mxu1 }
 0x255   :  { %v2216_v6 = vmax.f32 %v1453_v29, 0.0  ;;  %v2329_v33 = vmax.f32 %v2018_v31, 0.0 }
 0x256   :  { %v1457_v34 = vpop.f32.mrb[182].mxu0  ;;  %v2022_v36 = vpop.f32.mrb[182].mxu1 }
 0x257   :  { %2442 = vst.msk [vmem:[%s6317_s3 + $0x2d0] sm:$0xff] %vm2351_vm5, %v2216_v6  ;;  %2555 = vst.msk [vmem:[%s6317_s3 + $0x658] sm:$0xff] %vm2351_vm5, %v2329_v33  ;;  %v1458_v37 = vadd.f32 %v5858_v35, %v1457_v34  ;;  %v3338_v38 = vpop.f32.mrb[183].mxu0  ;;  %v2023_v39 = vadd.f32 %v5858_v35, %v2022_v36  ;;  %v3677_v40 = vpop.f32.mrb[183].mxu1 }
 0x259   :  { %v2217_v41 = vmax.f32 %v1458_v37, 0.0  ;;  %v2330_v11 = vmax.f32 %v2023_v39, 0.0 }
 0x25a   :  { %v1462_v42 = vpop.f32.mrb[184].mxu0  ;;  %v2027_v43 = vpop.f32.mrb[184].mxu1 }
 0x25b   :  { %2443 = vst.msk [vmem:[%s6317_s3 + $0x2d8] sm:$0xff] %vm2351_vm5, %v2217_v41  ;;  %2556 = vst.msk [vmem:[%s6317_s3 + $0x660] sm:$0xff] %vm2351_vm5, %v2330_v11  ;;  %v1463_v44 = vadd.f32 %v5858_v35, %v1462_v42  ;;  %v3341_v45 = vpop.f32.mrb[185].mxu0  ;;  %v2028_v46 = vadd.f32 %v5858_v35, %v2027_v43  ;;  %v3680_v47 = vpop.f32.mrb[185].mxu1 }
 0x25d   :  { %v2218_v48 = vmax.f32 %v1463_v44, 0.0  ;;  %v2331_v49 = vmax.f32 %v2028_v46, 0.0 }
 0x25e   :  { %v1467_v50 = vpop.f32.mrb[186].mxu0  ;;  %v2032_v51 = vpop.f32.mrb[186].mxu1 }
 0x25f   :  { %2444 = vst.msk [vmem:[%s6317_s3 + $0x2e0] sm:$0xff] %vm2351_vm5, %v2218_v48  ;;  %2557 = vst.msk [vmem:[%s6317_s3 + $0x668] sm:$0xff] %vm2351_vm5, %v2331_v49  ;;  %v1468_v52 = vadd.f32 %v5858_v35, %v1467_v50  ;;  %v3344_v53 = vpop.f32.mrb[187].mxu0  ;;  %v2033_v54 = vadd.f32 %v5858_v35, %v2032_v51  ;;  %v3683_v55 = vpop.f32.mrb[187].mxu1 }
 0x261   :  { %v2219_v56 = vmax.f32 %v1468_v52, 0.0  ;;  %v2332_v57 = vmax.f32 %v2033_v54, 0.0 }
 0x262   :  { %v1472_v58 = vpop.f32.mrb[188].mxu0  ;;  %v2037_v59 = vpop.f32.mrb[188].mxu1 }
 0x263   :  { %2445 = vst.msk [vmem:[%s6317_s3 + $0x2e8] sm:$0xff] %vm2351_vm5, %v2219_v56  ;;  %2558 = vst.msk [vmem:[%s6317_s3 + $0x670] sm:$0xff] %vm2351_vm5, %v2332_v57  ;;  %v1473_v61 = vadd.f32 %v5858_v35, %v1472_v58  ;;  %v3347_v62 = vpop.f32.mrb[189].mxu0  ;;  %v2038_v63 = vadd.f32 %v5858_v35, %v2037_v59  ;;  %v3686_v0 = vpop.f32.mrb[189].mxu1 }
 0x265   :  { %v2220_v1 = vmax.f32 %v1473_v61, 0.0  ;;  %v2333_v2 = vmax.f32 %v2038_v63, 0.0 }
 0x266   :  { %v1477_v3 = vpop.f32.mrb[190].mxu0  ;;  %v2042_v4 = vpop.f32.mrb[190].mxu1 }
 0x267   :  { %2446 = vst.msk [vmem:[%s6317_s3 + $0x2f0] sm:$0xff] %vm2351_vm5, %v2220_v1  ;;  %2559 = vst.msk [vmem:[%s6317_s3 + $0x678] sm:$0xff] %vm2351_vm5, %v2333_v2  ;;  %v1478_v5 = vadd.f32 %v5858_v35, %v1477_v3  ;;  %v3350_v7 = vpop.f32.mrb[191].mxu0  ;;  %v2043_v8 = vadd.f32 %v5858_v35, %v2042_v4  ;;  %v3689_v9 = vpop.f32.mrb[191].mxu1 }
 0x269   :  { %v2221_v60 = vmax.f32 %v1478_v5, 0.0  ;;  %v2334_v10 = vmax.f32 %v2043_v8, 0.0 }
 0x26a   :  { %v1482_v12 = vpop.f32.mrb[192].mxu0  ;;  %v2047_v13 = vpop.f32.mrb[192].mxu1 }
 0x26b   :  { %2447 = vst.msk [vmem:[%s6317_s3 + $0x2f8] sm:$0xff] %vm2351_vm5, %v2221_v60  ;;  %2560 = vst.msk [vmem:[%s6317_s3 + $0x680] sm:$0xff] %vm2351_vm5, %v2334_v10  ;;  %v1483_v14 = vadd.f32 %v5858_v35, %v1482_v12  ;;  %v3353_v15 = vpop.f32.mrb[193].mxu0  ;;  %v2048_v16 = vadd.f32 %v5858_v35, %v2047_v13  ;;  %v3692_v17 = vpop.f32.mrb[193].mxu1 }
 0x26d   :  { %v2222_v18 = vmax.f32 %v1483_v14, 0.0  ;;  %v2335_v19 = vmax.f32 %v2048_v16, 0.0 }
 0x26e   :  { %v1487_v20 = vpop.f32.mrb[194].mxu0  ;;  %v2052_v21 = vpop.f32.mrb[194].mxu1 }
 0x26f   :  { %2448 = vst.msk [vmem:[%s6317_s3 + $0x300] sm:$0xff] %vm2351_vm5, %v2222_v18  ;;  %2561 = vst.msk [vmem:[%s6317_s3 + $0x688] sm:$0xff] %vm2351_vm5, %v2335_v19  ;;  %v1488_v22 = vadd.f32 %v5858_v35, %v1487_v20  ;;  %v3356_v23 = vpop.f32.mrb[195].mxu0  ;;  %v2053_v24 = vadd.f32 %v5858_v35, %v2052_v21  ;;  %v3695_v25 = vpop.f32.mrb[195].mxu1 }
 0x271   :  { %v2223_v26 = vmax.f32 %v1488_v22, 0.0  ;;  %v2336_v27 = vmax.f32 %v2053_v24, 0.0 }
 0x272   :  { %v1492_v28 = vpop.f32.mrb[196].mxu0  ;;  %v2057_v29 = vpop.f32.mrb[196].mxu1 }
 0x273   :  { %2449 = vst.msk [vmem:[%s6317_s3 + $0x308] sm:$0xff] %vm2351_vm5, %v2223_v26  ;;  %2562 = vst.msk [vmem:[%s6317_s3 + $0x690] sm:$0xff] %vm2351_vm5, %v2336_v27  ;;  %v1493_v30 = vadd.f32 %v5858_v35, %v1492_v28  ;;  %v3359_v31 = vpop.f32.mrb[197].mxu0  ;;  %v2058_v32 = vadd.f32 %v5858_v35, %v2057_v29  ;;  %v3698_v6 = vpop.f32.mrb[197].mxu1 }
 0x275   :  { %v2224_v33 = vmax.f32 %v1493_v30, 0.0  ;;  %v2337_v34 = vmax.f32 %v2058_v32, 0.0 }
 0x276   :  { %v1497_v36 = vpop.f32.mrb[198].mxu0  ;;  %v2062_v37 = vpop.f32.mrb[198].mxu1 }
 0x277   :  { %2450 = vst.msk [vmem:[%s6317_s3 + $0x310] sm:$0xff] %vm2351_vm5, %v2224_v33  ;;  %2563 = vst.msk [vmem:[%s6317_s3 + $0x698] sm:$0xff] %vm2351_vm5, %v2337_v34  ;;  %v1498_v38 = vadd.f32 %v5858_v35, %v1497_v36  ;;  %v3362_v39 = vpop.f32.mrb[199].mxu0  ;;  %v2063_v40 = vadd.f32 %v5858_v35, %v2062_v37  ;;  %v3701_v41 = vpop.f32.mrb[199].mxu1 }
 0x279   :  { %v2225_v11 = vmax.f32 %v1498_v38, 0.0  ;;  %v2338_v42 = vmax.f32 %v2063_v40, 0.0 }
 0x27a   :  { %v1502_v43 = vpop.f32.mrb[200].mxu0  ;;  %v2067_v44 = vpop.f32.mrb[200].mxu1 }
 0x27b   :  { %2451 = vst.msk [vmem:[%s6317_s3 + $0x318] sm:$0xff] %vm2351_vm5, %v2225_v11  ;;  %2564 = vst.msk [vmem:[%s6317_s3 + $0x6a0] sm:$0xff] %vm2351_vm5, %v2338_v42  ;;  %v1503_v45 = vadd.f32 %v5858_v35, %v1502_v43  ;;  %v3365_v46 = vpop.f32.mrb[201].mxu0  ;;  %v2068_v47 = vadd.f32 %v5858_v35, %v2067_v44  ;;  %v3704_v48 = vpop.f32.mrb[201].mxu1 }
 0x27d   :  { %v2226_v49 = vmax.f32 %v1503_v45, 0.0  ;;  %v2339_v50 = vmax.f32 %v2068_v47, 0.0 }
 0x27e   :  { %v1507_v51 = vpop.f32.mrb[202].mxu0  ;;  %v2072_v52 = vpop.f32.mrb[202].mxu1 }
 0x27f   :  { %2452 = vst.msk [vmem:[%s6317_s3 + $0x320] sm:$0xff] %vm2351_vm5, %v2226_v49  ;;  %2565 = vst.msk [vmem:[%s6317_s3 + $0x6a8] sm:$0xff] %vm2351_vm5, %v2339_v50  ;;  %v1508_v53 = vadd.f32 %v5858_v35, %v1507_v51  ;;  %v3368_v54 = vpop.f32.mrb[203].mxu0  ;;  %v2073_v55 = vadd.f32 %v5858_v35, %v2072_v52  ;;  %v3707_v56 = vpop.f32.mrb[203].mxu1 }
 0x281   :  { %v2227_v57 = vmax.f32 %v1508_v53, 0.0  ;;  %v2340_v58 = vmax.f32 %v2073_v55, 0.0 }
 0x282   :  { %v1512_v59 = vpop.f32.mrb[204].mxu0  ;;  %v2077_v61 = vpop.f32.mrb[204].mxu1 }
 0x283   :  { %2453 = vst.msk [vmem:[%s6317_s3 + $0x328] sm:$0xff] %vm2351_vm5, %v2227_v57  ;;  %2566 = vst.msk [vmem:[%s6317_s3 + $0x6b0] sm:$0xff] %vm2351_vm5, %v2340_v58  ;;  %v1513_v62 = vadd.f32 %v5858_v35, %v1512_v59  ;;  %v3371_v63 = vpop.f32.mrb[205].mxu0  ;;  %v2078_v0 = vadd.f32 %v5858_v35, %v2077_v61  ;;  %v3710_v1 = vpop.f32.mrb[205].mxu1 }
 0x285   :  { %v2228_v2 = vmax.f32 %v1513_v62, 0.0  ;;  %v2341_v3 = vmax.f32 %v2078_v0, 0.0 }
 0x286   :  { %v1517_v4 = vpop.f32.mrb[206].mxu0  ;;  %v2082_v5 = vpop.f32.mrb[206].mxu1 }
 0x287   :  { %2454 = vst.msk [vmem:[%s6317_s3 + $0x330] sm:$0xff] %vm2351_vm5, %v2228_v2  ;;  %2567 = vst.msk [vmem:[%s6317_s3 + $0x6b8] sm:$0xff] %vm2351_vm5, %v2341_v3  ;;  %v1518_v7 = vadd.f32 %v5858_v35, %v1517_v4  ;;  %v3374_v8 = vpop.f32.mrb[207].mxu0  ;;  %v2083_v9 = vadd.f32 %v5858_v35, %v2082_v5  ;;  %v3713_v60 = vpop.f32.mrb[207].mxu1 }
 0x289   :  { %v2229_v10 = vmax.f32 %v1518_v7, 0.0  ;;  %v2342_v12 = vmax.f32 %v2083_v9, 0.0 }
 0x28a   :  { %v1522_v13 = vpop.f32.mrb[208].mxu0  ;;  %v2087_v14 = vpop.f32.mrb[208].mxu1 }
 0x28b   :  { %2455 = vst.msk [vmem:[%s6317_s3 + $0x338] sm:$0xff] %vm2351_vm5, %v2229_v10  ;;  %2568 = vst.msk [vmem:[%s6317_s3 + $0x6c0] sm:$0xff] %vm2351_vm5, %v2342_v12  ;;  %v1523_v15 = vadd.f32 %v5858_v35, %v1522_v13  ;;  %v3377_v16 = vpop.f32.mrb[209].mxu0  ;;  %v2088_v17 = vadd.f32 %v5858_v35, %v2087_v14  ;;  %v3716_v18 = vpop.f32.mrb[209].mxu1 }
 0x28d   :  { %v2230_v19 = vmax.f32 %v1523_v15, 0.0  ;;  %v2343_v20 = vmax.f32 %v2088_v17, 0.0 }
 0x28e   :  { %v1527_v21 = vpop.f32.mrb[210].mxu0  ;;  %v2092_v22 = vpop.f32.mrb[210].mxu1 }
 0x28f   :  { %2456 = vst.msk [vmem:[%s6317_s3 + $0x340] sm:$0xff] %vm2351_vm5, %v2230_v19  ;;  %2569 = vst.msk [vmem:[%s6317_s3 + $0x6c8] sm:$0xff] %vm2351_vm5, %v2343_v20  ;;  %v1528_v23 = vadd.f32 %v5858_v35, %v1527_v21  ;;  %v3380_v24 = vpop.f32.mrb[211].mxu0  ;;  %v2093_v25 = vadd.f32 %v5858_v35, %v2092_v22  ;;  %v3719_v26 = vpop.f32.mrb[211].mxu1 }
 0x291   :  { %v2231_v27 = vmax.f32 %v1528_v23, 0.0  ;;  %v2344_v28 = vmax.f32 %v2093_v25, 0.0 }
 0x292   :  { %v1532_v29 = vpop.f32.mrb[212].mxu0  ;;  %v2097_v30 = vpop.f32.mrb[212].mxu1 }
 0x293   :  { %2457 = vst.msk [vmem:[%s6317_s3 + $0x348] sm:$0xff] %vm2351_vm5, %v2231_v27  ;;  %2570 = vst.msk [vmem:[%s6317_s3 + $0x6d0] sm:$0xff] %vm2351_vm5, %v2344_v28  ;;  %v1533_v31 = vadd.f32 %v5858_v35, %v1532_v29  ;;  %v3383_v32 = vpop.f32.mrb[213].mxu0  ;;  %v2098_v6 = vadd.f32 %v5858_v35, %v2097_v30  ;;  %v3722_v33 = vpop.f32.mrb[213].mxu1 }
 0x295   :  { %v2232_v34 = vmax.f32 %v1533_v31, 0.0  ;;  %v2345_v36 = vmax.f32 %v2098_v6, 0.0 }
 0x296   :  { %v1537_v37 = vpop.f32.mrb[214].mxu0  ;;  %v2102_v38 = vpop.f32.mrb[214].mxu1 }
 0x297   :  { %2458 = vst.msk [vmem:[%s6317_s3 + $0x350] sm:$0xff] %vm2351_vm5, %v2232_v34  ;;  %2571 = vst.msk [vmem:[%s6317_s3 + $0x6d8] sm:$0xff] %vm2351_vm5, %v2345_v36  ;;  %v1538_v39 = vadd.f32 %v5858_v35, %v1537_v37  ;;  %v3386_v40 = vpop.f32.mrb[215].mxu0  ;;  %v2103_v41 = vadd.f32 %v5858_v35, %v2102_v38  ;;  %v3725_v11 = vpop.f32.mrb[215].mxu1 }
 0x299   :  { %v2233_v42 = vmax.f32 %v1538_v39, 0.0  ;;  %v2346_v43 = vmax.f32 %v2103_v41, 0.0 }
 0x29a   :  { %v1542_v44 = vpop.f32.mrb[216].mxu0  ;;  %v2107_v45 = vpop.f32.mrb[216].mxu1 }
 0x29b   :  { %2459 = vst.msk [vmem:[%s6317_s3 + $0x358] sm:$0xff] %vm2351_vm5, %v2233_v42  ;;  %2572 = vst.msk [vmem:[%s6317_s3 + $0x6e0] sm:$0xff] %vm2351_vm5, %v2346_v43  ;;  %v1543_v46 = vadd.f32 %v5858_v35, %v1542_v44  ;;  %v3389_v47 = vpop.f32.mrb[217].mxu0  ;;  %v2108_v48 = vadd.f32 %v5858_v35, %v2107_v45  ;;  %v3728_v49 = vpop.f32.mrb[217].mxu1 }
 0x29d   :  { %v2234_v50 = vmax.f32 %v1543_v46, 0.0  ;;  %v2347_v51 = vmax.f32 %v2108_v48, 0.0 }
 0x29e   :  { %v1547_v52 = vpop.f32.mrb[218].mxu0  ;;  %v2112_v53 = vpop.f32.mrb[218].mxu1 }
 0x29f   :  { %2460 = vst.msk [vmem:[%s6317_s3 + $0x360] sm:$0xff] %vm2351_vm5, %v2234_v50  ;;  %2573 = vst.msk [vmem:[%s6317_s3 + $0x6e8] sm:$0xff] %vm2351_vm5, %v2347_v51  ;;  %v1548_v54 = vadd.f32 %v5858_v35, %v1547_v52  ;;  %v3392_v55 = vpop.f32.mrb[219].mxu0  ;;  %v2113_v56 = vadd.f32 %v5858_v35, %v2112_v53  ;;  %v3731_v57 = vpop.f32.mrb[219].mxu1 }
 0x2a1   :  { %v2235_v58 = vmax.f32 %v1548_v54, 0.0  ;;  %v2348_v59 = vmax.f32 %v2113_v56, 0.0 }
 0x2a2   :  { %v1552_v61 = vpop.f32.mrb[220].mxu0  ;;  %v2117_v62 = vpop.f32.mrb[220].mxu1 }
 0x2a3   :  { %2461 = vst.msk [vmem:[%s6317_s3 + $0x368] sm:$0xff] %vm2351_vm5, %v2235_v58  ;;  %2574 = vst.msk [vmem:[%s6317_s3 + $0x6f0] sm:$0xff] %vm2351_vm5, %v2348_v59  ;;  %v1553_v63 = vadd.f32 %v5858_v35, %v1552_v61  ;;  %v3395_v0 = vpop.f32.mrb[221].mxu0  ;;  %v2118_v1 = vadd.f32 %v5858_v35, %v2117_v62  ;;  %v3734_v2 = vpop.f32.mrb[221].mxu1 }
 0x2a5   :  { %v2236_v3 = vmax.f32 %v1553_v63, 0.0  ;;  %v2349_v4 = vmax.f32 %v2118_v1, 0.0 }
 0x2a6   :  { %v1557_v5 = vpop.f32.mrb[222].mxu0  ;;  %v2122_v7 = vpop.f32.mrb[222].mxu1 }
 0x2a7   :  { %2462 = vst.msk [vmem:[%s6317_s3 + $0x370] sm:$0xff] %vm2351_vm5, %v2236_v3  ;;  %2575 = vst.msk [vmem:[%s6317_s3 + $0x6f8] sm:$0xff] %vm2351_vm5, %v2349_v4  ;;  %v1558_v8 = vadd.f32 %v5858_v35, %v1557_v5  ;;  %v3398_v9 = vpop.f32.mrb[223].mxu0  ;;  %v2123_v60 = vadd.f32 %v5858_v35, %v2122_v7  ;;  %v3737_v10 = vpop.f32.mrb[223].mxu1 }
 0x2a9   :  { %v2237_v12 = vmax.f32 %v1558_v8, 0.0  ;;  %v2350_v13 = vmax.f32 %v2123_v60, 0.0 }
 0x2aa   :  { %v1562_v14 = vpop.f32.mrb[224].mxu0 }
 0x2ab   :  { %2463 = vst.msk [vmem:[%s6317_s3 + $0x378] sm:$0xff] %vm2351_vm5, %v2237_v12  ;;  %2576 = vst.msk [vmem:[%s6317_s3 + $0x700] sm:$0xff] %vm2351_vm5, %v2350_v13  ;;  %v1563_v15 = vadd.f32 %v5858_v35, %v1562_v14  ;;  %v3401_v16 = vpop.f32.mrb[225].mxu0 }
 0x2ad   :  { %v2238_v17 = vmax.f32 %v1563_v15, 0.0 }
 0x2af   :  { %2464 = vst.msk [vmem:[%s6317_s3 + $0x380] sm:$0xff] %vm2351_vm5, %v2238_v17 }

// kernel: mini_rnn_forward.4
= control target key start
LH: loop header
LB: loop body
LE: loop exit
PB: predicated region body
PF: predicated region fallthrough
CT: control target
= control target key end

     0   :  { %v1940_v0 = vmov 0.0|0.0   ;;  %vm1942_vm0 = vmmov 0   ;;  %vm311_vm1 = vcmask 719872   ;;  %vm1324_vm2 = vcmask 293888   ;;  %s3365_s1 = inlined_call_operand.vmem [shape: f32[600,36], index: 1, kind: input, shape index: {}]   ;;  %s3366_s0 = inlined_call_operand.vmem [shape: f32[338,600], index: 0, kind: input, shape index: {}]   ;;  %s3367_s2 = inlined_call_operand.vmem [shape: f32[1,36], index: 2, kind: input, shape index: {}]   ;;  %s3368_s3 = inlined_call_operand.vmem [shape: f32[338,36], index: 3, kind: output, shape index: {}]  }
   0x1   :  { %1622 = vmatprep.subr.bf16.mxu1 %v1940_v0  ;;  %1670 = vmatprep.subr.bf16.mxu0 %v1940_v0  ;;  %v229_v1 = vld [vmem:[%s3365_s1] sm:$0xff]  ;;  %v230_v2 = vld [vmem:[%s3365_s1 + $0x8] sm:$0xff]  ;;  %v231_v6 = vld [vmem:[%s3365_s1 + $0x10] sm:$0xff]  ;;  %vm1367_vm3 = vcmask 287744  }
   0x2   :  { %v261_v3 = vld [vmem:[%s3365_s1 + $0x100] sm:$0xff]  ;;  %v1623_v4 = vpack.c.bf16 %v230_v2, %v229_v1  ;;  %v262_v5 = vld [vmem:[%s3365_s1 + $0x108] sm:$0xff]  ;;  %v232_v7 = vld [vmem:[%s3365_s1 + $0x18] sm:$0xff] }
   0x3   :  { %v1983_v8 = vpack.c.bf16 %v262_v5, %v261_v3  ;;  %v263_v9 = vld [vmem:[%s3365_s1 + $0x110] sm:$0xff]  ;;  %v264_v10 = vld [vmem:[%s3365_s1 + $0x118] sm:$0xff]  ;;  %v1626_v11 = vpack.c.bf16 %v232_v7, %v231_v6  ;;  %v233_v13 = vld [vmem:[%s3365_s1 + $0x20] sm:$0xff] }
   0x4   :  { %1624 = vmatpush1.bf16.msra.mxu1 %v1623_v4  ;;  %v1993_v12 = vpack.c.bf16 %v264_v10, %v263_v9  ;;  %v234_v14 = vld [vmem:[%s3365_s1 + $0x28] sm:$0xff]  ;;  %v265_v15 = vld [vmem:[%s3365_s1 + $0x120] sm:$0xff]  ;;  %v235_v19 = vld [vmem:[%s3365_s1 + $0x30] sm:$0xff] }
   0x5   :  { %1672 = vmatpush1.bf16.msra.mxu0 %v1983_v8  ;;  %1625 = vmatprep.subr.bf16.mxu1 %v1940_v0  ;;  %v266_v16 = vld [vmem:[%s3365_s1 + $0x128] sm:$0xff]  ;;  %v1629_v17 = vpack.c.bf16 %v234_v14, %v233_v13  ;;  %v236_v20 = vld [vmem:[%s3365_s1 + $0x38] sm:$0xff]  ;;  %v267_v21 = vld [vmem:[%s3365_s1 + $0x130] sm:$0xff] }
   0x6   :  { %1673 = vmatprep.subr.bf16.mxu0 %v1940_v0  ;;  %v2010_v18 = vpack.c.bf16 %v266_v16, %v265_v15  ;;  %v268_v22 = vld [vmem:[%s3365_s1 + $0x138] sm:$0xff]  ;;  %v1632_v23 = vpack.c.bf16 %v236_v20, %v235_v19  ;;  %v237_v25 = vld [vmem:[%s3365_s1 + $0x40] sm:$0xff]  ;;  %v238_v26 = vld [vmem:[%s3365_s1 + $0x48] sm:$0xff] }
   0x7   :  { %v2027_v24 = vpack.c.bf16 %v268_v22, %v267_v21  ;;  %v269_v27 = vld [vmem:[%s3365_s1 + $0x140] sm:$0xff]  ;;  %v270_v28 = vld [vmem:[%s3365_s1 + $0x148] sm:$0xff]  ;;  %v1635_v29 = vpack.c.bf16 %v238_v26, %v237_v25  ;;  %v239_v31 = vld [vmem:[%s3365_s1 + $0x50] sm:$0xff] }
   0x8   :  { %1627 = vmatpush1.bf16.msra.mxu1 %v1626_v11  ;;  %v2044_v30 = vpack.c.bf16 %v270_v28, %v269_v27  ;;  %v240_v32 = vld [vmem:[%s3365_s1 + $0x58] sm:$0xff]  ;;  %v271_v33 = vld [vmem:[%s3365_s1 + $0x150] sm:$0xff]  ;;  %v241_v37 = vld [vmem:[%s3365_s1 + $0x60] sm:$0xff] }
   0x9   :  { %1675 = vmatpush1.bf16.msra.mxu0 %v1993_v12  ;;  %1628 = vmatprep.subr.bf16.mxu1 %v1940_v0  ;;  %v272_v34 = vld [vmem:[%s3365_s1 + $0x158] sm:$0xff]  ;;  %v1638_v35 = vpack.c.bf16 %v240_v32, %v239_v31  ;;  %v242_v38 = vld [vmem:[%s3365_s1 + $0x68] sm:$0xff]  ;;  %v273_v39 = vld [vmem:[%s3365_s1 + $0x160] sm:$0xff] }
   0xa   :  { %1676 = vmatprep.subr.bf16.mxu0 %v1940_v0  ;;  %v2061_v36 = vpack.c.bf16 %v272_v34, %v271_v33  ;;  %v274_v40 = vld [vmem:[%s3365_s1 + $0x168] sm:$0xff]  ;;  %v17_v42 = vld [vmem:[%s3366_s0 + $0x18] sm:$0xff]  ;;  %v1641_v43 = vpack.c.bf16 %v242_v38, %v241_v37  ;;  %v243_v45 = vld [vmem:[%s3365_s1 + $0x70] sm:$0xff] }
   0xb   :  { %v15_v41 = vld [vmem:[%s3366_s0 + $0x8] sm:$0xff]  ;;  %785 = vmatprep.mubr.f32.mxu0 %v17_v42  ;;  %v2084_v44 = vpack.c.bf16 %v274_v40, %v273_v39  ;;  %v244_v46 = vld [vmem:[%s3365_s1 + $0x78] sm:$0xff]  ;;  %v275_v47 = vld [vmem:[%s3365_s1 + $0x170] sm:$0xff] }
   0xc   :  { %1630 = vmatpush1.bf16.msra.mxu1 %v1629_v17  ;;  %505 = vmatprep.mubr.f32.mxu1 %v15_v41  ;;  %v276_v48 = vld [vmem:[%s3365_s1 + $0x178] sm:$0xff]  ;;  %v1644_v49 = vpack.c.bf16 %v244_v46, %v243_v45  ;;  %v245_v51 = vld [vmem:[%s3365_s1 + $0x80] sm:$0xff]  ;;  %v246_v52 = vld [vmem:[%s3365_s1 + $0x88] sm:$0xff] }
   0xd   :  { %1678 = vmatpush1.bf16.msra.mxu0 %v2010_v18  ;;  %1631 = vmatprep.subr.bf16.mxu1 %v1940_v0  ;;  %v2101_v50 = vpack.c.bf16 %v276_v48, %v275_v47  ;;  %v277_v53 = vld [vmem:[%s3365_s1 + $0x180] sm:$0xff]  ;;  %v278_v54 = vld [vmem:[%s3365_s1 + $0x188] sm:$0xff]  ;;  %v1647_v55 = vpack.c.bf16 %v246_v52, %v245_v51  ;;  %v247_v57 = vld [vmem:[%s3365_s1 + $0x90] sm:$0xff] }
   0xe   :  { %1679 = vmatprep.subr.bf16.mxu0 %v1940_v0  ;;  %v2118_v56 = vpack.c.bf16 %v278_v54, %v277_v53  ;;  %v248_v58 = vld [vmem:[%s3365_s1 + $0x98] sm:$0xff]  ;;  %v279_v59 = vld [vmem:[%s3365_s1 + $0x190] sm:$0xff]  ;;  %v249_v63 = vld [vmem:[%s3365_s1 + $0xa0] sm:$0xff] }
   0xf   :  { %v280_v60 = vld [vmem:[%s3365_s1 + $0x198] sm:$0xff]  ;;  %v1650_v61 = vpack.c.bf16 %v248_v58, %v247_v57  ;;  %v250_v1 = vld [vmem:[%s3365_s1 + $0xa8] sm:$0xff]  ;;  %v281_v2 = vld [vmem:[%s3365_s1 + $0x1a0] sm:$0xff] }
  0x10   :  { %1633 = vmatpush1.bf16.msra.mxu1 %v1632_v23  ;;  %v2135_v62 = vpack.c.bf16 %v280_v60, %v279_v59  ;;  %v282_v3 = vld [vmem:[%s3365_s1 + $0x1a8] sm:$0xff]  ;;  %v1653_v4 = vpack.c.bf16 %v250_v1, %v249_v63  ;;  %v251_v6 = vld [vmem:[%s3365_s1 + $0xb0] sm:$0xff]  ;;  %v252_v7 = vld [vmem:[%s3365_s1 + $0xb8] sm:$0xff] }
  0x11   :  { %1681 = vmatpush1.bf16.msra.mxu0 %v2027_v24  ;;  %1634 = vmatprep.subr.bf16.mxu1 %v1940_v0  ;;  %v2152_v5 = vpack.c.bf16 %v282_v3, %v281_v2  ;;  %v283_v9 = vld [vmem:[%s3365_s1 + $0x1b0] sm:$0xff]  ;;  %v284_v10 = vld [vmem:[%s3365_s1 + $0x1b8] sm:$0xff]  ;;  %v1656_v11 = vpack.c.bf16 %v252_v7, %v251_v6  ;;  %v253_v14 = vld [vmem:[%s3365_s1 + $0xc0] sm:$0xff] }
  0x12   :  { %1682 = vmatprep.subr.bf16.mxu0 %v1940_v0  ;;  %v2169_v13 = vpack.c.bf16 %v284_v10, %v283_v9  ;;  %v254_v15 = vld [vmem:[%s3365_s1 + $0xc8] sm:$0xff]  ;;  %v285_v16 = vld [vmem:[%s3365_s1 + $0x1c0] sm:$0xff]  ;;  %v255_v21 = vld [vmem:[%s3365_s1 + $0xd0] sm:$0xff] }
  0x13   :  { %v286_v17 = vld [vmem:[%s3365_s1 + $0x1c8] sm:$0xff]  ;;  %v1659_v19 = vpack.c.bf16 %v254_v15, %v253_v14  ;;  %v256_v22 = vld [vmem:[%s3365_s1 + $0xd8] sm:$0xff]  ;;  %v287_v23 = vld [vmem:[%s3365_s1 + $0x1d0] sm:$0xff] }
  0x14   :  { %1636 = vmatpush1.bf16.msra.mxu1 %v1635_v29  ;;  %v2186_v20 = vpack.c.bf16 %v286_v17, %v285_v16  ;;  %v288_v25 = vld [vmem:[%s3365_s1 + $0x1d8] sm:$0xff]  ;;  %v1662_v26 = vpack.c.bf16 %v256_v22, %v255_v21  ;;  %v257_v28 = vld [vmem:[%s3365_s1 + $0xe0] sm:$0xff]  ;;  %v258_v29 = vld [vmem:[%s3365_s1 + $0xe8] sm:$0xff] }
  0x15   :  { %1684 = vmatpush1.bf16.msra.mxu0 %v2044_v30  ;;  %1637 = vmatprep.subr.bf16.mxu1 %v1940_v0  ;;  %v2203_v27 = vpack.c.bf16 %v288_v25, %v287_v23  ;;  %v289_v31 = vld [vmem:[%s3365_s1 + $0x1e0] sm:$0xff]  ;;  %v290_v32 = vld [vmem:[%s3365_s1 + $0x1e8] sm:$0xff]  ;;  %v1665_v33 = vpack.c.bf16 %v258_v29, %v257_v28  ;;  %v260_v37 = vld [vmem:[%s3365_s1 + $0xf8] sm:$0xff]  ;;  %v1941_v25 = vmov 0.0  }
  0x16   :  { %1685 = vmatprep.subr.bf16.mxu0 %v1940_v0  ;;  %v2220_v34 = vpack.c.bf16 %v290_v32, %v289_v31  ;;  %v291_v38 = vld [vmem:[%s3365_s1 + $0x1f0] sm:$0xff]  ;;  %v292_v39 = vld [vmem:[%s3365_s1 + $0x1f8] sm:$0xff]  ;;  %v293_v42 = vld [vmem:[%s3365_s1 + $0x200] sm:$0xff] }
  0x17   :  { %v2237_v41 = vpack.c.bf16 %v292_v39, %v291_v38  ;;  %v14_v45 = vld [vmem:[%s3366_s0] sm:$0xff]  ;;  %v16_v46 = vld [vmem:[%s3366_s0 + $0x10] sm:$0xff]  ;;  %v296_v52 = vld [vmem:[%s3365_s1 + $0x218] sm:$0xff] }
  0x18   :  { %1639 = vmatpush1.bf16.msra.mxu1 %v1638_v35  ;;  %v259_v35 = vld [vmem:[%s3365_s1 + $0xf0] sm:$0xff]  ;;  %v19_v53 = vld [vmem:[%s3366_s0 + $0x28] sm:$0xff]  ;;  %v21_v54 = vld [vmem:[%s3366_s0 + $0x38] sm:$0xff] }
  0x19   :  { %1687 = vmatpush1.bf16.msra.mxu0 %v2061_v36  ;;  %1640 = vmatprep.subr.bf16.mxu1 %v1940_v0  ;;  %v1668_v40 = vpack.c.bf16 %v260_v37, %v259_v35  ;;  %v20_v48 = vld [vmem:[%s3366_s0 + $0x30] sm:$0xff]  ;;  %v27_v57 = vld [vmem:[%s3366_s0 + $0x68] sm:$0xff]  ;;  %v30_v63 = vld [vmem:[%s3366_s0 + $0x80] sm:$0xff] }
  0x1a   :  { %1688 = vmatprep.subr.bf16.mxu0 %v1940_v0  ;;  %v295_v51 = vld [vmem:[%s3365_s1 + $0x210] sm:$0xff]  ;;  %v298_v59 = vld [vmem:[%s3365_s1 + $0x228] sm:$0xff]  ;;  %v37_v9 = vld [vmem:[%s3366_s0 + $0xb8] sm:$0xff] }
  0x1b   :  { %v1722_v58 = vpack.c.bf16 %v296_v52, %v295_v51  ;;  %v24_v60 = vld [vmem:[%s3366_s0 + $0x50] sm:$0xff]  ;;  %v31_v6 = vld [vmem:[%s3366_s0 + $0x88] sm:$0xff]  ;;  %v42_v17 = vld [vmem:[%s3366_s0 + $0xe0] sm:$0xff] }
  0x1c   :  { %1642 = vmatpush1.bf16.msra.mxu1 %v1641_v43  ;;  %v294_v43 = vld [vmem:[%s3365_s1 + $0x208] sm:$0xff]  ;;  %v32_v1 = vld [vmem:[%s3366_s0 + $0x90] sm:$0xff]  ;;  %v45_v22 = vld [vmem:[%s3366_s0 + $0xf8] sm:$0xff] }
  0x1d   :  { %1690 = vmatpush1.bf16.msra.mxu0 %v2084_v44  ;;  %1643 = vmatprep.subr.bf16.mxu1 %v1940_v0  ;;  %v1719_v47 = vpack.c.bf16 %v294_v43, %v293_v42  ;;  %v299_v3 = vld [vmem:[%s3365_s1 + $0x230] sm:$0xff]  ;;  %v35_v7 = vld [vmem:[%s3366_s0 + $0xa8] sm:$0xff]  ;;  %v46_v28 = vld [vmem:[%s3366_s0 + $0x100] sm:$0xff] }
  0x1e   :  { %1691 = vmatprep.subr.bf16.mxu0 %v1940_v0  ;;  %v302_v14 = vld [vmem:[%s3365_s1 + $0x248] sm:$0xff]  ;;  %v36_v15 = vld [vmem:[%s3366_s0 + $0xb0] sm:$0xff]  ;;  %v50_v29 = vld [vmem:[%s3366_s0 + $0x120] sm:$0xff] }
  0x1f   :  { %v40_v16 = vld [vmem:[%s3366_s0 + $0xd0] sm:$0xff]  ;;  %v39_v21 = vld [vmem:[%s3366_s0 + $0xc8] sm:$0xff]  ;;  %v49_v32 = vld [vmem:[%s3366_s0 + $0x118] sm:$0xff] }
  0x20   :  { %1645 = vmatpush1.bf16.msra.mxu1 %v1644_v49  ;;  %v22_v49 = vld [vmem:[%s3366_s0 + $0x40] sm:$0xff]  ;;  %v47_v23 = vld [vmem:[%s3366_s0 + $0x108] sm:$0xff]  ;;  %v52_v31 = vld [vmem:[%s3366_s0 + $0x130] sm:$0xff] }
  0x21   :  { %1693 = vmatpush1.bf16.msra.mxu0 %v2101_v50  ;;  %1646 = vmatprep.subr.bf16.mxu1 %v1940_v0  ;;  %v57_v35 = vld [vmem:[%s3366_s0 + $0x158] sm:$0xff]  ;;  %v54_v37 = vld [vmem:[%s3366_s0 + $0x140] sm:$0xff]  ;;  %v56_v38 = vld [vmem:[%s3366_s0 + $0x150] sm:$0xff] }
  0x22   :  { %1694 = vmatprep.subr.bf16.mxu0 %v1940_v0  ;;  %v62_v39 = vld [vmem:[%s3366_s0 + $0x180] sm:$0xff]  ;;  %v61_v42 = vld [vmem:[%s3366_s0 + $0x178] sm:$0xff]  ;;  %v67_v43 = vld [vmem:[%s3366_s0 + $0x1a8] sm:$0xff] }
  0x23   :  { %v77_v51 = vld [vmem:[%s3366_s0 + $0x1f8] sm:$0xff]  ;;  %v74_v52 = vld [vmem:[%s3366_s0 + $0x1e0] sm:$0xff] }
  0x24   :  { %1648 = vmatpush1.bf16.msra.mxu1 %v1647_v55  ;;  %v25_v55 = vld [vmem:[%s3366_s0 + $0x58] sm:$0xff] }
  0x25   :  { %1696 = vmatpush1.bf16.msra.mxu0 %v2118_v56  ;;  %1649 = vmatprep.subr.bf16.mxu1 %v1940_v0 }
  0x26   :  { %1697 = vmatprep.subr.bf16.mxu0 %v1940_v0 }
  0x28   :  { %1651 = vmatpush1.bf16.msra.mxu1 %v1650_v61  ;;  %v26_v61 = vld [vmem:[%s3366_s0 + $0x60] sm:$0xff] }
  0x29   :  { %1699 = vmatpush1.bf16.msra.mxu0 %v2135_v62  ;;  %1652 = vmatprep.subr.bf16.mxu1 %v1940_v0 }
  0x2a   :  { %1700 = vmatprep.subr.bf16.mxu0 %v1940_v0 }
  0x2c   :  { %1654 = vmatpush1.bf16.msra.mxu1 %v1653_v4  ;;  %v300_v4 = vld [vmem:[%s3365_s1 + $0x238] sm:$0xff] }
  0x2d   :  { %1702 = vmatpush1.bf16.msra.mxu0 %v2152_v5  ;;  %1655 = vmatprep.subr.bf16.mxu1 %v1940_v0  ;;  %v1728_v10 = vpack.c.bf16 %v300_v4, %v299_v3  ;;  %v96_v3 = vld [vmem:[%s3366_s0 + $0x290] sm:$0xff]  ;;  %v99_v4 = vld [vmem:[%s3366_s0 + $0x2a8] sm:$0xff] }
  0x2e   :  { %1703 = vmatprep.subr.bf16.mxu0 %v1940_v0 }
  0x30   :  { %1657 = vmatpush1.bf16.msra.mxu1 %v1656_v11  ;;  %v301_v11 = vld [vmem:[%s3365_s1 + $0x240] sm:$0xff] }
  0x31   :  { %1705 = vmatpush1.bf16.msra.mxu0 %v2169_v13  ;;  %1658 = vmatprep.subr.bf16.mxu1 %v1940_v0 }
  0x32   :  { %1706 = vmatprep.subr.bf16.mxu0 %v1940_v0 }
  0x34   :  { %1660 = vmatpush1.bf16.msra.mxu1 %v1659_v19  ;;  %v1731_v19 = vpack.c.bf16 %v302_v14, %v301_v11  ;;  %v112_v11 = vld [vmem:[%s3366_s0 + $0x310] sm:$0xff]  ;;  %v109_v14 = vld [vmem:[%s3366_s0 + $0x2f8] sm:$0xff] }
  0x35   :  { %1708 = vmatpush1.bf16.msra.mxu0 %v2186_v20  ;;  %1661 = vmatprep.subr.bf16.mxu1 %v1940_v0 }
  0x36   :  { %1709 = vmatprep.subr.bf16.mxu0 %v1940_v0 }
  0x38   :  { %1663 = vmatpush1.bf16.msra.mxu1 %v1662_v26  ;;  %v303_v26 = vld [vmem:[%s3365_s1 + $0x250] sm:$0xff] }
  0x39   :  { %1711 = vmatpush1.bf16.msra.mxu0 %v2203_v27  ;;  %1664 = vmatprep.subr.bf16.mxu1 %v1940_v0 }
  0x3a   :  { %1712 = vmatprep.subr.bf16.mxu0 %v1940_v0 }
  0x3c   :  { %1666 = vmatpush1.bf16.msra.mxu1 %v1665_v33  ;;  %v51_v33 = vld [vmem:[%s3366_s0 + $0x128] sm:$0xff] }
  0x3d   :  { %1714 = vmatpush1.bf16.msra.mxu0 %v2220_v34  ;;  %1667 = vmatprep.subr.bf16.mxu1 %v1940_v0 }
  0x3e   :  { %1715 = vmatprep.subr.bf16.mxu0 %v1940_v0 }
  0x40   :  { %1669 = vmatpush1.bf16.msra.mxu1 %v1668_v40  ;;  %v59_v40 = vld [vmem:[%s3366_s0 + $0x168] sm:$0xff] }
  0x41   :  { %1717 = vmatpush1.bf16.msra.mxu0 %v2237_v41  ;;  %1733 = vmatprep.subr.bf16.mxu1 %v1940_v0 }
  0x42   :  { %1718 = vmatprep.subr.bf16.mxu0 %v1940_v0 }
  0x43   :  { %506 = vmatmul.mubr.f32.vlgmr.msra.gmra.mrb[0].mxu1 %v14_v45  ;;  %v64_v45 = vld [vmem:[%s3366_s0 + $0x190] sm:$0xff] }
  0x44   :  { %786 = vmatmul.mubr.f32.vlgmr.msra.gmra.mrb[0].mxu0 %v16_v46  ;;  %510 = vmatprep.mubr.f32.mxu1 %v20_v48  ;;  %v66_v46 = vld [vmem:[%s3366_s0 + $0x1a0] sm:$0xff]  ;;  %v69_v48 = vld [vmem:[%s3366_s0 + $0x1b8] sm:$0xff] }
  0x45   :  { %1720 = vmatpush3.bf16.msra.mxu0 %v1719_v47  ;;  %1749 = vmatpush1.bf16.msra.mxu1 %v1983_v8  ;;  %v297_v8 = vld [vmem:[%s3365_s1 + $0x220] sm:$0xff]  ;;  %v72_v47 = vld [vmem:[%s3366_s0 + $0x1d0] sm:$0xff] }
  0x46   :  { %790 = vmatprep.mubr.f32.mxu0 %v22_v49  ;;  %1734 = vmatprep.subr.bf16.mxu1 %v1940_v0  ;;  %v1725_v2 = vpack.c.bf16 %v298_v59, %v297_v8  ;;  %v71_v49 = vld [vmem:[%s3366_s0 + $0x1c8] sm:$0xff]  ;;  %v84_v8 = vld [vmem:[%s3366_s0 + $0x230] sm:$0xff]  ;;  %v86_v59 = vld [vmem:[%s3366_s0 + $0x240] sm:$0xff] }
  0x47   :  { %511 = vmatmul.mubr.f32.gmra.mrb[2].mxu1 %v19_v53  ;;  %1721 = vmatprep.subr.bf16.mxu0 %v1940_v0  ;;  %v76_v53 = vld [vmem:[%s3366_s0 + $0x1f0] sm:$0xff] }
  0x48   :  { %791 = vmatmul.mubr.f32.gmra.mrb[2].mxu0 %v21_v54  ;;  %515 = vmatprep.mubr.f32.mxu1 %v25_v55  ;;  %v82_v54 = vld [vmem:[%s3366_s0 + $0x220] sm:$0xff]  ;;  %v79_v55 = vld [vmem:[%s3366_s0 + $0x208] sm:$0xff] }
  0x49   :  { %795 = vmatprep.mubr.f32.mxu0 %v27_v57  ;;  %1750 = vmatpush1.bf16.msra.mxu1 %v1993_v12  ;;  %v29_v12 = vld [vmem:[%s3366_s0 + $0x78] sm:$0xff] }
  0x4a   :  { %1723 = vmatpush3.bf16.msra.mxu0 %v1722_v58  ;;  %1735 = vmatprep.subr.bf16.mxu1 %v1940_v0  ;;  %v81_v57 = vld [vmem:[%s3366_s0 + $0x218] sm:$0xff]  ;;  %v87_v58 = vld [vmem:[%s3366_s0 + $0x248] sm:$0xff] }
  0x4b   :  { %516 = vmatmul.mubr.f32.gmra.mrb[4].mxu1 %v24_v60  ;;  %1724 = vmatprep.subr.bf16.mxu0 %v1940_v0  ;;  %v92_v60 = vld [vmem:[%s3366_s0 + $0x270] sm:$0xff] }
  0x4c   :  { %796 = vmatmul.mubr.f32.gmra.mrb[4].mxu0 %v26_v61  ;;  %520 = vmatprep.mubr.f32.mxu1 %v30_v63  ;;  %v89_v61 = vld [vmem:[%s3366_s0 + $0x258] sm:$0xff]  ;;  %v91_v63 = vld [vmem:[%s3366_s0 + $0x268] sm:$0xff] }
  0x4d   :  { %800 = vmatprep.mubr.f32.mxu0 %v32_v1  ;;  %1751 = vmatpush1.bf16.msra.mxu1 %v2010_v18  ;;  %v34_v18 = vld [vmem:[%s3366_s0 + $0xa0] sm:$0xff]  ;;  %v97_v1 = vld [vmem:[%s3366_s0 + $0x298] sm:$0xff] }
  0x4e   :  { %1726 = vmatpush3.bf16.msra.mxu0 %v1725_v2  ;;  %1736 = vmatprep.subr.bf16.mxu1 %v1940_v0  ;;  %v94_v2 = vld [vmem:[%s3366_s0 + $0x280] sm:$0xff] }
  0x4f   :  { %521 = vmatmul.mubr.f32.gmra.mrb[6].mxu1 %v29_v12  ;;  %1727 = vmatprep.subr.bf16.mxu0 %v1940_v0  ;;  %v101_v12 = vld [vmem:[%s3366_s0 + $0x2b8] sm:$0xff] }
  0x50   :  { %801 = vmatmul.mubr.f32.gmra.mrb[6].mxu0 %v31_v6  ;;  %525 = vmatprep.mubr.f32.mxu1 %v35_v7  ;;  %v107_v6 = vld [vmem:[%s3366_s0 + $0x2e8] sm:$0xff]  ;;  %v104_v7 = vld [vmem:[%s3366_s0 + $0x2d0] sm:$0xff] }
  0x51   :  { %805 = vmatprep.mubr.f32.mxu0 %v37_v9  ;;  %1752 = vmatpush1.bf16.msra.mxu1 %v2027_v24  ;;  %v41_v24 = vld [vmem:[%s3366_s0 + $0xd8] sm:$0xff]  ;;  %v106_v9 = vld [vmem:[%s3366_s0 + $0x2e0] sm:$0xff] }
  0x52   :  { %1737 = vmatprep.subr.bf16.mxu1 %v1940_v0  ;;  %1729 = vmatpush3.bf16.msra.mxu0 %v1728_v10  ;;  %v110_v10 = vld [vmem:[%s3366_s0 + $0x300] sm:$0xff] }
  0x53   :  { %526 = vmatmul.mubr.f32.gmra.mrb[8].mxu1 %v34_v18  ;;  %1730 = vmatprep.subr.bf16.mxu0 %v1940_v0  ;;  %v111_v18 = vld [vmem:[%s3366_s0 + $0x308] sm:$0xff] }
  0x54   :  { %806 = vmatmul.mubr.f32.gmra.mrb[8].mxu0 %v36_v15  ;;  %530 = vmatprep.mubr.f32.mxu1 %v40_v16  ;;  %v115_v15 = vld [vmem:[%s3366_s0 + $0x328] sm:$0xff]  ;;  %v117_v16 = vld [vmem:[%s3366_s0 + $0x338] sm:$0xff] }
  0x55   :  { %810 = vmatprep.mubr.f32.mxu0 %v42_v17  ;;  %1753 = vmatpush1.bf16.msra.mxu1 %v2044_v30  ;;  %v44_v30 = vld [vmem:[%s3366_s0 + $0xf0] sm:$0xff]  ;;  %v114_v17 = vld [vmem:[%s3366_s0 + $0x320] sm:$0xff] }
  0x56   :  { %1738 = vmatprep.subr.bf16.mxu1 %v1940_v0  ;;  %1732 = vmatpush3.bf16.msra.mxu0 %v1731_v19  ;;  %v116_v19 = vld [vmem:[%s3366_s0 + $0x330] sm:$0xff] }
  0x57   :  { %531 = vmatmul.mubr.f32.gmra.mrb[10].mxu1 %v39_v21  ;;  %1491 = vmatprep.subr.mxu0 %v1941_v25  ;;  %v120_v21 = vld [vmem:[%s3366_s0 + $0x350] sm:$0xff] }
  0x58   :  { %811 = vmatmul.mubr.f32.gmra.mrb[10].mxu0 %v41_v24  ;;  %535 = vmatprep.mubr.f32.mxu1 %v45_v22  ;;  %v122_v24 = vld [vmem:[%s3366_s0 + $0x360] sm:$0xff]  ;;  %v119_v22 = vld [vmem:[%s3366_s0 + $0x348] sm:$0xff] }
  0x59   :  { %815 = vmatprep.mubr.f32.mxu0 %v47_v23  ;;  %1754 = vmatpush1.bf16.msra.mxu1 %v2061_v36  ;;  %v55_v36 = vld [vmem:[%s3366_s0 + $0x148] sm:$0xff]  ;;  %v121_v23 = vld [vmem:[%s3366_s0 + $0x358] sm:$0xff] }
  0x5a   :  { %1739 = vmatprep.subr.bf16.mxu1 %v1940_v0  ;;  %1492 = vmatpush3.msra.mxu0 %v303_v26  ;;  %v125_v26 = vld [vmem:[%s3366_s0 + $0x378] sm:$0xff] }
  0x5b   :  { %536 = vmatmul.mubr.f32.gmra.mrb[12].mxu1 %v44_v30  ;;  %v124_v30 = vld [vmem:[%s3366_s0 + $0x370] sm:$0xff] }
  0x5c   :  { %816 = vmatmul.mubr.f32.gmra.mrb[12].mxu0 %v46_v28  ;;  %540 = vmatprep.mubr.f32.mxu1 %v50_v29  ;;  %v18_v28 = vld [vmem:[%s3366_s0 + $0x20] sm:$0xff] }
  0x5d   :  { %820 = vmatprep.mubr.f32.mxu0 %v52_v31  ;;  %1755 = vmatpush1.bf16.msra.mxu1 %v2084_v44  ;;  %v60_v44 = vld [vmem:[%s3366_s0 + $0x170] sm:$0xff]  ;;  %v130_v29 = vld [vmem:[%s3366_s0 + $0x3a0] sm:$0xff]  ;;  %v129_v31 = vld [vmem:[%s3366_s0 + $0x398] sm:$0xff] }
  0x5e   :  { %1740 = vmatprep.subr.bf16.mxu1 %v1940_v0 }
  0x5f   :  { %541 = vmatmul.mubr.f32.gmra.mrb[14].mxu1 %v49_v32  ;;  %v23_v32 = vld [vmem:[%s3366_s0 + $0x48] sm:$0xff] }
  0x60   :  { %821 = vmatmul.mubr.f32.gmra.mrb[14].mxu0 %v51_v33  ;;  %545 = vmatprep.mubr.f32.mxu1 %v55_v36  ;;  %v135_v33 = vld [vmem:[%s3366_s0 + $0x3c8] sm:$0xff]  ;;  %v134_v36 = vld [vmem:[%s3366_s0 + $0x3c0] sm:$0xff] }
  0x61   :  { %825 = vmatprep.mubr.f32.mxu0 %v57_v35  ;;  %1756 = vmatpush1.bf16.msra.mxu1 %v2101_v50  ;;  %v65_v50 = vld [vmem:[%s3366_s0 + $0x198] sm:$0xff]  ;;  %v28_v35 = vld [vmem:[%s3366_s0 + $0x70] sm:$0xff] }
  0x62   :  { %1741 = vmatprep.subr.bf16.mxu1 %v1940_v0 }
  0x63   :  { %546 = vmatmul.mubr.f32.gmra.mrb[16].mxu1 %v54_v37  ;;  %v140_v37 = vld [vmem:[%s3366_s0 + $0x3f0] sm:$0xff] }
  0x64   :  { %826 = vmatmul.mubr.f32.gmra.mrb[16].mxu0 %v56_v38  ;;  %550 = vmatprep.mubr.f32.mxu1 %v60_v44  ;;  %v139_v38 = vld [vmem:[%s3366_s0 + $0x3e8] sm:$0xff]  ;;  %v33_v44 = vld [vmem:[%s3366_s0 + $0x98] sm:$0xff] }
  0x65   :  { %830 = vmatprep.mubr.f32.mxu0 %v62_v39  ;;  %1757 = vmatpush1.bf16.msra.mxu1 %v2118_v56  ;;  %v70_v56 = vld [vmem:[%s3366_s0 + $0x1c0] sm:$0xff]  ;;  %v145_v39 = vld [vmem:[%s3366_s0 + $0x418] sm:$0xff] }
  0x66   :  { %1742 = vmatprep.subr.bf16.mxu1 %v1940_v0 }
  0x67   :  { %551 = vmatmul.mubr.f32.gmra.mrb[18].mxu1 %v59_v40  ;;  %v144_v40 = vld [vmem:[%s3366_s0 + $0x410] sm:$0xff] }
  0x68   :  { %831 = vmatmul.mubr.f32.gmra.mrb[18].mxu0 %v61_v42  ;;  %555 = vmatprep.mubr.f32.mxu1 %v65_v50  ;;  %v38_v42 = vld [vmem:[%s3366_s0 + $0xc0] sm:$0xff] }
  0x69   :  { %835 = vmatprep.mubr.f32.mxu0 %v67_v43  ;;  %1758 = vmatpush1.bf16.msra.mxu1 %v2135_v62  ;;  %v75_v62 = vld [vmem:[%s3366_s0 + $0x1e8] sm:$0xff]  ;;  %v150_v50 = vld [vmem:[%s3366_s0 + $0x440] sm:$0xff]  ;;  %v149_v43 = vld [vmem:[%s3366_s0 + $0x438] sm:$0xff] }
  0x6a   :  { %1743 = vmatprep.subr.bf16.mxu1 %v1940_v0 }
  0x6b   :  { %556 = vmatmul.mubr.f32.gmra.mrb[20].mxu1 %v64_v45  ;;  %v43_v45 = vld [vmem:[%s3366_s0 + $0xe8] sm:$0xff] }
  0x6c   :  { %836 = vmatmul.mubr.f32.gmra.mrb[20].mxu0 %v66_v46  ;;  %560 = vmatprep.mubr.f32.mxu1 %v70_v56  ;;  %v155_v46 = vld [vmem:[%s3366_s0 + $0x468] sm:$0xff]  ;;  %v154_v56 = vld [vmem:[%s3366_s0 + $0x460] sm:$0xff] }
  0x6d   :  { %840 = vmatprep.mubr.f32.mxu0 %v72_v47  ;;  %1759 = vmatpush1.bf16.msra.mxu1 %v2152_v5  ;;  %v80_v5 = vld [vmem:[%s3366_s0 + $0x210] sm:$0xff] }
  0x6e   :  { %1744 = vmatprep.subr.bf16.mxu1 %v1940_v0  ;;  %v48_v47 = vld [vmem:[%s3366_s0 + $0x110] sm:$0xff] }
  0x6f   :  { %561 = vmatmul.mubr.f32.gmra.mrb[22].mxu1 %v69_v48  ;;  %v160_v48 = vld [vmem:[%s3366_s0 + $0x490] sm:$0xff] }
  0x70   :  { %841 = vmatmul.mubr.f32.gmra.mrb[22].mxu0 %v71_v49  ;;  %565 = vmatprep.mubr.f32.mxu1 %v75_v62  ;;  %v159_v49 = vld [vmem:[%s3366_s0 + $0x488] sm:$0xff]  ;;  %v53_v62 = vld [vmem:[%s3366_s0 + $0x138] sm:$0xff] }
  0x71   :  { %845 = vmatprep.mubr.f32.mxu0 %v77_v51  ;;  %1760 = vmatpush1.bf16.msra.mxu1 %v2169_v13  ;;  %v85_v13 = vld [vmem:[%s3366_s0 + $0x238] sm:$0xff] }
  0x72   :  { %1745 = vmatprep.subr.bf16.mxu1 %v1940_v0  ;;  %v165_v51 = vld [vmem:[%s3366_s0 + $0x4b8] sm:$0xff] }
  0x73   :  { %566 = vmatmul.mubr.f32.gmra.mrb[24].mxu1 %v74_v52  ;;  %v164_v52 = vld [vmem:[%s3366_s0 + $0x4b0] sm:$0xff] }
  0x74   :  { %846 = vmatmul.mubr.f32.gmra.mrb[24].mxu0 %v76_v53  ;;  %570 = vmatprep.mubr.f32.mxu1 %v80_v5  ;;  %v58_v53 = vld [vmem:[%s3366_s0 + $0x160] sm:$0xff] }
  0x75   :  { %850 = vmatprep.mubr.f32.mxu0 %v82_v54  ;;  %1761 = vmatpush1.bf16.msra.mxu1 %v2186_v20  ;;  %v90_v20 = vld [vmem:[%s3366_s0 + $0x260] sm:$0xff]  ;;  %v169_v54 = vld [vmem:[%s3366_s0 + $0x4d8] sm:$0xff] }
  0x76   :  { %1746 = vmatprep.subr.bf16.mxu1 %v1940_v0  ;;  %v170_v5 = vld [vmem:[%s3366_s0 + $0x4e0] sm:$0xff] }
  0x77   :  { %571 = vmatmul.mubr.f32.gmra.mrb[26].mxu1 %v79_v55  ;;  %v63_v55 = vld [vmem:[%s3366_s0 + $0x188] sm:$0xff] }
  0x78   :  { %851 = vmatmul.mubr.f32.gmra.mrb[26].mxu0 %v81_v57  ;;  %575 = vmatprep.mubr.f32.mxu1 %v85_v13  ;;  %v175_v57 = vld [vmem:[%s3366_s0 + $0x508] sm:$0xff]  ;;  %v174_v13 = vld [vmem:[%s3366_s0 + $0x500] sm:$0xff] }
  0x79   :  { %855 = vmatprep.mubr.f32.mxu0 %v87_v58  ;;  %1762 = vmatpush1.bf16.msra.mxu1 %v2203_v27  ;;  %v95_v27 = vld [vmem:[%s3366_s0 + $0x288] sm:$0xff]  ;;  %v68_v58 = vld [vmem:[%s3366_s0 + $0x1b0] sm:$0xff] }
  0x7a   :  { %1747 = vmatprep.subr.bf16.mxu1 %v1940_v0 }
  0x7b   :  { %576 = vmatmul.mubr.f32.gmra.mrb[28].mxu1 %v84_v8  ;;  %v180_v8 = vld [vmem:[%s3366_s0 + $0x530] sm:$0xff] }
  0x7c   :  { %856 = vmatmul.mubr.f32.gmra.mrb[28].mxu0 %v86_v59  ;;  %580 = vmatprep.mubr.f32.mxu1 %v90_v20  ;;  %v179_v59 = vld [vmem:[%s3366_s0 + $0x528] sm:$0xff]  ;;  %v73_v20 = vld [vmem:[%s3366_s0 + $0x1d8] sm:$0xff] }
  0x7d   :  { %860 = vmatprep.mubr.f32.mxu0 %v92_v60  ;;  %1763 = vmatpush1.bf16.msra.mxu1 %v2220_v34  ;;  %v100_v34 = vld [vmem:[%s3366_s0 + $0x2b0] sm:$0xff]  ;;  %v185_v60 = vld [vmem:[%s3366_s0 + $0x558] sm:$0xff] }
  0x7e   :  { %1748 = vmatprep.subr.bf16.mxu1 %v1940_v0  ;;  %v102_v0 = vld [vmem:[%s3366_s0 + $0x2c0] sm:$0xff] }
  0x7f   :  { %581 = vmatmul.mubr.f32.gmra.mrb[30].mxu1 %v89_v61  ;;  %v184_v61 = vld [vmem:[%s3366_s0 + $0x550] sm:$0xff] }
  0x80   :  { %861 = vmatmul.mubr.f32.gmra.mrb[30].mxu0 %v91_v63  ;;  %585 = vmatprep.mubr.f32.mxu1 %v95_v27  ;;  %v78_v63 = vld [vmem:[%s3366_s0 + $0x200] sm:$0xff] }
  0x81   :  { %865 = vmatprep.mubr.f32.mxu0 %v97_v1  ;;  %1764 = vmatpush1.bf16.msra.mxu1 %v2237_v41  ;;  %v105_v41 = vld [vmem:[%s3366_s0 + $0x2d8] sm:$0xff]  ;;  %v190_v27 = vld [vmem:[%s3366_s0 + $0x580] sm:$0xff] }
  0x82   :  { %v189_v1 = vld [vmem:[%s3366_s0 + $0x578] sm:$0xff] }
  0x83   :  { %586 = vmatmul.mubr.f32.gmra.mrb[32].mxu1 %v94_v2  ;;  %v83_v2 = vld [vmem:[%s3366_s0 + $0x228] sm:$0xff] }
  0x84   :  { %866 = vmatmul.mubr.f32.gmra.mrb[32].mxu0 %v96_v3  ;;  %590 = vmatprep.mubr.f32.mxu1 %v100_v34  ;;  %v195_v3 = vld [vmem:[%s3366_s0 + $0x5a8] sm:$0xff]  ;;  %v194_v34 = vld [vmem:[%s3366_s0 + $0x5a0] sm:$0xff] }
  0x85   :  { %870 = vmatprep.mubr.f32.mxu0 %v102_v0  ;;  %v88_v0 = vld [vmem:[%s3366_s0 + $0x250] sm:$0xff] }
  0x87   :  { %591 = vmatmul.mubr.f32.gmra.mrb[34].mxu1 %v99_v4  ;;  %v200_v4 = vld [vmem:[%s3366_s0 + $0x5d0] sm:$0xff] }
  0x88   :  { %871 = vmatmul.mubr.f32.gmra.mrb[34].mxu0 %v101_v12  ;;  %595 = vmatprep.mubr.f32.mxu1 %v105_v41  ;;  %v199_v12 = vld [vmem:[%s3366_s0 + $0x5c8] sm:$0xff]  ;;  %v93_v41 = vld [vmem:[%s3366_s0 + $0x278] sm:$0xff] }
  0x89   :  { %875 = vmatprep.mubr.f32.mxu0 %v107_v6  ;;  %v205_v6 = vld [vmem:[%s3366_s0 + $0x5f8] sm:$0xff] }
  0x8b   :  { %596 = vmatmul.mubr.f32.gmra.mrb[36].mxu1 %v104_v7  ;;  %v204_v7 = vld [vmem:[%s3366_s0 + $0x5f0] sm:$0xff] }
  0x8c   :  { %876 = vmatmul.mubr.f32.gmra.mrb[36].mxu0 %v106_v9  ;;  %600 = vmatprep.mubr.f32.mxu1 %v110_v10  ;;  %v98_v9 = vld [vmem:[%s3366_s0 + $0x2a0] sm:$0xff] }
  0x8d   :  { %880 = vmatprep.mubr.f32.mxu0 %v112_v11  ;;  %v210_v10 = vld [vmem:[%s3366_s0 + $0x620] sm:$0xff]  ;;  %v209_v11 = vld [vmem:[%s3366_s0 + $0x618] sm:$0xff] }
  0x8f   :  { %601 = vmatmul.mubr.f32.gmra.mrb[38].mxu1 %v109_v14  ;;  %v103_v14 = vld [vmem:[%s3366_s0 + $0x2c8] sm:$0xff] }
  0x90   :  { %881 = vmatmul.mubr.f32.gmra.mrb[38].mxu0 %v111_v18  ;;  %605 = vmatprep.mubr.f32.mxu1 %v115_v15  ;;  %v215_v18 = vld [vmem:[%s3366_s0 + $0x648] sm:$0xff]  ;;  %v214_v15 = vld [vmem:[%s3366_s0 + $0x640] sm:$0xff] }
  0x91   :  { %885 = vmatprep.mubr.f32.mxu0 %v117_v16  ;;  %v108_v16 = vld [vmem:[%s3366_s0 + $0x2f0] sm:$0xff] }
  0x93   :  { %606 = vmatmul.mubr.f32.gmra.mrb[40].mxu1 %v114_v17  ;;  %v220_v17 = vld [vmem:[%s3366_s0 + $0x670] sm:$0xff] }
  0x94   :  { %886 = vmatmul.mubr.f32.gmra.mrb[40].mxu0 %v116_v19  ;;  %610 = vmatprep.mubr.f32.mxu1 %v120_v21  ;;  %v219_v19 = vld [vmem:[%s3366_s0 + $0x668] sm:$0xff]  ;;  %v113_v21 = vld [vmem:[%s3366_s0 + $0x318] sm:$0xff] }
  0x95   :  { %890 = vmatprep.mubr.f32.mxu0 %v122_v24  ;;  %v225_v24 = vld [vmem:[%s3366_s0 + $0x698] sm:$0x3] }
  0x97   :  { %611 = vmatmul.mubr.f32.gmra.mrb[42].mxu1 %v119_v22  ;;  %v224_v22 = vld [vmem:[%s3366_s0 + $0x690] sm:$0x3] }
  0x98   :  { %891 = vmatmul.mubr.f32.gmra.mrb[42].mxu0 %v121_v23  ;;  %615 = vmatprep.mubr.f32.mxu1 %v125_v26  ;;  %v118_v23 = vld [vmem:[%s3366_s0 + $0x340] sm:$0xff]  ;;  %v127_v26 = vld [vmem:[%s3366_s0 + $0x388] sm:$0xff] }
  0x99   :  { %1493 = vmatprep.mubr.msk.f32.mxu0 %vm1942_vm0, %v1941_v25 }
  0x9b   :  { %616 = vmatmul.mubr.f32.gmra.mrb[44].mxu1 %v124_v30  ;;  %v126_v30 = vld [vmem:[%s3366_s0 + $0x380] sm:$0xff] }
  0x9c   :  { %1494 = vmatmul.mubr.msk.f32.vlgmr.msra.gmra.mrb[0].mxu0 %vm311_vm1, %v18_v28  ;;  %620 = vmatprep.mubr.f32.mxu1 %v130_v29  ;;  %v123_v28 = vld [vmem:[%s3366_s0 + $0x368] sm:$0xff]  ;;  %v132_v29 = vld [vmem:[%s3366_s0 + $0x3b0] sm:$0xff] }
  0x9d   :  { %1496 = vmatprep.mubr.msk.f32.mxu0 %vm1942_vm0, %v1941_v25 }
  0x9f   :  { %621 = vmatmul.mubr.f32.gmra.mrb[46].mxu1 %v129_v31  ;;  %v131_v31 = vld [vmem:[%s3366_s0 + $0x3a8] sm:$0xff] }
  0xa0   :  { %1497 = vmatmul.mubr.msk.f32.gmra.mrb[2].mxu0 %vm311_vm1, %v23_v32  ;;  %625 = vmatprep.mubr.f32.mxu1 %v135_v33  ;;  %v128_v32 = vld [vmem:[%s3366_s0 + $0x390] sm:$0xff]  ;;  %v137_v33 = vld [vmem:[%s3366_s0 + $0x3d8] sm:$0xff] }
  0xa1   :  { %1499 = vmatprep.mubr.msk.f32.mxu0 %vm1942_vm0, %v1941_v25 }
  0xa3   :  { %626 = vmatmul.mubr.f32.gmra.mrb[48].mxu1 %v134_v36  ;;  %v136_v36 = vld [vmem:[%s3366_s0 + $0x3d0] sm:$0xff] }
  0xa4   :  { %1500 = vmatmul.mubr.msk.f32.gmra.mrb[4].mxu0 %vm311_vm1, %v28_v35  ;;  %630 = vmatprep.mubr.f32.mxu1 %v140_v37  ;;  %v133_v35 = vld [vmem:[%s3366_s0 + $0x3b8] sm:$0xff]  ;;  %v142_v37 = vld [vmem:[%s3366_s0 + $0x400] sm:$0xff] }
  0xa5   :  { %1502 = vmatprep.mubr.msk.f32.mxu0 %vm1942_vm0, %v1941_v25 }
  0xa7   :  { %631 = vmatmul.mubr.f32.gmra.mrb[50].mxu1 %v139_v38  ;;  %v141_v38 = vld [vmem:[%s3366_s0 + $0x3f8] sm:$0xff] }
  0xa8   :  { %1503 = vmatmul.mubr.msk.f32.gmra.mrb[6].mxu0 %vm311_vm1, %v33_v44  ;;  %635 = vmatprep.mubr.f32.mxu1 %v145_v39  ;;  %v138_v44 = vld [vmem:[%s3366_s0 + $0x3e0] sm:$0xff]  ;;  %v147_v39 = vld [vmem:[%s3366_s0 + $0x428] sm:$0xff] }
  0xa9   :  { %1505 = vmatprep.mubr.msk.f32.mxu0 %vm1942_vm0, %v1941_v25 }
  0xab   :  { %636 = vmatmul.mubr.f32.gmra.mrb[52].mxu1 %v144_v40  ;;  %v146_v40 = vld [vmem:[%s3366_s0 + $0x420] sm:$0xff] }
  0xac   :  { %1506 = vmatmul.mubr.msk.f32.gmra.mrb[8].mxu0 %vm311_vm1, %v38_v42  ;;  %640 = vmatprep.mubr.f32.mxu1 %v150_v50  ;;  %v143_v42 = vld [vmem:[%s3366_s0 + $0x408] sm:$0xff]  ;;  %v152_v50 = vld [vmem:[%s3366_s0 + $0x450] sm:$0xff] }
  0xad   :  { %1508 = vmatprep.mubr.msk.f32.mxu0 %vm1942_vm0, %v1941_v25 }
  0xaf   :  { %641 = vmatmul.mubr.f32.gmra.mrb[54].mxu1 %v149_v43  ;;  %v151_v43 = vld [vmem:[%s3366_s0 + $0x448] sm:$0xff] }
  0xb0   :  { %1509 = vmatmul.mubr.msk.f32.gmra.mrb[10].mxu0 %vm311_vm1, %v43_v45  ;;  %645 = vmatprep.mubr.f32.mxu1 %v155_v46  ;;  %v148_v45 = vld [vmem:[%s3366_s0 + $0x430] sm:$0xff]  ;;  %v157_v46 = vld [vmem:[%s3366_s0 + $0x478] sm:$0xff] }
  0xb1   :  { %1511 = vmatprep.mubr.msk.f32.mxu0 %vm1942_vm0, %v1941_v25 }
  0xb3   :  { %646 = vmatmul.mubr.f32.gmra.mrb[56].mxu1 %v154_v56  ;;  %v156_v56 = vld [vmem:[%s3366_s0 + $0x470] sm:$0xff] }
  0xb4   :  { %1512 = vmatmul.mubr.msk.f32.gmra.mrb[12].mxu0 %vm311_vm1, %v48_v47  ;;  %650 = vmatprep.mubr.f32.mxu1 %v160_v48  ;;  %v153_v47 = vld [vmem:[%s3366_s0 + $0x458] sm:$0xff]  ;;  %v162_v48 = vld [vmem:[%s3366_s0 + $0x4a0] sm:$0xff] }
  0xb5   :  { %1514 = vmatprep.mubr.msk.f32.mxu0 %vm1942_vm0, %v1941_v25 }
  0xb7   :  { %651 = vmatmul.mubr.f32.gmra.mrb[58].mxu1 %v159_v49  ;;  %v161_v49 = vld [vmem:[%s3366_s0 + $0x498] sm:$0xff] }
  0xb8   :  { %1515 = vmatmul.mubr.msk.f32.gmra.mrb[14].mxu0 %vm311_vm1, %v53_v62  ;;  %655 = vmatprep.mubr.f32.mxu1 %v165_v51  ;;  %v158_v62 = vld [vmem:[%s3366_s0 + $0x480] sm:$0xff]  ;;  %v167_v51 = vld [vmem:[%s3366_s0 + $0x4c8] sm:$0xff] }
  0xb9   :  { %1517 = vmatprep.mubr.msk.f32.mxu0 %vm1942_vm0, %v1941_v25 }
  0xbb   :  { %656 = vmatmul.mubr.f32.gmra.mrb[60].mxu1 %v164_v52  ;;  %v166_v52 = vld [vmem:[%s3366_s0 + $0x4c0] sm:$0xff] }
  0xbc   :  { %1518 = vmatmul.mubr.msk.f32.gmra.mrb[16].mxu0 %vm311_vm1, %v58_v53  ;;  %660 = vmatprep.mubr.f32.mxu1 %v170_v5  ;;  %v163_v53 = vld [vmem:[%s3366_s0 + $0x4a8] sm:$0xff]  ;;  %v172_v5 = vld [vmem:[%s3366_s0 + $0x4f0] sm:$0xff] }
  0xbd   :  { %1520 = vmatprep.mubr.msk.f32.mxu0 %vm1942_vm0, %v1941_v25 }
  0xbf   :  { %661 = vmatmul.mubr.f32.gmra.mrb[62].mxu1 %v169_v54  ;;  %v171_v54 = vld [vmem:[%s3366_s0 + $0x4e8] sm:$0xff] }
  0xc0   :  { %1521 = vmatmul.mubr.msk.f32.gmra.mrb[18].mxu0 %vm311_vm1, %v63_v55  ;;  %665 = vmatprep.mubr.f32.mxu1 %v175_v57  ;;  %v168_v55 = vld [vmem:[%s3366_s0 + $0x4d0] sm:$0xff]  ;;  %v177_v57 = vld [vmem:[%s3366_s0 + $0x518] sm:$0xff] }
  0xc1   :  { %1523 = vmatprep.mubr.msk.f32.mxu0 %vm1942_vm0, %v1941_v25 }
  0xc3   :  { %666 = vmatmul.mubr.f32.gmra.mrb[64].mxu1 %v174_v13  ;;  %v176_v13 = vld [vmem:[%s3366_s0 + $0x510] sm:$0xff] }
  0xc4   :  { %1524 = vmatmul.mubr.msk.f32.gmra.mrb[20].mxu0 %vm311_vm1, %v68_v58  ;;  %670 = vmatprep.mubr.f32.mxu1 %v180_v8  ;;  %v173_v58 = vld [vmem:[%s3366_s0 + $0x4f8] sm:$0xff]  ;;  %v182_v8 = vld [vmem:[%s3366_s0 + $0x540] sm:$0xff] }
  0xc5   :  { %1526 = vmatprep.mubr.msk.f32.mxu0 %vm1942_vm0, %v1941_v25 }
  0xc7   :  { %671 = vmatmul.mubr.f32.gmra.mrb[66].mxu1 %v179_v59 }
  0xc8   :  { %1527 = vmatmul.mubr.msk.f32.gmra.mrb[22].mxu0 %vm311_vm1, %v73_v20  ;;  %675 = vmatprep.mubr.f32.mxu1 %v185_v60  ;;  %v181_v60 = vld [vmem:[%s3366_s0 + $0x538] sm:$0xff] }
  0xc9   :  { %1529 = vmatprep.mubr.msk.f32.mxu0 %vm1942_vm0, %v1941_v25 }
  0xcb   :  { %676 = vmatmul.mubr.f32.gmra.mrb[68].mxu1 %v184_v61  ;;  %v178_v61 = vld [vmem:[%s3366_s0 + $0x520] sm:$0xff] }
  0xcc   :  { %1530 = vmatmul.mubr.msk.f32.gmra.mrb[24].mxu0 %vm311_vm1, %v78_v63  ;;  %680 = vmatprep.mubr.f32.mxu1 %v190_v27  ;;  %v187_v63 = vld [vmem:[%s3366_s0 + $0x568] sm:$0xff] }
  0xcd   :  { %1532 = vmatprep.mubr.msk.f32.mxu0 %vm1942_vm0, %v1941_v25 }
  0xcf   :  { %681 = vmatmul.mubr.f32.gmra.mrb[70].mxu1 %v189_v1 }
  0xd0   :  { %1533 = vmatmul.mubr.msk.f32.gmra.mrb[26].mxu0 %vm311_vm1, %v83_v2  ;;  %685 = vmatprep.mubr.f32.mxu1 %v195_v3  ;;  %v186_v2 = vld [vmem:[%s3366_s0 + $0x560] sm:$0xff]  ;;  %v183_v3 = vld [vmem:[%s3366_s0 + $0x548] sm:$0xff] }
  0xd1   :  { %1535 = vmatprep.mubr.msk.f32.mxu0 %vm1942_vm0, %v1941_v25 }
  0xd3   :  { %686 = vmatmul.mubr.f32.gmra.mrb[72].mxu1 %v194_v34  ;;  %v192_v34 = vld [vmem:[%s3366_s0 + $0x590] sm:$0xff] }
  0xd4   :  { %1536 = vmatmul.mubr.msk.f32.gmra.mrb[28].mxu0 %vm311_vm1, %v88_v0  ;;  %690 = vmatprep.mubr.f32.mxu1 %v200_v4 }
  0xd5   :  { %1538 = vmatprep.mubr.msk.f32.mxu0 %vm1942_vm0, %v1941_v25 }
  0xd7   :  { %691 = vmatmul.mubr.f32.gmra.mrb[74].mxu1 %v199_v12  ;;  %v191_v12 = vld [vmem:[%s3366_s0 + $0x588] sm:$0xff] }
  0xd8   :  { %1539 = vmatmul.mubr.msk.f32.gmra.mrb[30].mxu0 %vm311_vm1, %v93_v41  ;;  %695 = vmatprep.mubr.f32.mxu1 %v205_v6  ;;  %v188_v41 = vld [vmem:[%s3366_s0 + $0x570] sm:$0xff]  ;;  %v197_v6 = vld [vmem:[%s3366_s0 + $0x5b8] sm:$0xff] }
  0xd9   :  { %1541 = vmatprep.mubr.msk.f32.mxu0 %vm1942_vm0, %v1941_v25 }
  0xdb   :  { %696 = vmatmul.mubr.f32.gmra.mrb[76].mxu1 %v204_v7 }
  0xdc   :  { %1542 = vmatmul.mubr.msk.f32.gmra.mrb[32].mxu0 %vm311_vm1, %v98_v9  ;;  %700 = vmatprep.mubr.f32.mxu1 %v210_v10  ;;  %v196_v10 = vld [vmem:[%s3366_s0 + $0x5b0] sm:$0xff] }
  0xdd   :  { %1544 = vmatprep.mubr.msk.f32.mxu0 %vm1942_vm0, %v1941_v25 }
  0xdf   :  { %701 = vmatmul.mubr.f32.gmra.mrb[78].mxu1 %v209_v11  ;;  %v193_v11 = vld [vmem:[%s3366_s0 + $0x598] sm:$0xff] }
  0xe0   :  { %1545 = vmatmul.mubr.msk.f32.gmra.mrb[34].mxu0 %vm311_vm1, %v103_v14  ;;  %705 = vmatprep.mubr.f32.mxu1 %v215_v18  ;;  %v202_v14 = vld [vmem:[%s3366_s0 + $0x5e0] sm:$0xff] }
  0xe1   :  { %1547 = vmatprep.mubr.msk.f32.mxu0 %vm1942_vm0, %v1941_v25 }
  0xe3   :  { %706 = vmatmul.mubr.f32.gmra.mrb[80].mxu1 %v214_v15 }
  0xe4   :  { %1548 = vmatmul.mubr.msk.f32.gmra.mrb[36].mxu0 %vm311_vm1, %v108_v16  ;;  %710 = vmatprep.mubr.f32.mxu1 %v220_v17  ;;  %v201_v16 = vld [vmem:[%s3366_s0 + $0x5d8] sm:$0xff]  ;;  %v198_v17 = vld [vmem:[%s3366_s0 + $0x5c0] sm:$0xff] }
  0xe5   :  { %1550 = vmatprep.mubr.msk.f32.mxu0 %vm1942_vm0, %v1941_v25 }
  0xe7   :  { %711 = vmatmul.mubr.f32.gmra.mrb[82].mxu1 %v219_v19  ;;  %v207_v19 = vld [vmem:[%s3366_s0 + $0x608] sm:$0xff] }
  0xe8   :  { %1551 = vmatmul.mubr.msk.f32.gmra.mrb[38].mxu0 %vm311_vm1, %v113_v21  ;;  %715 = vmatprep.mubr.f32.mxu1 %v225_v24 }
  0xe9   :  { %1553 = vmatprep.mubr.msk.f32.mxu0 %vm1942_vm0, %v1941_v25 }
  0xeb   :  { %716 = vmatmul.mubr.f32.gmra.mrb[84].mxu1 %v224_v22  ;;  %v206_v22 = vld [vmem:[%s3366_s0 + $0x600] sm:$0xff] }
  0xec   :  { %1554 = vmatmul.mubr.msk.f32.gmra.mrb[40].mxu0 %vm311_vm1, %v118_v23  ;;  %895 = vmatprep.mubr.f32.mxu1 %v127_v26  ;;  %v203_v23 = vld [vmem:[%s3366_s0 + $0x5e8] sm:$0xff]  ;;  %v212_v26 = vld [vmem:[%s3366_s0 + $0x630] sm:$0xff] }
  0xed   :  { %1556 = vmatprep.mubr.msk.f32.mxu0 %vm1942_vm0, %v1941_v25 }
  0xef   :  { %896 = vmatmul.mubr.f32.vlgmr.msra.gmra.mrb[44].mxu1 %v126_v30 }
  0xf0   :  { %1557 = vmatmul.mubr.msk.f32.gmra.mrb[42].mxu0 %vm311_vm1, %v123_v28  ;;  %900 = vmatprep.mubr.f32.mxu1 %v132_v29  ;;  %v211_v29 = vld [vmem:[%s3366_s0 + $0x628] sm:$0xff] }
  0xf1   :  { %1559 = vmatprep.mubr.msk.f32.mxu0 %vm1942_vm0, %v1941_v25 }
  0xf3   :  { %901 = vmatmul.mubr.f32.gmra.mrb[46].mxu1 %v131_v31  ;;  %v208_v31 = vld [vmem:[%s3366_s0 + $0x610] sm:$0xff] }
  0xf4   :  { %1560 = vmatmul.mubr.msk.f32.gmra.mrb[44].mxu0 %vm311_vm1, %v128_v32  ;;  %905 = vmatprep.mubr.f32.mxu1 %v137_v33  ;;  %v217_v32 = vld [vmem:[%s3366_s0 + $0x658] sm:$0xff] }
  0xf5   :  { %1562 = vmatprep.mubr.msk.f32.mxu0 %vm1942_vm0, %v1941_v25 }
  0xf7   :  { %906 = vmatmul.mubr.f32.gmra.mrb[48].mxu1 %v136_v36 }
  0xf8   :  { %1563 = vmatmul.mubr.msk.f32.gmra.mrb[46].mxu0 %vm311_vm1, %v133_v35  ;;  %910 = vmatprep.mubr.f32.mxu1 %v142_v37  ;;  %v216_v35 = vld [vmem:[%s3366_s0 + $0x650] sm:$0xff]  ;;  %v213_v37 = vld [vmem:[%s3366_s0 + $0x638] sm:$0xff] }
  0xf9   :  { %1565 = vmatprep.mubr.msk.f32.mxu0 %vm1942_vm0, %v1941_v25 }
  0xfb   :  { %911 = vmatmul.mubr.f32.gmra.mrb[50].mxu1 %v141_v38  ;;  %v222_v38 = vld [vmem:[%s3366_s0 + $0x680] sm:$0xff] }
  0xfc   :  { %1566 = vmatmul.mubr.msk.f32.gmra.mrb[48].mxu0 %vm311_vm1, %v138_v44  ;;  %915 = vmatprep.mubr.f32.mxu1 %v147_v39 }
  0xfd   :  { %1568 = vmatprep.mubr.msk.f32.mxu0 %vm1942_vm0, %v1941_v25 }
  0xff   :  { %916 = vmatmul.mubr.f32.gmra.mrb[52].mxu1 %v146_v40  ;;  %v221_v40 = vld [vmem:[%s3366_s0 + $0x678] sm:$0xff] }
 0x100   :  { %1569 = vmatmul.mubr.msk.f32.gmra.mrb[50].mxu0 %vm311_vm1, %v143_v42  ;;  %920 = vmatprep.mubr.f32.mxu1 %v152_v50  ;;  %v218_v42 = vld [vmem:[%s3366_s0 + $0x660] sm:$0xff]  ;;  %v227_v50 = vld [vmem:[%s3366_s0 + $0x6a8] sm:$0x3] }
 0x101   :  { %1571 = vmatprep.mubr.msk.f32.mxu0 %vm1942_vm0, %v1941_v25 }
 0x103   :  { %921 = vmatmul.mubr.f32.gmra.mrb[54].mxu1 %v151_v43 }
 0x104   :  { %1572 = vmatmul.mubr.msk.f32.gmra.mrb[52].mxu0 %vm311_vm1, %v148_v45  ;;  %925 = vmatprep.mubr.f32.mxu1 %v157_v46  ;;  %v226_v46 = vld [vmem:[%s3366_s0 + $0x6a0] sm:$0x3] }
 0x105   :  { %1574 = vmatprep.mubr.msk.f32.mxu0 %vm1942_vm0, %v1941_v25 }
 0x107   :  { %926 = vmatmul.mubr.f32.gmra.mrb[56].mxu1 %v156_v56  ;;  %v223_v56 = vld [vmem:[%s3366_s0 + $0x688] sm:$0xff] }
 0x108   :  { %1575 = vmatmul.mubr.msk.f32.gmra.mrb[54].mxu0 %vm311_vm1, %v153_v47  ;;  %930 = vmatprep.mubr.f32.mxu1 %v162_v48 }
 0x109   :  { %1577 = vmatprep.mubr.msk.f32.mxu0 %vm1942_vm0, %v1941_v25 }
 0x10b   :  { %931 = vmatmul.mubr.f32.gmra.mrb[58].mxu1 %v161_v49  ;;  %v228_v49 = vld [vmem:[%s3366_s0 + $0x6b0] sm:$0x3] }
 0x10c   :  { %1578 = vmatmul.mubr.msk.f32.gmra.mrb[56].mxu0 %vm311_vm1, %v158_v62  ;;  %935 = vmatprep.mubr.f32.mxu1 %v167_v51 }
 0x10d   :  { %1580 = vmatprep.mubr.msk.f32.mxu0 %vm1942_vm0, %v1941_v25 }
 0x10f   :  { %936 = vmatmul.mubr.f32.gmra.mrb[60].mxu1 %v166_v52 }
 0x110   :  { %1581 = vmatmul.mubr.msk.f32.gmra.mrb[58].mxu0 %vm311_vm1, %v163_v53  ;;  %940 = vmatprep.mubr.f32.mxu1 %v172_v5 }
 0x111   :  { %1583 = vmatprep.mubr.msk.f32.mxu0 %vm1942_vm0, %v1941_v25 }
 0x113   :  { %941 = vmatmul.mubr.f32.gmra.mrb[62].mxu1 %v171_v54 }
 0x114   :  { %1584 = vmatmul.mubr.msk.f32.gmra.mrb[60].mxu0 %vm311_vm1, %v168_v55  ;;  %945 = vmatprep.mubr.f32.mxu1 %v177_v57 }
 0x115   :  { %1586 = vmatprep.mubr.msk.f32.mxu0 %vm1942_vm0, %v1941_v25 }
 0x116   :  { %v2956_v59 = vpop.f32.mrb[0].mxu1 }
 0x117   :  { %946 = vmatmul.mubr.f32.gmra.mrb[64].mxu1 %v176_v13  ;;  %v509_v20 = vpop.f32.mrb[1].mxu1 }
 0x118   :  { %1587 = vmatmul.mubr.msk.f32.gmra.mrb[62].mxu0 %vm311_vm1, %v173_v58  ;;  %950 = vmatprep.mubr.f32.mxu1 %v182_v8 }
 0x119   :  { %1589 = vmatprep.mubr.msk.f32.mxu0 %vm1942_vm0, %v1941_v25 }
 0x11a   :  { %v2970_v27 = vpop.f32.mrb[2].mxu1 }
 0x11b   :  { %951 = vmatmul.mubr.f32.gmra.mrb[66].mxu1 %v181_v60  ;;  %v514_v1 = vpop.f32.mrb[3].mxu1 }
 0x11c   :  { %1590 = vmatmul.mubr.msk.f32.gmra.mrb[64].mxu0 %vm311_vm1, %v178_v61  ;;  %955 = vmatprep.mubr.f32.mxu1 %v187_v63 }
 0x11d   :  { %1592 = vmatprep.mubr.msk.f32.mxu0 %vm1942_vm0, %v1941_v25 }
 0x11e   :  { %v2984_v0 = vpop.f32.mrb[4].mxu1 }
 0x11f   :  { %956 = vmatmul.mubr.f32.gmra.mrb[68].mxu1 %v186_v2  ;;  %v519_v4 = vpop.f32.mrb[5].mxu1 }
 0x120   :  { %1593 = vmatmul.mubr.msk.f32.gmra.mrb[66].mxu0 %vm311_vm1, %v183_v3  ;;  %960 = vmatprep.mubr.f32.mxu1 %v192_v34 }
 0x121   :  { %1595 = vmatprep.mubr.msk.f32.mxu0 %vm1942_vm0, %v1941_v25 }
 0x122   :  { %v2998_v7 = vpop.f32.mrb[6].mxu1 }
 0x123   :  { %961 = vmatmul.mubr.f32.gmra.mrb[70].mxu1 %v191_v12  ;;  %v524_v9 = vpop.f32.mrb[7].mxu1  ;;  %v3127_v12 = vld [vmem:[%s3367_s2] ss:$0 sm:$0xff] }
 0x124   :  { %1596 = vmatmul.mubr.msk.f32.gmra.mrb[68].mxu0 %vm311_vm1, %v188_v41  ;;  %965 = vmatprep.mubr.f32.mxu1 %v197_v6  ;;  %v508_v6 = vadd.f32 %v3127_v12, %v2956_v59 }
 0x125   :  { %1598 = vmatprep.mubr.msk.f32.mxu0 %vm1942_vm0, %v1941_v25 }
 0x126   :  { %v3012_v18 = vpop.f32.mrb[8].mxu1 }
 0x127   :  { %966 = vmatmul.mubr.f32.gmra.mrb[72].mxu1 %v196_v10  ;;  %v529_v15 = vpop.f32.mrb[9].mxu1 }
 0x128   :  { %1599 = vmatmul.mubr.msk.f32.gmra.mrb[70].mxu0 %vm311_vm1, %v193_v11  ;;  %970 = vmatprep.mubr.f32.mxu1 %v202_v14  ;;  %v513_v14 = vadd.f32 %v3127_v12, %v2970_v27 }
 0x129   :  { %1601 = vmatprep.mubr.msk.f32.mxu0 %vm1942_vm0, %v1941_v25 }
 0x12a   :  { %v3026_v21 = vpop.f32.mrb[10].mxu1 }
 0x12b   :  { %971 = vmatmul.mubr.f32.gmra.mrb[74].mxu1 %v201_v16  ;;  %v534_v24 = vpop.f32.mrb[11].mxu1 }
 0x12c   :  { %1602 = vmatmul.mubr.msk.f32.gmra.mrb[72].mxu0 %vm311_vm1, %v198_v17  ;;  %975 = vmatprep.mubr.f32.mxu1 %v207_v19  ;;  %v518_v24 = vadd.f32 %v3127_v12, %v2984_v0 }
 0x12d   :  { %1604 = vmatprep.mubr.msk.f32.mxu0 %vm1942_vm0, %v1941_v25 }
 0x12e   :  { %v3040_v30 = vpop.f32.mrb[12].mxu1 }
 0x12f   :  { %976 = vmatmul.mubr.f32.gmra.mrb[76].mxu1 %v206_v22  ;;  %v539_v28 = vpop.f32.mrb[13].mxu1 }
 0x130   :  { %1605 = vmatmul.mubr.msk.f32.gmra.mrb[74].mxu0 %vm311_vm1, %v203_v23  ;;  %980 = vmatprep.mubr.f32.mxu1 %v212_v26  ;;  %v523_v26 = vadd.f32 %v3127_v12, %v2998_v7 }
 0x131   :  { %1607 = vmatprep.mubr.msk.f32.mxu0 %vm1942_vm0, %v1941_v25 }
 0x132   :  { %v3054_v33 = vpop.f32.mrb[14].mxu1 }
 0x133   :  { %981 = vmatmul.mubr.f32.gmra.mrb[78].mxu1 %v211_v29  ;;  %v544_v36 = vpop.f32.mrb[15].mxu1 }
 0x134   :  { %1608 = vmatmul.mubr.msk.f32.gmra.mrb[76].mxu0 %vm311_vm1, %v208_v31  ;;  %985 = vmatprep.mubr.f32.mxu1 %v217_v32  ;;  %v528_v32 = vadd.f32 %v3127_v12, %v3012_v18 }
 0x135   :  { %1610 = vmatprep.mubr.msk.f32.mxu0 %vm1942_vm0, %v1941_v25 }
 0x136   :  { %v3068_v44 = vpop.f32.mrb[16].mxu1 }
 0x137   :  { %986 = vmatmul.mubr.f32.gmra.mrb[80].mxu1 %v216_v35  ;;  %v549_v39 = vpop.f32.mrb[17].mxu1 }
 0x138   :  { %1611 = vmatmul.mubr.msk.f32.gmra.mrb[78].mxu0 %vm311_vm1, %v213_v37  ;;  %990 = vmatprep.mubr.f32.mxu1 %v222_v38  ;;  %v533_v38 = vadd.f32 %v3127_v12, %v3026_v21 }
 0x139   :  { %1613 = vmatprep.mubr.msk.f32.mxu0 %vm1942_vm0, %v1941_v25 }
 0x13a   :  { %v3082_v43 = vpop.f32.mrb[18].mxu1 }
 0x13b   :  { %991 = vmatmul.mubr.f32.gmra.mrb[82].mxu1 %v221_v40  ;;  %v554_v45 = vpop.f32.mrb[19].mxu1 }
 0x13c   :  { %1614 = vmatmul.mubr.msk.f32.gmra.mrb[80].mxu0 %vm311_vm1, %v218_v42  ;;  %995 = vmatprep.mubr.f32.mxu1 %v227_v50  ;;  %v538_v50 = vadd.f32 %v3127_v12, %v3040_v30 }
 0x13d   :  { %1616 = vmatprep.mubr.msk.f32.mxu0 %vm1942_vm0, %v1941_v25 }
 0x13e   :  { %v3093_v47 = vpop.f32.mrb[20].mxu1 }
 0x13f   :  { %996 = vmatmul.mubr.f32.gmra.mrb[84].mxu1 %v226_v46  ;;  %v559_v48 = vpop.f32.mrb[21].mxu1 }
 0x140   :  { %1617 = vmatmul.mubr.msk.f32.gmra.mrb[82].mxu0 %vm311_vm1, %v223_v56  ;;  %v543_v48 = vadd.f32 %v3127_v12, %v3054_v33 }
 0x141   :  { %1619 = vmatprep.mubr.msk.f32.mxu0 %vm1942_vm0, %v1941_v25 }
 0x142   :  { %v3101_v62 = vpop.f32.mrb[22].mxu1 }
 0x143   :  { %v564_v51 = vpop.f32.mrb[23].mxu1 }
 0x144   :  { %1620 = vmatmul.mubr.msk.f32.gmra.mrb[84].mxu0 %vm311_vm1, %v228_v49 }
 0x146   :  { %v3104_v52 = vpop.f32.mrb[24].mxu1 }
 0x147   :  { %v569_v53 = vpop.f32.mrb[25].mxu1 }
 0x14a   :  { %v3106_v5 = vpop.f32.mrb[26].mxu1 }
 0x14b   :  { %v574_v54 = vpop.f32.mrb[27].mxu1 }
 0x14c   :  { %v548_v54 = vadd.f32 %v3127_v12, %v3068_v44 }
 0x14e   :  { %v3108_v55 = vpop.f32.mrb[28].mxu1 }
 0x14f   :  { %v579_v57 = vpop.f32.mrb[29].mxu1 }
 0x152   :  { %v3110_v13 = vpop.f32.mrb[30].mxu1 }
 0x153   :  { %v584_v25 = vpop.f32.mrb[31].mxu1 }
 0x156   :  { %v3112_v58 = vpop.f32.mrb[32].mxu1 }
 0x157   :  { %v589_v8 = vpop.f32.mrb[33].mxu1 }
 0x15a   :  { %v3114_v20 = vpop.f32.mrb[34].mxu1 }
 0x15b   :  { %v594_v60 = vpop.f32.mrb[35].mxu1 }
 0x15c   :  { %v553_v60 = vadd.f32 %v3127_v12, %v3082_v43 }
 0x15e   :  { %v3116_v61 = vpop.f32.mrb[36].mxu1 }
 0x15f   :  { %v599_v63 = vpop.f32.mrb[37].mxu1 }
 0x162   :  { %v3118_v1 = vpop.f32.mrb[38].mxu1 }
 0x163   :  { %v604_v2 = vpop.f32.mrb[39].mxu1 }
 0x166   :  { %v3120_v3 = vpop.f32.mrb[40].mxu1 }
 0x167   :  { %v609_v34 = vpop.f32.mrb[41].mxu1 }
 0x16a   :  { %v3122_v4 = vpop.f32.mrb[42].mxu1 }
 0x16b   :  { %v614_v41 = vpop.f32.mrb[43].mxu1 }
 0x16c   :  { %v558_v41 = vadd.f32 %v3127_v12, %v3093_v47 }
 0x16f   :  { %v1067_v9 = vpop.f32.mrb[0].mxu0 }
 0x170   :  { %v1766_v10 = vadd.f32 %v1067_v9, %v508_v6  ;;  %v1495_v11 = vpop.f32.mrb[1].mxu0 }
 0x171   :  { %v563_v11 = vadd.f32 %v3127_v12, %v3101_v62 }
 0x172   :  { %v1281_v15 = vmax.f32 %v1766_v10, 0.0 }
 0x173   :  { %v1072_v16 = vpop.f32.mrb[2].mxu0 }
 0x174   :  { %1325 = vst.msk [vmem:[%s3368_s3] sm:$0xff] %vm1324_vm2, %v1281_v15  ;;  %v1768_v17 = vadd.f32 %v1072_v16, %v513_v14  ;;  %v1498_v19 = vpop.f32.mrb[3].mxu0 }
 0x176   :  { %v1282_v59 = vmax.f32 %v1768_v17, 0.0  ;;  %v568_v17 = vadd.f32 %v3127_v12, %v3104_v52 }
 0x177   :  { %v1077_v22 = vpop.f32.mrb[4].mxu0 }
 0x178   :  { %1326 = vst.msk [vmem:[%s3368_s3 + $0x8] sm:$0xff] %vm1324_vm2, %v1282_v59  ;;  %v1770_v27 = vadd.f32 %v1077_v22, %v518_v24  ;;  %v1501_v23 = vpop.f32.mrb[5].mxu0  ;;  %v573_v22 = vadd.f32 %v3127_v12, %v3106_v5 }
 0x17a   :  { %v1283_v28 = vmax.f32 %v1770_v27, 0.0 }
 0x17b   :  { %v1082_v29 = vpop.f32.mrb[6].mxu0 }
 0x17c   :  { %1327 = vst.msk [vmem:[%s3368_s3 + $0x10] sm:$0xff] %vm1324_vm2, %v1283_v28  ;;  %v1772_v0 = vadd.f32 %v1082_v29, %v523_v26  ;;  %v1504_v31 = vpop.f32.mrb[7].mxu0  ;;  %v578_v28 = vadd.f32 %v3127_v12, %v3108_v55 }
 0x17e   :  { %v1284_v36 = vmax.f32 %v1772_v0, 0.0 }
 0x17f   :  { %v1087_v35 = vpop.f32.mrb[8].mxu0 }
 0x180   :  { %1328 = vst.msk [vmem:[%s3368_s3 + $0x18] sm:$0xff] %vm1324_vm2, %v1284_v36  ;;  %v1774_v7 = vadd.f32 %v1087_v35, %v528_v32  ;;  %v1507_v37 = vpop.f32.mrb[9].mxu0  ;;  %v583_v32 = vadd.f32 %v3127_v12, %v3110_v13 }
 0x181   :  { %v588_v37 = vadd.f32 %v3127_v12, %v3112_v58 }
 0x182   :  { %v1285_v39 = vmax.f32 %v1774_v7, 0.0 }
 0x183   :  { %v1092_v40 = vpop.f32.mrb[10].mxu0 }
 0x184   :  { %1329 = vst.msk [vmem:[%s3368_s3 + $0x20] sm:$0xff] %vm1324_vm2, %v1285_v39  ;;  %v1776_v18 = vadd.f32 %v1092_v40, %v533_v38  ;;  %v1510_v42 = vpop.f32.mrb[11].mxu0 }
 0x186   :  { %v1286_v45 = vmax.f32 %v1776_v18, 0.0  ;;  %v593_v18 = vadd.f32 %v3127_v12, %v3114_v20 }
 0x187   :  { %v1097_v46 = vpop.f32.mrb[12].mxu0 }
 0x188   :  { %1330 = vst.msk [vmem:[%s3368_s3 + $0x28] sm:$0xff] %vm1324_vm2, %v1286_v45  ;;  %v1778_v21 = vadd.f32 %v1097_v46, %v538_v50  ;;  %v1513_v56 = vpop.f32.mrb[13].mxu0  ;;  %v598_v46 = vadd.f32 %v3127_v12, %v3116_v61 }
 0x18a   :  { %v1287_v49 = vmax.f32 %v1778_v21, 0.0 }
 0x18b   :  { %v1102_v51 = vpop.f32.mrb[14].mxu0 }
 0x18c   :  { %1331 = vst.msk [vmem:[%s3368_s3 + $0x30] sm:$0xff] %vm1324_vm2, %v1287_v49  ;;  %v1780_v30 = vadd.f32 %v1102_v51, %v543_v48  ;;  %v1516_v53 = vpop.f32.mrb[15].mxu0  ;;  %v603_v49 = vadd.f32 %v3127_v12, %v3118_v1 }
 0x18e   :  { %v1288_v57 = vmax.f32 %v1780_v30, 0.0 }
 0x18f   :  { %v1107_v25 = vpop.f32.mrb[16].mxu0 }
 0x190   :  { %1332 = vst.msk [vmem:[%s3368_s3 + $0x38] sm:$0xff] %vm1324_vm2, %v1288_v57  ;;  %v1782_v33 = vadd.f32 %v1107_v25, %v548_v54  ;;  %v1519_v8 = vpop.f32.mrb[17].mxu0  ;;  %v608_v54 = vadd.f32 %v3127_v12, %v3120_v3 }
 0x191   :  { %v613_v8 = vadd.f32 %v3127_v12, %v3122_v4 }
 0x192   :  { %v1289_v63 = vmax.f32 %v1782_v33, 0.0 }
 0x193   :  { %v1112_v2 = vpop.f32.mrb[18].mxu0 }
 0x194   :  { %1333 = vst.msk [vmem:[%s3368_s3 + $0x40] sm:$0xff] %vm1324_vm2, %v1289_v63  ;;  %v1784_v44 = vadd.f32 %v1112_v2, %v553_v60  ;;  %v1522_v34 = vpop.f32.mrb[19].mxu0 }
 0x196   :  { %v1290_v6 = vmax.f32 %v1784_v44, 0.0 }
 0x197   :  { %v1117_v9 = vpop.f32.mrb[20].mxu0 }
 0x198   :  { %1334 = vst.msk [vmem:[%s3368_s3 + $0x48] sm:$0xff] %vm1324_vm2, %v1290_v6  ;;  %v1786_v43 = vadd.f32 %v1117_v9, %v558_v41  ;;  %v1525_v10 = vpop.f32.mrb[21].mxu0 }
 0x19a   :  { %v1291_v14 = vmax.f32 %v1786_v43, 0.0 }
 0x19b   :  { %v1122_v15 = vpop.f32.mrb[22].mxu0 }
 0x19c   :  { %1335 = vst.msk [vmem:[%s3368_s3 + $0x50] sm:$0xff] %vm1324_vm2, %v1291_v14  ;;  %v1788_v47 = vadd.f32 %v1122_v15, %v563_v11  ;;  %v1528_v16 = vpop.f32.mrb[23].mxu0 }
 0x19e   :  { %v1292_v19 = vmax.f32 %v1788_v47, 0.0 }
 0x19f   :  { %v1127_v24 = vpop.f32.mrb[24].mxu0 }
 0x1a0   :  { %1336 = vst.msk [vmem:[%s3368_s3 + $0x58] sm:$0xff] %vm1324_vm2, %v1292_v19  ;;  %v1790_v62 = vadd.f32 %v1127_v24, %v568_v17  ;;  %v1531_v59 = vpop.f32.mrb[25].mxu0 }
 0x1a2   :  { %v1293_v27 = vmax.f32 %v1790_v62, 0.0 }
 0x1a3   :  { %v1132_v23 = vpop.f32.mrb[26].mxu0 }
 0x1a4   :  { %1337 = vst.msk [vmem:[%s3368_s3 + $0x60] sm:$0xff] %vm1324_vm2, %v1293_v27  ;;  %v1792_v52 = vadd.f32 %v1132_v23, %v573_v22  ;;  %v1534_v26 = vpop.f32.mrb[27].mxu0 }
 0x1a6   :  { %v1294_v29 = vmax.f32 %v1792_v52, 0.0 }
 0x1a7   :  { %v1137_v0 = vpop.f32.mrb[28].mxu0 }
 0x1a8   :  { %1338 = vst.msk [vmem:[%s3368_s3 + $0x68] sm:$0xff] %vm1324_vm2, %v1294_v29  ;;  %v1794_v5 = vadd.f32 %v1137_v0, %v578_v28  ;;  %v1537_v31 = vpop.f32.mrb[29].mxu0 }
 0x1aa   :  { %v1295_v36 = vmax.f32 %v1794_v5, 0.0 }
 0x1ab   :  { %v1142_v35 = vpop.f32.mrb[30].mxu0 }
 0x1ac   :  { %1339 = vst.msk [vmem:[%s3368_s3 + $0x70] sm:$0xff] %vm1324_vm2, %v1295_v36  ;;  %v1796_v55 = vadd.f32 %v1142_v35, %v583_v32  ;;  %v1540_v7 = vpop.f32.mrb[31].mxu0 }
 0x1ae   :  { %v1296_v38 = vmax.f32 %v1796_v55, 0.0 }
 0x1af   :  { %v1147_v39 = vpop.f32.mrb[32].mxu0 }
 0x1b0   :  { %1340 = vst.msk [vmem:[%s3368_s3 + $0x78] sm:$0xff] %vm1324_vm2, %v1296_v38  ;;  %v1798_v13 = vadd.f32 %v1147_v39, %v588_v37  ;;  %v1543_v40 = vpop.f32.mrb[33].mxu0 }
 0x1b2   :  { %v1297_v42 = vmax.f32 %v1798_v13, 0.0 }
 0x1b3   :  { %v1152_v50 = vpop.f32.mrb[34].mxu0 }
 0x1b4   :  { %1341 = vst.msk [vmem:[%s3368_s3 + $0x80] sm:$0xff] %vm1324_vm2, %v1297_v42  ;;  %v1800_v58 = vadd.f32 %v1152_v50, %v593_v18  ;;  %v1546_v45 = vpop.f32.mrb[35].mxu0 }
 0x1b6   :  { %v1298_v21 = vmax.f32 %v1800_v58, 0.0 }
 0x1b7   :  { %v1157_v56 = vpop.f32.mrb[36].mxu0 }
 0x1b8   :  { %1342 = vst.msk [vmem:[%s3368_s3 + $0x88] sm:$0xff] %vm1324_vm2, %v1298_v21  ;;  %v1802_v20 = vadd.f32 %v1157_v56, %v598_v46  ;;  %v1549_v48 = vpop.f32.mrb[37].mxu0 }
 0x1ba   :  { %v1299_v51 = vmax.f32 %v1802_v20, 0.0 }
 0x1bb   :  { %v1162_v30 = vpop.f32.mrb[38].mxu0 }
 0x1bc   :  { %1343 = vst.msk [vmem:[%s3368_s3 + $0x90] sm:$0xff] %vm1324_vm2, %v1299_v51  ;;  %v1804_v61 = vadd.f32 %v1162_v30, %v603_v49  ;;  %v1552_v53 = vpop.f32.mrb[39].mxu0 }
 0x1be   :  { %v1300_v57 = vmax.f32 %v1804_v61, 0.0 }
 0x1bf   :  { %v1167_v25 = vpop.f32.mrb[40].mxu0 }
 0x1c0   :  { %1344 = vst.msk [vmem:[%s3368_s3 + $0x98] sm:$0xff] %vm1324_vm2, %v1300_v57  ;;  %v1806_v1 = vadd.f32 %v1167_v25, %v608_v54  ;;  %v1555_v33 = vpop.f32.mrb[41].mxu0 }
 0x1c2   :  { %v1301_v60 = vmax.f32 %v1806_v1, 0.0  ;;  %v897_v63 = vpop.f32.mrb[44].mxu1 }
 0x1c3   :  { %v1172_v2 = vpop.f32.mrb[42].mxu0  ;;  %v899_v44 = vpop.f32.mrb[45].mxu1  ;;  %v1809_v41 = vadd.f32 %v3127_v12, %v897_v63 }
 0x1c4   :  { %1345 = vst.msk [vmem:[%s3368_s3 + $0xa0] sm:$0xff] %vm1324_vm2, %v1301_v60  ;;  %v1808_v3 = vadd.f32 %v1172_v2, %v613_v8  ;;  %v1558_v34 = vpop.f32.mrb[43].mxu0 }
 0x1c6   :  { %v1302_v6 = vmax.f32 %v1808_v3, 0.0  ;;  %v902_v9 = vpop.f32.mrb[46].mxu1 }
 0x1c7   :  { %v1177_v43 = vpop.f32.mrb[44].mxu0  ;;  %v904_v10 = vpop.f32.mrb[47].mxu1  ;;  %v1811_v14 = vadd.f32 %v3127_v12, %v902_v9 }
 0x1c8   :  { %1346 = vst.msk [vmem:[%s3368_s3 + $0xa8] sm:$0xff] %vm1324_vm2, %v1302_v6  ;;  %v1810_v4 = vadd.f32 %v1809_v41, %v1177_v43  ;;  %v1561_v11 = vpop.f32.mrb[45].mxu0 }
 0x1ca   :  { %v1303_v15 = vmax.f32 %v1810_v4, 0.0  ;;  %v907_v47 = vpop.f32.mrb[48].mxu1 }
 0x1cb   :  { %v1182_v16 = vpop.f32.mrb[46].mxu0  ;;  %v909_v17 = vpop.f32.mrb[49].mxu1  ;;  %v1813_v62 = vadd.f32 %v3127_v12, %v907_v47 }
 0x1cc   :  { %1347 = vst.msk [vmem:[%s3368_s3 + $0xb0] sm:$0xff] %vm1324_vm2, %v1303_v15  ;;  %v1812_v19 = vadd.f32 %v1811_v14, %v1182_v16  ;;  %v1564_v24 = vpop.f32.mrb[47].mxu0 }
 0x1ce   :  { %v1304_v59 = vmax.f32 %v1812_v19, 0.0  ;;  %v912_v22 = vpop.f32.mrb[50].mxu1 }
 0x1cf   :  { %v1187_v27 = vpop.f32.mrb[48].mxu0  ;;  %v914_v23 = vpop.f32.mrb[51].mxu1  ;;  %v1815_v28 = vadd.f32 %v3127_v12, %v912_v22 }
 0x1d0   :  { %1348 = vst.msk [vmem:[%s3368_s3 + $0xb8] sm:$0xff] %vm1324_vm2, %v1304_v59  ;;  %v1814_v52 = vadd.f32 %v1813_v62, %v1187_v27  ;;  %v1567_v26 = vpop.f32.mrb[49].mxu0 }
 0x1d2   :  { %v1305_v29 = vmax.f32 %v1814_v52, 0.0  ;;  %v917_v0 = vpop.f32.mrb[52].mxu1 }
 0x1d3   :  { %v1192_v5 = vpop.f32.mrb[50].mxu0  ;;  %v919_v31 = vpop.f32.mrb[53].mxu1  ;;  %v1817_v35 = vadd.f32 %v3127_v12, %v917_v0 }
 0x1d4   :  { %1349 = vst.msk [vmem:[%s3368_s3 + $0xc0] sm:$0xff] %vm1324_vm2, %v1305_v29  ;;  %v1816_v32 = vadd.f32 %v1815_v28, %v1192_v5  ;;  %v1570_v36 = vpop.f32.mrb[51].mxu0 }
 0x1d6   :  { %v1306_v55 = vmax.f32 %v1816_v32, 0.0  ;;  %v922_v7 = vpop.f32.mrb[54].mxu1 }
 0x1d7   :  { %v1197_v37 = vpop.f32.mrb[52].mxu0  ;;  %v924_v38 = vpop.f32.mrb[55].mxu1  ;;  %v1819_v40 = vadd.f32 %v3127_v12, %v922_v7 }
 0x1d8   :  { %1350 = vst.msk [vmem:[%s3368_s3 + $0xc8] sm:$0xff] %vm1324_vm2, %v1306_v55  ;;  %v1818_v39 = vadd.f32 %v1817_v35, %v1197_v37  ;;  %v1573_v13 = vpop.f32.mrb[53].mxu0 }
 0x1da   :  { %v1307_v18 = vmax.f32 %v1818_v39, 0.0  ;;  %v927_v42 = vpop.f32.mrb[56].mxu1 }
 0x1db   :  { %v1202_v50 = vpop.f32.mrb[54].mxu0  ;;  %v929_v58 = vpop.f32.mrb[57].mxu1  ;;  %v1821_v21 = vadd.f32 %v3127_v12, %v927_v42 }
 0x1dc   :  { %1351 = vst.msk [vmem:[%s3368_s3 + $0xd0] sm:$0xff] %vm1324_vm2, %v1307_v18  ;;  %v1820_v45 = vadd.f32 %v1819_v40, %v1202_v50  ;;  %v1576_v46 = vpop.f32.mrb[55].mxu0 }
 0x1de   :  { %v1308_v56 = vmax.f32 %v1820_v45, 0.0  ;;  %v932_v20 = vpop.f32.mrb[58].mxu1 }
 0x1df   :  { %v1207_v48 = vpop.f32.mrb[56].mxu0  ;;  %v934_v49 = vpop.f32.mrb[59].mxu1  ;;  %v1823_v61 = vadd.f32 %v3127_v12, %v932_v20 }
 0x1e0   :  { %1352 = vst.msk [vmem:[%s3368_s3 + $0xd8] sm:$0xff] %vm1324_vm2, %v1308_v56  ;;  %v1822_v51 = vadd.f32 %v1821_v21, %v1207_v48  ;;  %v1579_v30 = vpop.f32.mrb[57].mxu0 }
 0x1e2   :  { %v1309_v53 = vmax.f32 %v1822_v51, 0.0  ;;  %v937_v54 = vpop.f32.mrb[60].mxu1 }
 0x1e3   :  { %v1212_v57 = vpop.f32.mrb[58].mxu0  ;;  %v939_v25 = vpop.f32.mrb[61].mxu1  ;;  %v1825_v8 = vadd.f32 %v3127_v12, %v937_v54 }
 0x1e4   :  { %1353 = vst.msk [vmem:[%s3368_s3 + $0xe0] sm:$0xff] %vm1324_vm2, %v1309_v53  ;;  %v1824_v1 = vadd.f32 %v1823_v61, %v1212_v57  ;;  %v1582_v33 = vpop.f32.mrb[59].mxu0 }
 0x1e6   :  { %v1310_v60 = vmax.f32 %v1824_v1, 0.0  ;;  %v942_v63 = vpop.f32.mrb[62].mxu1 }
 0x1e7   :  { %v1217_v2 = vpop.f32.mrb[60].mxu0  ;;  %v944_v44 = vpop.f32.mrb[63].mxu1  ;;  %v1827_v41 = vadd.f32 %v3127_v12, %v942_v63 }
 0x1e8   :  { %1354 = vst.msk [vmem:[%s3368_s3 + $0xe8] sm:$0xff] %vm1324_vm2, %v1310_v60  ;;  %v1826_v3 = vadd.f32 %v1825_v8, %v1217_v2  ;;  %v1585_v34 = vpop.f32.mrb[61].mxu0 }
 0x1ea   :  { %v1311_v6 = vmax.f32 %v1826_v3, 0.0  ;;  %v947_v9 = vpop.f32.mrb[64].mxu1 }
 0x1eb   :  { %v1222_v43 = vpop.f32.mrb[62].mxu0  ;;  %v949_v10 = vpop.f32.mrb[65].mxu1  ;;  %v1829_v14 = vadd.f32 %v3127_v12, %v947_v9 }
 0x1ec   :  { %1355 = vst.msk [vmem:[%s3368_s3 + $0xf0] sm:$0xff] %vm1324_vm2, %v1311_v6  ;;  %v1828_v4 = vadd.f32 %v1827_v41, %v1222_v43  ;;  %v1588_v11 = vpop.f32.mrb[63].mxu0 }
 0x1ee   :  { %v1312_v15 = vmax.f32 %v1828_v4, 0.0  ;;  %v952_v47 = vpop.f32.mrb[66].mxu1 }
 0x1ef   :  { %v1227_v16 = vpop.f32.mrb[64].mxu0  ;;  %v954_v17 = vpop.f32.mrb[67].mxu1  ;;  %v1831_v62 = vadd.f32 %v3127_v12, %v952_v47 }
 0x1f0   :  { %1356 = vst.msk [vmem:[%s3368_s3 + $0xf8] sm:$0xff] %vm1324_vm2, %v1312_v15  ;;  %v1830_v19 = vadd.f32 %v1829_v14, %v1227_v16  ;;  %v1591_v24 = vpop.f32.mrb[65].mxu0 }
 0x1f2   :  { %v1313_v59 = vmax.f32 %v1830_v19, 0.0  ;;  %v957_v22 = vpop.f32.mrb[68].mxu1 }
 0x1f3   :  { %v1232_v27 = vpop.f32.mrb[66].mxu0  ;;  %v959_v23 = vpop.f32.mrb[69].mxu1  ;;  %v1833_v28 = vadd.f32 %v3127_v12, %v957_v22 }
 0x1f4   :  { %1357 = vst.msk [vmem:[%s3368_s3 + $0x100] sm:$0xff] %vm1324_vm2, %v1313_v59  ;;  %v1832_v52 = vadd.f32 %v1831_v62, %v1232_v27  ;;  %v1594_v26 = vpop.f32.mrb[67].mxu0 }
 0x1f6   :  { %v1314_v29 = vmax.f32 %v1832_v52, 0.0  ;;  %v962_v0 = vpop.f32.mrb[70].mxu1 }
 0x1f7   :  { %v1237_v5 = vpop.f32.mrb[68].mxu0  ;;  %v964_v31 = vpop.f32.mrb[71].mxu1  ;;  %v1835_v35 = vadd.f32 %v3127_v12, %v962_v0 }
 0x1f8   :  { %1358 = vst.msk [vmem:[%s3368_s3 + $0x108] sm:$0xff] %vm1324_vm2, %v1314_v29  ;;  %v1834_v32 = vadd.f32 %v1833_v28, %v1237_v5  ;;  %v1597_v36 = vpop.f32.mrb[69].mxu0 }
 0x1fa   :  { %v1315_v55 = vmax.f32 %v1834_v32, 0.0  ;;  %v967_v7 = vpop.f32.mrb[72].mxu1 }
 0x1fb   :  { %v1242_v37 = vpop.f32.mrb[70].mxu0  ;;  %v969_v38 = vpop.f32.mrb[73].mxu1  ;;  %v1837_v40 = vadd.f32 %v3127_v12, %v967_v7 }
 0x1fc   :  { %1359 = vst.msk [vmem:[%s3368_s3 + $0x110] sm:$0xff] %vm1324_vm2, %v1315_v55  ;;  %v1836_v39 = vadd.f32 %v1835_v35, %v1242_v37  ;;  %v1600_v13 = vpop.f32.mrb[71].mxu0 }
 0x1fe   :  { %v1316_v18 = vmax.f32 %v1836_v39, 0.0  ;;  %v972_v42 = vpop.f32.mrb[74].mxu1 }
 0x1ff   :  { %v1247_v50 = vpop.f32.mrb[72].mxu0  ;;  %v974_v58 = vpop.f32.mrb[75].mxu1  ;;  %v1839_v21 = vadd.f32 %v3127_v12, %v972_v42 }
 0x200   :  { %1360 = vst.msk [vmem:[%s3368_s3 + $0x118] sm:$0xff] %vm1324_vm2, %v1316_v18  ;;  %v1838_v45 = vadd.f32 %v1837_v40, %v1247_v50  ;;  %v1603_v46 = vpop.f32.mrb[73].mxu0 }
 0x202   :  { %v1317_v56 = vmax.f32 %v1838_v45, 0.0  ;;  %v977_v20 = vpop.f32.mrb[76].mxu1 }
 0x203   :  { %v1252_v48 = vpop.f32.mrb[74].mxu0  ;;  %v979_v49 = vpop.f32.mrb[77].mxu1  ;;  %v1841_v61 = vadd.f32 %v3127_v12, %v977_v20 }
 0x204   :  { %1361 = vst.msk [vmem:[%s3368_s3 + $0x120] sm:$0xff] %vm1324_vm2, %v1317_v56  ;;  %v1840_v51 = vadd.f32 %v1839_v21, %v1252_v48  ;;  %v1606_v30 = vpop.f32.mrb[75].mxu0 }
 0x206   :  { %v1318_v53 = vmax.f32 %v1840_v51, 0.0  ;;  %v982_v54 = vpop.f32.mrb[78].mxu1 }
 0x207   :  { %v1257_v57 = vpop.f32.mrb[76].mxu0  ;;  %v984_v25 = vpop.f32.mrb[79].mxu1  ;;  %v1843_v8 = vadd.f32 %v3127_v12, %v982_v54 }
 0x208   :  { %1362 = vst.msk [vmem:[%s3368_s3 + $0x128] sm:$0xff] %vm1324_vm2, %v1318_v53  ;;  %v1842_v1 = vadd.f32 %v1841_v61, %v1257_v57  ;;  %v1609_v33 = vpop.f32.mrb[77].mxu0 }
 0x20a   :  { %v1319_v60 = vmax.f32 %v1842_v1, 0.0  ;;  %v987_v63 = vpop.f32.mrb[80].mxu1 }
 0x20b   :  { %v1262_v2 = vpop.f32.mrb[78].mxu0  ;;  %v989_v44 = vpop.f32.mrb[81].mxu1  ;;  %v1845_v41 = vadd.f32 %v3127_v12, %v987_v63 }
 0x20c   :  { %1363 = vst.msk [vmem:[%s3368_s3 + $0x130] sm:$0xff] %vm1324_vm2, %v1319_v60  ;;  %v1844_v3 = vadd.f32 %v1843_v8, %v1262_v2  ;;  %v1612_v34 = vpop.f32.mrb[79].mxu0 }
 0x20e   :  { %v1320_v6 = vmax.f32 %v1844_v3, 0.0  ;;  %v992_v9 = vpop.f32.mrb[82].mxu1 }
 0x20f   :  { %v1267_v43 = vpop.f32.mrb[80].mxu0  ;;  %v994_v10 = vpop.f32.mrb[83].mxu1  ;;  %v1847_v14 = vadd.f32 %v3127_v12, %v992_v9 }
 0x210   :  { %1364 = vst.msk [vmem:[%s3368_s3 + $0x138] sm:$0xff] %vm1324_vm2, %v1320_v6  ;;  %v1846_v4 = vadd.f32 %v1845_v41, %v1267_v43  ;;  %v1615_v11 = vpop.f32.mrb[81].mxu0 }
 0x212   :  { %v1321_v15 = vmax.f32 %v1846_v4, 0.0  ;;  %v997_v47 = vpop.f32.mrb[84].mxu1 }
 0x213   :  { %v1272_v16 = vpop.f32.mrb[82].mxu0  ;;  %v999_v17 = vpop.f32.mrb[85].mxu1  ;;  %v1849_v62 = vadd.f32 %v3127_v12, %v997_v47 }
 0x214   :  { %1365 = vst.msk [vmem:[%s3368_s3 + $0x140] sm:$0xff] %vm1324_vm2, %v1321_v15  ;;  %v1848_v19 = vadd.f32 %v1847_v14, %v1272_v16  ;;  %v1618_v24 = vpop.f32.mrb[83].mxu0 }
 0x216   :  { %v1322_v59 = vmax.f32 %v1848_v19, 0.0 }
 0x217   :  { %v1277_v22 = vpop.f32.mrb[84].mxu0 }
 0x218   :  { %1366 = vst.msk [vmem:[%s3368_s3 + $0x148] sm:$0xff] %vm1324_vm2, %v1322_v59  ;;  %v1850_v27 = vadd.f32 %v1849_v62, %v1277_v22  ;;  %v1621_v23 = vpop.f32.mrb[85].mxu0 }
 0x21a   :  { %v1323_v52 = vmax.f32 %v1850_v27, 0.0 }
 0x21c   :  { %1368 = vst.msk [vmem:[%s3368_s3 + $0x150] sm:$0x3] %vm1367_vm3, %v1323_v52 }

// kernel: mini_rnn_forward.5
= control target key start
LH: loop header
LB: loop body
LE: loop exit
PB: predicated region body
PF: predicated region fallthrough
CT: control target
= control target key end

     0   :  { %s12980_s0 = inlined_call_operand.vmem [shape: f32[50,900], index: 0, kind: input, shape index: {}]   ;;  %s12981_s1 = inlined_call_operand.vmem [shape: f32[2176,128], index: 1, kind: input, shape index: {}]   ;;  %s12982_s2 = inlined_call_operand.vmem [shape: f32[4,4], index: 2, kind: input, shape index: {}]   ;;  %s12983_s3 = inlined_call_operand.vmem [shape: f32[2,1], index: 3, kind: output, shape index: {0}]   ;;  %s12984_s4 = inlined_call_operand.hbm [shape: f32[4,4], index: 4, kind: output, shape index: {1}]  }
   0x1   :  { %v89_v0 = vld [vmem:[%s12981_s1 + $0x80] sm:$0xff]  ;;  %v90_v1 = vld [vmem:[%s12981_s1 + $0x88] sm:$0xff]  ;;  %v91_v11 = vld [vmem:[%s12981_s1 + $0x90] sm:$0xff] }
   0x2   :  { %v73_v2 = vld [vmem:[%s12981_s1] sm:$0xff]  ;;  %v9844_v3 = vpack.c.bf16 %v90_v1, %v89_v0  ;;  %v74_v4 = vld [vmem:[%s12981_s1 + $0x8] sm:$0xff]  ;;  %v92_v13 = vld [vmem:[%s12981_s1 + $0x98] sm:$0xff] }
   0x3   :  { %v121_v5 = vld [vmem:[%s12981_s1 + $0x180] sm:$0xff]  ;;  %v122_v6 = vld [vmem:[%s12981_s1 + $0x188] sm:$0xff]  ;;  %v9846_v7 = vpack.c.bf16 %v74_v4, %v73_v2  ;;  %v75_v14 = vld [vmem:[%s12981_s1 + $0x10] sm:$0xff]  ;;  %v9848_v16 = vpack.c.bf16 %v92_v13, %v91_v11 }
   0x4   :  { %v9876_v8 = vpack.c.bf16 %v122_v6, %v121_v5  ;;  %v105_v9 = vld [vmem:[%s12981_s1 + $0x100] sm:$0xff]  ;;  %v106_v10 = vld [vmem:[%s12981_s1 + $0x108] sm:$0xff]  ;;  %9845 = vmatprep.subr.bf16.mxu0 %v9844_v3  ;;  %v76_v15 = vld [vmem:[%s12981_s1 + $0x18] sm:$0xff] }
   0x5   :  { %v9878_v12 = vpack.c.bf16 %v106_v10, %v105_v9  ;;  %9847 = vmatpush3.bf16.msra.mxu0 %v9846_v7  ;;  %v9850_v17 = vpack.c.bf16 %v76_v15, %v75_v14  ;;  %v123_v18 = vld [vmem:[%s12981_s1 + $0x190] sm:$0xff]  ;;  %v124_v19 = vld [vmem:[%s12981_s1 + $0x198] sm:$0xff]  ;;  %v93_v23 = vld [vmem:[%s12981_s1 + $0xa0] sm:$0xff] }
   0x6   :  { %9877 = vmatprep.subr.bf16.mxu1 %v9876_v8  ;;  %v107_v20 = vld [vmem:[%s12981_s1 + $0x110] sm:$0xff]  ;;  %v9880_v21 = vpack.c.bf16 %v124_v19, %v123_v18  ;;  %v108_v22 = vld [vmem:[%s12981_s1 + $0x118] sm:$0xff]  ;;  %v94_v24 = vld [vmem:[%s12981_s1 + $0xa8] sm:$0xff]  ;;  %9849 = vmatprep.subr.bf16.mxu0 %v9848_v16 }
   0x7   :  { %9879 = vmatpush3.bf16.msra.mxu1 %v9878_v12  ;;  %v9882_v25 = vpack.c.bf16 %v108_v22, %v107_v20  ;;  %v9852_v26 = vpack.c.bf16 %v94_v24, %v93_v23  ;;  %v77_v27 = vld [vmem:[%s12981_s1 + $0x20] sm:$0xff]  ;;  %v78_v28 = vld [vmem:[%s12981_s1 + $0x28] sm:$0xff]  ;;  %v95_v35 = vld [vmem:[%s12981_s1 + $0xb0] sm:$0xff] }
   0x8   :  { %v125_v29 = vld [vmem:[%s12981_s1 + $0x1a0] sm:$0xff]  ;;  %9881 = vmatprep.subr.bf16.mxu1 %v9880_v21  ;;  %v126_v30 = vld [vmem:[%s12981_s1 + $0x1a8] sm:$0xff]  ;;  %v9854_v33 = vpack.c.bf16 %v78_v28, %v77_v27  ;;  %v96_v36 = vld [vmem:[%s12981_s1 + $0xb8] sm:$0xff] }
   0x9   :  { %v109_v31 = vld [vmem:[%s12981_s1 + $0x120] sm:$0xff]  ;;  %v110_v32 = vld [vmem:[%s12981_s1 + $0x128] sm:$0xff]  ;;  %9851 = vmatpush3.bf16.msra.mxu0 %v9850_v17  ;;  %v9884_v34 = vpack.c.bf16 %v126_v30, %v125_v29  ;;  %v79_v37 = vld [vmem:[%s12981_s1 + $0x30] sm:$0xff]  ;;  %v9856_v39 = vpack.c.bf16 %v96_v36, %v95_v35 }
   0xa   :  { %9853 = vmatprep.subr.bf16.mxu0 %v9852_v26  ;;  %v9886_v38 = vpack.c.bf16 %v110_v32, %v109_v31  ;;  %v80_v40 = vld [vmem:[%s12981_s1 + $0x38] sm:$0xff]  ;;  %v127_v41 = vld [vmem:[%s12981_s1 + $0x1b0] sm:$0xff]  ;;  %v97_v46 = vld [vmem:[%s12981_s1 + $0xc0] sm:$0xff] }
   0xb   :  { %9883 = vmatpush3.bf16.msra.mxu1 %v9882_v25  ;;  %v128_v42 = vld [vmem:[%s12981_s1 + $0x1b8] sm:$0xff]  ;;  %v111_v44 = vld [vmem:[%s12981_s1 + $0x130] sm:$0xff]  ;;  %v98_v47 = vld [vmem:[%s12981_s1 + $0xc8] sm:$0xff]  ;;  %v9858_v48 = vpack.c.bf16 %v80_v40, %v79_v37 }
   0xc   :  { %9885 = vmatprep.subr.bf16.mxu1 %v9884_v34  ;;  %v9888_v43 = vpack.c.bf16 %v128_v42, %v127_v41  ;;  %v112_v45 = vld [vmem:[%s12981_s1 + $0x138] sm:$0xff]  ;;  %v129_v49 = vld [vmem:[%s12981_s1 + $0x1c0] sm:$0xff]  ;;  %v130_v50 = vld [vmem:[%s12981_s1 + $0x1c8] sm:$0xff]  ;;  %v9860_v52 = vpack.c.bf16 %v98_v47, %v97_v46 }
   0xd   :  { %9855 = vmatpush3.bf16.msra.mxu0 %v9854_v33  ;;  %v9890_v51 = vpack.c.bf16 %v112_v45, %v111_v44  ;;  %v81_v53 = vld [vmem:[%s12981_s1 + $0x40] sm:$0xff]  ;;  %v82_v54 = vld [vmem:[%s12981_s1 + $0x48] sm:$0xff]  ;;  %v9892_v56 = vpack.c.bf16 %v130_v50, %v129_v49  ;;  %v99_v58 = vld [vmem:[%s12981_s1 + $0xd0] sm:$0xff] }
   0xe   :  { %9857 = vmatprep.subr.bf16.mxu0 %v9856_v39  ;;  %v113_v55 = vld [vmem:[%s12981_s1 + $0x140] sm:$0xff]  ;;  %v114_v57 = vld [vmem:[%s12981_s1 + $0x148] sm:$0xff]  ;;  %v100_v59 = vld [vmem:[%s12981_s1 + $0xd8] sm:$0xff]  ;;  %v9862_v62 = vpack.c.bf16 %v82_v54, %v81_v53 }
   0xf   :  { %9887 = vmatpush3.bf16.msra.mxu1 %v9886_v38  ;;  %v131_v60 = vld [vmem:[%s12981_s1 + $0x1d0] sm:$0xff]  ;;  %v132_v61 = vld [vmem:[%s12981_s1 + $0x1d8] sm:$0xff]  ;;  %v9894_v63 = vpack.c.bf16 %v114_v57, %v113_v55  ;;  %v9864_v0 = vpack.c.bf16 %v100_v59, %v99_v58  ;;  %v101_v6 = vld [vmem:[%s12981_s1 + $0xe0] sm:$0xff] }
  0x10   :  { %9889 = vmatprep.subr.bf16.mxu1 %v9888_v43  ;;  %v83_v1 = vld [vmem:[%s12981_s1 + $0x50] sm:$0xff]  ;;  %v84_v2 = vld [vmem:[%s12981_s1 + $0x58] sm:$0xff]  ;;  %v9896_v4 = vpack.c.bf16 %v132_v61, %v131_v60  ;;  %v102_v7 = vld [vmem:[%s12981_s1 + $0xe8] sm:$0xff] }
  0x11   :  { %9859 = vmatpush3.bf16.msra.mxu0 %v9858_v48  ;;  %v115_v3 = vld [vmem:[%s12981_s1 + $0x150] sm:$0xff]  ;;  %v116_v5 = vld [vmem:[%s12981_s1 + $0x158] sm:$0xff]  ;;  %v133_v8 = vld [vmem:[%s12981_s1 + $0x1e0] sm:$0xff]  ;;  %v9866_v10 = vpack.c.bf16 %v84_v2, %v83_v1  ;;  %v9868_v14 = vpack.c.bf16 %v102_v7, %v101_v6 }
  0x12   :  { %9861 = vmatprep.subr.bf16.mxu0 %v9860_v52  ;;  %v134_v9 = vld [vmem:[%s12981_s1 + $0x1e8] sm:$0xff]  ;;  %v85_v11 = vld [vmem:[%s12981_s1 + $0x60] sm:$0xff]  ;;  %v9898_v13 = vpack.c.bf16 %v116_v5, %v115_v3  ;;  %v103_v19 = vld [vmem:[%s12981_s1 + $0xf0] sm:$0xff] }
  0x13   :  { %9891 = vmatpush3.bf16.msra.mxu1 %v9890_v51  ;;  %v86_v12 = vld [vmem:[%s12981_s1 + $0x68] sm:$0xff]  ;;  %v117_v15 = vld [vmem:[%s12981_s1 + $0x160] sm:$0xff]  ;;  %v9900_v18 = vpack.c.bf16 %v134_v9, %v133_v8  ;;  %v104_v20 = vld [vmem:[%s12981_s1 + $0xf8] sm:$0xff]  ;;  %v12985_v51 = vmov 0.0|0.0  }
  0x14   :  { %9893 = vmatprep.subr.bf16.mxu1 %v9892_v56  ;;  %v118_v16 = vld [vmem:[%s12981_s1 + $0x168] sm:$0xff]  ;;  %v20_v21 = vld [vmem:[%s12980_s0 + $0x18] sm:$0xff]  ;;  %v135_v22 = vld [vmem:[%s12981_s1 + $0x1f0] sm:$0xff]  ;;  %v9870_v24 = vpack.c.bf16 %v86_v12, %v85_v11  ;;  %v9872_v26 = vpack.c.bf16 %v104_v20, %v103_v19 }
  0x15   :  { %9863 = vmatpush3.bf16.msra.mxu0 %v9862_v62  ;;  %v18_v17 = vld [vmem:[%s12980_s0 + $0x8] sm:$0xff]  ;;  %v136_v23 = vld [vmem:[%s12981_s1 + $0x1f8] sm:$0xff]  ;;  %381 = vmatprep.mubr.f32.mxu1 %v20_v21  ;;  %v9902_v25 = vpack.c.bf16 %v118_v16, %v117_v15  ;;  %v87_v27 = vld [vmem:[%s12981_s1 + $0x70] sm:$0xff] }
  0x16   :  { %9865 = vmatprep.subr.bf16.mxu0 %v9864_v0  ;;  %281 = vmatprep.mubr.f32.mxu0 %v18_v17  ;;  %v88_v28 = vld [vmem:[%s12981_s1 + $0x78] sm:$0xff]  ;;  %v119_v29 = vld [vmem:[%s12981_s1 + $0x170] sm:$0xff]  ;;  %v9904_v30 = vpack.c.bf16 %v136_v23, %v135_v22  ;;  %v153_v32 = vld [vmem:[%s12981_s1 + $0x280] sm:$0xff] }
  0x17   :  { %9895 = vmatpush3.bf16.msra.mxu1 %v9894_v63  ;;  %v120_v31 = vld [vmem:[%s12981_s1 + $0x178] sm:$0xff]  ;;  %v154_v33 = vld [vmem:[%s12981_s1 + $0x288] sm:$0xff]  ;;  %v9874_v34 = vpack.c.bf16 %v88_v28, %v87_v27  ;;  %v137_v37 = vld [vmem:[%s12981_s1 + $0x200] sm:$0xff] }
  0x18   :  { %9897 = vmatprep.subr.bf16.mxu1 %v9896_v4  ;;  %v9906_v35 = vpack.c.bf16 %v120_v31, %v119_v29  ;;  %v9908_v36 = vpack.c.bf16 %v154_v33, %v153_v32  ;;  %v138_v38 = vld [vmem:[%s12981_s1 + $0x208] sm:$0xff]  ;;  %v169_v39 = vld [vmem:[%s12981_s1 + $0x300] sm:$0xff]  ;;  %v155_v41 = vld [vmem:[%s12981_s1 + $0x290] sm:$0xff] }
  0x19   :  { %9867 = vmatpush3.bf16.msra.mxu0 %v9866_v10  ;;  %v170_v40 = vld [vmem:[%s12981_s1 + $0x308] sm:$0xff]  ;;  %v156_v42 = vld [vmem:[%s12981_s1 + $0x298] sm:$0xff]  ;;  %v17_v43 = vld [vmem:[%s12980_s0] sm:$0xff]  ;;  %v9910_v45 = vpack.c.bf16 %v138_v38, %v137_v37 }
  0x1a   :  { %9869 = vmatprep.subr.bf16.mxu0 %v9868_v14  ;;  %v19_v44 = vld [vmem:[%s12980_s0 + $0x10] sm:$0xff]  ;;  %v9941_v46 = vpack.c.bf16 %v170_v40, %v169_v39  ;;  %v9912_v47 = vpack.c.bf16 %v156_v42, %v155_v41  ;;  %v140_v49 = vld [vmem:[%s12981_s1 + $0x218] sm:$0xff]  ;;  %v157_v53 = vld [vmem:[%s12981_s1 + $0x2a0] sm:$0xff] }
  0x1b   :  { %9899 = vmatpush3.bf16.msra.mxu1 %v9898_v13  ;;  %v139_v48 = vld [vmem:[%s12981_s1 + $0x210] sm:$0xff]  ;;  %v172_v52 = vld [vmem:[%s12981_s1 + $0x318] sm:$0xff]  ;;  %v158_v54 = vld [vmem:[%s12981_s1 + $0x2a8] sm:$0xff] }
  0x1c   :  { %9901 = vmatprep.subr.bf16.mxu1 %v9900_v18  ;;  %v171_v50 = vld [vmem:[%s12981_s1 + $0x310] sm:$0xff]  ;;  %v26_v55 = vld [vmem:[%s12980_s0 + $0x48] sm:$0xff]  ;;  %v9914_v56 = vpack.c.bf16 %v140_v49, %v139_v48  ;;  %v25_v57 = vld [vmem:[%s12980_s0 + $0x40] sm:$0xff]  ;;  %v9916_v61 = vpack.c.bf16 %v158_v54, %v157_v53 }
  0x1d   :  { %9871 = vmatpush3.bf16.msra.mxu0 %v9870_v24  ;;  %v28_v58 = vld [vmem:[%s12980_s0 + $0x58] sm:$0xff]  ;;  %v27_v59 = vld [vmem:[%s12980_s0 + $0x50] sm:$0xff]  ;;  %v9944_v60 = vpack.c.bf16 %v172_v52, %v171_v50  ;;  %v141_v62 = vld [vmem:[%s12981_s1 + $0x220] sm:$0xff] }
  0x1e   :  { %9873 = vmatprep.subr.bf16.mxu0 %v9872_v26  ;;  %v142_v63 = vld [vmem:[%s12981_s1 + $0x228] sm:$0xff]  ;;  %v173_v0 = vld [vmem:[%s12981_s1 + $0x320] sm:$0xff]  ;;  %v159_v2 = vld [vmem:[%s12981_s1 + $0x2b0] sm:$0xff] }
  0x1f   :  { %9903 = vmatpush3.bf16.msra.mxu1 %v9902_v25  ;;  %v174_v1 = vld [vmem:[%s12981_s1 + $0x328] sm:$0xff]  ;;  %v160_v3 = vld [vmem:[%s12981_s1 + $0x2b8] sm:$0xff]  ;;  %v9918_v5 = vpack.c.bf16 %v142_v63, %v141_v62  ;;  %v33_v6 = vld [vmem:[%s12980_s0 + $0x80] sm:$0xff] }
  0x20   :  { %9905 = vmatprep.subr.bf16.mxu1 %v9904_v30  ;;  %v34_v4 = vld [vmem:[%s12980_s0 + $0x88] sm:$0xff]  ;;  %v36_v7 = vld [vmem:[%s12980_s0 + $0x98] sm:$0xff]  ;;  %v35_v8 = vld [vmem:[%s12980_s0 + $0x90] sm:$0xff]  ;;  %v9947_v9 = vpack.c.bf16 %v174_v1, %v173_v0  ;;  %v9920_v10 = vpack.c.bf16 %v160_v3, %v159_v2 }
  0x21   :  { %9875 = vmatpush3.bf16.msra.mxu0 %v9874_v34  ;;  %v143_v11 = vld [vmem:[%s12981_s1 + $0x230] sm:$0xff]  ;;  %v144_v12 = vld [vmem:[%s12981_s1 + $0x238] sm:$0xff]  ;;  %v161_v15 = vld [vmem:[%s12981_s1 + $0x2c0] sm:$0xff] }
  0x22   :  { %9909 = vmatprep.subr.bf16.mxu0 %v9908_v36  ;;  %v175_v13 = vld [vmem:[%s12981_s1 + $0x330] sm:$0xff]  ;;  %v176_v14 = vld [vmem:[%s12981_s1 + $0x338] sm:$0xff]  ;;  %v162_v16 = vld [vmem:[%s12981_s1 + $0x2c8] sm:$0xff]  ;;  %v9922_v18 = vpack.c.bf16 %v144_v12, %v143_v11 }
  0x23   :  { %9907 = vmatpush3.bf16.msra.mxu1 %v9906_v35  ;;  %v42_v17 = vld [vmem:[%s12980_s0 + $0xc8] sm:$0xff]  ;;  %v41_v19 = vld [vmem:[%s12980_s0 + $0xc0] sm:$0xff]  ;;  %v44_v20 = vld [vmem:[%s12980_s0 + $0xd8] sm:$0xff]  ;;  %v9950_v22 = vpack.c.bf16 %v176_v14, %v175_v13  ;;  %v9924_v23 = vpack.c.bf16 %v162_v16, %v161_v15 }
  0x24   :  { %9940 = vmatprep.subr.bf16.mxu1 %v12985_v51  ;;  %282 = vmatmul.mubr.f32.vlgmr.msra.gmra.mrb[0].mxu0 %v17_v43  ;;  %v43_v21 = vld [vmem:[%s12980_s0 + $0xd0] sm:$0xff]  ;;  %v145_v24 = vld [vmem:[%s12981_s1 + $0x240] sm:$0xff]  ;;  %v146_v25 = vld [vmem:[%s12981_s1 + $0x248] sm:$0xff] }
  0x25   :  { %9911 = vmatpush3.bf16.msra.mxu0 %v9910_v45  ;;  %286 = vmatprep.mubr.f32.mxu0 %v26_v55  ;;  %v177_v26 = vld [vmem:[%s12981_s1 + $0x340] sm:$0xff]  ;;  %v178_v27 = vld [vmem:[%s12981_s1 + $0x348] sm:$0xff]  ;;  %v163_v28 = vld [vmem:[%s12981_s1 + $0x2d0] sm:$0xff]  ;;  %v9926_v31 = vpack.c.bf16 %v146_v25, %v145_v24 }
  0x26   :  { %382 = vmatmul.mubr.f32.vlgmr.msra.gmra.mrb[0].mxu1 %v19_v44  ;;  %9913 = vmatprep.subr.bf16.mxu0 %v9912_v47  ;;  %v164_v29 = vld [vmem:[%s12981_s1 + $0x2d8] sm:$0xff]  ;;  %v50_v30 = vld [vmem:[%s12980_s0 + $0x108] sm:$0xff]  ;;  %v49_v32 = vld [vmem:[%s12980_s0 + $0x100] sm:$0xff]  ;;  %v9953_v35 = vpack.c.bf16 %v178_v27, %v177_v26 }
  0x27   :  { %9942 = vmatpush1.bf16.msra.mxu1 %v9941_v46  ;;  %386 = vmatprep.mubr.f32.mxu1 %v28_v58  ;;  %v52_v33 = vld [vmem:[%s12980_s0 + $0x118] sm:$0xff]  ;;  %v51_v34 = vld [vmem:[%s12980_s0 + $0x110] sm:$0xff]  ;;  %v9928_v36 = vpack.c.bf16 %v164_v29, %v163_v28  ;;  %v165_v41 = vld [vmem:[%s12981_s1 + $0x2e0] sm:$0xff] }
  0x28   :  { %9943 = vmatprep.subr.bf16.mxu1 %v12985_v51  ;;  %287 = vmatmul.mubr.f32.gmra.mrb[2].mxu0 %v25_v57  ;;  %v147_v37 = vld [vmem:[%s12981_s1 + $0x250] sm:$0xff]  ;;  %v148_v38 = vld [vmem:[%s12981_s1 + $0x258] sm:$0xff]  ;;  %v166_v42 = vld [vmem:[%s12981_s1 + $0x2e8] sm:$0xff] }
  0x29   :  { %9915 = vmatpush3.bf16.msra.mxu0 %v9914_v56  ;;  %291 = vmatprep.mubr.f32.mxu0 %v34_v4  ;;  %v179_v39 = vld [vmem:[%s12981_s1 + $0x350] sm:$0xff]  ;;  %v180_v40 = vld [vmem:[%s12981_s1 + $0x358] sm:$0xff]  ;;  %v58_v43 = vld [vmem:[%s12980_s0 + $0x148] sm:$0xff]  ;;  %v9930_v44 = vpack.c.bf16 %v148_v38, %v147_v37  ;;  %v9932_v49 = vpack.c.bf16 %v166_v42, %v165_v41 }
  0x2a   :  { %387 = vmatmul.mubr.f32.gmra.mrb[2].mxu1 %v27_v59  ;;  %9917 = vmatprep.subr.bf16.mxu0 %v9916_v61  ;;  %v57_v45 = vld [vmem:[%s12980_s0 + $0x140] sm:$0xff]  ;;  %v60_v46 = vld [vmem:[%s12980_s0 + $0x158] sm:$0xff]  ;;  %v59_v47 = vld [vmem:[%s12980_s0 + $0x150] sm:$0xff]  ;;  %v9956_v48 = vpack.c.bf16 %v180_v40, %v179_v39 }
  0x2b   :  { %9945 = vmatpush1.bf16.msra.mxu1 %v9944_v60  ;;  %391 = vmatprep.mubr.f32.mxu1 %v36_v7  ;;  %v149_v50 = vld [vmem:[%s12981_s1 + $0x260] sm:$0xff]  ;;  %v150_v52 = vld [vmem:[%s12981_s1 + $0x268] sm:$0xff]  ;;  %v167_v55 = vld [vmem:[%s12981_s1 + $0x2f0] sm:$0xff] }
  0x2c   :  { %9946 = vmatprep.subr.bf16.mxu1 %v12985_v51  ;;  %292 = vmatmul.mubr.f32.gmra.mrb[4].mxu0 %v33_v6  ;;  %v181_v53 = vld [vmem:[%s12981_s1 + $0x360] sm:$0xff]  ;;  %v182_v54 = vld [vmem:[%s12981_s1 + $0x368] sm:$0xff]  ;;  %v168_v56 = vld [vmem:[%s12981_s1 + $0x2f8] sm:$0xff]  ;;  %v9934_v58 = vpack.c.bf16 %v150_v52, %v149_v50 }
  0x2d   :  { %9919 = vmatpush3.bf16.msra.mxu0 %v9918_v5  ;;  %296 = vmatprep.mubr.f32.mxu0 %v42_v17  ;;  %v66_v57 = vld [vmem:[%s12980_s0 + $0x188] sm:$0x3]  ;;  %v65_v59 = vld [vmem:[%s12980_s0 + $0x180] sm:$0x3]  ;;  %v68_v60 = vld [vmem:[%s12980_s0 + $0x198] sm:$0x3] }
  0x2e   :  { %392 = vmatmul.mubr.f32.gmra.mrb[4].mxu1 %v35_v8  ;;  %9921 = vmatprep.subr.bf16.mxu0 %v9920_v10 }
  0x2f   :  { %9948 = vmatpush1.bf16.msra.mxu1 %v9947_v9  ;;  %396 = vmatprep.mubr.f32.mxu1 %v44_v20 }
  0x30   :  { %9949 = vmatprep.subr.bf16.mxu1 %v12985_v51  ;;  %297 = vmatmul.mubr.f32.gmra.mrb[6].mxu0 %v41_v19 }
  0x31   :  { %9923 = vmatpush3.bf16.msra.mxu0 %v9922_v18  ;;  %301 = vmatprep.mubr.f32.mxu0 %v50_v30 }
  0x32   :  { %397 = vmatmul.mubr.f32.gmra.mrb[6].mxu1 %v43_v21  ;;  %9925 = vmatprep.subr.bf16.mxu0 %v9924_v23 }
  0x33   :  { %9951 = vmatpush1.bf16.msra.mxu1 %v9950_v22  ;;  %401 = vmatprep.mubr.f32.mxu1 %v52_v33 }
  0x34   :  { %9952 = vmatprep.subr.bf16.mxu1 %v12985_v51  ;;  %302 = vmatmul.mubr.f32.gmra.mrb[8].mxu0 %v49_v32 }
  0x35   :  { %9927 = vmatpush3.bf16.msra.mxu0 %v9926_v31  ;;  %306 = vmatprep.mubr.f32.mxu0 %v58_v43 }
  0x36   :  { %402 = vmatmul.mubr.f32.gmra.mrb[8].mxu1 %v51_v34  ;;  %9929 = vmatprep.subr.bf16.mxu0 %v9928_v36 }
  0x37   :  { %9954 = vmatpush1.bf16.msra.mxu1 %v9953_v35  ;;  %406 = vmatprep.mubr.f32.mxu1 %v60_v46 }
  0x38   :  { %9955 = vmatprep.subr.bf16.mxu1 %v12985_v51  ;;  %307 = vmatmul.mubr.f32.gmra.mrb[10].mxu0 %v57_v45 }
  0x39   :  { %9931 = vmatpush3.bf16.msra.mxu0 %v9930_v44 }
  0x3a   :  { %407 = vmatmul.mubr.f32.gmra.mrb[10].mxu1 %v59_v47 }
  0x3b   :  { %10 = vsyncpa [#allocation3], 0  ;;  %9957 = vmatpush1.bf16.msra.mxu1 %v9956_v48  ;;  %9933 = vmatprep.subr.bf16.mxu0 %v9932_v49  ;;  %v9959_v61 = vpack.c.bf16 %v182_v54, %v181_v53  ;;  %v9936_v62 = vpack.c.bf16 %v168_v56, %v167_v55  ;;  %v67_v63 = vld [vmem:[%s12980_s0 + $0x190] sm:$0x3]  ;;  %v152_v1 = vld [vmem:[%s12981_s1 + $0x278] sm:$0xff]  ;;  %vm191_vm0 = vcmask 31744  }
  0x3c   :  { %v151_v0 = vld [vmem:[%s12981_s1 + $0x270] sm:$0xff]  ;;  %9958 = vmatprep.subr.bf16.mxu1 %v12985_v51  ;;  %311 = vmatprep.mubr.f32.mxu0 %v66_v57  ;;  %v184_v3 = vld [vmem:[%s12981_s1 + $0x378] sm:$0xff]  ;;  %v22_v4 = vld [vmem:[%s12980_s0 + $0x28] sm:$0xff]  ;;  %v12987_v10 = vmov 0.0   ;;  %vm213_vm1 = vcmask 1043456   ;;  %vm10763_vm2 = vmmov 0  }
  0x3d   :  { %v183_v2 = vld [vmem:[%s12981_s1 + $0x370] sm:$0xff]  ;;  %312 = vmatmul.mubr.f32.gmra.mrb[12].mxu0 %v65_v59  ;;  %411 = vmatprep.mubr.f32.mxu1 %v68_v60  ;;  %v9938_v5 = vpack.c.bf16 %v152_v1, %v151_v0  ;;  %v24_v6 = vld [vmem:[%s12980_s0 + $0x38] sm:$0xff]  ;;  %v21_v8 = vld [vmem:[%s12980_s0 + $0x20] sm:$0xff]  ;;  %vm754_vm3 = vcmask 392192   ;;  %vm1125_vm4 = vcmask 1040384   ;;  %vm1048_vm5 = vcmask 1041408  }
  0x3e   :  { %9935 = vmatpush3.bf16.msra.mxu0 %v9934_v58  ;;  %412 = vmatmul.mubr.f32.gmra.mrb[12].mxu1 %v67_v63  ;;  %v9962_v7 = vpack.c.bf16 %v184_v3, %v183_v2  ;;  %v30_v9 = vld [vmem:[%s12980_s0 + $0x68] sm:$0xff]  ;;  %v185_v11 = vld [vmem:[%s12981_s1 + $0x380] sm:$0xf]  ;;  %v23_v12 = vld [vmem:[%s12980_s0 + $0x30] sm:$0xff]  ;;  %vm2732_vm6 = vcmask 523264   ;;  %vm6142_vm7 = vcmask 818176  }
  0x3f   :  { %9960 = vmatpush1.bf16.msra.mxu1 %v9959_v61  ;;  %9937 = vmatprep.subr.bf16.mxu0 %v9936_v62  ;;  %v29_v13 = vld [vmem:[%s12980_s0 + $0x60] sm:$0xff]  ;;  %v32_v14 = vld [vmem:[%s12980_s0 + $0x78] sm:$0xff]  ;;  %v38_v15 = vld [vmem:[%s12980_s0 + $0xa8] sm:$0xff]  ;;  %vm6232_vm8 = vcmask 408576   ;;  %vm10764_vm9 = vmmov 1   ;;  %vm6396_vm11 = vcmask 80896  }
  0x40   :  { %9961 = vmatprep.subr.bf16.mxu1 %v12985_v51  ;;  %481 = vmatprep.mubr.f32.mxu0 %v22_v4  ;;  %v31_v16 = vld [vmem:[%s12980_s0 + $0x70] sm:$0xff]  ;;  %v37_v17 = vld [vmem:[%s12980_s0 + $0xa0] sm:$0xff]  ;;  %v40_v18 = vld [vmem:[%s12980_s0 + $0xb8] sm:$0xff]  ;;  %vm7536_vm12 = vcmask 1042432   ;;  %vm7538_vm13 = vcmask 27648   ;;  %s10765_s9 = smov [#allocation2]  }
  0x41   :  { %7649 = vmatprep.mubr.msk.f32.mxu1 %vm191_vm0, %v24_v6  ;;  %v46_v19 = vld [vmem:[%s12980_s0 + $0xe8] sm:$0xff]  ;;  %v39_v20 = vld [vmem:[%s12980_s0 + $0xb0] sm:$0xff]  ;;  %v45_v21 = vld [vmem:[%s12980_s0 + $0xe0] sm:$0xff]  ;;  %s7637_s10 = sshll.u32 %s10765_s9, 4  ;;  %s7638_s10 = int_to_ptr.vmem [resolvable:$true] %s7637_s10 }
  0x42   :  { %9939 = vmatpush3.bf16.msra.mxu0 %v9938_v5  ;;  %v48_v22 = vld [vmem:[%s12980_s0 + $0xf8] sm:$0xff]  ;;  %v54_v23 = vld [vmem:[%s12980_s0 + $0x128] sm:$0xff]  ;;  %v47_v24 = vld [vmem:[%s12980_s0 + $0xf0] sm:$0xff]  ;;  %s10737_s11 = scalar_lea.vmem %s7638_s10, 64  ;;  %p10742_p1 = scmp.lt.s32.totalorder %s7638_s10, %s7638_s10 }
  0x43   :  { %9963 = vmatpush1.bf16.msra.mxu1 %v9962_v7  ;;  %9964 = vmatprep.subr.bf16.mxu0 %v12985_v51  ;;  %v53_v25 = vld [vmem:[%s12980_s0 + $0x120] sm:$0xff]  ;;  %v56_v26 = vld [vmem:[%s12980_s0 + $0x138] sm:$0xff]  ;;  %v62_v27 = vld [vmem:[%s12980_s0 + $0x168] sm:$0xff]  ;;  %p10738_p0 = scmp.ne.s32.totalorder %s7638_s10, %s10737_s11  ;;  %p10743_p2 = scmp.lt.s32.totalorder %s10737_s11, %s10737_s11 }
  0x44   :  { %549 = vmatprep.subr.mxu1 %v12987_v10  ;;  %v55_v28 = vld [vmem:[%s12980_s0 + $0x130] sm:$0xff]  ;;  %v61_v29 = vld [vmem:[%s12980_s0 + $0x160] sm:$0xff]  ;;  %v64_v30 = vld [vmem:[%s12980_s0 + $0x178] sm:$0xff] }
  0x45   :  { %482 = vmatmul.mubr.f32.vlgmr.msra.gmra.mrb[14].mxu0 %v21_v8  ;;  %v70_v31 = vld [vmem:[%s12980_s0 + $0x1a8] sm:$0x3]  ;;  %v63_v32 = vld [vmem:[%s12980_s0 + $0x170] sm:$0xff]  ;;  %v69_v33 = vld [vmem:[%s12980_s0 + $0x1a0] sm:$0x3]  ;;  %p10744_p3 = por %p10743_p2, %p10742_p1 }
  0x46   :  { %486 = vmatprep.mubr.f32.mxu0 %v30_v9  ;;  %v72_v34 = vld [vmem:[%s12980_s0 + $0x1b8] sm:$0x3]  ;;  %v71_v35 = vld [vmem:[%s12980_s0 + $0x1b0] sm:$0x3]  ;;  %v631_v37 = vld [vmem:[%s12981_s1 + $0x3bd] sm:$0xff] }
  0x47   :  { %7648 = vmatpush1.msk.msra.mxu1 %vm213_vm1, %v185_v11  ;;  %v630_v36 = vld [vmem:[%s12981_s1 + $0x3b5] sm:$0xff]  ;;  %v632_v39 = vld [vmem:[%s12981_s1 + $0x3c5] sm:$0xff]  ;;  %v633_v40 = vld [vmem:[%s12981_s1 + $0x3cd] sm:$0xff]  ;;  %p10745_p4 = pnand %p10744_p3, %p10738_p0 }
  0x48   :  { %582 = vmatmul.mubr.f32.vlgmr.msra.gmra.mrb[14].mxu1 %v23_v12  ;;  %9973 = vmatprep.subr.bf16.mxu1 %v12985_v51  ;;  %v11323_v38 = vpack.c.bf16 %v631_v37, %v630_v36  ;;  %v624_v41 = vld [vmem:[%s12981_s1 + $0x385] sm:$0xff]  ;;  %v11336_v42 = vpack.c.bf16 %v633_v40, %v632_v39  ;;  %v625_v43 = vld [vmem:[%s12981_s1 + $0x38d] sm:$0xff]  ;;  %v626_v45 = vld [vmem:[%s12981_s1 + $0x395] sm:$0xff] }
  0x49   :  { %487 = vmatmul.mubr.f32.gmra.mrb[16].mxu0 %v29_v13  ;;  %7650 = vmatprep.mubr.msk.f32.mxu1 %vm191_vm0, %v32_v14  ;;  %v11341_v44 = vpack.c.bf16 %v625_v43, %v624_v41  ;;  %v627_v46 = vld [vmem:[%s12981_s1 + $0x39d] sm:$0xff]  ;;  %v634_v48 = vld [vmem:[%s12981_s1 + $0x3d5] sm:$0xff]  ;;  %v628_v52 = vld [vmem:[%s12981_s1 + $0x3a5] sm:$0xff] }
  0x4a   :  { %491 = vmatprep.mubr.f32.mxu0 %v38_v15  ;;  %9966 = vmatpush3.bf16.msra.mxu0 %v11323_v38  ;;  %v11353_v47 = vpack.c.bf16 %v627_v46, %v626_v45  ;;  %v635_v49 = vld [vmem:[%s12981_s1 + $0x3dd] sm:$0xff]  ;;  %v629_v53 = vld [vmem:[%s12981_s1 + $0x3ad] sm:$0xff]  ;;  %vm12813_vm10 = vmpackc.low %vm1048_vm5, %vm10764_vm9 }
  0x4b   :  { %9967 = vmatprep.subr.bf16.mxu0 %v12985_v51  ;;  %9975 = vmatpush3.bf16.msra.mxu1 %v11341_v44  ;;  %v11362_v50 = vpack.c.bf16 %v635_v49, %v634_v48  ;;  %v11371_v54 = vpack.c.bf16 %v629_v53, %v628_v52  ;;  %v7647_v56 = vld [vmem:[%s12981_s1 + $0x384] ss:$0 sm:$0xff] }
  0x4c   :  { %587 = vmatmul.mubr.f32.gmra.mrb[16].mxu1 %v31_v16  ;;  %9976 = vmatprep.subr.bf16.mxu1 %v12985_v51 }
  0x4d   :  { %492 = vmatmul.mubr.f32.gmra.mrb[18].mxu0 %v37_v17  ;;  %7651 = vmatprep.mubr.msk.f32.mxu1 %vm191_vm0, %v40_v18 }
  0x4e   :  { %496 = vmatprep.mubr.f32.mxu0 %v46_v19  ;;  %9969 = vmatpush3.bf16.msra.mxu0 %v11336_v42 }
  0x4f   :  { %9970 = vmatprep.subr.bf16.mxu0 %v12985_v51  ;;  %9978 = vmatpush3.bf16.msra.mxu1 %v11353_v47 }
  0x50   :  { %592 = vmatmul.mubr.f32.gmra.mrb[18].mxu1 %v39_v20  ;;  %9979 = vmatprep.subr.bf16.mxu1 %v12985_v51 }
  0x51   :  { %497 = vmatmul.mubr.f32.gmra.mrb[20].mxu0 %v45_v21  ;;  %7652 = vmatprep.mubr.msk.f32.mxu1 %vm191_vm0, %v48_v22 }
  0x52   :  { %501 = vmatprep.mubr.f32.mxu0 %v54_v23  ;;  %9972 = vmatpush3.bf16.msra.mxu0 %v11362_v50 }
  0x53   :  { %9981 = vmatpush3.bf16.msra.mxu1 %v11371_v54  ;;  %9982 = vmatprep.subr.bf16.mxu0 %v12985_v51 }
  0x54   :  { %597 = vmatmul.mubr.f32.gmra.mrb[20].mxu1 %v47_v24  ;;  %9991 = vmatprep.subr.bf16.mxu1 %v12985_v51 }
  0x55   :  { %502 = vmatmul.mubr.f32.gmra.mrb[22].mxu0 %v53_v25  ;;  %7653 = vmatprep.mubr.msk.f32.mxu1 %vm191_vm0, %v56_v26 }
  0x56   :  { %506 = vmatprep.mubr.f32.mxu0 %v62_v27 }
  0x58   :  { %602 = vmatmul.mubr.f32.gmra.mrb[22].mxu1 %v55_v28 }
  0x59   :  { %507 = vmatmul.mubr.f32.gmra.mrb[24].mxu0 %v61_v29  ;;  %7654 = vmatprep.mubr.msk.f32.mxu1 %vm191_vm0, %v64_v30 }
  0x5a   :  { %511 = vmatprep.mubr.f32.mxu0 %v70_v31 }
  0x5c   :  { %607 = vmatmul.mubr.f32.gmra.mrb[24].mxu1 %v63_v32 }
  0x5d   :  { %512 = vmatmul.mubr.f32.gmra.mrb[26].mxu0 %v69_v33  ;;  %7655 = vmatprep.mubr.msk.f32.mxu1 %vm191_vm0, %v72_v34 }
  0x5e   :  { %8550 = vmatprep.mubr.msk.f32.mxu0 %vm10763_vm2, %v12987_v10 }
  0x60   :  { %612 = vmatmul.mubr.f32.gmra.mrb[26].mxu1 %v71_v35 }
  0x61   :  { %8565 = vmatprep.mubr.msk.f32.mxu1 %vm10763_vm2, %v12987_v10 }
  0xf7   :  { %v7804_v55 = vpop.f32.mrb[0].mxu0 }
  0xf8   :  { %v7805_v57 = vpop.f32.mrb[1].mxu0 }
  0xf9   :  { %v7857_v58 = vpop.f32.mrb[0].mxu1  ;;  %v7806_v59 = vadd.f32 %v7805_v57, %v7804_v55 }
  0xfa   :  { %v7858_v60 = vpop.f32.mrb[1].mxu1 }
  0xfb   :  { %v7859_v61 = vadd.f32 %v7858_v60, %v7857_v58  ;;  %v284_v62 = vadd.f32 %v7806_v59, %v7647_v56  ;;  %v7807_v63 = vpop.f32.mrb[2].mxu0 }
  0xfc   :  { %v7808_v0 = vpop.f32.mrb[3].mxu0 }
  0xfd   :  { %v7860_v1 = vpop.f32.mrb[2].mxu1  ;;  %v384_v2 = vadd.f32 %v7859_v61, %v284_v62  ;;  %v7809_v3 = vadd.f32 %v7808_v0, %v7807_v63  ;;  %v642_v0 = vld [vmem:[%s12981_s1 + $0x415] sm:$0xff] }
  0xfe   :  { %v7861_v4 = vpop.f32.mrb[3].mxu1 }
  0xff   :  { %v7862_v5 = vadd.f32 %v7861_v4, %v7860_v1  ;;  %v289_v6 = vadd.f32 %v7809_v3, %v7647_v56  ;;  %v7810_v7 = vpop.f32.mrb[4].mxu0  ;;  %v643_v1 = vld [vmem:[%s12981_s1 + $0x41d] sm:$0xff] }
 0x100   :  { %v7811_v8 = vpop.f32.mrb[5].mxu0 }
 0x101   :  { %v7863_v9 = vpop.f32.mrb[4].mxu1  ;;  %v389_v11 = vadd.f32 %v7862_v5, %v289_v6  ;;  %v7812_v12 = vadd.f32 %v7811_v8, %v7810_v7  ;;  %v636_v5 = vld [vmem:[%s12981_s1 + $0x3e5] sm:$0xff]  ;;  %v11406_v7 = vpack.c.bf16 %v643_v1, %v642_v0  ;;  %v649_v1 = vld [vmem:[%s12981_s1 + $0x44d] sm:$0xff] }
 0x102   :  { %v7864_v13 = vpop.f32.mrb[5].mxu1  ;;  %v648_v0 = vld [vmem:[%s12981_s1 + $0x445] sm:$0xff] }
 0x103   :  { %v7865_v14 = vadd.f32 %v7864_v13, %v7863_v9  ;;  %v294_v15 = vadd.f32 %v7812_v12, %v7647_v56  ;;  %v7813_v16 = vpop.f32.mrb[6].mxu0 }
 0x104   :  { %v7814_v17 = vpop.f32.mrb[7].mxu0 }
 0x105   :  { %v7866_v18 = vpop.f32.mrb[6].mxu1  ;;  %v11384_v19 = vadd.f32 %v7865_v14, %v294_v15  ;;  %v7815_v20 = vadd.f32 %v7814_v17, %v7813_v16  ;;  %v644_v14 = vld [vmem:[%s12981_s1 + $0x425] sm:$0xff]  ;;  %v645_v15 = vld [vmem:[%s12981_s1 + $0x42d] sm:$0xff] }
 0x106   :  { %v7867_v21 = vpop.f32.mrb[7].mxu1 }
 0x107   :  { %v7868_v22 = vadd.f32 %v7867_v21, %v7866_v18  ;;  %v299_v23 = vadd.f32 %v7815_v20, %v7647_v56  ;;  %v7816_v24 = vpop.f32.mrb[8].mxu0  ;;  %v638_v18 = vld [vmem:[%s12981_s1 + $0x3f5] sm:$0xff] }
 0x108   :  { %v7817_v25 = vpop.f32.mrb[9].mxu0 }
 0x109   :  { %v7869_v26 = vpop.f32.mrb[8].mxu1  ;;  %v11386_v27 = vadd.f32 %v7868_v22, %v299_v23  ;;  %v7818_v28 = vadd.f32 %v7817_v25, %v7816_v24  ;;  %v11428_v24 = vpack.c.bf16 %v645_v15, %v644_v14  ;;  %v11505_v15 = vpack.c.bf16 %v649_v1, %v648_v0 }
 0x10a   :  { %v7870_v29 = vpop.f32.mrb[9].mxu1 }
 0x10b   :  { %v7871_v30 = vadd.f32 %v7870_v29, %v7869_v26  ;;  %v304_v31 = vadd.f32 %v7818_v28, %v7647_v56  ;;  %v7819_v32 = vpop.f32.mrb[10].mxu0 }
 0x10c   :  { %v7820_v33 = vpop.f32.mrb[11].mxu0 }
 0x10d   :  { %v7872_v34 = vpop.f32.mrb[10].mxu1  ;;  %v11388_v35 = vadd.f32 %v7871_v30, %v304_v31  ;;  %v7821_v36 = vadd.f32 %v7820_v33, %v7819_v32  ;;  %v646_v31 = vld [vmem:[%s12981_s1 + $0x435] sm:$0xff]  ;;  %v647_v32 = vld [vmem:[%s12981_s1 + $0x43d] sm:$0xff] }
 0x10e   :  { %v7873_v37 = vpop.f32.mrb[11].mxu1 }
 0x10f   :  { %v7874_v39 = vadd.f32 %v7873_v37, %v7872_v34  ;;  %v309_v40 = vadd.f32 %v7821_v36, %v7647_v56 }
 0x110   :  { %v7822_v41 = vpop.f32.mrb[12].mxu0 }
 0x111   :  { %v7823_v43 = vpop.f32.mrb[13].mxu0  ;;  %v7875_v45 = vpop.f32.mrb[12].mxu1  ;;  %v11390_v46 = vadd.f32 %v7874_v39, %v309_v40  ;;  %v640_v39 = vld [vmem:[%s12981_s1 + $0x405] sm:$0xff]  ;;  %v641_v40 = vld [vmem:[%s12981_s1 + $0x40d] sm:$0xff] }
 0x112   :  { %v7824_v48 = vadd.f32 %v7823_v43, %v7822_v41  ;;  %v7876_v49 = vpop.f32.mrb[13].mxu1 }
 0x113   :  { %v7877_v52 = vadd.f32 %v7876_v49, %v7875_v45 }
 0x114   :  { %v314_v53 = vadd.f32 %v7824_v48, %v7647_v56  ;;  %v11462_v48 = vpack.c.bf16 %v647_v32, %v646_v31  ;;  %v658_v31 = vld [vmem:[%s12981_s1 + $0x495] sm:$0xff]  ;;  %v659_v32 = vld [vmem:[%s12981_s1 + $0x49d] sm:$0xff] }
 0x116   :  { %v11392_v55 = vadd.f32 %v7877_v52, %v314_v53 }
 0x118   :  { %v7910_v57 = vpop.f32.mrb[14].mxu0 }
 0x119   :  { %v7911_v58 = vpop.f32.mrb[15].mxu0 }
 0x11a   :  { %v7912_v59 = vadd.f32 %v7911_v58, %v7910_v57  ;;  %v654_v57 = vld [vmem:[%s12981_s1 + $0x475] sm:$0xff]  ;;  %v655_v58 = vld [vmem:[%s12981_s1 + $0x47d] sm:$0xff] }
 0x11b   :  { %v583_v60 = vpop.f32.mrb[14].mxu1 }
 0x11c   :  { %v7913_v61 = vpop.f32.mrb[16].mxu0  ;;  %v484_v62 = vadd.f32 %v7912_v59, %v384_v2  ;;  %v585_v63 = vpop.f32.mrb[15].mxu1  ;;  %v637_v2 = vld [vmem:[%s12981_s1 + $0x3ed] sm:$0xff] }
 0x11d   :  { %v7914_v3 = vpop.f32.mrb[17].mxu0  ;;  %v11416_v17 = vpack.c.bf16 %v637_v2, %v636_v5 }
 0x11e   :  { %v584_v4 = vadd.f32 %v583_v60, %v484_v62  ;;  %v7915_v56 = vadd.f32 %v7914_v3, %v7913_v61  ;;  %v11481_v61 = vpack.c.bf16 %v641_v40, %v640_v39  ;;  %v652_v40 = vld [vmem:[%s12981_s1 + $0x465] sm:$0xff] }
 0x11f   :  { %v588_v6 = vpop.f32.mrb[16].mxu1 }
 0x120   :  { %v11408_v8 = vmax.f32 %v584_v4, 0.0  ;;  %v7916_v9 = vpop.f32.mrb[18].mxu0  ;;  %v489_v12 = vadd.f32 %v7915_v56, %v389_v11  ;;  %v590_v13 = vpop.f32.mrb[17].mxu1  ;;  %v639_v11 = vld [vmem:[%s12981_s1 + $0x3fd] sm:$0xff]  ;;  %v11491_v4 = vpack.c.bf16 %v655_v58, %v654_v57  ;;  %v666_v58 = vld [vmem:[%s12981_s1 + $0x4d5] sm:$0xff] }
 0x121   :  { %v7917_v16 = vpop.f32.mrb[19].mxu0  ;;  %v11437_v30 = vpack.c.bf16 %v639_v11, %v638_v18  ;;  %v650_v11 = vld [vmem:[%s12981_s1 + $0x455] sm:$0xff] }
 0x122   :  { %v7918_v20 = vadd.f32 %v7917_v16, %v7916_v9  ;;  %v589_v21 = vadd.f32 %v588_v6, %v489_v12  ;;  %8566 = vmatmul.mubr.msk.f32.vlgmr.msra.gmra.mrb[28].mxu1 %vm754_vm3, %v11408_v8  ;;  %v753_v22 = vrot.slane %v11408_v8, 1  ;;  %v1049_v34 = vrot.slane %v11408_v8, 6  ;;  %v656_v9 = vld [vmem:[%s12981_s1 + $0x485] sm:$0xff]  ;;  %v657_v12 = vld [vmem:[%s12981_s1 + $0x48d] sm:$0xff] }
 0x123   :  { %9993 = vmatpush3.bf16.msra.mxu1 %v11406_v7  ;;  %v593_v23 = vpop.f32.mrb[18].mxu1  ;;  %8595 = vmatprep.mubr.msk.f32.mxu1 %vm10763_vm2, %v12987_v10  ;;  %v973_v2 = vrot.slane %v11408_v8, 5  ;;  %v899_v18 = vrot.slane %v11408_v8, 2 }
 0x124   :  { %v11432_v25 = vmax.f32 %v589_v21, 0.0  ;;  %v7919_v26 = vpop.f32.mrb[20].mxu0  ;;  %8551 = vmatmul.mubr.msk.f32.vlgmr.msra.gmra.mrb[28].mxu0 %vm754_vm3, %v753_v22  ;;  %v494_v28 = vadd.f32 %v7918_v20, %v11384_v19  ;;  %9994 = vmatprep.subr.bf16.mxu1 %v12985_v51  ;;  %v595_v29 = vpop.f32.mrb[19].mxu1  ;;  %v1126_v19 = vrot.slane %v11408_v8, 7  ;;  %v651_v20 = vld [vmem:[%s12981_s1 + $0x45d] sm:$0xff]  ;;  %v11519_v22 = vpack.c.bf16 %v657_v12, %v656_v9  ;;  %v668_v12 = vld [vmem:[%s12981_s1 + $0x4e5] sm:$0xff] }
 0x125   :  { %9984 = vmatpush3.bf16.msra.mxu0 %v11416_v17  ;;  %v7920_v33 = vpop.f32.mrb[21].mxu0  ;;  %8580 = vmatprep.mubr.msk.f32.mxu0 %vm10763_vm2, %v12987_v10 }
 0x126   :  { %v7921_v36 = vadd.f32 %v7920_v33, %v7919_v26  ;;  %v11450_v37 = vadd.f32 %v593_v23, %v494_v28  ;;  %9985 = vmatprep.subr.bf16.mxu0 %v12985_v51  ;;  %v1127_v41 = vrot.slane %v11432_v25, 7  ;;  %v1050_v43 = vrot.slane %v11432_v25, 6 }
 0x127   :  { %9996 = vmatpush3.bf16.msra.mxu1 %v11428_v24  ;;  %v598_v45 = vpop.f32.mrb[20].mxu1 }
 0x128   :  { %v7922_v49 = vpop.f32.mrb[22].mxu0  ;;  %v499_v52 = vadd.f32 %v7921_v36, %v11386_v27  ;;  %9997 = vmatprep.subr.bf16.mxu1 %v12985_v51  ;;  %v600_v53 = vpop.f32.mrb[21].mxu1  ;;  %v11475_v59 = vsel %vm1125_vm4, %v1126_v19, %v1127_v41  ;;  %v11478_v60 = vsel %vm1048_vm5, %v1049_v34, %v1050_v43  ;;  %v11535_v19 = vpack.c.bf16 %v651_v20, %v650_v11  ;;  %v653_v43 = vld [vmem:[%s12981_s1 + $0x46d] sm:$0xff]  ;;  %v662_v11 = vld [vmem:[%s12981_s1 + $0x4b5] sm:$0xff]  ;;  %v663_v20 = vld [vmem:[%s12981_s1 + $0x4bd] sm:$0xff] }
 0x129   :  { %9987 = vmatpush3.bf16.msra.mxu0 %v11437_v30  ;;  %v7923_v27 = vpop.f32.mrb[23].mxu0  ;;  %v11551_v53 = vpack.c.bf16 %v659_v32, %v658_v31  ;;  %v671_v31 = vld [vmem:[%s12981_s1 + $0x4fd] sm:$0xff]  ;;  %v11752_v8 = vmax.f32 %v11450_v37, 0.0 }
 0x12a   :  { %v7924_v62 = vadd.f32 %v7923_v27, %v7922_v49  ;;  %v599_v63 = vadd.f32 %v598_v45, %v499_v52  ;;  %9988 = vmatprep.subr.bf16.mxu0 %v12985_v51  ;;  %v667_v27 = vld [vmem:[%s12981_s1 + $0x4dd] sm:$0xff] }
 0x12b   :  { %9999 = vmatpush3.bf16.msra.mxu1 %v11462_v48  ;;  %v603_v3 = vpop.f32.mrb[22].mxu1 }
 0x12c   :  { %v7925_v56 = vpop.f32.mrb[24].mxu0  ;;  %v504_v5 = vadd.f32 %v7924_v62, %v11388_v35  ;;  %10009 = vmatprep.subr.bf16.mxu1 %v12985_v51  ;;  %v605_v6 = vpop.f32.mrb[23].mxu1  ;;  %v11502_v13 = vmax.f32 %v599_v63, 0.0 }
 0x12d   :  { %9990 = vmatpush3.bf16.msra.mxu0 %v11481_v61  ;;  %v7926_v14 = vpop.f32.mrb[25].mxu0  ;;  %v11582_v6 = vpack.c.bf16 %v667_v27, %v666_v58  ;;  %v11662_v58 = vrot.slane %v11432_v25, 2  ;;  %v674_v27 = vld [vmem:[%s12981_s1 + $0x515] sm:$0xff] }
 0x12e   :  { %v7927_v35 = vadd.f32 %v7926_v14, %v7925_v56  ;;  %v604_v16 = vadd.f32 %v603_v3, %v504_v5  ;;  %8596 = vmatmul.mubr.msk.f32.vlgmr.msra.gmra.mrb[30].mxu1 %vm754_vm3, %v973_v2  ;;  %10000 = vmatprep.subr.bf16.mxu0 %v12985_v51  ;;  %v3693_v34 = vrot.slane %v11502_v13, 7  ;;  %v660_v56 = vld [vmem:[%s12981_s1 + $0x4a5] sm:$0xff]  ;;  %v661_v5 = vld [vmem:[%s12981_s1 + $0x4ad] sm:$0xff] }
 0x12f   :  { %10011 = vmatpush3.bf16.msra.mxu1 %v11491_v4  ;;  %v608_v21 = vpop.f32.mrb[24].mxu1  ;;  %8625 = vmatprep.mubr.msk.f32.mxu1 %vm10763_vm2, %v12987_v10  ;;  %v669_v14 = vld [vmem:[%s12981_s1 + $0x4ed] sm:$0xff] }
 0x130   :  { %v11523_v23 = vmax.f32 %v604_v16, 0.0  ;;  %8581 = vmatmul.mubr.msk.f32.vlgmr.msra.gmra.mrb[30].mxu0 %vm754_vm3, %v899_v18  ;;  %v7928_v26 = vpop.f32.mrb[26].mxu0  ;;  %v509_v28 = vadd.f32 %v7927_v35, %v11390_v46  ;;  %10012 = vmatprep.subr.bf16.mxu1 %v12985_v51  ;;  %v610_v29 = vpop.f32.mrb[25].mxu1  ;;  %v2653_v46 = vrot.slane %v11502_v13, 6  ;;  %v11592_v35 = vpack.c.bf16 %v661_v5, %v660_v56  ;;  %v676_v56 = vld [vmem:[%s12981_s1 + $0x525] sm:$0xff]  ;;  %v677_v5 = vld [vmem:[%s12981_s1 + $0x52d] sm:$0xff] }
 0x131   :  { %10002 = vmatpush3.bf16.msra.mxu0 %v11505_v15  ;;  %v7929_v33 = vpop.f32.mrb[27].mxu0  ;;  %8610 = vmatprep.mubr.msk.f32.mxu0 %vm10763_vm2, %v12987_v10  ;;  %v670_v29 = vld [vmem:[%s12981_s1 + $0x4f5] sm:$0xff] }
 0x132   :  { %v7930_v36 = vadd.f32 %v7929_v33, %v7928_v26  ;;  %v609_v39 = vadd.f32 %v608_v21, %v509_v28  ;;  %10003 = vmatprep.subr.bf16.mxu0 %v12985_v51  ;;  %v3694_v45 = vrot.slane %v11523_v23, 7  ;;  %v3618_v49 = vrot.slane %v11523_v23, 6 }
 0x133   :  { %10014 = vmatpush3.bf16.msra.mxu1 %v11519_v22  ;;  %v613_v52 = vpop.f32.mrb[26].mxu1  ;;  %v11606_v28 = vpack.c.bf16 %v669_v14, %v668_v12  ;;  %v11701_v12 = vrot.slane %v11432_v25, 4  ;;  %v2577_v14 = vrot.slane %v11752_v8, 5 }
 0x134   :  { %v514_v57 = vadd.f32 %v7930_v36, %v11392_v55  ;;  %10015 = vmatprep.subr.bf16.mxu1 %v12985_v51  ;;  %v615_v62 = vpop.f32.mrb[27].mxu1  ;;  %v11562_v63 = vsel %vm1125_vm4, %v3693_v34, %v3694_v45  ;;  %v11567_v0 = vsel %vm1048_vm5, %v2653_v46, %v3618_v49  ;;  %v11570_v55 = vpack.c.bf16 %v653_v43, %v652_v40  ;;  %v664_v36 = vld [vmem:[%s12981_s1 + $0x4c5] sm:$0xff]  ;;  %v673_v49 = vld [vmem:[%s12981_s1 + $0x50d] sm:$0xff] }
 0x135   :  { %10005 = vmatpush3.bf16.msra.mxu0 %v11535_v19  ;;  %v11572_v1 = vmax.f32 %v609_v39, 0.0  ;;  %v11626_v34 = vpack.c.bf16 %v663_v20, %v662_v11  ;;  %v665_v39 = vld [vmem:[%s12981_s1 + $0x4cd] sm:$0xff]  ;;  %v11638_v40 = vpack.c.bf16 %v671_v31, %v670_v29  ;;  %v672_v45 = vld [vmem:[%s12981_s1 + $0x505] sm:$0xff]  ;;  %v675_v62 = vld [vmem:[%s12981_s1 + $0x51d] sm:$0xff]  ;;  %v2503_v11 = vrot.slane %v11752_v8, 4 }
 0x136   :  { %v614_v3 = vadd.f32 %v613_v52, %v514_v57  ;;  %10006 = vmatprep.subr.bf16.mxu0 %v12985_v51  ;;  %v11642_v43 = vpack.c.bf16 %v665_v39, %v664_v36  ;;  %v11653_v52 = vrot.slane %v11432_v25, 3  ;;  %v11657_v57 = vpack.c.bf16 %v673_v49, %v672_v45  ;;  %v692_v31 = vld [vmem:[%s12981_s1 + $0x5a6] sm:$0xff]  ;;  %v693_v36 = vld [vmem:[%s12981_s1 + $0x5ae] sm:$0xff]  ;;  %v678_v39 = vld [vmem:[%s12981_s1 + $0x536] sm:$0xff] }
 0x137   :  { %10017 = vmatpush3.bf16.msra.mxu1 %v11551_v53  ;;  %v5289_v21 = vrot.slane %v11572_v1, 7  ;;  %v5213_v26 = vrot.slane %v11572_v1, 6  ;;  %v2003_v25 = vrot.slane %v11752_v8, 1  ;;  %v679_v45 = vld [vmem:[%s12981_s1 + $0x53e] sm:$0xff]  ;;  %v11920_v49 = vpack.c.bf16 %v693_v36, %v692_v31 }
 0x138   :  { %v623_v9 = vmax.f32 %v614_v3, 0.0  ;;  %10027 = vmatprep.subr.bf16.mxu1 %v12985_v51  ;;  %v11678_v3 = vpack.c.bf16 %v675_v62, %v674_v27  ;;  %v680_v27 = vld [vmem:[%s12981_s1 + $0x546] sm:$0xff]  ;;  %v681_v62 = vld [vmem:[%s12981_s1 + $0x54e] sm:$0xff] }
 0x139   :  { %10008 = vmatpush3.bf16.msra.mxu0 %v11570_v55 }
 0x13a   :  { %v5214_v16 = vrot.slane %v623_v9, 6  ;;  %v5290_v18 = vrot.slane %v623_v9, 7  ;;  %8626 = vmatmul.mubr.msk.f32.vlgmr.msra.gmra.mrb[32].mxu1 %vm754_vm3, %v11475_v59  ;;  %10018 = vmatprep.subr.bf16.mxu0 %v12985_v51  ;;  %v11692_v9 = vpack.c.bf16 %v677_v5, %v676_v56  ;;  %v11941_v5 = vpack.c.bf16 %v681_v62, %v680_v27 }
 0x13b   :  { %10029 = vmatpush3.bf16.msra.mxu1 %v11582_v6  ;;  %8655 = vmatprep.mubr.msk.f32.mxu1 %vm10763_vm2, %v12987_v10 }
 0x13c   :  { %8611 = vmatmul.mubr.msk.f32.vlgmr.msra.gmra.mrb[32].mxu0 %vm754_vm3, %v11478_v60  ;;  %10030 = vmatprep.subr.bf16.mxu1 %v12985_v51  ;;  %v11620_v32 = vsel %vm1125_vm4, %v5289_v21, %v5290_v18  ;;  %v11623_v33 = vsel %vm1048_vm5, %v5213_v26, %v5214_v16  ;;  %v688_v16 = vld [vmem:[%s12981_s1 + $0x586] sm:$0xff]  ;;  %v689_v18 = vld [vmem:[%s12981_s1 + $0x58e] sm:$0xff]  ;;  %v690_v21 = vld [vmem:[%s12981_s1 + $0x596] sm:$0xff] }
 0x13d   :  { %10020 = vmatpush3.bf16.msra.mxu0 %v11592_v35  ;;  %8640 = vmatprep.mubr.msk.f32.mxu0 %vm10763_vm2, %v12987_v10  ;;  %v11885_v20 = vpack.c.bf16 %v689_v18, %v688_v16  ;;  %v691_v26 = vld [vmem:[%s12981_s1 + $0x59e] sm:$0xff] }
 0x13e   :  { %10021 = vmatprep.subr.bf16.mxu0 %v12985_v51  ;;  %v11902_v29 = vpack.c.bf16 %v691_v26, %v690_v21 }
 0x13f   :  { %10032 = vmatpush3.bf16.msra.mxu1 %v11606_v28 }
 0x140   :  { %10033 = vmatprep.subr.bf16.mxu1 %v12985_v51 }
 0x141   :  { %10023 = vmatpush3.bf16.msra.mxu0 %v11626_v34 }
 0x142   :  { %10024 = vmatprep.subr.bf16.mxu0 %v12985_v51 }
 0x143   :  { %10035 = vmatpush3.bf16.msra.mxu1 %v11638_v40 }
 0x144   :  { %10045 = vmatprep.subr.bf16.mxu1 %v12985_v51 }
 0x145   :  { %10026 = vmatpush3.bf16.msra.mxu0 %v11642_v43 }
 0x146   :  { %8656 = vmatmul.mubr.msk.f32.vlgmr.msra.gmra.mrb[34].mxu1 %vm754_vm3, %v11653_v52  ;;  %10036 = vmatprep.subr.bf16.mxu0 %v12985_v51 }
 0x147   :  { %10047 = vmatpush3.bf16.msra.mxu1 %v11323_v38  ;;  %8685 = vmatprep.mubr.msk.f32.mxu1 %vm10763_vm2, %v12987_v10 }
 0x148   :  { %8641 = vmatmul.mubr.msk.f32.vlgmr.msra.gmra.mrb[34].mxu0 %vm754_vm3, %v11662_v58  ;;  %10048 = vmatprep.subr.bf16.mxu1 %v12985_v51 }
 0x149   :  { %10038 = vmatpush3.bf16.msra.mxu0 %v11657_v57  ;;  %8670 = vmatprep.mubr.msk.f32.mxu0 %vm10763_vm2, %v12987_v10 }
 0x14a   :  { %10039 = vmatprep.subr.bf16.mxu0 %v12985_v51 }
 0x14b   :  { %10050 = vmatpush3.bf16.msra.mxu1 %v11336_v42 }
 0x14c   :  { %10051 = vmatprep.subr.bf16.mxu1 %v12985_v51 }
 0x14d   :  { %10041 = vmatpush3.bf16.msra.mxu0 %v11678_v3 }
 0x14e   :  { %10042 = vmatprep.subr.bf16.mxu0 %v12985_v51 }
 0x14f   :  { %10053 = vmatpush3.bf16.msra.mxu1 %v11362_v50 }
 0x150   :  { %10063 = vmatprep.subr.bf16.mxu1 %v12985_v51 }
 0x151   :  { %10044 = vmatpush3.bf16.msra.mxu0 %v11692_v9 }
 0x152   :  { %8686 = vmatmul.mubr.msk.f32.vlgmr.msra.gmra.mrb[36].mxu1 %vm754_vm3, %v11478_v60  ;;  %10054 = vmatprep.subr.bf16.mxu0 %v12985_v51  ;;  %v687_v60 = vld [vmem:[%s12981_s1 + $0x57e] sm:$0xff] }
 0x153   :  { %10065 = vmatpush3.bf16.msra.mxu1 %v11416_v17  ;;  %8715 = vmatprep.mubr.msk.f32.mxu1 %vm10763_vm2, %v12987_v10 }
 0x154   :  { %8671 = vmatmul.mubr.msk.f32.vlgmr.msra.gmra.mrb[36].mxu0 %vm754_vm3, %v11701_v12  ;;  %10066 = vmatprep.subr.bf16.mxu1 %v12985_v51 }
 0x155   :  { %10056 = vmatpush3.bf16.msra.mxu0 %v11341_v44  ;;  %8700 = vmatprep.mubr.msk.f32.mxu0 %vm10763_vm2, %v12987_v10 }
 0x156   :  { %10057 = vmatprep.subr.bf16.mxu0 %v12985_v51 }
 0x157   :  { %10068 = vmatpush3.bf16.msra.mxu1 %v11437_v30 }
 0x158   :  { %10069 = vmatprep.subr.bf16.mxu1 %v12985_v51 }
 0x159   :  { %10059 = vmatpush3.bf16.msra.mxu0 %v11353_v47 }
 0x15a   :  { %10060 = vmatprep.subr.bf16.mxu0 %v12985_v51 }
 0x15b   :  { %10071 = vmatpush3.bf16.msra.mxu1 %v11481_v61 }
 0x15c   :  { %10081 = vmatprep.subr.bf16.mxu1 %v12985_v51 }
 0x15d   :  { %10062 = vmatpush3.bf16.msra.mxu0 %v11371_v54 }
 0x15e   :  { %8716 = vmatmul.mubr.msk.f32.vlgmr.msra.gmra.mrb[38].mxu1 %vm754_vm3, %v11475_v59  ;;  %10072 = vmatprep.subr.bf16.mxu0 %v12985_v51  ;;  %v1855_v59 = vrot.slane %v11752_v8, 7 }
 0x15f   :  { %10083 = vmatpush3.bf16.msra.mxu1 %v11505_v15  ;;  %8745 = vmatprep.mubr.msk.f32.mxu1 %vm10763_vm2, %v12987_v10 }
 0x160   :  { %8701 = vmatmul.mubr.msk.f32.vlgmr.msra.gmra.mrb[38].mxu0 %vm754_vm3, %v973_v2  ;;  %10084 = vmatprep.subr.bf16.mxu1 %v12985_v51  ;;  %v1856_v37 = vsel %vm1125_vm4, %v1127_v41, %v1855_v59  ;;  %v686_v41 = vld [vmem:[%s12981_s1 + $0x576] sm:$0xff]  ;;  %v684_v59 = vld [vmem:[%s12981_s1 + $0x566] sm:$0xff] }
 0x161   :  { %10074 = vmatpush3.bf16.msra.mxu0 %v11406_v7  ;;  %8730 = vmatprep.mubr.msk.f32.mxu0 %vm10763_vm2, %v12987_v10  ;;  %v11870_v2 = vpack.c.bf16 %v687_v60, %v686_v41 }
 0x162   :  { %10075 = vmatprep.subr.bf16.mxu0 %v12985_v51 }
 0x163   :  { %10086 = vmatpush3.bf16.msra.mxu1 %v11535_v19 }
 0x164   :  { %10087 = vmatprep.subr.bf16.mxu1 %v12985_v51 }
 0x165   :  { %10077 = vmatpush3.bf16.msra.mxu0 %v11428_v24 }
 0x166   :  { %10078 = vmatprep.subr.bf16.mxu0 %v12985_v51 }
 0x167   :  { %10089 = vmatpush3.bf16.msra.mxu1 %v11570_v55 }
 0x168   :  { %10099 = vmatprep.subr.bf16.mxu1 %v12985_v51 }
 0x169   :  { %10080 = vmatpush3.bf16.msra.mxu0 %v11462_v48 }
 0x16a   :  { %8746 = vmatmul.mubr.msk.f32.vlgmr.msra.gmra.mrb[40].mxu1 %vm754_vm3, %v11653_v52  ;;  %10090 = vmatprep.subr.bf16.mxu0 %v12985_v51 }
 0x16b   :  { %10101 = vmatpush3.bf16.msra.mxu1 %v11592_v35  ;;  %8775 = vmatprep.mubr.msk.f32.mxu1 %vm10763_vm2, %v12987_v10 }
 0x16c   :  { %8731 = vmatmul.mubr.msk.f32.vlgmr.msra.gmra.mrb[40].mxu0 %vm754_vm3, %v11662_v58  ;;  %10102 = vmatprep.subr.bf16.mxu1 %v12985_v51 }
 0x16d   :  { %10092 = vmatpush3.bf16.msra.mxu0 %v11491_v4  ;;  %8760 = vmatprep.mubr.msk.f32.mxu0 %vm10763_vm2, %v12987_v10 }
 0x16e   :  { %10093 = vmatprep.subr.bf16.mxu0 %v12985_v51 }
 0x16f   :  { %10104 = vmatpush3.bf16.msra.mxu1 %v11626_v34 }
 0x170   :  { %10105 = vmatprep.subr.bf16.mxu1 %v12985_v51 }
 0x171   :  { %10095 = vmatpush3.bf16.msra.mxu0 %v11519_v22 }
 0x172   :  { %10096 = vmatprep.subr.bf16.mxu0 %v12985_v51 }
 0x173   :  { %10107 = vmatpush3.bf16.msra.mxu1 %v11642_v43 }
 0x174   :  { %10117 = vmatprep.subr.bf16.mxu1 %v12985_v51 }
 0x175   :  { %10098 = vmatpush3.bf16.msra.mxu0 %v11551_v53 }
 0x176   :  { %8776 = vmatmul.mubr.msk.f32.vlgmr.msra.gmra.mrb[42].mxu1 %vm754_vm3, %v1856_v37  ;;  %10108 = vmatprep.subr.bf16.mxu0 %v12985_v51 }
 0x177   :  { %10119 = vmatpush3.bf16.msra.mxu1 %v11657_v57  ;;  %8805 = vmatprep.mubr.msk.f32.mxu1 %vm10763_vm2, %v12987_v10 }
 0x178   :  { %8761 = vmatmul.mubr.msk.f32.vlgmr.msra.gmra.mrb[42].mxu0 %vm754_vm3, %v11701_v12  ;;  %10120 = vmatprep.subr.bf16.mxu1 %v12985_v51 }
 0x179   :  { %10110 = vmatpush3.bf16.msra.mxu0 %v11582_v6  ;;  %8790 = vmatprep.mubr.msk.f32.mxu0 %vm10763_vm2, %v12987_v10 }
 0x17a   :  { %10111 = vmatprep.subr.bf16.mxu0 %v12985_v51 }
 0x17b   :  { %10122 = vmatpush3.bf16.msra.mxu1 %v11678_v3 }
 0x17c   :  { %10123 = vmatprep.subr.bf16.mxu1 %v12985_v51 }
 0x17d   :  { %10113 = vmatpush3.bf16.msra.mxu0 %v11606_v28 }
 0x17e   :  { %10114 = vmatprep.subr.bf16.mxu0 %v12985_v51 }
 0x17f   :  { %10125 = vmatpush3.bf16.msra.mxu1 %v11692_v9 }
 0x180   :  { %10135 = vmatprep.subr.bf16.mxu1 %v12985_v51 }
 0x181   :  { %10116 = vmatpush3.bf16.msra.mxu0 %v11638_v40 }
 0x182   :  { %8806 = vmatmul.mubr.msk.f32.vlgmr.msra.gmra.mrb[44].mxu1 %vm754_vm3, %v2003_v25  ;;  %10126 = vmatprep.subr.bf16.mxu0 %v12985_v51 }
 0x183   :  { %10137 = vmatpush3.bf16.msra.mxu1 %v11341_v44  ;;  %8835 = vmatprep.mubr.msk.f32.mxu1 %vm10763_vm2, %v12987_v10 }
 0x184   :  { %8791 = vmatmul.mubr.msk.f32.vlgmr.msra.gmra.mrb[44].mxu0 %vm754_vm3, %v11752_v8  ;;  %10138 = vmatprep.subr.bf16.mxu1 %v12985_v51 }
 0x185   :  { %10128 = vmatpush3.bf16.msra.mxu0 %v11323_v38  ;;  %8820 = vmatprep.mubr.msk.f32.mxu0 %vm10763_vm2, %v12987_v10 }
 0x186   :  { %10129 = vmatprep.subr.bf16.mxu0 %v12985_v51 }
 0x187   :  { %10140 = vmatpush3.bf16.msra.mxu1 %v11353_v47 }
 0x188   :  { %10141 = vmatprep.subr.bf16.mxu1 %v12985_v51 }
 0x189   :  { %10131 = vmatpush3.bf16.msra.mxu0 %v11336_v42 }
 0x18a   :  { %10132 = vmatprep.subr.bf16.mxu0 %v12985_v51 }
 0x18b   :  { %10143 = vmatpush3.bf16.msra.mxu1 %v11371_v54 }
 0x18c   :  { %10153 = vmatprep.subr.bf16.mxu1 %v12985_v51 }
 0x18d   :  { %10134 = vmatpush3.bf16.msra.mxu0 %v11362_v50 }
 0x18e   :  { %8836 = vmatmul.mubr.msk.f32.vlgmr.msra.gmra.mrb[46].mxu1 %vm754_vm3, %v11662_v58  ;;  %10144 = vmatprep.subr.bf16.mxu0 %v12985_v51  ;;  %v11925_v58 = vpack.c.bf16 %v679_v45, %v678_v39 }
 0x18f   :  { %10155 = vmatpush3.bf16.msra.mxu1 %v11406_v7  ;;  %8865 = vmatprep.mubr.msk.f32.mxu1 %vm10763_vm2, %v12987_v10 }
 0x190   :  { %8821 = vmatmul.mubr.msk.f32.vlgmr.msra.gmra.mrb[46].mxu0 %vm754_vm3, %v11653_v52  ;;  %10156 = vmatprep.subr.bf16.mxu1 %v12985_v51  ;;  %v2652_v52 = vrot.slane %v11752_v8, 6 }
 0x191   :  { %10146 = vmatpush3.bf16.msra.mxu0 %v11416_v17  ;;  %8850 = vmatprep.mubr.msk.f32.mxu0 %vm10763_vm2, %v12987_v10 }
 0x192   :  { %10147 = vmatprep.subr.bf16.mxu0 %v12985_v51  ;;  %v2654_v56 = vsel %vm1048_vm5, %v2652_v52, %v2653_v46  ;;  %v683_v46 = vld [vmem:[%s12981_s1 + $0x55e] sm:$0xff] }
 0x193   :  { %10158 = vmatpush3.bf16.msra.mxu1 %v11428_v24 }
 0x194   :  { %10159 = vmatprep.subr.bf16.mxu1 %v12985_v51 }
 0x195   :  { %10149 = vmatpush3.bf16.msra.mxu0 %v11437_v30 }
 0x196   :  { %10150 = vmatprep.subr.bf16.mxu0 %v12985_v51 }
 0x197   :  { %10161 = vmatpush3.bf16.msra.mxu1 %v11462_v48 }
 0x198   :  { %10171 = vmatprep.subr.bf16.mxu1 %v12985_v51 }
 0x199   :  { %10152 = vmatpush3.bf16.msra.mxu0 %v11481_v61 }
 0x19a   :  { %8866 = vmatmul.mubr.msk.f32.vlgmr.msra.gmra.mrb[48].mxu1 %vm754_vm3, %v1856_v37  ;;  %10162 = vmatprep.subr.bf16.mxu0 %v12985_v51  ;;  %v685_v37 = vld [vmem:[%s12981_s1 + $0x56e] sm:$0xff] }
 0x19b   :  { %10173 = vmatpush3.bf16.msra.mxu1 %v11491_v4  ;;  %8895 = vmatprep.mubr.msk.f32.mxu1 %vm10763_vm2, %v12987_v10 }
 0x19c   :  { %8851 = vmatmul.mubr.msk.f32.vlgmr.msra.gmra.mrb[48].mxu0 %vm754_vm3, %v11701_v12  ;;  %10174 = vmatprep.subr.bf16.mxu1 %v12985_v51  ;;  %v682_v12 = vld [vmem:[%s12981_s1 + $0x556] sm:$0xff] }
 0x19d   :  { %10164 = vmatpush3.bf16.msra.mxu0 %v11505_v15  ;;  %8880 = vmatprep.mubr.msk.f32.mxu0 %vm10763_vm2, %v12987_v10 }
 0x19e   :  { %10165 = vmatprep.subr.bf16.mxu0 %v12985_v51 }
 0x19f   :  { %10176 = vmatpush3.bf16.msra.mxu1 %v11519_v22 }
 0x1a0   :  { %10177 = vmatprep.subr.bf16.mxu1 %v12985_v51 }
 0x1a1   :  { %10167 = vmatpush3.bf16.msra.mxu0 %v11535_v19 }
 0x1a2   :  { %10168 = vmatprep.subr.bf16.mxu0 %v12985_v51 }
 0x1a3   :  { %10179 = vmatpush3.bf16.msra.mxu1 %v11551_v53 }
 0x1a4   :  { %10189 = vmatprep.subr.bf16.mxu1 %v12985_v51 }
 0x1a5   :  { %10170 = vmatpush3.bf16.msra.mxu0 %v11570_v55 }
 0x1a6   :  { %8896 = vmatmul.mubr.msk.f32.vlgmr.msra.gmra.mrb[50].mxu1 %vm754_vm3, %v2003_v25  ;;  %10180 = vmatprep.subr.bf16.mxu0 %v12985_v51  ;;  %v11963_v25 = vpack.c.bf16 %v685_v37, %v684_v59 }
 0x1a7   :  { %10191 = vmatpush3.bf16.msra.mxu1 %v11582_v6  ;;  %8925 = vmatprep.mubr.msk.f32.mxu1 %vm10763_vm2, %v12987_v10 }
 0x1a8   :  { %8881 = vmatmul.mubr.msk.f32.vlgmr.msra.gmra.mrb[50].mxu0 %vm754_vm3, %v11752_v8  ;;  %10192 = vmatprep.subr.bf16.mxu1 %v12985_v51  ;;  %v11953_v8 = vpack.c.bf16 %v683_v46, %v682_v12 }
 0x1a9   :  { %10182 = vmatpush3.bf16.msra.mxu0 %v11592_v35  ;;  %8910 = vmatprep.mubr.msk.f32.mxu0 %vm10763_vm2, %v12987_v10 }
 0x1aa   :  { %10183 = vmatprep.subr.bf16.mxu0 %v12985_v51 }
 0x1ab   :  { %10194 = vmatpush3.bf16.msra.mxu1 %v11606_v28 }
 0x1ac   :  { %10195 = vmatprep.subr.bf16.mxu1 %v12985_v51 }
 0x1ad   :  { %10185 = vmatpush3.bf16.msra.mxu0 %v11626_v34 }
 0x1ae   :  { %10186 = vmatprep.subr.bf16.mxu0 %v12985_v51 }
 0x1af   :  { %10197 = vmatpush3.bf16.msra.mxu1 %v11638_v40 }
 0x1b0   :  { %10207 = vmatprep.subr.bf16.mxu1 %v12985_v51 }
 0x1b1   :  { %10188 = vmatpush3.bf16.msra.mxu0 %v11642_v43 }
 0x1b2   :  { %8926 = vmatmul.mubr.msk.f32.vlgmr.msra.gmra.mrb[52].mxu1 %vm754_vm3, %v2577_v14  ;;  %10198 = vmatprep.subr.bf16.mxu0 %v12985_v51 }
 0x1b3   :  { %10209 = vmatpush3.bf16.msra.mxu1 %v11870_v2  ;;  %8959 = vmatprep.mubr.msk.f32.mxu1 %vm10763_vm2, %v12987_v10 }
 0x1b4   :  { %8911 = vmatmul.mubr.msk.f32.vlgmr.msra.gmra.mrb[52].mxu0 %vm754_vm3, %v2503_v11  ;;  %10210 = vmatprep.subr.bf16.mxu1 %v12985_v51 }
 0x1b5   :  { %10200 = vmatpush3.bf16.msra.mxu0 %v11657_v57  ;;  %8940 = vmatprep.mubr.msk.f32.mxu0 %vm10763_vm2, %v12987_v10 }
 0x1b6   :  { %10201 = vmatprep.subr.bf16.mxu0 %v12985_v51 }
 0x1b7   :  { %10212 = vmatpush3.bf16.msra.mxu1 %v11885_v20 }
 0x1b8   :  { %10213 = vmatprep.subr.bf16.mxu1 %v12985_v51 }
 0x1b9   :  { %10203 = vmatpush3.bf16.msra.mxu0 %v11678_v3 }
 0x1ba   :  { %10204 = vmatprep.subr.bf16.mxu0 %v12985_v51 }
 0x1bb   :  { %10215 = vmatpush3.bf16.msra.mxu1 %v11902_v29 }
 0x1bc   :  { %10216 = vmatprep.subr.bf16.mxu1 %v12985_v51 }
 0x1bd   :  { %10206 = vmatpush3.bf16.msra.mxu0 %v11692_v9 }
 0x1be   :  { %10219 = vmatprep.subr.bf16.mxu0 %v12985_v51 }
 0x1bf   :  { %10218 = vmatpush3.bf16.msra.mxu1 %v11920_v49 }
 0x1c0   :  { %8941 = vmatmul.mubr.msk.f32.vlgmr.msra.gmra.mrb[54].mxu0 %vm754_vm3, %v2654_v56  ;;  %10231 = vmatprep.subr.bf16.mxu1 %v12985_v51 }
 0x1c1   :  { %10221 = vmatpush3.bf16.msra.mxu0 %v11925_v58  ;;  %8978 = vmatprep.mubr.msk.f32.mxu0 %vm10763_vm2, %v12987_v10 }
 0x1c2   :  { %10222 = vmatprep.subr.bf16.mxu0 %v12985_v51 }
 0x1c5   :  { %10224 = vmatpush3.bf16.msra.mxu0 %v11941_v5 }
 0x1c6   :  { %10225 = vmatprep.subr.bf16.mxu0 %v12985_v51 }
 0x1c9   :  { %10227 = vmatpush3.bf16.msra.mxu0 %v11953_v8 }
 0x1ca   :  { %10228 = vmatprep.subr.bf16.mxu0 %v12985_v51 }
 0x1cd   :  { %10230 = vmatpush3.bf16.msra.mxu0 %v11963_v25 }
 0x1ce   :  { %10243 = vmatprep.subr.bf16.mxu0 %v12985_v51 }
 0x1f5   :  { %v895_v41 = vpop.f32.mrb[28].mxu1 }
 0x1f6   :  { %v8567_v60 = vpop.f32.mrb[29].mxu1 }
 0x1f7   :  { %v823_v14 = vpop.f32.mrb[28].mxu0 }
 0x1f8   :  { %v896_v16 = vadd.f32 %v895_v41, %v823_v14  ;;  %v8552_v18 = vpop.f32.mrb[29].mxu0 }
 0x201   :  { %v1042_v11 = vpop.f32.mrb[30].mxu1 }
 0x202   :  { %v8597_v21 = vpop.f32.mrb[31].mxu1 }
 0x203   :  { %v968_v26 = vpop.f32.mrb[30].mxu0 }
 0x204   :  { %v972_v31 = vadd.f32 %v968_v26, %v896_v16  ;;  %v8582_v36 = vpop.f32.mrb[31].mxu0  ;;  %v11971_v16 = vld [vmem:[%s12981_s1 + $0x535] ss:$0 sm:$0xff]  ;;  %v702_v26 = vld [vmem:[%s12981_s1 + $0x5f6] sm:$0xff] }
 0x205   :  { %v694_v36 = vld [vmem:[%s12981_s1 + $0x5b6] sm:$0xff] }
 0x206   :  { %v1046_v39 = vadd.f32 %v1042_v11, %v972_v31  ;;  %v703_v31 = vld [vmem:[%s12981_s1 + $0x5fe] sm:$0xff] }
 0x20d   :  { %v1197_v45 = vpop.f32.mrb[32].mxu1 }
 0x20e   :  { %v8627_v52 = vpop.f32.mrb[33].mxu1 }
 0x20f   :  { %v1120_v27 = vpop.f32.mrb[32].mxu0  ;;  %v704_v52 = vld [vmem:[%s12981_s1 + $0x606] sm:$0xff] }
 0x210   :  { %v1124_v62 = vadd.f32 %v1120_v27, %v1046_v39  ;;  %v8612_v56 = vpop.f32.mrb[33].mxu0  ;;  %v695_v39 = vld [vmem:[%s12981_s1 + $0x5be] sm:$0xff]  ;;  %v705_v27 = vld [vmem:[%s12981_s1 + $0x60e] sm:$0xff] }
 0x212   :  { %v1201_v12 = vadd.f32 %v1197_v45, %v1124_v62  ;;  %v11994_v62 = vpack.c.bf16 %v695_v39, %v694_v36 }
 0x219   :  { %v1345_v46 = vpop.f32.mrb[34].mxu1 }
 0x21a   :  { %v8657_v59 = vpop.f32.mrb[35].mxu1 }
 0x21b   :  { %v1271_v37 = vpop.f32.mrb[34].mxu0  ;;  %v12004_v59 = vpack.c.bf16 %v705_v27, %v704_v52 }
 0x21c   :  { %v1275_v51 = vadd.f32 %v1271_v37, %v1201_v12  ;;  %v8642_v60 = vpop.f32.mrb[35].mxu0  ;;  %v696_v12 = vld [vmem:[%s12981_s1 + $0x5c6] sm:$0xff]  ;;  %v13011_v37 = vmov 0.0  }
 0x21d   :  { %13010 = vst [vmem:[#allocation5_spill] sm:$0xff] %v12004_v59  ;;  %v13012_v60 = vmov 0.0|0.0  }
 0x21e   :  { %v1349_v10 = vadd.f32 %v1345_v46, %v1275_v51  ;;  %v697_v46 = vld [vmem:[%s12981_s1 + $0x5ce] sm:$0xff] }
 0x225   :  { %v1496_v41 = vpop.f32.mrb[36].mxu1 }
 0x226   :  { %v8687_v14 = vpop.f32.mrb[37].mxu1 }
 0x227   :  { %v1419_v18 = vpop.f32.mrb[36].mxu0  ;;  %v706_v14 = vld [vmem:[%s12981_s1 + $0x616] sm:$0xff] }
 0x228   :  { %v1423_v11 = vadd.f32 %v1419_v18, %v1349_v10  ;;  %v8672_v21 = vpop.f32.mrb[37].mxu0  ;;  %v11986_v10 = vpack.c.bf16 %v703_v31, %v702_v26  ;;  %v707_v18 = vld [vmem:[%s12981_s1 + $0x61e] sm:$0xff]  ;;  %v698_v31 = vld [vmem:[%s12981_s1 + $0x5d6] sm:$0xff] }
 0x229   :  { %v12017_v21 = vpack.c.bf16 %v697_v46, %v696_v12  ;;  %v12029_v39 = vpack.c.bf16 %v707_v18, %v706_v14  ;;  %v709_v12 = vld [vmem:[%s12981_s1 + $0x62e] sm:$0xff] }
 0x22a   :  { %v1428_v51 = vadd.f32 %v11971_v16, %v1423_v11  ;;  %v701_v14 = vld [vmem:[%s12981_s1 + $0x5ee] sm:$0xff] }
 0x22b   :  { %13013 = vst [vmem:[#allocation6_spill] sm:$0xff] %v12017_v21  ;;  %13014 = vst [vmem:[#allocation7_spill] sm:$0xff] %v12029_v39 }
 0x22c   :  { %v1429_v45 = vmax.f32 %v1428_v51, 0.0  ;;  %v699_v51 = vld [vmem:[%s12981_s1 + $0x5de] sm:$0xff] }
 0x22d   :  { %v12039_v46 = vpack.c.bf16 %v699_v51, %v698_v31  ;;  %v710_v51 = vld [vmem:[%s12981_s1 + $0x636] sm:$0xff] }
 0x22e   :  { %v2731_v56 = vrot.slane %v1429_v45, 1  ;;  %8979 = vmatmul.mubr.msk.f32.vlgmr.msra.gmra.mrb[56].mxu0 %vm2732_vm6, %v1429_v45 }
 0x22f   :  { %10245 = vmatpush3.bf16.msra.mxu0 %v11986_v10  ;;  %9016 = vmatprep.mubr.msk.f32.mxu0 %vm10763_vm2, %v13011_v37  ;;  %13015 = vst [vmem:[#allocation8_spill] sm:$0xff] %v12039_v46 }
 0x230   :  { %8960 = vmatmul.mubr.msk.f32.vlgmr.msra.gmra.mrb[54].mxu1 %vm2732_vm6, %v2731_v56  ;;  %10246 = vmatprep.subr.bf16.mxu0 %v13012_v60  ;;  %v708_v56 = vld [vmem:[%s12981_s1 + $0x626] sm:$0xff] }
 0x231   :  { %10233 = vmatpush3.bf16.msra.mxu1 %v11994_v62  ;;  %v1636_v11 = vpop.f32.mrb[38].mxu1  ;;  %8997 = vmatprep.mubr.msk.f32.mxu1 %vm10763_vm2, %v13011_v37 }
 0x232   :  { %v8717_v26 = vpop.f32.mrb[39].mxu1  ;;  %10234 = vmatprep.subr.bf16.mxu1 %v13012_v60 }
 0x233   :  { %v1566_v36 = vpop.f32.mrb[38].mxu0  ;;  %10248 = vmatpush3.bf16.msra.mxu0 %v12004_v59  ;;  %v12049_v26 = vpack.c.bf16 %v709_v12, %v708_v56  ;;  %v712_v12 = vld [vmem:[%s12981_s1 + $0x646] sm:$0xff] }
 0x234   :  { %v1567_v52 = vadd.f32 %v1566_v36, %v1496_v41  ;;  %v8702_v27 = vpop.f32.mrb[39].mxu0  ;;  %10249 = vmatprep.subr.bf16.mxu0 %v13012_v60  ;;  %v700_v41 = vld [vmem:[%s12981_s1 + $0x5e6] sm:$0xff] }
 0x235   :  { %10236 = vmatpush3.bf16.msra.mxu1 %v12017_v21  ;;  %13016 = vst [vmem:[#allocation9_spill] sm:$0xff] %v12049_v26  ;;  %v12053_v31 = vpack.c.bf16 %v701_v14, %v700_v41  ;;  %v2877_v27 = vrot.slane %v1429_v45, 2  ;;  %v713_v41 = vld [vmem:[%s12981_s1 + $0x64e] sm:$0xff] }
 0x236   :  { %10237 = vmatprep.subr.bf16.mxu1 %v13012_v60  ;;  %v1640_v18 = vadd.f32 %v1636_v11, %v1567_v52  ;;  %v711_v11 = vld [vmem:[%s12981_s1 + $0x63e] sm:$0xff] }
 0x237   :  { %10251 = vmatpush3.bf16.msra.mxu0 %v12029_v39  ;;  %13017 = vst [vmem:[#allocation10_spill] sm:$0xff] %v12053_v31  ;;  %v12065_v52 = vpack.c.bf16 %v711_v11, %v710_v51  ;;  %v12076_v51 = vpack.c.bf16 %v713_v41, %v712_v12  ;;  %v714_v11 = vld [vmem:[%s12981_s1 + $0x656] sm:$0xff] }
 0x238   :  { %10252 = vmatprep.subr.bf16.mxu0 %v13012_v60 }
 0x239   :  { %10239 = vmatpush3.bf16.msra.mxu1 %v12039_v46  ;;  %13018 = vst [vmem:[#allocation11_spill] sm:$0xff] %v12065_v52  ;;  %13019 = vst [vmem:[#allocation12_spill] sm:$0xff] %v12076_v51 }
 0x23a   :  { %10240 = vmatprep.subr.bf16.mxu1 %v13012_v60 }
 0x23b   :  { %10254 = vmatpush3.bf16.msra.mxu0 %v12049_v26 }
 0x23c   :  { %10267 = vmatprep.subr.bf16.mxu0 %v13012_v60 }
 0x23d   :  { %10242 = vmatpush3.bf16.msra.mxu1 %v12053_v31  ;;  %v1778_v36 = vpop.f32.mrb[40].mxu1 }
 0x23e   :  { %v8747_v56 = vpop.f32.mrb[41].mxu1  ;;  %10255 = vmatprep.subr.bf16.mxu1 %v13012_v60 }
 0x23f   :  { %v1707_v14 = vpop.f32.mrb[40].mxu0 }
 0x240   :  { %v1711_v26 = vadd.f32 %v1707_v14, %v1640_v18  ;;  %8998 = vmatmul.mubr.msk.f32.vlgmr.msra.gmra.mrb[56].mxu1 %vm2732_vm6, %v2877_v27  ;;  %v8732_v31 = vpop.f32.mrb[41].mxu0  ;;  %v715_v18 = vld [vmem:[%s12981_s1 + $0x65e] sm:$0xff] }
 0x241   :  { %10257 = vmatpush3.bf16.msra.mxu1 %v12065_v52  ;;  %9035 = vmatprep.mubr.msk.f32.mxu1 %vm10763_vm2, %v13011_v37  ;;  %v12088_v31 = vpack.c.bf16 %v715_v18, %v714_v11 }
 0x242   :  { %v1782_v45 = vadd.f32 %v1778_v36, %v1711_v26  ;;  %10258 = vmatprep.subr.bf16.mxu1 %v13012_v60  ;;  %v716_v26 = vld [vmem:[%s12981_s1 + $0x666] sm:$0xff]  ;;  %v717_v36 = vld [vmem:[%s12981_s1 + $0x66e] sm:$0xff] }
 0x243   :  { %13020 = vst [vmem:[#allocation13_spill] sm:$0xff] %v12088_v31  ;;  %v12098_v56 = vpack.c.bf16 %v717_v36, %v716_v26  ;;  %v718_v26 = vld [vmem:[%s12981_s1 + $0x676] sm:$0xff] }
 0x245   :  { %10260 = vmatpush3.bf16.msra.mxu1 %v12076_v51  ;;  %13021 = vst [vmem:[#allocation14_spill] sm:$0xff] %v12098_v56 }
 0x246   :  { %10261 = vmatprep.subr.bf16.mxu1 %v13012_v60 }
 0x249   :  { %v1925_v27 = vpop.f32.mrb[42].mxu1  ;;  %10263 = vmatpush3.bf16.msra.mxu1 %v12088_v31 }
 0x24a   :  { %v8777_v12 = vpop.f32.mrb[43].mxu1  ;;  %10264 = vmatprep.subr.bf16.mxu1 %v13012_v60 }
 0x24b   :  { %v1849_v41 = vpop.f32.mrb[42].mxu0 }
 0x24c   :  { %v1853_v14 = vadd.f32 %v1849_v41, %v1782_v45  ;;  %v8762_v11 = vpop.f32.mrb[43].mxu0  ;;  %v719_v45 = vld [vmem:[%s12981_s1 + $0x67e] sm:$0xff]  ;;  %v728_v41 = vld [vmem:[%s12981_s1 + $0x6c6] sm:$0xff] }
 0x24d   :  { %10266 = vmatpush3.bf16.msra.mxu1 %v12098_v56 }
 0x24e   :  { %v1929_v18 = vadd.f32 %v1925_v27, %v1853_v14  ;;  %10279 = vmatprep.subr.bf16.mxu1 %v13012_v60  ;;  %v726_v27 = vld [vmem:[%s12981_s1 + $0x6b6] sm:$0xff]  ;;  %v729_v14 = vld [vmem:[%s12981_s1 + $0x6ce] sm:$0xff] }
 0x255   :  { %v2072_v51 = vpop.f32.mrb[44].mxu1 }
 0x256   :  { %v8807_v52 = vpop.f32.mrb[45].mxu1 }
 0x257   :  { %v1998_v46 = vpop.f32.mrb[44].mxu0  ;;  %v720_v52 = vld [vmem:[%s12981_s1 + $0x686] sm:$0xff] }
 0x258   :  { %v2002_v39 = vadd.f32 %v1998_v46, %v1929_v18  ;;  %v8792_v21 = vpop.f32.mrb[45].mxu0  ;;  %v727_v46 = vld [vmem:[%s12981_s1 + $0x6be] sm:$0xff] }
 0x259   :  { %v12116_v21 = vpack.c.bf16 %v719_v45, %v718_v26  ;;  %v722_v45 = vld [vmem:[%s12981_s1 + $0x696] sm:$0xff] }
 0x25a   :  { %v2076_v59 = vadd.f32 %v2072_v51, %v2002_v39  ;;  %v721_v51 = vld [vmem:[%s12981_s1 + $0x68e] sm:$0xff] }
 0x25b   :  { %13022 = vst [vmem:[#allocation15_spill] sm:$0xff] %v12116_v21  ;;  %v12134_v18 = vpack.c.bf16 %v721_v51, %v720_v52 }
 0x25c   :  { %v2077_v36 = vadd.f32 %v11971_v16, %v2076_v59  ;;  %v12124_v59 = vpack.c.bf16 %v727_v46, %v726_v27  ;;  %v12147_v46 = vpack.c.bf16 %v729_v14, %v728_v41  ;;  %v724_v41 = vld [vmem:[%s12981_s1 + $0x6a6] sm:$0xff]  ;;  %v725_v14 = vld [vmem:[%s12981_s1 + $0x6ae] sm:$0xff] }
 0x25d   :  { %13024 = vst [vmem:[#allocation17_spill] sm:$0xff] %v12134_v18 }
 0x25e   :  { %v2078_v39 = vmax.f32 %v2077_v36, 0.0  ;;  %13023 = vst [vmem:[#allocation16_spill] sm:$0xff] %v12124_v59  ;;  %v723_v36 = vld [vmem:[%s12981_s1 + $0x69e] sm:$0xff]  ;;  %13025 = vst [vmem:[#allocation18_spill] sm:$0xff] %v12147_v46 }
 0x260   :  { %v3025_v12 = vrot.slane %v2078_v39, 1  ;;  %9017 = vmatmul.mubr.msk.f32.vlgmr.msra.gmra.mrb[58].mxu0 %vm2732_vm6, %v2078_v39 }
 0x261   :  { %10269 = vmatpush3.bf16.msra.mxu0 %v12116_v21  ;;  %v2215_v11 = vpop.f32.mrb[46].mxu1  ;;  %9054 = vmatprep.mubr.msk.f32.mxu0 %vm10763_vm2, %v13011_v37 }
 0x262   :  { %v8837_v26 = vpop.f32.mrb[47].mxu1  ;;  %9036 = vmatmul.mubr.msk.f32.vlgmr.msra.gmra.mrb[58].mxu1 %vm2732_vm6, %v3025_v12  ;;  %10270 = vmatprep.subr.bf16.mxu0 %v13012_v60  ;;  %v730_v12 = vld [vmem:[%s12981_s1 + $0x6d6] sm:$0xff] }
 0x263   :  { %v2145_v27 = vpop.f32.mrb[46].mxu0  ;;  %10281 = vmatpush3.bf16.msra.mxu1 %v12124_v59  ;;  %9073 = vmatprep.mubr.msk.f32.mxu1 %vm10763_vm2, %v13011_v37  ;;  %v731_v26 = vld [vmem:[%s12981_s1 + $0x6de] sm:$0xff]  ;;  %v12159_v59 = vpack.c.bf16 %v723_v36, %v722_v45  ;;  %v732_v45 = vld [vmem:[%s12981_s1 + $0x6e6] sm:$0xff]  ;;  %v733_v36 = vld [vmem:[%s12981_s1 + $0x6ee] sm:$0xff] }
 0x264   :  { %v2216_v52 = vadd.f32 %v2215_v11, %v2145_v27  ;;  %v8822_v51 = vpop.f32.mrb[47].mxu0  ;;  %10282 = vmatprep.subr.bf16.mxu1 %v13012_v60  ;;  %v12169_v11 = vpack.c.bf16 %v731_v26, %v730_v12  ;;  %v12179_v27 = vpack.c.bf16 %v725_v14, %v724_v41  ;;  %v735_v12 = vld [vmem:[%s12981_s1 + $0x6fe] sm:$0xff]  ;;  %v12189_v26 = vpack.c.bf16 %v733_v36, %v732_v45  ;;  %v737_v45 = vld [vmem:[%s12981_s1 + $0x70e] sm:$0xff] }
 0x265   :  { %10272 = vmatpush3.bf16.msra.mxu0 %v12134_v18  ;;  %13026 = vst [vmem:[#allocation19_spill] sm:$0xff] %v12159_v59  ;;  %v734_v51 = vld [vmem:[%s12981_s1 + $0x6f6] sm:$0xff]  ;;  %v736_v18 = vld [vmem:[%s12981_s1 + $0x706] sm:$0xff] }
 0x266   :  { %10273 = vmatprep.subr.bf16.mxu0 %v13012_v60  ;;  %13027 = vst [vmem:[#allocation20_spill] sm:$0xff] %v12169_v11  ;;  %13028 = vst [vmem:[#allocation21_spill] sm:$0xff] %v12179_v27  ;;  %v12193_v14 = vpack.c.bf16 %v735_v12, %v734_v51  ;;  %v738_v12 = vld [vmem:[%s12981_s1 + $0x716] sm:$0xff] }
 0x267   :  { %10284 = vmatpush3.bf16.msra.mxu1 %v12147_v46  ;;  %13029 = vst [vmem:[#allocation22_spill] sm:$0xff] %v12189_v26 }
 0x268   :  { %10285 = vmatprep.subr.bf16.mxu1 %v13012_v60  ;;  %13030 = vst [vmem:[#allocation23_spill] sm:$0xff] %v12193_v14 }
 0x269   :  { %10275 = vmatpush3.bf16.msra.mxu0 %v12159_v59  ;;  %v3099_v59 = vrot.slane %v2078_v39, 2  ;;  %v12206_v39 = vpack.c.bf16 %v737_v45, %v736_v18  ;;  %v740_v18 = vld [vmem:[%s12981_s1 + $0x726] sm:$0xff] }
 0x26a   :  { %10276 = vmatprep.subr.bf16.mxu0 %v13012_v60 }
 0x26b   :  { %10287 = vmatpush3.bf16.msra.mxu1 %v12169_v11  ;;  %13031 = vst [vmem:[#allocation24_spill] sm:$0xff] %v12206_v39 }
 0x26c   :  { %10288 = vmatprep.subr.bf16.mxu1 %v13012_v60 }
 0x26d   :  { %10278 = vmatpush3.bf16.msra.mxu0 %v12179_v27  ;;  %v2356_v41 = vpop.f32.mrb[48].mxu1 }
 0x26e   :  { %v8867_v46 = vpop.f32.mrb[49].mxu1  ;;  %10291 = vmatprep.subr.bf16.mxu0 %v13012_v60 }
 0x26f   :  { %v2285_v36 = vpop.f32.mrb[48].mxu0  ;;  %10290 = vmatpush3.bf16.msra.mxu1 %v12189_v26 }
 0x270   :  { %v2289_v11 = vadd.f32 %v2285_v36, %v2216_v52  ;;  %9055 = vmatmul.mubr.msk.f32.vlgmr.msra.gmra.mrb[60].mxu0 %vm2732_vm6, %v3099_v59  ;;  %v8852_v51 = vpop.f32.mrb[49].mxu0  ;;  %10303 = vmatprep.subr.bf16.mxu1 %v13012_v60  ;;  %v739_v59 = vld [vmem:[%s12981_s1 + $0x71e] sm:$0xff] }
 0x271   :  { %10293 = vmatpush3.bf16.msra.mxu0 %v12193_v14  ;;  %9092 = vmatprep.mubr.msk.f32.mxu0 %vm10763_vm2, %v13011_v37  ;;  %v12218_v52 = vpack.c.bf16 %v739_v59, %v738_v12 }
 0x272   :  { %v2360_v46 = vadd.f32 %v2356_v41, %v2289_v11  ;;  %10294 = vmatprep.subr.bf16.mxu0 %v13012_v60  ;;  %v741_v11 = vld [vmem:[%s12981_s1 + $0x72e] sm:$0xff] }
 0x273   :  { %13032 = vst [vmem:[#allocation25_spill] sm:$0xff] %v12218_v52  ;;  %v12228_v45 = vpack.c.bf16 %v741_v11, %v740_v18 }
 0x275   :  { %10296 = vmatpush3.bf16.msra.mxu0 %v12206_v39 }
 0x276   :  { %10297 = vmatprep.subr.bf16.mxu0 %v13012_v60 }
 0x279   :  { %v2498_v41 = vpop.f32.mrb[50].mxu1  ;;  %10299 = vmatpush3.bf16.msra.mxu0 %v12218_v52 }
 0x27a   :  { %v8897_v36 = vpop.f32.mrb[51].mxu1  ;;  %10300 = vmatprep.subr.bf16.mxu0 %v13012_v60 }
 0x27b   :  { %v2427_v51 = vpop.f32.mrb[50].mxu0  ;;  %v742_v36 = vld [vmem:[%s12981_s1 + $0x736] sm:$0xff] }
 0x27c   :  { %v2431_v12 = vadd.f32 %v2427_v51, %v2360_v46  ;;  %v8882_v59 = vpop.f32.mrb[51].mxu0  ;;  %v743_v46 = vld [vmem:[%s12981_s1 + $0x73e] sm:$0xff] }
 0x27d   :  { %10302 = vmatpush3.bf16.msra.mxu0 %v12228_v45  ;;  %v12240_v51 = vpack.c.bf16 %v743_v46, %v742_v36  ;;  %v3543_v36 = vrot.slane %v11502_v13, 3  ;;  %v3470_v46 = vrot.slane %v11502_v13, 1 }
 0x27e   :  { %v2502_v39 = vadd.f32 %v2498_v41, %v2431_v12  ;;  %10315 = vmatprep.subr.bf16.mxu0 %v13012_v60  ;;  %v749_v12 = vld [vmem:[%s12981_s1 + $0x76e] sm:$0xff] }
 0x285   :  { %v2646_v14 = vpop.f32.mrb[52].mxu1 }
 0x286   :  { %v8927_v26 = vpop.f32.mrb[53].mxu1 }
 0x287   :  { %v2572_v27 = vpop.f32.mrb[52].mxu0 }
 0x288   :  { %v2576_v21 = vadd.f32 %v2572_v27, %v2502_v39  ;;  %v8912_v56 = vpop.f32.mrb[53].mxu0 }
 0x289   :  { %v744_v56 = vld [vmem:[%s12981_s1 + $0x746] sm:$0xff] }
 0x28a   :  { %v2650_v31 = vadd.f32 %v2646_v14, %v2576_v21  ;;  %v747_v14 = vld [vmem:[%s12981_s1 + $0x75e] sm:$0xff] }
 0x293   :  { %v2723_v52 = vpop.f32.mrb[54].mxu0 }
 0x294   :  { %v2727_v18 = vadd.f32 %v2723_v52, %v2650_v31  ;;  %v8942_v11 = vpop.f32.mrb[55].mxu0  ;;  %v745_v31 = vld [vmem:[%s12981_s1 + $0x74e] sm:$0xff]  ;;  %v748_v52 = vld [vmem:[%s12981_s1 + $0x766] sm:$0xff] }
 0x295   :  { %v12250_v27 = vpack.c.bf16 %v745_v31, %v744_v56  ;;  %v12279_v59 = vpack.c.bf16 %v749_v12, %v748_v52 }
 0x296   :  { %v2728_v41 = vadd.f32 %v11971_v16, %v2727_v18  ;;  %v746_v16 = vld [vmem:[%s12981_s1 + $0x756] sm:$0xff]  ;;  %v3397_v18 = vrot.slane %v11502_v13, 2  ;;  %v12343_v13 = vrot.slane %v11523_v23, 3 }
 0x297   :  { %v12267_v39 = vpack.c.bf16 %v747_v14, %v746_v16 }
 0x298   :  { %v2729_v26 = vmax.f32 %v2728_v41, 0.0  ;;  %v12366_v41 = vrot.slane %v11523_v23, 5 }
 0x29a   :  { %v3247_v21 = vrot.slane %v2729_v26, 1  ;;  %9074 = vmatmul.mubr.msk.f32.vlgmr.msra.gmra.mrb[60].mxu1 %vm2732_vm6, %v2729_v26  ;;  %v3321_v11 = vrot.slane %v2729_v26, 2  ;;  %v12373_v26 = vrot.slane %v11523_v23, 4 }
 0x29b   :  { %10305 = vmatpush3.bf16.msra.mxu1 %v12240_v51  ;;  %9111 = vmatprep.mubr.msk.f32.mxu1 %vm10763_vm2, %v13011_v37 }
 0x29c   :  { %9093 = vmatmul.mubr.msk.f32.vlgmr.msra.gmra.mrb[62].mxu0 %vm2732_vm6, %v3247_v21  ;;  %10306 = vmatprep.subr.bf16.mxu1 %v13012_v60  ;;  %v4564_v21 = vrot.slane %v11572_v1, 1 }
 0x29d   :  { %10317 = vmatpush3.bf16.msra.mxu0 %v11323_v38  ;;  %9126 = vmatprep.mubr.msk.f32.mxu0 %vm10763_vm2, %v13011_v37 }
 0x29e   :  { %10318 = vmatprep.subr.bf16.mxu0 %v13012_v60 }
 0x29f   :  { %10308 = vmatpush3.bf16.msra.mxu1 %v12250_v27 }
 0x2a0   :  { %10309 = vmatprep.subr.bf16.mxu1 %v13012_v60 }
 0x2a1   :  { %10320 = vmatpush3.bf16.msra.mxu0 %v11336_v42 }
 0x2a2   :  { %10321 = vmatprep.subr.bf16.mxu0 %v13012_v60 }
 0x2a3   :  { %10311 = vmatpush3.bf16.msra.mxu1 %v12267_v39 }
 0x2a4   :  { %10312 = vmatprep.subr.bf16.mxu1 %v13012_v60 }
 0x2a5   :  { %10323 = vmatpush3.bf16.msra.mxu0 %v11362_v50 }
 0x2a6   :  { %10333 = vmatprep.subr.bf16.mxu0 %v13012_v60 }
 0x2a7   :  { %10314 = vmatpush3.bf16.msra.mxu1 %v12279_v59 }
 0x2a8   :  { %9127 = vmatmul.mubr.msk.f32.vlgmr.msra.gmra.mrb[64].mxu0 %vm754_vm3, %v3397_v18  ;;  %10324 = vmatprep.subr.bf16.mxu1 %v13012_v60 }
 0x2a9   :  { %10335 = vmatpush3.bf16.msra.mxu0 %v11416_v17  ;;  %9156 = vmatprep.mubr.msk.f32.mxu0 %vm10763_vm2, %v13011_v37 }
 0x2aa   :  { %9112 = vmatmul.mubr.msk.f32.vlgmr.msra.gmra.mrb[62].mxu1 %vm2732_vm6, %v3321_v11  ;;  %10336 = vmatprep.subr.bf16.mxu0 %v13012_v60 }
 0x2ab   :  { %10326 = vmatpush3.bf16.msra.mxu1 %v11341_v44  ;;  %9141 = vmatprep.mubr.msk.f32.mxu1 %vm10763_vm2, %v13011_v37 }
 0x2ac   :  { %10327 = vmatprep.subr.bf16.mxu1 %v13012_v60 }
 0x2ad   :  { %10338 = vmatpush3.bf16.msra.mxu0 %v11437_v30 }
 0x2ae   :  { %10339 = vmatprep.subr.bf16.mxu0 %v13012_v60 }
 0x2af   :  { %10329 = vmatpush3.bf16.msra.mxu1 %v11353_v47 }
 0x2b0   :  { %10330 = vmatprep.subr.bf16.mxu1 %v13012_v60 }
 0x2b1   :  { %10341 = vmatpush3.bf16.msra.mxu0 %v11481_v61 }
 0x2b2   :  { %10351 = vmatprep.subr.bf16.mxu0 %v13012_v60 }
 0x2b3   :  { %10332 = vmatpush3.bf16.msra.mxu1 %v11371_v54 }
 0x2b4   :  { %9157 = vmatmul.mubr.msk.f32.vlgmr.msra.gmra.mrb[66].mxu0 %vm754_vm3, %v3543_v36  ;;  %10342 = vmatprep.subr.bf16.mxu1 %v13012_v60 }
 0x2b5   :  { %10353 = vmatpush3.bf16.msra.mxu0 %v11505_v15  ;;  %9186 = vmatprep.mubr.msk.f32.mxu0 %vm10763_vm2, %v13011_v37 }
 0x2b6   :  { %9142 = vmatmul.mubr.msk.f32.vlgmr.msra.gmra.mrb[64].mxu1 %vm754_vm3, %v3470_v46  ;;  %10354 = vmatprep.subr.bf16.mxu0 %v13012_v60 }
 0x2b7   :  { %10344 = vmatpush3.bf16.msra.mxu1 %v11406_v7  ;;  %9171 = vmatprep.mubr.msk.f32.mxu1 %vm10763_vm2, %v13011_v37 }
 0x2b8   :  { %10345 = vmatprep.subr.bf16.mxu1 %v13012_v60 }
 0x2b9   :  { %10356 = vmatpush3.bf16.msra.mxu0 %v11535_v19 }
 0x2ba   :  { %10357 = vmatprep.subr.bf16.mxu0 %v13012_v60 }
 0x2bb   :  { %10347 = vmatpush3.bf16.msra.mxu1 %v11428_v24 }
 0x2bc   :  { %10348 = vmatprep.subr.bf16.mxu1 %v13012_v60 }
 0x2bd   :  { %10359 = vmatpush3.bf16.msra.mxu0 %v11570_v55 }
 0x2be   :  { %10369 = vmatprep.subr.bf16.mxu0 %v13012_v60 }
 0x2bf   :  { %10350 = vmatpush3.bf16.msra.mxu1 %v11462_v48 }
 0x2c0   :  { %9187 = vmatmul.mubr.msk.f32.vlgmr.msra.gmra.mrb[68].mxu0 %vm754_vm3, %v11562_v63  ;;  %10360 = vmatprep.subr.bf16.mxu1 %v13012_v60 }
 0x2c1   :  { %10371 = vmatpush3.bf16.msra.mxu0 %v11592_v35  ;;  %9216 = vmatprep.mubr.msk.f32.mxu0 %vm10763_vm2, %v13011_v37 }
 0x2c2   :  { %9172 = vmatmul.mubr.msk.f32.vlgmr.msra.gmra.mrb[66].mxu1 %vm754_vm3, %v11567_v0  ;;  %10372 = vmatprep.subr.bf16.mxu0 %v13012_v60 }
 0x2c3   :  { %10362 = vmatpush3.bf16.msra.mxu1 %v11491_v4  ;;  %9201 = vmatprep.mubr.msk.f32.mxu1 %vm10763_vm2, %v13011_v37 }
 0x2c4   :  { %10363 = vmatprep.subr.bf16.mxu1 %v13012_v60 }
 0x2c5   :  { %10374 = vmatpush3.bf16.msra.mxu0 %v11626_v34 }
 0x2c6   :  { %10375 = vmatprep.subr.bf16.mxu0 %v13012_v60 }
 0x2c7   :  { %10365 = vmatpush3.bf16.msra.mxu1 %v11519_v22 }
 0x2c8   :  { %10366 = vmatprep.subr.bf16.mxu1 %v13012_v60 }
 0x2c9   :  { %10377 = vmatpush3.bf16.msra.mxu0 %v11642_v43 }
 0x2ca   :  { %10387 = vmatprep.subr.bf16.mxu0 %v13012_v60 }
 0x2cb   :  { %10368 = vmatpush3.bf16.msra.mxu1 %v11551_v53 }
 0x2cc   :  { %9217 = vmatmul.mubr.msk.f32.vlgmr.msra.gmra.mrb[70].mxu0 %vm754_vm3, %v12343_v13  ;;  %10378 = vmatprep.subr.bf16.mxu1 %v13012_v60 }
 0x2cd   :  { %10389 = vmatpush3.bf16.msra.mxu0 %v11657_v57  ;;  %9246 = vmatprep.mubr.msk.f32.mxu0 %vm10763_vm2, %v13011_v37 }
 0x2ce   :  { %9202 = vmatmul.mubr.msk.f32.vlgmr.msra.gmra.mrb[68].mxu1 %vm754_vm3, %v11523_v23  ;;  %10390 = vmatprep.subr.bf16.mxu0 %v13012_v60 }
 0x2cf   :  { %10380 = vmatpush3.bf16.msra.mxu1 %v11582_v6  ;;  %9231 = vmatprep.mubr.msk.f32.mxu1 %vm10763_vm2, %v13011_v37 }
 0x2d0   :  { %10381 = vmatprep.subr.bf16.mxu1 %v13012_v60 }
 0x2d1   :  { %10392 = vmatpush3.bf16.msra.mxu0 %v11678_v3 }
 0x2d2   :  { %10393 = vmatprep.subr.bf16.mxu0 %v13012_v60 }
 0x2d3   :  { %10383 = vmatpush3.bf16.msra.mxu1 %v11606_v28 }
 0x2d4   :  { %10384 = vmatprep.subr.bf16.mxu1 %v13012_v60 }
 0x2d5   :  { %10395 = vmatpush3.bf16.msra.mxu0 %v11692_v9 }
 0x2d6   :  { %10405 = vmatprep.subr.bf16.mxu0 %v13012_v60 }
 0x2d7   :  { %10386 = vmatpush3.bf16.msra.mxu1 %v11638_v40 }
 0x2d8   :  { %9247 = vmatmul.mubr.msk.f32.vlgmr.msra.gmra.mrb[72].mxu0 %vm754_vm3, %v12366_v41  ;;  %10396 = vmatprep.subr.bf16.mxu1 %v13012_v60 }
 0x2d9   :  { %10407 = vmatpush3.bf16.msra.mxu0 %v11341_v44  ;;  %9276 = vmatprep.mubr.msk.f32.mxu0 %vm10763_vm2, %v13011_v37 }
 0x2da   :  { %9232 = vmatmul.mubr.msk.f32.vlgmr.msra.gmra.mrb[70].mxu1 %vm754_vm3, %v12373_v26  ;;  %10408 = vmatprep.subr.bf16.mxu0 %v13012_v60 }
 0x2db   :  { %10398 = vmatpush3.bf16.msra.mxu1 %v11323_v38  ;;  %9261 = vmatprep.mubr.msk.f32.mxu1 %vm10763_vm2, %v13011_v37 }
 0x2dc   :  { %10399 = vmatprep.subr.bf16.mxu1 %v13012_v60 }
 0x2dd   :  { %10410 = vmatpush3.bf16.msra.mxu0 %v11353_v47 }
 0x2de   :  { %10411 = vmatprep.subr.bf16.mxu0 %v13012_v60 }
 0x2df   :  { %10401 = vmatpush3.bf16.msra.mxu1 %v11336_v42 }
 0x2e0   :  { %10402 = vmatprep.subr.bf16.mxu1 %v13012_v60 }
 0x2e1   :  { %10413 = vmatpush3.bf16.msra.mxu0 %v11371_v54 }
 0x2e2   :  { %10423 = vmatprep.subr.bf16.mxu0 %v13012_v60 }
 0x2e3   :  { %10404 = vmatpush3.bf16.msra.mxu1 %v11362_v50 }
 0x2e4   :  { %9277 = vmatmul.mubr.msk.f32.vlgmr.msra.gmra.mrb[74].mxu0 %vm754_vm3, %v11567_v0  ;;  %10414 = vmatprep.subr.bf16.mxu1 %v13012_v60 }
 0x2e5   :  { %10425 = vmatpush3.bf16.msra.mxu0 %v11406_v7  ;;  %9306 = vmatprep.mubr.msk.f32.mxu0 %vm10763_vm2, %v13011_v37 }
 0x2e6   :  { %9262 = vmatmul.mubr.msk.f32.vlgmr.msra.gmra.mrb[72].mxu1 %vm754_vm3, %v11562_v63  ;;  %10426 = vmatprep.subr.bf16.mxu0 %v13012_v60 }
 0x2e7   :  { %10416 = vmatpush3.bf16.msra.mxu1 %v11416_v17  ;;  %9291 = vmatprep.mubr.msk.f32.mxu1 %vm10763_vm2, %v13011_v37 }
 0x2e8   :  { %10417 = vmatprep.subr.bf16.mxu1 %v13012_v60 }
 0x2e9   :  { %10428 = vmatpush3.bf16.msra.mxu0 %v11428_v24 }
 0x2ea   :  { %10429 = vmatprep.subr.bf16.mxu0 %v13012_v60 }
 0x2eb   :  { %10419 = vmatpush3.bf16.msra.mxu1 %v11437_v30 }
 0x2ec   :  { %10420 = vmatprep.subr.bf16.mxu1 %v13012_v60 }
 0x2ed   :  { %10431 = vmatpush3.bf16.msra.mxu0 %v11462_v48 }
 0x2ee   :  { %10441 = vmatprep.subr.bf16.mxu0 %v13012_v60 }
 0x2ef   :  { %10422 = vmatpush3.bf16.msra.mxu1 %v11481_v61 }
 0x2f0   :  { %9307 = vmatmul.mubr.msk.f32.vlgmr.msra.gmra.mrb[76].mxu0 %vm754_vm3, %v12343_v13  ;;  %10432 = vmatprep.subr.bf16.mxu1 %v13012_v60 }
 0x2f1   :  { %10443 = vmatpush3.bf16.msra.mxu0 %v11491_v4  ;;  %9336 = vmatprep.mubr.msk.f32.mxu0 %vm10763_vm2, %v13011_v37 }
 0x2f2   :  { %9292 = vmatmul.mubr.msk.f32.vlgmr.msra.gmra.mrb[74].mxu1 %vm754_vm3, %v11523_v23  ;;  %10444 = vmatprep.subr.bf16.mxu0 %v13012_v60 }
 0x2f3   :  { %10434 = vmatpush3.bf16.msra.mxu1 %v11505_v15  ;;  %9321 = vmatprep.mubr.msk.f32.mxu1 %vm10763_vm2, %v13011_v37 }
 0x2f4   :  { %10435 = vmatprep.subr.bf16.mxu1 %v13012_v60 }
 0x2f5   :  { %10446 = vmatpush3.bf16.msra.mxu0 %v11519_v22 }
 0x2f6   :  { %10447 = vmatprep.subr.bf16.mxu0 %v13012_v60 }
 0x2f7   :  { %10437 = vmatpush3.bf16.msra.mxu1 %v11535_v19 }
 0x2f8   :  { %10438 = vmatprep.subr.bf16.mxu1 %v13012_v60 }
 0x2f9   :  { %10449 = vmatpush3.bf16.msra.mxu0 %v11551_v53 }
 0x2fa   :  { %10459 = vmatprep.subr.bf16.mxu0 %v13012_v60 }
 0x2fb   :  { %10440 = vmatpush3.bf16.msra.mxu1 %v11570_v55 }
 0x2fc   :  { %9337 = vmatmul.mubr.msk.f32.vlgmr.msra.gmra.mrb[78].mxu0 %vm754_vm3, %v12366_v41  ;;  %10450 = vmatprep.subr.bf16.mxu1 %v13012_v60 }
 0x2fd   :  { %10461 = vmatpush3.bf16.msra.mxu0 %v11582_v6  ;;  %9366 = vmatprep.mubr.msk.f32.mxu0 %vm10763_vm2, %v13011_v37 }
 0x2fe   :  { %9322 = vmatmul.mubr.msk.f32.vlgmr.msra.gmra.mrb[76].mxu1 %vm754_vm3, %v12373_v26  ;;  %10462 = vmatprep.subr.bf16.mxu0 %v13012_v60 }
 0x2ff   :  { %10452 = vmatpush3.bf16.msra.mxu1 %v11592_v35  ;;  %9351 = vmatprep.mubr.msk.f32.mxu1 %vm10763_vm2, %v13011_v37 }
 0x300   :  { %10453 = vmatprep.subr.bf16.mxu1 %v13012_v60 }
 0x301   :  { %10464 = vmatpush3.bf16.msra.mxu0 %v11606_v28  ;;  %v2873_v23 = vpop.f32.mrb[56].mxu0 }
 0x302   :  { %v8980_v63 = vpop.f32.mrb[57].mxu0  ;;  %10465 = vmatprep.subr.bf16.mxu0 %v13012_v60 }
 0x303   :  { %10455 = vmatpush3.bf16.msra.mxu1 %v11626_v34  ;;  %v2801_v0 = vpop.f32.mrb[54].mxu1 }
 0x304   :  { %v2874_v56 = vadd.f32 %v2873_v23, %v2801_v0  ;;  %v8961_v31 = vpop.f32.mrb[55].mxu1  ;;  %10456 = vmatprep.subr.bf16.mxu1 %v13012_v60  ;;  %v12581_v23 = vld [vmem:[%s12981_s1 + $0x535] ss:$0 sm:$0xff] }
 0x305   :  { %10467 = vmatpush3.bf16.msra.mxu0 %v11638_v40 }
 0x306   :  { %10477 = vmatprep.subr.bf16.mxu0 %v13012_v60 }
 0x307   :  { %10458 = vmatpush3.bf16.msra.mxu1 %v11642_v43 }
 0x308   :  { %9367 = vmatmul.mubr.msk.f32.vlgmr.msra.gmra.mrb[80].mxu0 %vm754_vm3, %v4564_v21  ;;  %10468 = vmatprep.subr.bf16.mxu1 %v13012_v60 }
 0x309   :  { %10479 = vmatpush3.bf16.msra.mxu0 %v11323_v38  ;;  %9396 = vmatprep.mubr.msk.f32.mxu0 %vm10763_vm2, %v13011_v37 }
 0x30a   :  { %9352 = vmatmul.mubr.msk.f32.vlgmr.msra.gmra.mrb[78].mxu1 %vm754_vm3, %v11572_v1  ;;  %10480 = vmatprep.subr.bf16.mxu0 %v13012_v60 }
 0x30b   :  { %10470 = vmatpush3.bf16.msra.mxu1 %v11657_v57  ;;  %9381 = vmatprep.mubr.msk.f32.mxu1 %vm10763_vm2, %v13011_v37 }
 0x30c   :  { %10471 = vmatprep.subr.bf16.mxu1 %v13012_v60 }
 0x30d   :  { %10482 = vmatpush3.bf16.msra.mxu0 %v11336_v42  ;;  %v4638_v42 = vrot.slane %v11572_v1, 2 }
 0x30e   :  { %10483 = vmatprep.subr.bf16.mxu0 %v13012_v60 }
 0x30f   :  { %10473 = vmatpush3.bf16.msra.mxu1 %v11678_v3 }
 0x310   :  { %10474 = vmatprep.subr.bf16.mxu1 %v13012_v60 }
 0x311   :  { %10485 = vmatpush3.bf16.msra.mxu0 %v11362_v50 }
 0x312   :  { %10495 = vmatprep.subr.bf16.mxu0 %v13012_v60 }
 0x313   :  { %v2946_v38 = vpop.f32.mrb[56].mxu1  ;;  %10476 = vmatpush3.bf16.msra.mxu1 %v11692_v9 }
 0x314   :  { %v2950_v16 = vadd.f32 %v2946_v38, %v2874_v56  ;;  %v8999_v14 = vpop.f32.mrb[57].mxu1  ;;  %9397 = vmatmul.mubr.msk.f32.vlgmr.msra.gmra.mrb[82].mxu0 %vm754_vm3, %v12373_v26  ;;  %10486 = vmatprep.subr.bf16.mxu1 %v13012_v60 }
 0x315   :  { %10497 = vmatpush3.bf16.msra.mxu0 %v11416_v17  ;;  %9426 = vmatprep.mubr.msk.f32.mxu0 %vm10763_vm2, %v13011_v37 }
 0x316   :  { %9382 = vmatmul.mubr.msk.f32.vlgmr.msra.gmra.mrb[80].mxu1 %vm754_vm3, %v4638_v42  ;;  %10498 = vmatprep.subr.bf16.mxu0 %v13012_v60 }
 0x317   :  { %10488 = vmatpush3.bf16.msra.mxu1 %v11341_v44  ;;  %9411 = vmatprep.mubr.msk.f32.mxu1 %vm10763_vm2, %v13011_v37 }
 0x318   :  { %10489 = vmatprep.subr.bf16.mxu1 %v13012_v60 }
 0x319   :  { %10500 = vmatpush3.bf16.msra.mxu0 %v11437_v30 }
 0x31a   :  { %10501 = vmatprep.subr.bf16.mxu0 %v13012_v60 }
 0x31b   :  { %10491 = vmatpush3.bf16.msra.mxu1 %v11353_v47 }
 0x31c   :  { %10492 = vmatprep.subr.bf16.mxu1 %v13012_v60 }
 0x31d   :  { %10503 = vmatpush3.bf16.msra.mxu0 %v11481_v61 }
 0x31e   :  { %10513 = vmatprep.subr.bf16.mxu0 %v13012_v60 }
 0x31f   :  { %10494 = vmatpush3.bf16.msra.mxu1 %v11371_v54 }
 0x320   :  { %9427 = vmatmul.mubr.msk.f32.vlgmr.msra.gmra.mrb[84].mxu0 %vm754_vm3, %v12366_v41  ;;  %10504 = vmatprep.subr.bf16.mxu1 %v13012_v60 }
 0x321   :  { %10515 = vmatpush3.bf16.msra.mxu0 %v11505_v15  ;;  %9456 = vmatprep.mubr.msk.f32.mxu0 %vm10763_vm2, %v13011_v37 }
 0x322   :  { %9412 = vmatmul.mubr.msk.f32.vlgmr.msra.gmra.mrb[82].mxu1 %vm754_vm3, %v12343_v13  ;;  %10516 = vmatprep.subr.bf16.mxu0 %v13012_v60 }
 0x323   :  { %10506 = vmatpush3.bf16.msra.mxu1 %v11406_v7  ;;  %9441 = vmatprep.mubr.msk.f32.mxu1 %vm10763_vm2, %v13011_v37 }
 0x324   :  { %10507 = vmatprep.subr.bf16.mxu1 %v13012_v60 }
 0x325   :  { %10518 = vmatpush3.bf16.msra.mxu0 %v11535_v19 }
 0x326   :  { %10519 = vmatprep.subr.bf16.mxu0 %v13012_v60 }
 0x327   :  { %10509 = vmatpush3.bf16.msra.mxu1 %v11428_v24  ;;  %v5138_v24 = vrot.slane %v11572_v1, 5 }
 0x328   :  { %10510 = vmatprep.subr.bf16.mxu1 %v13012_v60 }
 0x329   :  { %10521 = vmatpush3.bf16.msra.mxu0 %v11570_v55 }
 0x32a   :  { %10531 = vmatprep.subr.bf16.mxu0 %v13012_v60 }
 0x32b   :  { %10512 = vmatpush3.bf16.msra.mxu1 %v11462_v48 }
 0x32c   :  { %9457 = vmatmul.mubr.msk.f32.vlgmr.msra.gmra.mrb[86].mxu0 %vm754_vm3, %v4564_v21  ;;  %10522 = vmatprep.subr.bf16.mxu1 %v13012_v60 }
 0x32d   :  { %10533 = vmatpush3.bf16.msra.mxu0 %v11592_v35  ;;  %9486 = vmatprep.mubr.msk.f32.mxu0 %vm10763_vm2, %v13011_v37 }
 0x32e   :  { %9442 = vmatmul.mubr.msk.f32.vlgmr.msra.gmra.mrb[84].mxu1 %vm754_vm3, %v11572_v1  ;;  %10534 = vmatprep.subr.bf16.mxu0 %v13012_v60 }
 0x32f   :  { %10524 = vmatpush3.bf16.msra.mxu1 %v11491_v4  ;;  %9471 = vmatprep.mubr.msk.f32.mxu1 %vm10763_vm2, %v13011_v37 }
 0x330   :  { %10525 = vmatprep.subr.bf16.mxu1 %v13012_v60 }
 0x331   :  { %10536 = vmatpush3.bf16.msra.mxu0 %v11626_v34 }
 0x332   :  { %10537 = vmatprep.subr.bf16.mxu0 %v13012_v60 }
 0x333   :  { %10527 = vmatpush3.bf16.msra.mxu1 %v11519_v22  ;;  %v3020_v44 = vpop.f32.mrb[58].mxu0 }
 0x334   :  { %v3024_v47 = vadd.f32 %v3020_v44, %v2950_v16  ;;  %v9018_v50 = vpop.f32.mrb[59].mxu0  ;;  %10528 = vmatprep.subr.bf16.mxu1 %v13012_v60  ;;  %v13035_v44 = vld [vmem:[#allocation7_spill] sm:$0xff] }
 0x335   :  { %10539 = vmatpush3.bf16.msra.mxu0 %v11642_v43  ;;  %v3094_v54 = vpop.f32.mrb[58].mxu1  ;;  %v13037_v50 = vld [vmem:[#allocation9_spill] sm:$0xff] }
 0x336   :  { %v3098_v7 = vadd.f32 %v3094_v54, %v3024_v47  ;;  %v9037_v17 = vpop.f32.mrb[59].mxu1  ;;  %10549 = vmatprep.subr.bf16.mxu0 %v13012_v60 }
 0x337   :  { %10530 = vmatpush3.bf16.msra.mxu1 %v11551_v53 }
 0x338   :  { %9487 = vmatmul.mubr.msk.f32.vlgmr.msra.gmra.mrb[88].mxu0 %vm754_vm3, %v5138_v24  ;;  %10540 = vmatprep.subr.bf16.mxu1 %v13012_v60 }
 0x339   :  { %10551 = vmatpush3.bf16.msra.mxu0 %v11657_v57  ;;  %9516 = vmatprep.mubr.msk.f32.mxu0 %vm10763_vm2, %v13011_v37 }
 0x33a   :  { %9472 = vmatmul.mubr.msk.f32.vlgmr.msra.gmra.mrb[86].mxu1 %vm754_vm3, %v4638_v42  ;;  %10552 = vmatprep.subr.bf16.mxu0 %v13012_v60  ;;  %v13033_v42 = vld [vmem:[#allocation5_spill] sm:$0xff] }
 0x33b   :  { %10542 = vmatpush3.bf16.msra.mxu1 %v11582_v6  ;;  %9501 = vmatprep.mubr.msk.f32.mxu1 %vm10763_vm2, %v13011_v37 }
 0x33c   :  { %10543 = vmatprep.subr.bf16.mxu1 %v13012_v60 }
 0x33d   :  { %10554 = vmatpush3.bf16.msra.mxu0 %v11678_v3 }
 0x33e   :  { %10555 = vmatprep.subr.bf16.mxu0 %v13012_v60 }
 0x33f   :  { %10545 = vmatpush3.bf16.msra.mxu1 %v11606_v28 }
 0x340   :  { %10546 = vmatprep.subr.bf16.mxu1 %v13012_v60 }
 0x341   :  { %10557 = vmatpush3.bf16.msra.mxu0 %v11692_v9 }
 0x342   :  { %10570 = vmatprep.subr.bf16.mxu0 %v13012_v60 }
 0x343   :  { %v3168_v30 = vpop.f32.mrb[60].mxu0  ;;  %10548 = vmatpush3.bf16.msra.mxu1 %v11638_v40 }
 0x344   :  { %v3172_v48 = vadd.f32 %v3168_v30, %v3098_v7  ;;  %v9056_v61 = vpop.f32.mrb[61].mxu0  ;;  %9517 = vmatmul.mubr.msk.f32.vlgmr.msra.gmra.mrb[90].mxu0 %vm754_vm3, %v11620_v32  ;;  %10558 = vmatprep.subr.bf16.mxu1 %v13012_v60  ;;  %v13038_v7 = vld [vmem:[#allocation10_spill] sm:$0xff] }
 0x345   :  { %10572 = vmatpush3.bf16.msra.mxu0 %v11925_v58  ;;  %9554 = vmatprep.mubr.msk.f32.mxu0 %vm10763_vm2, %v13011_v37 }
 0x346   :  { %9502 = vmatmul.mubr.msk.f32.vlgmr.msra.gmra.mrb[88].mxu1 %vm754_vm3, %v11623_v33  ;;  %10573 = vmatprep.subr.bf16.mxu0 %v13012_v60 }
 0x347   :  { %10560 = vmatpush3.bf16.msra.mxu1 %v11870_v2  ;;  %9535 = vmatprep.mubr.msk.f32.mxu1 %vm10763_vm2, %v13011_v37 }
 0x348   :  { %10561 = vmatprep.subr.bf16.mxu1 %v13012_v60 }
 0x349   :  { %10575 = vmatpush3.bf16.msra.mxu0 %v11941_v5 }
 0x34a   :  { %10576 = vmatprep.subr.bf16.mxu0 %v13012_v60 }
 0x34b   :  { %10563 = vmatpush3.bf16.msra.mxu1 %v11885_v20 }
 0x34c   :  { %10564 = vmatprep.subr.bf16.mxu1 %v13012_v60 }
 0x34d   :  { %10578 = vmatpush3.bf16.msra.mxu0 %v11953_v8 }
 0x34e   :  { %10579 = vmatprep.subr.bf16.mxu0 %v13012_v60 }
 0x34f   :  { %10566 = vmatpush3.bf16.msra.mxu1 %v11902_v29 }
 0x350   :  { %10567 = vmatprep.subr.bf16.mxu1 %v13012_v60 }
 0x351   :  { %10581 = vmatpush3.bf16.msra.mxu0 %v11963_v25 }
 0x352   :  { %10594 = vmatprep.subr.bf16.mxu0 %v13012_v60 }
 0x353   :  { %10569 = vmatpush3.bf16.msra.mxu1 %v11920_v49 }
 0x354   :  { %10582 = vmatprep.subr.bf16.mxu1 %v13012_v60 }
 0x36d   :  { %v3242_v4 = vpop.f32.mrb[60].mxu1 }
 0x36e   :  { %v3246_v15 = vadd.f32 %v3242_v4, %v3172_v48  ;;  %v9075_v22 = vpop.f32.mrb[61].mxu1  ;;  %v13039_v4 = vld [vmem:[#allocation11_spill] sm:$0xff] }
 0x36f   :  { %v3316_v19 = vpop.f32.mrb[62].mxu0 }
 0x370   :  { %v3320_v53 = vadd.f32 %v3316_v19, %v3246_v15  ;;  %v9094_v55 = vpop.f32.mrb[63].mxu0  ;;  %v13040_v15 = vld [vmem:[#allocation12_spill] sm:$0xff] }
 0x371   :  { %v13041_v55 = vld [vmem:[#allocation13_spill] sm:$0xff] }
 0x37b   :  { %v3466_v1 = vpop.f32.mrb[64].mxu0 }
 0x37c   :  { %v9128_v6 = vpop.f32.mrb[65].mxu0 }
 0x37d   :  { %v3390_v35 = vpop.f32.mrb[62].mxu1 }
 0x37e   :  { %v12576_v28 = vadd.f32 %v3390_v35, %v3320_v53  ;;  %v9113_v32 = vpop.f32.mrb[63].mxu1 }
 0x37f   :  { %v13042_v32 = vld [vmem:[#allocation14_spill] sm:$0xff] }
 0x387   :  { %v3612_v33 = vpop.f32.mrb[66].mxu0 }
 0x388   :  { %v9158_v34 = vpop.f32.mrb[67].mxu0 }
 0x389   :  { %v3539_v40 = vpop.f32.mrb[64].mxu1 }
 0x38a   :  { %v3540_v43 = vadd.f32 %v3539_v40, %v3466_v1  ;;  %v9143_v57 = vpop.f32.mrb[65].mxu1 }
 0x38c   :  { %v3616_v3 = vadd.f32 %v3612_v33, %v3540_v43 }
 0x393   :  { %v3764_v9 = vpop.f32.mrb[68].mxu0 }
 0x394   :  { %v9188_v2 = vpop.f32.mrb[69].mxu0 }
 0x395   :  { %v3688_v20 = vpop.f32.mrb[66].mxu1 }
 0x396   :  { %v3692_v29 = vadd.f32 %v3688_v20, %v3616_v3  ;;  %v9173_v49 = vpop.f32.mrb[67].mxu1 }
 0x398   :  { %v3768_v58 = vadd.f32 %v3764_v9, %v3692_v29 }
 0x39f   :  { %v3911_v5 = vpop.f32.mrb[70].mxu0 }
 0x3a0   :  { %v9218_v8 = vpop.f32.mrb[71].mxu0 }
 0x3a1   :  { %v3837_v25 = vpop.f32.mrb[68].mxu1 }
 0x3a2   :  { %v3841_v52 = vadd.f32 %v3837_v25, %v3768_v58  ;;  %v9203_v12 = vpop.f32.mrb[69].mxu1  ;;  %v13043_v25 = vld [vmem:[#allocation15_spill] sm:$0xff] }
 0x3a3   :  { %v13044_v12 = vld [vmem:[#allocation16_spill] sm:$0xff] }
 0x3a4   :  { %v3915_v18 = vadd.f32 %v3911_v5, %v3841_v52 }
 0x3ab   :  { %v4059_v11 = vpop.f32.mrb[72].mxu0 }
 0x3ac   :  { %v9248_v36 = vpop.f32.mrb[73].mxu0 }
 0x3ad   :  { %v3985_v46 = vpop.f32.mrb[70].mxu1 }
 0x3ae   :  { %v3989_v13 = vadd.f32 %v3985_v46, %v3915_v18  ;;  %v9233_v41 = vpop.f32.mrb[71].mxu1 }
 0x3af   :  { %v13046_v41 = vld [vmem:[#allocation18_spill] sm:$0xff] }
 0x3b0   :  { %v4063_v26 = vadd.f32 %v4059_v11, %v3989_v13  ;;  %v13045_v11 = vld [vmem:[#allocation17_spill] sm:$0xff] }
 0x3b2   :  { %v4064_v63 = vadd.f32 %v12581_v23, %v4063_v26 }
 0x3b4   :  { %v4065_v0 = vmax.f32 %v4064_v63, 0.0  ;;  %v13047_v63 = vld [vmem:[#allocation19_spill] sm:$0xff] }
 0x3b6   :  { %v5368_v56 = vrot.slane %v4065_v0, 1  ;;  %9555 = vmatmul.mubr.msk.f32.vlgmr.msra.gmra.mrb[92].mxu0 %vm2732_vm6, %v4065_v0  ;;  %v5513_v24 = vrot.slane %v4065_v0, 2  ;;  %v13048_v0 = vld [vmem:[#allocation20_spill] sm:$0xff] }
 0x3b7   :  { %v4202_v31 = vpop.f32.mrb[74].mxu0  ;;  %10596 = vmatpush3.bf16.msra.mxu0 %v11986_v10  ;;  %9592 = vmatprep.mubr.msk.f32.mxu0 %vm10763_vm2, %v13011_v37  ;;  %v13034_v10 = vld [vmem:[#allocation6_spill] sm:$0xff] }
 0x3b8   :  { %v9278_v21 = vpop.f32.mrb[75].mxu0  ;;  %9536 = vmatmul.mubr.msk.f32.vlgmr.msra.gmra.mrb[90].mxu1 %vm2732_vm6, %v5368_v56  ;;  %10597 = vmatprep.subr.bf16.mxu0 %v13012_v60  ;;  %v13049_v56 = vld [vmem:[#allocation21_spill] sm:$0xff] }
 0x3b9   :  { %10584 = vmatpush3.bf16.msra.mxu1 %v11994_v62  ;;  %v4132_v38 = vpop.f32.mrb[72].mxu1  ;;  %9573 = vmatprep.mubr.msk.f32.mxu1 %vm10763_vm2, %v13011_v37  ;;  %v13036_v62 = vld [vmem:[#allocation8_spill] sm:$0xff] }
 0x3ba   :  { %v4203_v16 = vadd.f32 %v4202_v31, %v4132_v38  ;;  %v9263_v14 = vpop.f32.mrb[73].mxu1  ;;  %10585 = vmatprep.subr.bf16.mxu1 %v13012_v60  ;;  %v13050_v38 = vld [vmem:[#allocation22_spill] sm:$0xff] }
 0x3bb   :  { %10599 = vmatpush3.bf16.msra.mxu0 %v13033_v42  ;;  %v13051_v42 = vld [vmem:[#allocation23_spill] sm:$0xff] }
 0x3bc   :  { %10600 = vmatprep.subr.bf16.mxu0 %v13012_v60 }
 0x3bd   :  { %10587 = vmatpush3.bf16.msra.mxu1 %v13034_v10 }
 0x3be   :  { %10588 = vmatprep.subr.bf16.mxu1 %v13012_v60 }
 0x3bf   :  { %10602 = vmatpush3.bf16.msra.mxu0 %v13035_v44 }
 0x3c0   :  { %10603 = vmatprep.subr.bf16.mxu0 %v13012_v60 }
 0x3c1   :  { %10590 = vmatpush3.bf16.msra.mxu1 %v13036_v62 }
 0x3c2   :  { %10591 = vmatprep.subr.bf16.mxu1 %v13012_v60 }
 0x3c3   :  { %v4343_v47 = vpop.f32.mrb[76].mxu0  ;;  %10605 = vmatpush3.bf16.msra.mxu0 %v13037_v50  ;;  %v13053_v50 = vld [vmem:[#allocation25_spill] sm:$0xff] }
 0x3c4   :  { %v9308_v54 = vpop.f32.mrb[77].mxu0  ;;  %10618 = vmatprep.subr.bf16.mxu0 %v13012_v60 }
 0x3c5   :  { %10593 = vmatpush3.bf16.msra.mxu1 %v13038_v7  ;;  %v4272_v17 = vpop.f32.mrb[74].mxu1 }
 0x3c6   :  { %v4276_v30 = vadd.f32 %v4272_v17, %v4203_v16  ;;  %v9293_v48 = vpop.f32.mrb[75].mxu1  ;;  %10606 = vmatprep.subr.bf16.mxu1 %v13012_v60 }
 0x3c8   :  { %9574 = vmatmul.mubr.msk.f32.vlgmr.msra.gmra.mrb[92].mxu1 %vm2732_vm6, %v5513_v24  ;;  %v4347_v61 = vadd.f32 %v4343_v47, %v4276_v30  ;;  %v13052_v47 = vld [vmem:[#allocation24_spill] sm:$0xff] }
 0x3c9   :  { %10608 = vmatpush3.bf16.msra.mxu1 %v13039_v4  ;;  %9611 = vmatprep.mubr.msk.f32.mxu1 %vm10763_vm2, %v13011_v37 }
 0x3ca   :  { %10609 = vmatprep.subr.bf16.mxu1 %v13012_v60 }
 0x3cd   :  { %10611 = vmatpush3.bf16.msra.mxu1 %v13040_v15 }
 0x3ce   :  { %10612 = vmatprep.subr.bf16.mxu1 %v13012_v60 }
 0x3cf   :  { %v4485_v22 = vpop.f32.mrb[78].mxu0 }
 0x3d0   :  { %v9338_v19 = vpop.f32.mrb[79].mxu0 }
 0x3d1   :  { %v4414_v53 = vpop.f32.mrb[76].mxu1  ;;  %10614 = vmatpush3.bf16.msra.mxu1 %v13041_v55 }
 0x3d2   :  { %v4418_v1 = vadd.f32 %v4414_v53, %v4347_v61  ;;  %v9323_v6 = vpop.f32.mrb[77].mxu1  ;;  %10615 = vmatprep.subr.bf16.mxu1 %v13012_v60 }
 0x3d4   :  { %v4489_v35 = vadd.f32 %v4485_v22, %v4418_v1 }
 0x3d5   :  { %10617 = vmatpush3.bf16.msra.mxu1 %v13042_v32  ;;  %v6041_v32 = vld [vmem:[%s12981_s1 + $0x797] sm:$0xff] }
 0x3d6   :  { %10630 = vmatprep.subr.bf16.mxu1 %v13012_v60 }
 0x3db   :  { %v4633_v33 = vpop.f32.mrb[80].mxu0 }
 0x3dc   :  { %v9368_v34 = vpop.f32.mrb[81].mxu0 }
 0x3dd   :  { %v4559_v40 = vpop.f32.mrb[78].mxu1 }
 0x3de   :  { %v4563_v43 = vadd.f32 %v4559_v40, %v4489_v35  ;;  %v9353_v57 = vpop.f32.mrb[79].mxu1 }
 0x3df   :  { %v6044_v57 = vld [vmem:[%s12981_s1 + $0x7af] sm:$0xff] }
 0x3e0   :  { %v4637_v3 = vadd.f32 %v4633_v33, %v4563_v43  ;;  %v6042_v33 = vld [vmem:[%s12981_s1 + $0x79f] sm:$0xff]  ;;  %v6043_v43 = vld [vmem:[%s12981_s1 + $0x7a7] sm:$0xff] }
 0x3e1   :  { %v10673_v34 = vpack.c.bf16 %v6042_v33, %v6041_v32  ;;  %v6223_v32 = vld [vmem:[%s12981_s1 + $0x835] sm:$0xff] }
 0x3e7   :  { %v4780_v9 = vpop.f32.mrb[82].mxu0 }
 0x3e8   :  { %v9398_v2 = vpop.f32.mrb[83].mxu0 }
 0x3e9   :  { %v4707_v20 = vpop.f32.mrb[80].mxu1 }
 0x3ea   :  { %v4711_v29 = vadd.f32 %v4707_v20, %v4637_v3  ;;  %v9383_v49 = vpop.f32.mrb[81].mxu1 }
 0x3eb   :  { %v6124_v49 = vld [vmem:[%s12981_s1 + $0x7b8] sm:$0xff] }
 0x3ec   :  { %v4712_v58 = vadd.f32 %v12581_v23, %v4711_v29 }
 0x3ee   :  { %v4713_v5 = vmax.f32 %v4712_v58, 0.0  ;;  %v6125_v58 = vld [vmem:[%s12981_s1 + $0x7c0] sm:$0xff] }
 0x3f0   :  { %v5661_v8 = vrot.slane %v4713_v5, 1  ;;  %9593 = vmatmul.mubr.msk.f32.vlgmr.msra.gmra.mrb[94].mxu0 %vm2732_vm6, %v4713_v5  ;;  %v5735_v31 = vrot.slane %v4713_v5, 2  ;;  %v6126_v5 = vld [vmem:[%s12981_s1 + $0x7c8] sm:$0xff] }
 0x3f1   :  { %10620 = vmatpush3.bf16.msra.mxu0 %v13043_v25  ;;  %9630 = vmatprep.mubr.msk.f32.mxu0 %vm10763_vm2, %v13011_v37  ;;  %v6127_v25 = vld [vmem:[%s12981_s1 + $0x7d0] sm:$0xff] }
 0x3f2   :  { %9612 = vmatmul.mubr.msk.f32.vlgmr.msra.gmra.mrb[94].mxu1 %vm2732_vm6, %v5661_v8  ;;  %10621 = vmatprep.subr.bf16.mxu0 %v13012_v60  ;;  %v10679_v8 = vpack.c.bf16 %v6125_v58, %v6124_v49  ;;  %v12786_v49 = vld [vmem:[%s12981_s1 + $0x86b] sm:$0xff] }
 0x3f3   :  { %v4920_v52 = vpop.f32.mrb[84].mxu0  ;;  %10632 = vmatpush3.bf16.msra.mxu1 %v13044_v12  ;;  %9649 = vmatprep.mubr.msk.f32.mxu1 %vm10763_vm2, %v13011_v37  ;;  %v6128_v12 = vld [vmem:[%s12981_s1 + $0x7d8] sm:$0xff]  ;;  %v6475_v58 = vrot.slane %v12786_v49, 4 }
 0x3f4   :  { %v9428_v18 = vpop.f32.mrb[85].mxu0  ;;  %10633 = vmatprep.subr.bf16.mxu1 %v13012_v60 }
 0x3f5   :  { %10623 = vmatpush3.bf16.msra.mxu0 %v13045_v11  ;;  %v4850_v36 = vpop.f32.mrb[82].mxu1  ;;  %v6129_v18 = vld [vmem:[%s12981_s1 + $0x7e0] sm:$0xff] }
 0x3f6   :  { %v4851_v46 = vadd.f32 %v4850_v36, %v4780_v9  ;;  %v9413_v13 = vpop.f32.mrb[83].mxu1  ;;  %10624 = vmatprep.subr.bf16.mxu0 %v13012_v60  ;;  %v10676_v9 = vpack.c.bf16 %v6044_v57, %v6043_v43  ;;  %v10685_v11 = vpack.c.bf16 %v6129_v18, %v6128_v12  ;;  %v6130_v36 = vld [vmem:[%s12981_s1 + $0x7e8] sm:$0xff]  ;;  %v6314_v18 = vld [vmem:[%s12981_s1 + $0x855] sm:$0xff] }
 0x3f7   :  { %10635 = vmatpush3.bf16.msra.mxu1 %v13046_v41 }
 0x3f8   :  { %v4924_v26 = vadd.f32 %v4920_v52, %v4851_v46  ;;  %10636 = vmatprep.subr.bf16.mxu1 %v13012_v60  ;;  %v10682_v52 = vpack.c.bf16 %v6127_v25, %v6126_v5  ;;  %v6131_v46 = vld [vmem:[%s12981_s1 + $0x7f0] sm:$0xff]  ;;  %v7731_v5 = vld [vmem:[%s12981_s1 + $0x81c] ss:$0 sm:$0xff] }
 0x3f9   :  { %10626 = vmatpush3.bf16.msra.mxu0 %v13047_v63  ;;  %v10688_v13 = vpack.c.bf16 %v6131_v46, %v6130_v36  ;;  %v6133_v63 = vld [vmem:[%s12981_s1 + $0x800] sm:$0xff] }
 0x3fa   :  { %10627 = vmatprep.subr.bf16.mxu0 %v13012_v60  ;;  %v6316_v36 = vld [vmem:[%s12982_s2] sm:$0x1] }
 0x3fb   :  { %10638 = vmatpush3.bf16.msra.mxu1 %v13048_v0 }
 0x3fc   :  { %10639 = vmatprep.subr.bf16.mxu1 %v13012_v60 }
 0x3fd   :  { %10629 = vmatpush3.bf16.msra.mxu0 %v13049_v56 }
 0x3fe   :  { %10642 = vmatprep.subr.bf16.mxu0 %v13012_v60 }
 0x3ff   :  { %v5062_v21 = vpop.f32.mrb[86].mxu0  ;;  %10641 = vmatpush3.bf16.msra.mxu1 %v13050_v38 }
 0x400   :  { %9631 = vmatmul.mubr.msk.f32.vlgmr.msra.gmra.mrb[96].mxu0 %vm2732_vm6, %v5735_v31  ;;  %v9458_v16 = vpop.f32.mrb[87].mxu0  ;;  %10654 = vmatprep.subr.bf16.mxu1 %v13012_v60 }
 0x401   :  { %v4991_v14 = vpop.f32.mrb[84].mxu1  ;;  %10644 = vmatpush3.bf16.msra.mxu0 %v13051_v42  ;;  %9668 = vmatprep.mubr.msk.f32.mxu0 %vm10763_vm2, %v13011_v37 }
 0x402   :  { %v4995_v10 = vadd.f32 %v4991_v14, %v4924_v26  ;;  %v9443_v44 = vpop.f32.mrb[85].mxu1  ;;  %10645 = vmatprep.subr.bf16.mxu0 %v13012_v60  ;;  %v6132_v26 = vld [vmem:[%s12981_s1 + $0x7f8] sm:$0xff] }
 0x403   :  { %v10691_v31 = vpack.c.bf16 %v6133_v63, %v6132_v26 }
 0x404   :  { %v5066_v62 = vadd.f32 %v5062_v21, %v4995_v10 }
 0x405   :  { %10647 = vmatpush3.bf16.msra.mxu0 %v13052_v47 }
 0x406   :  { %10648 = vmatprep.subr.bf16.mxu0 %v13012_v60 }
 0x409   :  { %10650 = vmatpush3.bf16.msra.mxu0 %v13053_v50 }
 0x40a   :  { %10651 = vmatprep.subr.bf16.mxu0 %v13012_v60 }
 0x40b   :  { %v5207_v54 = vpop.f32.mrb[88].mxu0 }
 0x40c   :  { %v9488_v7 = vpop.f32.mrb[89].mxu0 }
 0x40d   :  { %v5133_v17 = vpop.f32.mrb[86].mxu1  ;;  %10653 = vmatpush3.bf16.msra.mxu0 %v12228_v45 }
 0x40e   :  { %v5137_v24 = vadd.f32 %v5133_v17, %v5066_v62  ;;  %v9473_v30 = vpop.f32.mrb[87].mxu1  ;;  %10666 = vmatprep.subr.bf16.mxu0 %v13012_v60 }
 0x410   :  { %v5211_v48 = vadd.f32 %v5207_v54, %v5137_v24 }
 0x417   :  { %v5360_v61 = vpop.f32.mrb[90].mxu0 }
 0x418   :  { %v9518_v4 = vpop.f32.mrb[91].mxu0 }
 0x419   :  { %v5284_v15 = vpop.f32.mrb[88].mxu1 }
 0x41a   :  { %v5288_v22 = vadd.f32 %v5284_v15, %v5211_v48  ;;  %v9503_v19 = vpop.f32.mrb[89].mxu1  ;;  %v751_v48 = vld [vmem:[%s12981_s1 + $0x776] sm:$0x1] }
 0x41c   :  { %v5364_v53 = vadd.f32 %v5360_v61, %v5288_v22  ;;  %v3395_v22 = vadd.f32 %v12576_v28, %v751_v48 }
 0x41e   :  { %v5365_v55 = vadd.f32 %v12581_v23, %v5364_v53  ;;  %v6040_v23 = vld [vmem:[%s12981_s1 + $0x78f] sm:$0xff] }
 0x420   :  { %v5366_v1 = vmax.f32 %v5365_v55, 0.0  ;;  %v3396_v55 = vmax.f32 %v3395_v22, 0.0 }
 0x422   :  { %v5883_v6 = vrot.slane %v5366_v1, 1  ;;  %9650 = vmatmul.mubr.msk.f32.vlgmr.msra.gmra.mrb[96].mxu1 %vm2732_vm6, %v5366_v1  ;;  %v5957_v45 = vrot.slane %v5366_v1, 2 }
 0x423   :  { %10656 = vmatpush3.bf16.msra.mxu1 %v12240_v51  ;;  %9687 = vmatprep.mubr.msk.f32.mxu1 %vm10763_vm2, %v13011_v37  ;;  %v6037_v51 = vld [vmem:[%s12981_s1 + $0x777] sm:$0xff] }
 0x424   :  { %9669 = vmatmul.mubr.msk.f32.vlgmr.msra.gmra.mrb[98].mxu0 %vm2732_vm6, %v5883_v6  ;;  %10657 = vmatprep.subr.bf16.mxu1 %v13012_v60 }
 0x425   :  { %9706 = vmatprep.mubr.msk.f32.mxu0 %vm10763_vm2, %v13011_v37 }
 0x427   :  { %10659 = vmatpush3.bf16.msra.mxu1 %v12250_v27  ;;  %v6038_v27 = vld [vmem:[%s12981_s1 + $0x77f] sm:$0xff] }
 0x428   :  { %10660 = vmatprep.subr.bf16.mxu1 %v13012_v60 }
 0x42b   :  { %10662 = vmatpush3.bf16.msra.mxu1 %v12267_v39  ;;  %v6039_v39 = vld [vmem:[%s12981_s1 + $0x787] sm:$0xff] }
 0x42c   :  { %10663 = vmatprep.subr.bf16.mxu1 %v13012_v60  ;;  %v10670_v35 = vpack.c.bf16 %v6040_v23, %v6039_v39  ;;  %v6220_v39 = vld [vmem:[%s12981_s1 + $0x81d] sm:$0xff]  ;;  %v6222_v23 = vld [vmem:[%s12981_s1 + $0x82d] sm:$0xff] }
 0x42d   :  { %v10700_v33 = vpack.c.bf16 %v6223_v32, %v6222_v23 }
 0x42f   :  { %10665 = vmatpush3.bf16.msra.mxu1 %v12279_v59  ;;  %v10667_v59 = vpack.c.bf16 %v6038_v27, %v6037_v51  ;;  %v6135_v51 = vld [vmem:[%s12981_s1 + $0x810] sm:$0xff]  ;;  %v6136_v27 = vld [vmem:[%s12981_s1 + $0x818] sm:$0xf] }
 0x430   :  { %10678 = vmatprep.subr.bf16.mxu1 %v13012_v60 }
 0x431   :  { %10668 = vmatpush3.bf16.msra.mxu0 %v10667_v59  ;;  %v6221_v59 = vld [vmem:[%s12981_s1 + $0x825] sm:$0xff] }
 0x432   :  { %9688 = vmatmul.mubr.msk.f32.vlgmr.msra.gmra.mrb[98].mxu1 %vm2732_vm6, %v5957_v45  ;;  %10669 = vmatprep.subr.bf16.mxu0 %v13012_v60  ;;  %v6134_v45 = vld [vmem:[%s12981_s1 + $0x808] sm:$0xff] }
 0x433   :  { %9735 = vmatprep.mubr.msk.f32.mxu1 %vm10763_vm2, %v13011_v37  ;;  %10680 = vmatpush3.bf16.msra.mxu1 %v10679_v8  ;;  %v10694_v28 = vpack.c.bf16 %v6135_v51, %v6134_v45 }
 0x434   :  { %10681 = vmatprep.subr.bf16.mxu1 %v13012_v60 }
 0x435   :  { %10671 = vmatpush3.bf16.msra.mxu0 %v10670_v35  ;;  %v10697_v35 = vpack.c.bf16 %v6221_v59, %v6220_v39 }
 0x436   :  { %10672 = vmatprep.subr.bf16.mxu0 %v13012_v60 }
 0x437   :  { %10683 = vmatpush3.bf16.msra.mxu1 %v10682_v52 }
 0x438   :  { %10684 = vmatprep.subr.bf16.mxu1 %v13012_v60 }
 0x439   :  { %10674 = vmatpush3.bf16.msra.mxu0 %v10673_v34  ;;  %v7729_v34 = vld [vmem:[%s12981_s1 + $0x7b7] ss:$0 sm:$0xff] }
 0x43a   :  { %10675 = vmatprep.subr.bf16.mxu0 %v13012_v60 }
 0x43b   :  { %10686 = vmatpush3.bf16.msra.mxu1 %v10685_v11  ;;  %v6315_v11 = vld [vmem:[%s12981_s1 + $0x85d] sm:$0x3] }
 0x43c   :  { %10687 = vmatprep.subr.bf16.mxu1 %v13012_v60  ;;  %v12809_v46 = vpack.c.bf16 %v6315_v11, %v6314_v18 }
 0x43d   :  { %10677 = vmatpush3.bf16.msra.mxu0 %v10676_v9  ;;  %v6224_v9 = vld [vmem:[%s12981_s1 + $0x83d] sm:$0xff] }
 0x43e   :  { %10696 = vmatprep.subr.bf16.mxu0 %v13012_v60 }
 0x43f   :  { %10689 = vmatpush3.bf16.msra.mxu1 %v10688_v13 }
 0x440   :  { %10690 = vmatprep.subr.bf16.mxu1 %v13012_v60 }
 0x443   :  { %10692 = vmatpush3.bf16.msra.mxu1 %v10691_v31 }
 0x444   :  { %10693 = vmatprep.subr.bf16.mxu1 %v13012_v60 }
 0x447   :  { %10695 = vmatpush3.bf16.msra.mxu1 %v10694_v28  ;;  %v6310_v28 = vld [vmem:[%s12981_s1 + $0x867] sm:$0xf] }
 0x448   :  { %9733 = vmatprep.subr.mxu1 %v13011_v37 }
 0x44b   :  { %9734 = vmatpush3.msk.msra.mxu1 %vm213_vm1, %v6136_v27 }
 0x44c   :  { %9767 = vmatprep.subr.mxu1 %v13011_v37 }
 0x489   :  { %v5509_v40 = vpop.f32.mrb[92].mxu0 }
 0x48a   :  { %v9556_v3 = vpop.f32.mrb[93].mxu0 }
 0x48b   :  { %v5437_v2 = vpop.f32.mrb[90].mxu1 }
 0x48c   :  { %v5510_v20 = vadd.f32 %v5509_v40, %v5437_v2  ;;  %v9537_v29 = vpop.f32.mrb[91].mxu1  ;;  %v6225_v2 = vld [vmem:[%s12981_s1 + $0x845] sm:$0xff] }
 0x48d   :  { %v6226_v29 = vld [vmem:[%s12981_s1 + $0x84d] sm:$0x3] }
 0x49b   :  { %v5582_v41 = vpop.f32.mrb[92].mxu1 }
 0x49c   :  { %v5586_v0 = vadd.f32 %v5582_v41, %v5510_v20  ;;  %v9575_v56 = vpop.f32.mrb[93].mxu1  ;;  %v10703_v20 = vpack.c.bf16 %v6225_v2, %v6224_v9  ;;  %v7734_v41 = vld [vmem:[%s12981_s1 + $0x84f] ss:$0 sm:$0xff] }
 0x4c3   :  { %v5656_v21 = vpop.f32.mrb[94].mxu0 }
 0x4c4   :  { %v5660_v38 = vadd.f32 %v5656_v21, %v5586_v0  ;;  %v9594_v16 = vpop.f32.mrb[95].mxu0  ;;  %v6317_v21 = vld [vmem:[%s12982_s2 + $0x1] sm:$0x1] }
 0x4c5   :  { %v5730_v14 = vpop.f32.mrb[94].mxu1  ;;  %v6318_v16 = vld [vmem:[%s12982_s2 + $0x2] sm:$0x1] }
 0x4c6   :  { %v5734_v42 = vadd.f32 %v5730_v14, %v5660_v38  ;;  %v9613_v10 = vpop.f32.mrb[95].mxu1  ;;  %v12840_v38 = vld [vmem:[%s12981_s1 + $0x873] sm:$0xff]  ;;  %v12850_v14 = vld [vmem:[%s12981_s1 + $0x85f] sm:$0xff] }
 0x4c7   :  { %v6319_v10 = vld [vmem:[%s12982_s2 + $0x3] sm:$0x1] }
 0x4d3   :  { %v5804_v44 = vpop.f32.mrb[96].mxu0 }
 0x4d4   :  { %v5808_v62 = vadd.f32 %v5804_v44, %v5734_v42  ;;  %v9632_v47 = vpop.f32.mrb[97].mxu0  ;;  %v6788_v42 = vrot.slane %v12840_v38, 4  ;;  %v12878_v44 = vld [vmem:[%s12981_s1 + $0x87b] sm:$0xf] }
 0x4d5   :  { %v6628_v22 = vrot.slane %v12878_v44, 1  ;;  %v6784_v27 = vrot.slane %v12878_v44, 2 }
 0x4f5   :  { %v5878_v50 = vpop.f32.mrb[96].mxu1 }
 0x4f6   :  { %v5882_v54 = vadd.f32 %v5878_v50, %v5808_v62  ;;  %v9651_v7 = vpop.f32.mrb[97].mxu1 }
 0x4f7   :  { %v5952_v17 = vpop.f32.mrb[98].mxu0  ;;  %v6708_v7 = vrot.slane %v12850_v14, 4 }
 0x4f8   :  { %v5956_v24 = vadd.f32 %v5952_v17, %v5882_v54  ;;  %v9670_v30 = vpop.f32.mrb[99].mxu0 }
 0x505   :  { %v6026_v61 = vpop.f32.mrb[98].mxu1 }
 0x506   :  { %v6030_v4 = vadd.f32 %v6026_v61, %v5956_v24  ;;  %v9689_v15 = vpop.f32.mrb[99].mxu1 }
 0x508   :  { %v6031_v19 = vadd.f32 %v6030_v4, %v751_v48 }
 0x50a   :  { %v6032_v53 = vmax.f32 %v6031_v19, 0.0 }
 0x50c   :  { %v6034_v1 = vrot.slane %v6032_v53, 7 }
 0x50e   :  { %v6036_v6 = vsel %vm1125_vm4, %v3396_v55, %v6034_v1 }
 0x50f   :  { %9707 = vmatmul.mubr.msk.f32.vlgmr.msra.gmra.mrb[100].mxu0 %vm2732_vm6, %v6036_v6 }
 0x510   :  { %9752 = vmatprep.mubr.msk.f32.mxu0 %vm10763_vm2, %v13011_v37  ;;  %10698 = vmatpush3.bf16.msra.mxu0 %v10697_v35 }
 0x511   :  { %10699 = vmatprep.subr.bf16.mxu0 %v13012_v60 }
 0x514   :  { %10701 = vmatpush3.bf16.msra.mxu0 %v10700_v33 }
 0x515   :  { %10702 = vmatprep.subr.bf16.mxu0 %v13012_v60 }
 0x518   :  { %10704 = vmatpush3.bf16.msra.mxu0 %v10703_v20 }
 0x519   :  { %9750 = vmatprep.subr.mxu0 %v13011_v37 }
 0x51c   :  { %9751 = vmatpush3.msk.msra.mxu0 %vm1048_vm5, %v6226_v29 }
 0x51d   :  { %9755 = vmatprep.subr.mxu0 %v13011_v37 }
 0x5e2   :  { %v6119_v40 = vpop.f32.mrb[100].mxu0 }
 0x5e3   :  { %v6120_v43 = vadd.f32 %v7729_v34, %v6119_v40  ;;  %v9708_v57 = vpop.f32.mrb[101].mxu0  ;;  %v6940_v40 = vrot.slane %v12878_v44, 3 }
 0x5e5   :  { %v6123_v3 = vmax.f32 %v6120_v43, 0.0 }
 0x5e7   :  { %9736 = vmatmul.mubr.msk.f32.vlgmr.msra.gmra.mrb[100].mxu1 %vm6142_vm7, %v6123_v3 }
 0x5e8   :  { %9769 = vmatprep.mubr.msk.f32.mxu1 %vm10763_vm2, %v13011_v37  ;;  %9768 = vmatpush3.msk.msra.mxu1 %vm213_vm1, %v6475_v58 }
 0x5e9   :  { %9777 = vmatprep.subr.mxu1 %v13011_v37 }
 0x5eb   :  { %9770 = vmatmul.mubr.msk.f32.vlgmr.msra.gmra.mrb[102].mxu1 %vm191_vm0, %v6317_v21 }
 0x5ec   :  { %9779 = vmatprep.mubr.msk.f32.mxu1 %vm10763_vm2, %v13011_v37  ;;  %9778 = vmatpush3.msk.msra.mxu1 %vm213_vm1, %v12840_v38 }
 0x5ed   :  { %9787 = vmatprep.subr.mxu1 %v13011_v37 }
 0x5ef   :  { %9780 = vmatmul.mubr.msk.f32.vlgmr.msra.gmra.mrb[104].mxu1 %vm191_vm0, %v6318_v16 }
 0x5f0   :  { %9788 = vmatpush3.msk.msra.mxu1 %vm213_vm1, %v6788_v42  ;;  %9789 = vmatprep.mubr.msk.f32.mxu1 %vm10763_vm2, %v13011_v37 }
 0x5f1   :  { %9797 = vmatprep.subr.mxu1 %v13011_v37 }
 0x5f3   :  { %9790 = vmatmul.mubr.msk.f32.vlgmr.msra.gmra.mrb[106].mxu1 %vm191_vm0, %v6319_v10 }
 0x5f4   :  { %9798 = vmatpush3.msk.msra.mxu1 %vm213_vm1, %v12786_v49  ;;  %9799 = vmatprep.mubr.msk.f32.mxu1 %vm10763_vm2, %v13011_v37 }
 0x5f5   :  { %9809 = vmatprep.subr.mxu1 %v13011_v37 }
 0x6ba   :  { %v6215_v8 = vpop.f32.mrb[100].mxu1 }
 0x6bb   :  { %v6216_v25 = vadd.f32 %v7731_v5, %v6215_v8  ;;  %v9737_v52 = vpop.f32.mrb[101].mxu1 }
 0x6bd   :  { %v6219_v12 = vmax.f32 %v6216_v25, 0.0 }
 0x6be   :  { %v6547_v24 = vpop.f32.mrb[102].mxu1 }
 0x6bf   :  { %9753 = vmatmul.mubr.msk.f32.vlgmr.msra.gmra.mrb[102].mxu0 %vm6232_vm8, %v6219_v12  ;;  %v9771_v30 = vpop.f32.mrb[103].mxu1 }
 0x6c0   :  { %9756 = vmatpush3.msk.msra.mxu0 %vm213_vm1, %v12786_v49  ;;  %9757 = vmatprep.mubr.msk.f32.mxu0 %vm10763_vm2, %v13011_v37 }
 0x6c1   :  { %10705 = vmatprep.subr.bf16.mxu0 %v13012_v60 }
 0x6c2   :  { %v6704_v48 = vpop.f32.mrb[104].mxu1 }
 0x6c3   :  { %9758 = vmatmul.mubr.msk.f32.vlgmr.msra.gmra.mrb[104].mxu0 %vm191_vm0, %v6316_v36  ;;  %v9781_v61 = vpop.f32.mrb[105].mxu1 }
 0x6c4   :  { %10708 = vmatpush3.bf16.msk.msra.mxu0 %vm12813_vm10, %v12809_v46  ;;  %9764 = vmatprep.mubr.msk.f32.mxu0 %vm10763_vm2, %v13011_v37 }
 0x6c5   :  { %9772 = vmatprep.subr.mxu0 %v13011_v37 }
 0x6c6   :  { %v6860_v4 = vpop.f32.mrb[106].mxu1 }
 0x6c7   :  { %v9791_v15 = vpop.f32.mrb[107].mxu1 }
 0x792   :  { %v6305_v26 = vpop.f32.mrb[102].mxu0 }
 0x793   :  { %v12827_v63 = vadd.f32 %v7734_v41, %v6305_v26  ;;  %v9754_v0 = vpop.f32.mrb[103].mxu0 }
 0x795   :  { %9765 = vmatmul.mubr.msk.f32.vlgmr.msra.gmra.mrb[106].mxu0 %vm6396_vm11, %v12827_v63 }
 0x796   :  { %v6392_v56 = vpop.f32.mrb[104].mxu0  ;;  %9774 = vmatprep.mubr.msk.f32.mxu0 %vm10763_vm2, %v13011_v37  ;;  %9773 = vmatpush3.msk.msra.mxu0 %vm213_vm1, %v12850_v14 }
 0x797   :  { %v9759_v31 = vpop.f32.mrb[105].mxu0  ;;  %9782 = vmatprep.subr.mxu0 %v13011_v37 }
 0x868   :  { %v6469_v62 = vpop.f32.mrb[106].mxu0 }
 0x869   :  { %v6470_v47 = vadd.f32 %v6469_v62, %v6392_v56  ;;  %v9766_v50 = vpop.f32.mrb[107].mxu0 }
 0x86b   :  { %v6473_v54 = vadd.f32 %v6470_v47, %v12878_v44 }
 0x86d   :  { %10718 = vtanh.f32 %v6473_v54 }
 0x877   :  { %v10719_v17 = vpop.eup %10718 }
 0x878   :  { %9775 = vmatmul.mubr.msk.f32.vlgmr.msra.gmra.mrb[108].mxu0 %vm191_vm0, %v10719_v17  ;;  %9800 = vmatmul.mubr.msk.f32.vlgmr.msra.gmra.mrb[108].mxu1 %vm191_vm0, %v10719_v17 }
 0x879   :  { %9783 = vmatpush3.msk.msra.mxu0 %vm213_vm1, %v6708_v7  ;;  %9784 = vmatprep.mubr.msk.f32.mxu0 %vm10763_vm2, %v13011_v37 }
 0x87a   :  { %9810 = vmatpush3.msk.msra.mxu1 %vm213_vm1, %v6475_v58  ;;  %9811 = vmatprep.mubr.msk.f32.mxu1 %vm10763_vm2, %v13011_v37 }
 0x87b   :  { %9792 = vmatprep.subr.mxu0 %v13011_v37  ;;  %9819 = vmatprep.subr.mxu1 %v13011_v37 }
 0x94b   :  { %v6623_v19 = vpop.f32.mrb[108].mxu0  ;;  %v7010_v53 = vpop.f32.mrb[108].mxu1 }
 0x94c   :  { %v6624_v55 = vadd.f32 %v6623_v19, %v6547_v24  ;;  %v9776_v1 = vpop.f32.mrb[109].mxu0  ;;  %v9801_v6 = vpop.f32.mrb[109].mxu1 }
 0x94e   :  { %v6630_v45 = vadd.f32 %v6628_v22, %v6624_v55 }
 0x950   :  { %10720 = vtanh.f32 %v6630_v45 }
 0x95a   :  { %v10721_v51 = vpop.eup %10720 }
 0x95b   :  { %9785 = vmatmul.mubr.msk.f32.vlgmr.msra.gmra.mrb[110].mxu0 %vm191_vm0, %v10721_v51  ;;  %9812 = vmatmul.mubr.msk.f32.vlgmr.msra.gmra.mrb[110].mxu1 %vm191_vm0, %v10721_v51 }
 0x95c   :  { %9794 = vmatprep.mubr.msk.f32.mxu0 %vm10763_vm2, %v13011_v37  ;;  %9820 = vmatpush3.msk.msra.mxu1 %vm213_vm1, %v12840_v38 }
 0x95d   :  { %9821 = vmatprep.mubr.msk.f32.mxu1 %vm10763_vm2, %v13011_v37  ;;  %9829 = vmatprep.subr.mxu1 %v13011_v37 }
 0x95e   :  { %9793 = vmatpush3.msk.msra.mxu0 %vm213_vm1, %v6310_v28 }
 0x95f   :  { %10709 = vmatprep.subr.bf16.mxu0 %v13012_v60  ;;  %v7014_v60 = vrot.slane %v12827_v63, 1 }
 0xa2e   :  { %v6780_v39 = vpop.f32.mrb[110].mxu0  ;;  %v7155_v59 = vpop.f32.mrb[110].mxu1 }
 0xa2f   :  { %v6781_v23 = vadd.f32 %v6780_v39, %v6704_v48  ;;  %v9786_v35 = vpop.f32.mrb[111].mxu0  ;;  %v9813_v32 = vpop.f32.mrb[111].mxu1 }
 0xa31   :  { %v6786_v33 = vadd.f32 %v6784_v27, %v6781_v23 }
 0xa33   :  { %10722 = vtanh.f32 %v6786_v33 }
 0xa3d   :  { %v10723_v34 = vpop.eup %10722 }
 0xa3e   :  { %9795 = vmatmul.mubr.msk.f32.vlgmr.msra.gmra.mrb[112].mxu0 %vm191_vm0, %v10723_v34  ;;  %9822 = vmatmul.mubr.msk.f32.vlgmr.msra.gmra.mrb[112].mxu1 %vm191_vm0, %v10723_v34 }
 0xa3f   :  { %10712 = vmatpush3.bf16.msk.msra.mxu0 %vm12813_vm10, %v12809_v46  ;;  %9806 = vmatprep.mubr.msk.f32.mxu0 %vm10763_vm2, %v13011_v37 }
 0xa40   :  { %9814 = vmatprep.subr.mxu0 %v13011_v37  ;;  %9830 = vmatpush3.msk.msra.mxu1 %vm213_vm1, %v6788_v42 }
 0xa41   :  { %9831 = vmatprep.mubr.msk.f32.mxu1 %vm10763_vm2, %v13011_v37  ;;  %9839 = vmatprep.subr.mxu1 %v13011_v37 }
 0xa42   :  { %9807 = vmatmul.mubr.msk.f32.vlgmr.msra.gmra.mrb[114].mxu0 %vm6396_vm11, %v7014_v60 }
 0xa43   :  { %9815 = vmatpush3.msk.msra.mxu0 %vm213_vm1, %v12850_v14  ;;  %9816 = vmatprep.mubr.msk.f32.mxu0 %vm10763_vm2, %v13011_v37  ;;  %v7544_v14 = vld [vmem:[%s12981_s1 + $0x850] sm:$0xf] }
 0xa44   :  { %9824 = vmatprep.subr.mxu0 %v13011_v37 }
 0xb11   :  { %v6936_v43 = vpop.f32.mrb[112].mxu0  ;;  %v7300_v57 = vpop.f32.mrb[112].mxu1 }
 0xb12   :  { %v6937_v3 = vadd.f32 %v6936_v43, %v6860_v4  ;;  %v9796_v9 = vpop.f32.mrb[113].mxu0  ;;  %v9823_v2 = vpop.f32.mrb[113].mxu1 }
 0xb14   :  { %v6942_v20 = vadd.f32 %v6940_v40, %v6937_v3 }
 0xb15   :  { %v7083_v29 = vpop.f32.mrb[114].mxu0 }
 0xb16   :  { %10724 = vtanh.f32 %v6942_v20  ;;  %v7084_v49 = vadd.f32 %v7083_v29, %v7010_v53  ;;  %v9808_v58 = vpop.f32.mrb[115].mxu0 }
 0xb18   :  { %v7087_v5 = vadd.f32 %v7084_v49, %v12878_v44 }
 0xb1a   :  { %10726 = vtanh.f32 %v7087_v5 }
 0xb20   :  { %v10725_v8 = vpop.eup %10724 }
 0xb21   :  { %9832 = vmatmul.mubr.msk.f32.vlgmr.msra.gmra.mrb[114].mxu1 %vm191_vm0, %v10725_v8 }
 0xb22   :  { %9841 = vmatprep.mubr.msk.f32.mxu1 %vm10763_vm2, %v13011_v37  ;;  %9840 = vmatpush3.msk.msra.mxu1 %vm213_vm1, %v7544_v14 }
 0xb24   :  { %v10727_v25 = vpop.eup %10726 }
 0xb25   :  { %9817 = vmatmul.mubr.msk.f32.vlgmr.msra.gmra.mrb[116].mxu0 %vm191_vm0, %v10727_v25 }
 0xb26   :  { %9825 = vmatpush3.msk.msra.mxu0 %vm213_vm1, %v6708_v7  ;;  %9826 = vmatprep.mubr.msk.f32.mxu0 %vm10763_vm2, %v13011_v37 }
 0xb27   :  { %9834 = vmatprep.subr.mxu0 %v13011_v37 }
 0xbf4   :  { %v7448_v52 = vpop.f32.mrb[114].mxu1 }
 0xbf5   :  { %v9833_v12 = vpop.f32.mrb[115].mxu1 }
 0xbf8   :  { %v7228_v18 = vpop.f32.mrb[116].mxu0 }
 0xbf9   :  { %v7229_v11 = vadd.f32 %v7228_v18, %v7155_v59  ;;  %v9818_v36 = vpop.f32.mrb[117].mxu0 }
 0xbfb   :  { %v7232_v46 = vadd.f32 %v7229_v11, %v6628_v22 }
 0xbfd   :  { %10728 = vtanh.f32 %v7232_v46 }
 0xc07   :  { %v10729_v13 = vpop.eup %10728 }
 0xc08   :  { %9827 = vmatmul.mubr.msk.f32.vlgmr.msra.gmra.mrb[118].mxu0 %vm191_vm0, %v10729_v13  ;;  %v7527_v56 = vrot.slane %v10729_v13, 7 }
 0xc09   :  { %9835 = vmatpush3.msk.msra.mxu0 %vm213_vm1, %v6310_v28  ;;  %9836 = vmatprep.mubr.msk.f32.mxu0 %vm10763_vm2, %v13011_v37 }
 0xc0a   :  { %v7534_v38 = vsel %vm1125_vm4, %v10727_v25, %v7527_v56 }
 0xcdb   :  { %v7373_v41 = vpop.f32.mrb[118].mxu0 }
 0xcdc   :  { %v7374_v26 = vadd.f32 %v7373_v41, %v7300_v57  ;;  %v9828_v63 = vpop.f32.mrb[119].mxu0 }
 0xcde   :  { %v7377_v0 = vadd.f32 %v7374_v26, %v6784_v27 }
 0xce0   :  { %10730 = vtanh.f32 %v7377_v0 }
 0xcea   :  { %v10731_v31 = vpop.eup %10730 }
 0xceb   :  { %9837 = vmatmul.mubr.msk.f32.vlgmr.msra.gmra.mrb[120].mxu0 %vm191_vm0, %v10731_v31  ;;  %v7529_v21 = vrot.slane %v10731_v31, 6 }
 0xced   :  { %v7535_v16 = vsel %vm1048_vm5, %v7534_v38, %v7529_v21 }
 0xdbe   :  { %v7521_v37 = vpop.f32.mrb[120].mxu0 }
 0xdbf   :  { %v7522_v42 = vadd.f32 %v7521_v37, %v7448_v52  ;;  %v9838_v10 = vpop.f32.mrb[121].mxu0 }
 0xdc1   :  { %v7525_v44 = vadd.f32 %v7522_v42, %v6940_v40 }
 0xdc3   :  { %10732 = vtanh.f32 %v7525_v44 }
 0xdcd   :  { %v10733_v62 = vpop.eup %10732 }
 0xdce   :  { %v7540_v47 = vrot.slane %v10733_v62, 7  ;;  %v7532_v50 = vrot.slane %v10733_v62, 5 }
 0xdd0   :  { %v7542_v54 = vsel %vm1125_vm4, %v10725_v8, %v7540_v47  ;;  %v7537_v7 = vsel %vm7536_vm12, %v7535_v16, %v7532_v50 }
 0xdd1   :  { %v7543_v17 = vmax.f32 %v7542_v54, 0.0  ;;  %7539 = vst.msk [vmem:[#allocation2] sm:$0xf] %vm7538_vm13, %v7537_v7 }
 0xdd3   :  { %9842 = vmatmul.mubr.msk.f32.vlgmr.msra.gmra.mrb[116].mxu1 %vm191_vm0, %v7543_v17 }
 0xdd4   :  { %10748 = shalt.err (!%p10745_p4)
}
 0xdd5   :  { %s10749_s14 = scalar_lea.hbm %s12984_s4, 64 }
 0xdd6   :  { %p10750_p5 = scmp.ne.s32.totalorder %s12984_s4, %s10749_s14  ;;  %p10753_p6 = scmp.lt.u32.totalorder %s10749_s14, %s12984_s4 }
 0xdd8   :  { %p10755_p7 = pnand %p10753_p6, %p10750_p5 }
 0xdda   :  { %10758 = shalt.err (!%p10755_p7)
}
 0xddb   :  { %7640 = dma.vmem_to_hbm [thread:$0]  %s7638_s10, 64, %s12984_s4, [#allocation3]   ;;  %v7769_v24 = vld [vmem:[%s12981_s1 + $0x854] ss:$0 sm:$0xff]  ;;  %vm7627_vm14 = vcmask 1024  }
 0xea6   :  { %v7622_v30 = vpop.f32.mrb[116].mxu1 }
 0xea7   :  { %v7623_v48 = vadd.f32 %v7769_v24, %v7622_v30  ;;  %v9843_v61 = vpop.f32.mrb[117].mxu1 }
 0xea9   :  { %10734 = vtanh.f32 %v7623_v48 }
 0xeb3   :  { %v10735_v4 = vpop.eup %10734 }
 0xeb4   :  { %7628 = vst.msk [vmem:[%s12983_s3] sm:$0x3] %vm7627_vm14, %v10735_v4 }
 0xeb5   :  { %10759 = dma.done.wait [#allocation3], 64  }
 0xeb6   :  { %10760 = vsyncadd [#allocation3], 4294967232 }
 0xeb7   :  { %7646 = vsyncpa [#allocation3], 1 }

</bundles_post_ra>
